<compile_context>
chip_gen: v6e
topology: v6e:2x2x1
jax: 0.10.0
libtpu: 0.0.40
codegen_flags: <defaults>
</compile_context>

<pallas_src>
import functools

import numpy as np
import jax
import jax.numpy as jnp
from jax.experimental import pallas as pl
from jax.experimental.pallas import tpu as pltpu


# ------------------------------------------------------------------ helpers --

def _round_up(x, m):
    return (x + m - 1) // m * m


def _choose_tk(Kp):
    """K-tile: single step for small K, otherwise 256..512 (multiple of 128)."""
    if Kp <= 1024:
        return Kp
    q = Kp // 128
    for d in (4, 3, 2):
        if q % d == 0:
            return 128 * d
    return 128


# ------------------------------------------------------------------ kernels --

def _make_fused_kernel(mode, m_valid, eps=1e-5):
    """Matmul accumulated into o_ref, with a fused epilogue on the last K step.

    mode:
      "bias"        -> o = acc + bias                         (conv w/ bias)
      "bn_relu"     -> o = relu(BN(acc))                      (conv3x3 + bn + relu)
      "bn_relu_add" -> o = relu(skip + relu(BN(acc)))         (2nd conv of a block)

    BN uses batch statistics over the m_valid real rows (padded rows masked
    out), matching PyTorch training-mode BatchNorm2d with biased variance.
    """

    def kernel(*refs):
        a_ref, b_ref = refs[0], refs[1]
        o_ref = refs[-1]
        k = pl.program_id(1)

        @pl.when(k == 0)
        def _():
            o_ref[...] = jnp.zeros_like(o_ref)

        o_ref[...] += jnp.dot(a_ref[...], b_ref[...],
                              preferred_element_type=jnp.float32)

        @pl.when(k == pl.num_programs(1) - 1)
        def _():
            acc = o_ref[...]
            if mode == "bias":
                o_ref[...] = acc + refs[2][...]
            else:
                gamma = refs[2][...]
                beta = refs[3][...]
                rows = acc.shape[0]
                ridx = jax.lax.broadcasted_iota(jnp.int32, (rows, 1), 0)
                msk = (ridx < m_valid).astype(jnp.float32)
                inv_m = jnp.float32(1.0 / m_valid)
                mean = jnp.sum(acc * msk, axis=0, keepdims=True) * inv_m
                d = (acc - mean) * msk
                var = jnp.sum(d * d, axis=0, keepdims=True) * inv_m
                y = (acc - mean) * jax.lax.rsqrt(var + eps) * gamma + beta
                y = jnp.maximum(y, 0.0)
                if mode == "bn_relu_add":
                    y = jnp.maximum(y + refs[4][...], 0.0)
                o_ref[...] = y

    return kernel


def _maxpool9_kernel(*refs):
    """Elementwise max tree over 9 shifted slabs (pure VPU, no XLU reduce)."""
    o_ref = refs[-1]
    m = refs[0][...]
    for r in refs[1:-1]:
        m = jnp.maximum(m, r[...])
    o_ref[...] = m


# ------------------------------------------------------------------ wrappers --

def _im2col(x, kh, kw, stride, pad):
    """x: NHWC (bf16) -> (N*Ho*Wo, kh*kw*C) patch matrix (XLA slicing glue)."""
    if pad > 0:
        x = jnp.pad(x, ((0, 0), (pad, pad), (pad, pad), (0, 0)))
    N, H, W, C = x.shape
    Ho = (H - kh) // stride + 1
    Wo = (W - kw) // stride + 1
    cols = []
    for i in range(kh):
        for j in range(kw):
            patch = jax.lax.slice(
                x,
                (0, i, j, 0),
                (N, i + (Ho - 1) * stride + 1, j + (Wo - 1) * stride + 1, C),
                (1, stride, stride, 1))
            cols.append(patch)  # (N, Ho, Wo, C)
    pat = jnp.stack(cols, axis=3)  # (N, Ho, Wo, kh*kw, C)
    return pat.reshape(N * Ho * Wo, kh * kw * C), (N, Ho, Wo)


def fused_conv(x_nhwc, prep, mode, skip_mat=None):
    """One fused conv = im2col (bf16) -> MXU matmul -> fused epilogue.

    Returns the (Mp, Cout) f32 output matrix plus (N, Ho, Wo, Cout, M, Mp).
    """
    patches, (N, Ho, Wo) = _im2col(x_nhwc.astype(jnp.bfloat16),
                                   prep["kh"], prep["kw"],
                                   prep["stride"], prep["pad"])
    M, K = patches.shape
    Kp, cout = prep["w"].shape
    Mp = _round_up(M, 16)
    # Single pad straight to the aligned (Mp, Kp) bf16 operand.
    a = jnp.pad(patches, ((0, Mp - M), (0, Kp - K)))

    tk = _choose_tk(Kp)
    kk = Kp // tk
    # M tiling only for the bias-only convs: BN modes need the whole row
    # range resident to compute batch statistics in one pass.
    if mode == "bias" and Mp >= 256 and Mp % 32 == 0:
        tm = Mp // 2
    else:
        tm = Mp
    mi = Mp // tm

    in_specs = [
        pl.BlockSpec((tm, tk), lambda i, k: (i, k)),
        pl.BlockSpec((tk, cout), lambda i, k: (k, 0)),
    ]
    inputs = [a, prep["w"]]
    if mode == "bias":
        in_specs.append(pl.BlockSpec((1, cout), lambda i, k: (0, 0)))
        inputs.append(prep["bias"])
    else:
        in_specs += [pl.BlockSpec((1, cout), lambda i, k: (0, 0)),
                     pl.BlockSpec((1, cout), lambda i, k: (0, 0))]
        inputs += [prep["gamma"], prep["beta"]]
        if mode == "bn_relu_add":
            in_specs.append(pl.BlockSpec((tm, cout), lambda i, k: (i, 0)))
            inputs.append(skip_mat)

    out = pl.pallas_call(
        _make_fused_kernel(mode, M),
        out_shape=jax.ShapeDtypeStruct((Mp, cout), jnp.float32),
        grid_spec=pltpu.PrefetchScalarGridSpec(
            num_scalar_prefetch=0,
            grid=(mi, kk),
            in_specs=in_specs,
            out_specs=pl.BlockSpec((tm, cout), lambda i, k: (i, 0)),
        ),
        compiler_params=pltpu.CompilerParams(
            dimension_semantics=("parallel", "arbitrary")),
    )(*inputs)
    return out, (N, Ho, Wo, cout, M, Mp)


def maxpool_3x3_s2(x):
    """MaxPool2d(kernel=3, stride=2, pad=0), NHWC, via a VPU max tree."""
    N, H, W, C = x.shape
    Ho = (H - 3) // 2 + 1
    Wo = (W - 3) // 2 + 1
    P = N * Ho * Wo
    slabs = []
    for i in range(3):
        for j in range(3):
            s = jax.lax.slice(
                x, (0, i, j, 0),
                (N, i + (Ho - 1) * 2 + 1, j + (Wo - 1) * 2 + 1, C),
                (1, 2, 2, 1))
            slabs.append(s.reshape(P, C))
    out = pl.pallas_call(
        _maxpool9_kernel,
        out_shape=jax.ShapeDtypeStruct((P, C), jnp.float32),
    )(*slabs)
    return out.reshape(N, Ho, Wo, C)


# ----------------------------------------------------------------- parameters --

def _conv_init(key, cout, cin, kh, kw, has_bias):
    k1, k2 = jax.random.split(key)
    fan_in = cin * kh * kw
    w = jax.random.normal(k1, (cout, cin, kh, kw), jnp.float32) / np.sqrt(fan_in)
    b = (jax.random.normal(k2, (cout,), jnp.float32) * 0.01) if has_bias else None
    return w, b


def _residual_block_init(key, cin, cout, same_shape):
    keys = jax.random.split(key, 3)
    p = {
        "same_shape": same_shape,
        "conv1_w": _conv_init(keys[0], cout, cin, 3, 3, False)[0],
        "bn1_g": jnp.ones((cout,), jnp.float32),
        "bn1_b": jnp.zeros((cout,), jnp.float32),
        "conv2_w": _conv_init(keys[1], cout, cout, 3, 3, False)[0],
        "bn2_g": jnp.ones((cout,), jnp.float32),
        "bn2_b": jnp.zeros((cout,), jnp.float32),
    }
    if not same_shape:
        w, b = _conv_init(keys[2], cout, cin, 1, 1, True)
        p["conv3_w"], p["conv3_b"] = w, b
    return p


def build_params(key, in_channel):
    keys = jax.random.split(key, 10)
    w1, b1 = _conv_init(keys[0], 64, in_channel, 7, 7, True)
    return {
        "block1_w": w1, "block1_b": b1,
        "block2": [_residual_block_init(keys[1], 64, 64, True),
                   _residual_block_init(keys[2], 64, 64, True)],
        "block3": [_residual_block_init(keys[3], 64, 128, False),
                   _residual_block_init(keys[4], 128, 128, True)],
        "block4": [_residual_block_init(keys[5], 128, 256, False),
                   _residual_block_init(keys[6], 256, 256, True)],
        "block5": [_residual_block_init(keys[7], 256, 512, False),
                   _residual_block_init(keys[8], 512, 512, True)],
    }


def _prep_conv(weight, bias=None, gamma=None, beta=None, stride=1, pad=0):
    """PyTorch (Cout, Cin, kh, kw) weight -> K-padded bf16 (Kp, Cout) matrix."""
    cout, cin, kh, kw = weight.shape
    K = kh * kw * cin
    Kp = _round_up(K, 128)
    w_mat = jnp.transpose(weight, (2, 3, 1, 0)).reshape(K, cout)
    w_mat = jnp.pad(w_mat, ((0, Kp - K), (0, 0))).astype(jnp.bfloat16)
    prep = {"w": w_mat, "kh": kh, "kw": kw, "stride": stride, "pad": pad}
    if bias is not None:
        prep["bias"] = bias.reshape(1, cout).astype(jnp.float32)
    if gamma is not None:
        prep["gamma"] = gamma.reshape(1, cout).astype(jnp.float32)
        prep["beta"] = beta.reshape(1, cout).astype(jnp.float32)
    return prep


def prepare_params(raw):
    """Precompute matmul-ready (bf16, padded) weights ONCE, outside the forward."""
    def prep_block(p):
        d = {
            "same_shape": p["same_shape"],
            "conv1": _prep_conv(p["conv1_w"], gamma=p["bn1_g"], beta=p["bn1_b"],
                                stride=(1 if p["same_shape"] else 2), pad=1),
            "conv2": _prep_conv(p["conv2_w"], gamma=p["bn2_g"], beta=p["bn2_b"],
                                stride=1, pad=1),
        }
        if not p["same_shape"]:
            d["conv3"] = _prep_conv(p["conv3_w"], bias=p["conv3_b"],
                                    stride=2, pad=0)
        return d

    return {
        "block1": _prep_conv(raw["block1_w"], bias=raw["block1_b"],
                             stride=2, pad=0),
        "block2": [prep_block(p) for p in raw["block2"]],
        "block3": [prep_block(p) for p in raw["block3"]],
        "block4": [prep_block(p) for p in raw["block4"]],
        "block5": [prep_block(p) for p in raw["block5"]],
    }


# ------------------------------------------------------------------- forward --

def residual_block_fwd(p, x):
    same = p["same_shape"]

    # conv1 -> BN -> ReLU, fully fused.
    h, meta1 = fused_conv(x, p["conv1"], "bn_relu")
    N, Ho, Wo, C1, M1, _ = meta1
    h_nhwc = h[:M1].reshape(N, Ho, Wo, C1)

    # Skip path, kept in padded (Mp, Cout) matrix form.
    if same:
        Nn, Hh, Ww, Cc = x.shape
        M = Nn * Hh * Ww
        Mp = _round_up(M, 16)
        skip = jnp.pad(x.reshape(M, Cc), ((0, Mp - M), (0, 0)))
    else:
        skip, _ = fused_conv(x, p["conv3"], "bias")  # 1x1 stride-2 conv w/ bias

    # conv2 -> BN -> ReLU -> (+skip) -> ReLU, fully fused.
    out, meta2 = fused_conv(h_nhwc, p["conv2"], "bn_relu_add", skip_mat=skip)
    N2, Ho2, Wo2, C2, M2, _ = meta2
    return out[:M2].reshape(N2, Ho2, Wo2, C2)


def resnet_forward(params, x_nchw):
    # NCHW (PyTorch) -> NHWC for kernels.
    x = jnp.transpose(x_nchw, (0, 2, 3, 1)).astype(jnp.float32)

    # block1: Conv2d(in_channel, 64, kernel=7, stride=2, pad=0, bias=True)
    y, meta = fused_conv(x, params["block1"], "bias")
    N, Ho, Wo, C, M, _ = meta
    x = y[:M].reshape(N, Ho, Wo, C)

    # block2: MaxPool2d(3, 2) + 2x residual_block(64, 64)
    x = maxpool_3x3_s2(x)
    for p in params["block2"]:
        x = residual_block_fwd(p, x)

    for p in params["block3"]:
        x = residual_block_fwd(p, x)
    for p in params["block4"]:
        x = residual_block_fwd(p, x)
    for p in params["block5"]:
        x = residual_block_fwd(p, x)

    # back to NCHW to match PyTorch output convention.
    return jnp.transpose(x, (0, 3, 1, 2))


# ---------------------------------------------------------------------- main --

if __name__ == "__main__":
    key = jax.random.PRNGKey(0)
    kp, kx = jax.random.split(key)

    in_channel = 3
    x = jax.random.normal(kx, (2, in_channel, 32, 32), jnp.float32)  # NCHW

    raw_params = build_params(kp, in_channel)
    params = prepare_params(raw_params)  # bf16 / padded weights, built once

    fwd = jax.jit(functools.partial(resnet_forward, params))
    out = fwd(x)
    out = jax.block_until_ready(out)

    # sanity: 32x32 input -> conv7/2: 13 -> pool3/2: 6 -> /2: 3 -> /2: 2 -> /2: 1
    assert out.shape == (2, 512, 1, 1), out.shape
    assert bool(jnp.all(jnp.isfinite(out)))
    print("KERNEL_OK")
</pallas_src>

<mosaic_0001>
module attributes {stable_mosaic.version = 11 : i64} {
  func.func @kernel(%arg0: i32, %arg1: i32, %arg2: memref<176x256xbf16, #tpu.memory_space<vmem>>, %arg3: memref<256x64xbf16, #tpu.memory_space<vmem>>, %arg4: memref<1x64xf32, #tpu.memory_space<vmem>>, %arg5: memref<176x64xf32, #tpu.memory_space<vmem>>) attributes {dimension_semantics = [#tpu.dimension_semantics<parallel>, #tpu.dimension_semantics<arbitrary>], iteration_bounds = array<i64: 2, 1>, scalar_prefetch = 0 : i64, scratch_operands = 0 : i64, tpu.core_type = #tpu.core_type<tc>, window_params = [{transform_indices = @transform_0, window_bounds = array<i64: 176, 256>}, {transform_indices = @transform_1, window_bounds = array<i64: 256, 64>}, {pipeline_mode = #tpu.pipeline_mode<synchronous>, transform_indices = @transform_2, window_bounds = array<i64: 1, 64>}, {transform_indices = @transform_3, window_bounds = array<i64: 176, 64>}]} {
    %c0_i32 = arith.constant 0 : i32
    %0 = arith.cmpi eq, %arg1, %c0_i32 : i32
    %1 = arith.extui %0 : i1 to i32
    %c0_i32_0 = arith.constant 0 : i32
    %2 = arith.cmpi ne, %1, %c0_i32_0 : i32
    scf.if %2 {
      %cst_10 = arith.constant 0.000000e+00 : f32
      %12 = vector.broadcast %cst_10 : f32 to vector<176x64xf32>
      %c0_11 = arith.constant 0 : index
      %c0_12 = arith.constant 0 : index
      %13 = vector.load %arg5[%c0_11, %c0_12] : memref<176x64xf32, #tpu.memory_space<vmem>>, vector<176x64xf32>
      tpu.vector_store %arg5[%c0_11, %c0_12], %12 {strides = array<i32>} : memref<176x64xf32, #tpu.memory_space<vmem>>, vector<176x64xf32>,
    } else {
    }
    %c0 = arith.constant 0 : index
    %c0_1 = arith.constant 0 : index
    %3 = vector.load %arg5[%c0, %c0_1] : memref<176x64xf32, #tpu.memory_space<vmem>>, vector<176x64xf32>
    %c0_2 = arith.constant 0 : index
    %c0_3 = arith.constant 0 : index
    %4 = vector.load %arg2[%c0_2, %c0_3] : memref<176x256xbf16, #tpu.memory_space<vmem>>, vector<176x256xbf16>
    %c0_4 = arith.constant 0 : index
    %c0_5 = arith.constant 0 : index
    %5 = vector.load %arg3[%c0_4, %c0_5] : memref<256x64xbf16, #tpu.memory_space<vmem>>, vector<256x64xbf16>
    %cst = arith.constant dense<0.000000e+00> : vector<176x64xf32>
    %6 = tpu.matmul %4, %5, %cst {dimension_numbers = #tpu.dot_dimension_numbers<[1], [0], [0], [1], [0, 0, 1, 1], [], []>} : vector<176x256xbf16>, vector<256x64xbf16>, vector<176x64xf32> -> vector<176x64xf32>
    %7 = arith.addf %3, %6 : vector<176x64xf32>
    %c0_6 = arith.constant 0 : index
    %c0_7 = arith.constant 0 : index
    %8 = vector.load %arg5[%c0_6, %c0_7] : memref<176x64xf32, #tpu.memory_space<vmem>>, vector<176x64xf32>
    tpu.vector_store %arg5[%c0_6, %c0_7], %7 {strides = array<i32>} : memref<176x64xf32, #tpu.memory_space<vmem>>, vector<176x64xf32>,
    %c0_i32_8 = arith.constant 0 : i32
    %9 = arith.cmpi eq, %arg1, %c0_i32_8 : i32
    %10 = arith.extui %9 : i1 to i32
    %c0_i32_9 = arith.constant 0 : i32
    %11 = arith.cmpi ne, %10, %c0_i32_9 : i32
    scf.if %11 {
      %c0_10 = arith.constant 0 : index
      %c0_11 = arith.constant 0 : index
      %12 = vector.load %arg5[%c0_10, %c0_11] : memref<176x64xf32, #tpu.memory_space<vmem>>, vector<176x64xf32>
      %c0_12 = arith.constant 0 : index
      %c0_13 = arith.constant 0 : index
      %13 = vector.load %arg4[%c0_12, %c0_13] : memref<1x64xf32, #tpu.memory_space<vmem>>, vector<1x64xf32>
      %14 = vector.broadcast %13 : vector<1x64xf32> to vector<176x64xf32>
      %15 = arith.addf %12, %14 : vector<176x64xf32>
      %c0_14 = arith.constant 0 : index
      %c0_15 = arith.constant 0 : index
      %16 = vector.load %arg5[%c0_14, %c0_15] : memref<176x64xf32, #tpu.memory_space<vmem>>, vector<176x64xf32>
      tpu.vector_store %arg5[%c0_14, %c0_15], %15 {strides = array<i32>} : memref<176x64xf32, #tpu.memory_space<vmem>>, vector<176x64xf32>,
    } else {
    }
    return
  }
  func.func @transform_0(%arg0: i32, %arg1: i32) -> (i32, i32) {
    %c0_i32 = arith.constant 0 : i32
    return %arg0, %arg1 : i32, i32
  }
  func.func @transform_1(%arg0: i32, %arg1: i32) -> (i32, i32) {
    %c0_i32 = arith.constant 0 : i32
    %c0_i32_0 = arith.constant 0 : i32
    return %arg1, %c0_i32 : i32, i32
  }
  func.func @transform_2(%arg0: i32, %arg1: i32) -> (i32, i32) {
    %c0_i32 = arith.constant 0 : i32
    %c0_i32_0 = arith.constant 0 : i32
    %c0_i32_1 = arith.constant 0 : i32
    return %c0_i32, %c0_i32_0 : i32, i32
  }
  func.func @transform_3(%arg0: i32, %arg1: i32) -> (i32, i32) {
    %c0_i32 = arith.constant 0 : i32
    %c0_i32_0 = arith.constant 0 : i32
    return %arg0, %c0_i32 : i32, i32
  }
}

module attributes {stable_mosaic.version = 11 : i64} {
  func.func @_maxpool9_kernel(%arg0: memref<72x64xf32, #tpu.memory_space<vmem>>, %arg1: memref<72x64xf32, #tpu.memory_space<vmem>>, %arg2: memref<72x64xf32, #tpu.memory_space<vmem>>, %arg3: memref<72x64xf32, #tpu.memory_space<vmem>>, %arg4: memref<72x64xf32, #tpu.memory_space<vmem>>, %arg5: memref<72x64xf32, #tpu.memory_space<vmem>>, %arg6: memref<72x64xf32, #tpu.memory_space<vmem>>, %arg7: memref<72x64xf32, #tpu.memory_space<vmem>>, %arg8: memref<72x64xf32, #tpu.memory_space<vmem>>, %arg9: memref<72x64xf32, #tpu.memory_space<vmem>>) attributes {dimension_semantics = [], scalar_prefetch = 0 : i64, scratch_operands = 0 : i64, tpu.core_type = #tpu.core_type<tc>} {
    %c0 = arith.constant 0 : index
    %c0_0 = arith.constant 0 : index
    %0 = vector.load %arg0[%c0, %c0_0] : memref<72x64xf32, #tpu.memory_space<vmem>>, vector<72x64xf32>
    %c0_1 = arith.constant 0 : index
    %c0_2 = arith.constant 0 : index
    %1 = vector.load %arg1[%c0_1, %c0_2] : memref<72x64xf32, #tpu.memory_space<vmem>>, vector<72x64xf32>
    %2 = arith.maximumf %0, %1 : vector<72x64xf32>
    %c0_3 = arith.constant 0 : index
    %c0_4 = arith.constant 0 : index
    %3 = vector.load %arg2[%c0_3, %c0_4] : memref<72x64xf32, #tpu.memory_space<vmem>>, vector<72x64xf32>
    %4 = arith.maximumf %2, %3 : vector<72x64xf32>
    %c0_5 = arith.constant 0 : index
    %c0_6 = arith.constant 0 : index
    %5 = vector.load %arg3[%c0_5, %c0_6] : memref<72x64xf32, #tpu.memory_space<vmem>>, vector<72x64xf32>
    %6 = arith.maximumf %4, %5 : vector<72x64xf32>
    %c0_7 = arith.constant 0 : index
    %c0_8 = arith.constant 0 : index
    %7 = vector.load %arg4[%c0_7, %c0_8] : memref<72x64xf32, #tpu.memory_space<vmem>>, vector<72x64xf32>
    %8 = arith.maximumf %6, %7 : vector<72x64xf32>
    %c0_9 = arith.constant 0 : index
    %c0_10 = arith.constant 0 : index
    %9 = vector.load %arg5[%c0_9, %c0_10] : memref<72x64xf32, #tpu.memory_space<vmem>>, vector<72x64xf32>
    %10 = arith.maximumf %8, %9 : vector<72x64xf32>
    %c0_11 = arith.constant 0 : index
    %c0_12 = arith.constant 0 : index
    %11 = vector.load %arg6[%c0_11, %c0_12] : memref<72x64xf32, #tpu.memory_space<vmem>>, vector<72x64xf32>
    %12 = arith.maximumf %10, %11 : vector<72x64xf32>
    %c0_13 = arith.constant 0 : index
    %c0_14 = arith.constant 0 : index
    %13 = vector.load %arg7[%c0_13, %c0_14] : memref<72x64xf32, #tpu.memory_space<vmem>>, vector<72x64xf32>
    %14 = arith.maximumf %12, %13 : vector<72x64xf32>
    %c0_15 = arith.constant 0 : index
    %c0_16 = arith.constant 0 : index
    %15 = vector.load %arg8[%c0_15, %c0_16] : memref<72x64xf32, #tpu.memory_space<vmem>>, vector<72x64xf32>
    %16 = arith.maximumf %14, %15 : vector<72x64xf32>
    %c0_17 = arith.constant 0 : index
    %c0_18 = arith.constant 0 : index
    %17 = vector.load %arg9[%c0_17, %c0_18] : memref<72x64xf32, #tpu.memory_space<vmem>>, vector<72x64xf32>
    tpu.vector_store %arg9[%c0_17, %c0_18], %16 {strides = array<i32>} : memref<72x64xf32, #tpu.memory_space<vmem>>, vector<72x64xf32>,
    return
  }
}

module attributes {stable_mosaic.version = 11 : i64} {
  func.func @kernel(%arg0: i32, %arg1: i32, %arg2: memref<80x640xbf16, #tpu.memory_space<vmem>>, %arg3: memref<640x64xbf16, #tpu.memory_space<vmem>>, %arg4: memref<1x64xf32, #tpu.memory_space<vmem>>, %arg5: memref<1x64xf32, #tpu.memory_space<vmem>>, %arg6: memref<80x64xf32, #tpu.memory_space<vmem>>) attributes {dimension_semantics = [#tpu.dimension_semantics<parallel>, #tpu.dimension_semantics<arbitrary>], iteration_bounds = array<i64: 1, 1>, scalar_prefetch = 0 : i64, scratch_operands = 0 : i64, tpu.core_type = #tpu.core_type<tc>, window_params = [{transform_indices = @transform_0, window_bounds = array<i64: 80, 640>}, {transform_indices = @transform_1, window_bounds = array<i64: 640, 64>}, {pipeline_mode = #tpu.pipeline_mode<synchronous>, transform_indices = @transform_2, window_bounds = array<i64: 1, 64>}, {pipeline_mode = #tpu.pipeline_mode<synchronous>, transform_indices = @transform_3, window_bounds = array<i64: 1, 64>}, {transform_indices = @transform_4, window_bounds = array<i64: 80, 64>}]} {
    %c0_i32 = arith.constant 0 : i32
    %0 = arith.cmpi eq, %arg1, %c0_i32 : i32
    %1 = arith.extui %0 : i1 to i32
    %c0_i32_0 = arith.constant 0 : i32
    %2 = arith.cmpi ne, %1, %c0_i32_0 : i32
    scf.if %2 {
      %cst_10 = arith.constant 0.000000e+00 : f32
      %12 = vector.broadcast %cst_10 : f32 to vector<80x64xf32>
      %c0_11 = arith.constant 0 : index
      %c0_12 = arith.constant 0 : index
      %13 = vector.load %arg6[%c0_11, %c0_12] : memref<80x64xf32, #tpu.memory_space<vmem>>, vector<80x64xf32>
      tpu.vector_store %arg6[%c0_11, %c0_12], %12 {strides = array<i32>} : memref<80x64xf32, #tpu.memory_space<vmem>>, vector<80x64xf32>,
    } else {
    }
    %c0 = arith.constant 0 : index
    %c0_1 = arith.constant 0 : index
    %3 = vector.load %arg6[%c0, %c0_1] : memref<80x64xf32, #tpu.memory_space<vmem>>, vector<80x64xf32>
    %c0_2 = arith.constant 0 : index
    %c0_3 = arith.constant 0 : index
    %4 = vector.load %arg2[%c0_2, %c0_3] : memref<80x640xbf16, #tpu.memory_space<vmem>>, vector<80x640xbf16>
    %c0_4 = arith.constant 0 : index
    %c0_5 = arith.constant 0 : index
    %5 = vector.load %arg3[%c0_4, %c0_5] : memref<640x64xbf16, #tpu.memory_space<vmem>>, vector<640x64xbf16>
    %cst = arith.constant dense<0.000000e+00> : vector<80x64xf32>
    %6 = tpu.matmul %4, %5, %cst {dimension_numbers = #tpu.dot_dimension_numbers<[1], [0], [0], [1], [0, 0, 1, 1], [], []>} : vector<80x640xbf16>, vector<640x64xbf16>, vector<80x64xf32> -> vector<80x64xf32>
    %7 = arith.addf %3, %6 : vector<80x64xf32>
    %c0_6 = arith.constant 0 : index
    %c0_7 = arith.constant 0 : index
    %8 = vector.load %arg6[%c0_6, %c0_7] : memref<80x64xf32, #tpu.memory_space<vmem>>, vector<80x64xf32>
    tpu.vector_store %arg6[%c0_6, %c0_7], %7 {strides = array<i32>} : memref<80x64xf32, #tpu.memory_space<vmem>>, vector<80x64xf32>,
    %c0_i32_8 = arith.constant 0 : i32
    %9 = arith.cmpi eq, %arg1, %c0_i32_8 : i32
    %10 = arith.extui %9 : i1 to i32
    %c0_i32_9 = arith.constant 0 : i32
    %11 = arith.cmpi ne, %10, %c0_i32_9 : i32
    scf.if %11 {
      %c0_10 = arith.constant 0 : index
      %c0_11 = arith.constant 0 : index
      %12 = vector.load %arg6[%c0_10, %c0_11] : memref<80x64xf32, #tpu.memory_space<vmem>>, vector<80x64xf32>
      %c0_12 = arith.constant 0 : index
      %c0_13 = arith.constant 0 : index
      %13 = vector.load %arg4[%c0_12, %c0_13] : memref<1x64xf32, #tpu.memory_space<vmem>>, vector<1x64xf32>
      %c0_14 = arith.constant 0 : index
      %c0_15 = arith.constant 0 : index
      %14 = vector.load %arg5[%c0_14, %c0_15] : memref<1x64xf32, #tpu.memory_space<vmem>>, vector<1x64xf32>
      %15 = tpu.iota {dimensions = array<i32: 0>} : vector<80x1xi32>
      %c72_i32 = arith.constant 72 : i32
      %16 = vector.broadcast %c72_i32 : i32 to vector<80x1xi32>
      %17 = arith.cmpi slt, %15, %16 : vector<80x1xi32>
      %18 = arith.extui %17 : vector<80x1xi1> to vector<80x1xi32>
      %19 = arith.sitofp %18 : vector<80x1xi32> to vector<80x1xf32>
      %20 = vector.broadcast %19 : vector<80x1xf32> to vector<80x64xf32>
      %21 = arith.mulf %12, %20 : vector<80x64xf32>
      %cst_16 = arith.constant dense<0.000000e+00> : vector<64xf32>
      %22 = vector.multi_reduction <add>, %21, %cst_16 [0] : vector<80x64xf32> to vector<64xf32>
      %23 = vector.shape_cast %22 : vector<64xf32> to vector<1x64xf32>
      %cst_17 = arith.constant 0.013888889 : f32
      %24 = vector.broadcast %cst_17 : f32 to vector<1x64xf32>
      %25 = arith.mulf %23, %24 : vector<1x64xf32>
      %26 = vector.broadcast %25 : vector<1x64xf32> to vector<80x64xf32>
      %27 = arith.subf %12, %26 : vector<80x64xf32>
      %28 = vector.broadcast %19 : vector<80x1xf32> to vector<80x64xf32>
      %29 = arith.mulf %27, %28 : vector<80x64xf32>
      %30 = arith.mulf %29, %29 : vector<80x64xf32>
      %cst_18 = arith.constant dense<0.000000e+00> : vector<64xf32>
      %31 = vector.multi_reduction <add>, %30, %cst_18 [0] : vector<80x64xf32> to vector<64xf32>
      %32 = vector.shape_cast %31 : vector<64xf32> to vector<1x64xf32>
      %cst_19 = arith.constant 0.013888889 : f32
      %33 = vector.broadcast %cst_19 : f32 to vector<1x64xf32>
      %34 = arith.mulf %32, %33 : vector<1x64xf32>
      %35 = vector.broadcast %25 : vector<1x64xf32> to vector<80x64xf32>
      %36 = arith.subf %12, %35 : vector<80x64xf32>
      %cst_20 = arith.constant 9.99999974E-6 : f32
      %37 = vector.broadcast %cst_20 : f32 to vector<1x64xf32>
      %38 = arith.addf %34, %37 : vector<1x64xf32>
      %39 = math.rsqrt %38 : vector<1x64xf32>
      %40 = vector.broadcast %39 : vector<1x64xf32> to vector<80x64xf32>
      %41 = arith.mulf %36, %40 : vector<80x64xf32>
      %42 = vector.broadcast %13 : vector<1x64xf32> to vector<80x64xf32>
      %43 = arith.mulf %41, %42 : vector<80x64xf32>
      %44 = vector.broadcast %14 : vector<1x64xf32> to vector<80x64xf32>
      %45 = arith.addf %43, %44 : vector<80x64xf32>
      %cst_21 = arith.constant 0.000000e+00 : f32
      %46 = vector.broadcast %cst_21 : f32 to vector<80x64xf32>
      %47 = arith.maximumf %45, %46 : vector<80x64xf32>
      %c0_22 = arith.constant 0 : index
      %c0_23 = arith.constant 0 : index
      %48 = vector.load %arg6[%c0_22, %c0_23] : memref<80x64xf32, #tpu.memory_space<vmem>>, vector<80x64xf32>
      tpu.vector_store %arg6[%c0_22, %c0_23], %47 {strides = array<i32>} : memref<80x64xf32, #tpu.memory_space<vmem>>, vector<80x64xf32>,
    } else {
    }
    return
  }
  func.func @transform_0(%arg0: i32, %arg1: i32) -> (i32, i32) {
    %c0_i32 = arith.constant 0 : i32
    return %arg0, %arg1 : i32, i32
  }
  func.func @transform_1(%arg0: i32, %arg1: i32) -> (i32, i32) {
    %c0_i32 = arith.constant 0 : i32
    %c0_i32_0 = arith.constant 0 : i32
    return %arg1, %c0_i32 : i32, i32
  }
  func.func @transform_2(%arg0: i32, %arg1: i32) -> (i32, i32) {
    %c0_i32 = arith.constant 0 : i32
    %c0_i32_0 = arith.constant 0 : i32
    %c0_i32_1 = arith.constant 0 : i32
    return %c0_i32, %c0_i32_0 : i32, i32
  }
  func.func @transform_3(%arg0: i32, %arg1: i32) -> (i32, i32) {
    %c0_i32 = arith.constant 0 : i32
    %c0_i32_0 = arith.constant 0 : i32
    %c0_i32_1 = arith.constant 0 : i32
    return %c0_i32, %c0_i32_0 : i32, i32
  }
  func.func @transform_4(%arg0: i32, %arg1: i32) -> (i32, i32) {
    %c0_i32 = arith.constant 0 : i32
    %c0_i32_0 = arith.constant 0 : i32
    return %arg0, %c0_i32 : i32, i32
  }
}

module attributes {stable_mosaic.version = 11 : i64} {
  func.func @kernel(%arg0: i32, %arg1: i32, %arg2: memref<80x640xbf16, #tpu.memory_space<vmem>>, %arg3: memref<640x64xbf16, #tpu.memory_space<vmem>>, %arg4: memref<1x64xf32, #tpu.memory_space<vmem>>, %arg5: memref<1x64xf32, #tpu.memory_space<vmem>>, %arg6: memref<80x64xf32, #tpu.memory_space<vmem>>, %arg7: memref<80x64xf32, #tpu.memory_space<vmem>>) attributes {dimension_semantics = [#tpu.dimension_semantics<parallel>, #tpu.dimension_semantics<arbitrary>], iteration_bounds = array<i64: 1, 1>, scalar_prefetch = 0 : i64, scratch_operands = 0 : i64, tpu.core_type = #tpu.core_type<tc>, window_params = [{transform_indices = @transform_0, window_bounds = array<i64: 80, 640>}, {transform_indices = @transform_1, window_bounds = array<i64: 640, 64>}, {pipeline_mode = #tpu.pipeline_mode<synchronous>, transform_indices = @transform_2, window_bounds = array<i64: 1, 64>}, {pipeline_mode = #tpu.pipeline_mode<synchronous>, transform_indices = @transform_3, window_bounds = array<i64: 1, 64>}, {transform_indices = @transform_4, window_bounds = array<i64: 80, 64>}, {transform_indices = @transform_5, window_bounds = array<i64: 80, 64>}]} {
    %c0_i32 = arith.constant 0 : i32
    %0 = arith.cmpi eq, %arg1, %c0_i32 : i32
    %1 = arith.extui %0 : i1 to i32
    %c0_i32_0 = arith.constant 0 : i32
    %2 = arith.cmpi ne, %1, %c0_i32_0 : i32
    scf.if %2 {
      %cst_10 = arith.constant 0.000000e+00 : f32
      %12 = vector.broadcast %cst_10 : f32 to vector<80x64xf32>
      %c0_11 = arith.constant 0 : index
      %c0_12 = arith.constant 0 : index
      %13 = vector.load %arg7[%c0_11, %c0_12] : memref<80x64xf32, #tpu.memory_space<vmem>>, vector<80x64xf32>
      tpu.vector_store %arg7[%c0_11, %c0_12], %12 {strides = array<i32>} : memref<80x64xf32, #tpu.memory_space<vmem>>, vector<80x64xf32>,
    } else {
    }
    %c0 = arith.constant 0 : index
    %c0_1 = arith.constant 0 : index
    %3 = vector.load %arg7[%c0, %c0_1] : memref<80x64xf32, #tpu.memory_space<vmem>>, vector<80x64xf32>
    %c0_2 = arith.constant 0 : index
    %c0_3 = arith.constant 0 : index
    %4 = vector.load %arg2[%c0_2, %c0_3] : memref<80x640xbf16, #tpu.memory_space<vmem>>, vector<80x640xbf16>
    %c0_4 = arith.constant 0 : index
    %c0_5 = arith.constant 0 : index
    %5 = vector.load %arg3[%c0_4, %c0_5] : memref<640x64xbf16, #tpu.memory_space<vmem>>, vector<640x64xbf16>
    %cst = arith.constant dense<0.000000e+00> : vector<80x64xf32>
    %6 = tpu.matmul %4, %5, %cst {dimension_numbers = #tpu.dot_dimension_numbers<[1], [0], [0], [1], [0, 0, 1, 1], [], []>} : vector<80x640xbf16>, vector<640x64xbf16>, vector<80x64xf32> -> vector<80x64xf32>
    %7 = arith.addf %3, %6 : vector<80x64xf32>
    %c0_6 = arith.constant 0 : index
    %c0_7 = arith.constant 0 : index
    %8 = vector.load %arg7[%c0_6, %c0_7] : memref<80x64xf32, #tpu.memory_space<vmem>>, vector<80x64xf32>
    tpu.vector_store %arg7[%c0_6, %c0_7], %7 {strides = array<i32>} : memref<80x64xf32, #tpu.memory_space<vmem>>, vector<80x64xf32>,
    %c0_i32_8 = arith.constant 0 : i32
    %9 = arith.cmpi eq, %arg1, %c0_i32_8 : i32
    %10 = arith.extui %9 : i1 to i32
    %c0_i32_9 = arith.constant 0 : i32
    %11 = arith.cmpi ne, %10, %c0_i32_9 : i32
    scf.if %11 {
      %c0_10 = arith.constant 0 : index
      %c0_11 = arith.constant 0 : index
      %12 = vector.load %arg7[%c0_10, %c0_11] : memref<80x64xf32, #tpu.memory_space<vmem>>, vector<80x64xf32>
      %c0_12 = arith.constant 0 : index
      %c0_13 = arith.constant 0 : index
      %13 = vector.load %arg4[%c0_12, %c0_13] : memref<1x64xf32, #tpu.memory_space<vmem>>, vector<1x64xf32>
      %c0_14 = arith.constant 0 : index
      %c0_15 = arith.constant 0 : index
      %14 = vector.load %arg5[%c0_14, %c0_15] : memref<1x64xf32, #tpu.memory_space<vmem>>, vector<1x64xf32>
      %15 = tpu.iota {dimensions = array<i32: 0>} : vector<80x1xi32>
      %c72_i32 = arith.constant 72 : i32
      %16 = vector.broadcast %c72_i32 : i32 to vector<80x1xi32>
      %17 = arith.cmpi slt, %15, %16 : vector<80x1xi32>
      %18 = arith.extui %17 : vector<80x1xi1> to vector<80x1xi32>
      %19 = arith.sitofp %18 : vector<80x1xi32> to vector<80x1xf32>
      %20 = vector.broadcast %19 : vector<80x1xf32> to vector<80x64xf32>
      %21 = arith.mulf %12, %20 : vector<80x64xf32>
      %cst_16 = arith.constant dense<0.000000e+00> : vector<64xf32>
      %22 = vector.multi_reduction <add>, %21, %cst_16 [0] : vector<80x64xf32> to vector<64xf32>
      %23 = vector.shape_cast %22 : vector<64xf32> to vector<1x64xf32>
      %cst_17 = arith.constant 0.013888889 : f32
      %24 = vector.broadcast %cst_17 : f32 to vector<1x64xf32>
      %25 = arith.mulf %23, %24 : vector<1x64xf32>
      %26 = vector.broadcast %25 : vector<1x64xf32> to vector<80x64xf32>
      %27 = arith.subf %12, %26 : vector<80x64xf32>
      %28 = vector.broadcast %19 : vector<80x1xf32> to vector<80x64xf32>
      %29 = arith.mulf %27, %28 : vector<80x64xf32>
      %30 = arith.mulf %29, %29 : vector<80x64xf32>
      %cst_18 = arith.constant dense<0.000000e+00> : vector<64xf32>
      %31 = vector.multi_reduction <add>, %30, %cst_18 [0] : vector<80x64xf32> to vector<64xf32>
      %32 = vector.shape_cast %31 : vector<64xf32> to vector<1x64xf32>
      %cst_19 = arith.constant 0.013888889 : f32
      %33 = vector.broadcast %cst_19 : f32 to vector<1x64xf32>
      %34 = arith.mulf %32, %33 : vector<1x64xf32>
      %35 = vector.broadcast %25 : vector<1x64xf32> to vector<80x64xf32>
      %36 = arith.subf %12, %35 : vector<80x64xf32>
      %cst_20 = arith.constant 9.99999974E-6 : f32
      %37 = vector.broadcast %cst_20 : f32 to vector<1x64xf32>
      %38 = arith.addf %34, %37 : vector<1x64xf32>
      %39 = math.rsqrt %38 : vector<1x64xf32>
      %40 = vector.broadcast %39 : vector<1x64xf32> to vector<80x64xf32>
      %41 = arith.mulf %36, %40 : vector<80x64xf32>
      %42 = vector.broadcast %13 : vector<1x64xf32> to vector<80x64xf32>
      %43 = arith.mulf %41, %42 : vector<80x64xf32>
      %44 = vector.broadcast %14 : vector<1x64xf32> to vector<80x64xf32>
      %45 = arith.addf %43, %44 : vector<80x64xf32>
      %cst_21 = arith.constant 0.000000e+00 : f32
      %46 = vector.broadcast %cst_21 : f32 to vector<80x64xf32>
      %47 = arith.maximumf %45, %46 : vector<80x64xf32>
      %c0_22 = arith.constant 0 : index
      %c0_23 = arith.constant 0 : index
      %48 = vector.load %arg6[%c0_22, %c0_23] : memref<80x64xf32, #tpu.memory_space<vmem>>, vector<80x64xf32>
      %49 = arith.addf %47, %48 : vector<80x64xf32>
      %cst_24 = arith.constant 0.000000e+00 : f32
      %50 = vector.broadcast %cst_24 : f32 to vector<80x64xf32>
      %51 = arith.maximumf %49, %50 : vector<80x64xf32>
      %c0_25 = arith.constant 0 : index
      %c0_26 = arith.constant 0 : index
      %52 = vector.load %arg7[%c0_25, %c0_26] : memref<80x64xf32, #tpu.memory_space<vmem>>, vector<80x64xf32>
      tpu.vector_store %arg7[%c0_25, %c0_26], %51 {strides = array<i32>} : memref<80x64xf32, #tpu.memory_space<vmem>>, vector<80x64xf32>,
    } else {
    }
    return
  }
  func.func @transform_0(%arg0: i32, %arg1: i32) -> (i32, i32) {
    %c0_i32 = arith.constant 0 : i32
    return %arg0, %arg1 : i32, i32
  }
  func.func @transform_1(%arg0: i32, %arg1: i32) -> (i32, i32) {
    %c0_i32 = arith.constant 0 : i32
    %c0_i32_0 = arith.constant 0 : i32
    return %arg1, %c0_i32 : i32, i32
  }
  func.func @transform_2(%arg0: i32, %arg1: i32) -> (i32, i32) {
    %c0_i32 = arith.constant 0 : i32
    %c0_i32_0 = arith.constant 0 : i32
    %c0_i32_1 = arith.constant 0 : i32
    return %c0_i32, %c0_i32_0 : i32, i32
  }
  func.func @transform_3(%arg0: i32, %arg1: i32) -> (i32, i32) {
    %c0_i32 = arith.constant 0 : i32
    %c0_i32_0 = arith.constant 0 : i32
    %c0_i32_1 = arith.constant 0 : i32
    return %c0_i32, %c0_i32_0 : i32, i32
  }
  func.func @transform_4(%arg0: i32, %arg1: i32) -> (i32, i32) {
    %c0_i32 = arith.constant 0 : i32
    %c0_i32_0 = arith.constant 0 : i32
    return %arg0, %c0_i32 : i32, i32
  }
  func.func @transform_5(%arg0: i32, %arg1: i32) -> (i32, i32) {
    %c0_i32 = arith.constant 0 : i32
    %c0_i32_0 = arith.constant 0 : i32
    return %arg0, %c0_i32 : i32, i32
  }
}

module attributes {stable_mosaic.version = 11 : i64} {
  func.func @kernel(%arg0: i32, %arg1: i32, %arg2: memref<32x640xbf16, #tpu.memory_space<vmem>>, %arg3: memref<640x128xbf16, #tpu.memory_space<vmem>>, %arg4: memref<1x128xf32, #tpu.memory_space<vmem>>, %arg5: memref<1x128xf32, #tpu.memory_space<vmem>>, %arg6: memref<32x128xf32, #tpu.memory_space<vmem>>) attributes {dimension_semantics = [#tpu.dimension_semantics<parallel>, #tpu.dimension_semantics<arbitrary>], iteration_bounds = array<i64: 1, 1>, scalar_prefetch = 0 : i64, scratch_operands = 0 : i64, tpu.core_type = #tpu.core_type<tc>, window_params = [{transform_indices = @transform_0, window_bounds = array<i64: 32, 640>}, {transform_indices = @transform_1, window_bounds = array<i64: 640, 128>}, {pipeline_mode = #tpu.pipeline_mode<synchronous>, transform_indices = @transform_2, window_bounds = array<i64: 1, 128>}, {pipeline_mode = #tpu.pipeline_mode<synchronous>, transform_indices = @transform_3, window_bounds = array<i64: 1, 128>}, {transform_indices = @transform_4, window_bounds = array<i64: 32, 128>}]} {
    %c0_i32 = arith.constant 0 : i32
    %0 = arith.cmpi eq, %arg1, %c0_i32 : i32
    %1 = arith.extui %0 : i1 to i32
    %c0_i32_0 = arith.constant 0 : i32
    %2 = arith.cmpi ne, %1, %c0_i32_0 : i32
    scf.if %2 {
      %cst_10 = arith.constant 0.000000e+00 : f32
      %12 = vector.broadcast %cst_10 : f32 to vector<32x128xf32>
      %c0_11 = arith.constant 0 : index
      %c0_12 = arith.constant 0 : index
      %13 = vector.load %arg6[%c0_11, %c0_12] : memref<32x128xf32, #tpu.memory_space<vmem>>, vector<32x128xf32>
      tpu.vector_store %arg6[%c0_11, %c0_12], %12 {strides = array<i32>} : memref<32x128xf32, #tpu.memory_space<vmem>>, vector<32x128xf32>,
    } else {
    }
    %c0 = arith.constant 0 : index
    %c0_1 = arith.constant 0 : index
    %3 = vector.load %arg6[%c0, %c0_1] : memref<32x128xf32, #tpu.memory_space<vmem>>, vector<32x128xf32>
    %c0_2 = arith.constant 0 : index
    %c0_3 = arith.constant 0 : index
    %4 = vector.load %arg2[%c0_2, %c0_3] : memref<32x640xbf16, #tpu.memory_space<vmem>>, vector<32x640xbf16>
    %c0_4 = arith.constant 0 : index
    %c0_5 = arith.constant 0 : index
    %5 = vector.load %arg3[%c0_4, %c0_5] : memref<640x128xbf16, #tpu.memory_space<vmem>>, vector<640x128xbf16>
    %cst = arith.constant dense<0.000000e+00> : vector<32x128xf32>
    %6 = tpu.matmul %4, %5, %cst {dimension_numbers = #tpu.dot_dimension_numbers<[1], [0], [0], [1], [0, 0, 1, 1], [], []>} : vector<32x640xbf16>, vector<640x128xbf16>, vector<32x128xf32> -> vector<32x128xf32>
    %7 = arith.addf %3, %6 : vector<32x128xf32>
    %c0_6 = arith.constant 0 : index
    %c0_7 = arith.constant 0 : index
    %8 = vector.load %arg6[%c0_6, %c0_7] : memref<32x128xf32, #tpu.memory_space<vmem>>, vector<32x128xf32>
    tpu.vector_store %arg6[%c0_6, %c0_7], %7 {strides = array<i32>} : memref<32x128xf32, #tpu.memory_space<vmem>>, vector<32x128xf32>,
    %c0_i32_8 = arith.constant 0 : i32
    %9 = arith.cmpi eq, %arg1, %c0_i32_8 : i32
    %10 = arith.extui %9 : i1 to i32
    %c0_i32_9 = arith.constant 0 : i32
    %11 = arith.cmpi ne, %10, %c0_i32_9 : i32
    scf.if %11 {
      %c0_10 = arith.constant 0 : index
      %c0_11 = arith.constant 0 : index
      %12 = vector.load %arg6[%c0_10, %c0_11] : memref<32x128xf32, #tpu.memory_space<vmem>>, vector<32x128xf32>
      %c0_12 = arith.constant 0 : index
      %c0_13 = arith.constant 0 : index
      %13 = vector.load %arg4[%c0_12, %c0_13] : memref<1x128xf32, #tpu.memory_space<vmem>>, vector<1x128xf32>
      %c0_14 = arith.constant 0 : index
      %c0_15 = arith.constant 0 : index
      %14 = vector.load %arg5[%c0_14, %c0_15] : memref<1x128xf32, #tpu.memory_space<vmem>>, vector<1x128xf32>
      %15 = tpu.iota {dimensions = array<i32: 0>} : vector<32x1xi32>
      %c18_i32 = arith.constant 18 : i32
      %16 = vector.broadcast %c18_i32 : i32 to vector<32x1xi32>
      %17 = arith.cmpi slt, %15, %16 : vector<32x1xi32>
      %18 = arith.extui %17 : vector<32x1xi1> to vector<32x1xi32>
      %19 = arith.sitofp %18 : vector<32x1xi32> to vector<32x1xf32>
      %20 = vector.broadcast %19 : vector<32x1xf32> to vector<32x128xf32>
      %21 = arith.mulf %12, %20 : vector<32x128xf32>
      %cst_16 = arith.constant dense<0.000000e+00> : vector<128xf32>
      %22 = vector.multi_reduction <add>, %21, %cst_16 [0] : vector<32x128xf32> to vector<128xf32>
      %23 = vector.shape_cast %22 : vector<128xf32> to vector<1x128xf32>
      %cst_17 = arith.constant 0.055555556 : f32
      %24 = vector.broadcast %cst_17 : f32 to vector<1x128xf32>
      %25 = arith.mulf %23, %24 : vector<1x128xf32>
      %26 = vector.broadcast %25 : vector<1x128xf32> to vector<32x128xf32>
      %27 = arith.subf %12, %26 : vector<32x128xf32>
      %28 = vector.broadcast %19 : vector<32x1xf32> to vector<32x128xf32>
      %29 = arith.mulf %27, %28 : vector<32x128xf32>
      %30 = arith.mulf %29, %29 : vector<32x128xf32>
      %cst_18 = arith.constant dense<0.000000e+00> : vector<128xf32>
      %31 = vector.multi_reduction <add>, %30, %cst_18 [0] : vector<32x128xf32> to vector<128xf32>
      %32 = vector.shape_cast %31 : vector<128xf32> to vector<1x128xf32>
      %cst_19 = arith.constant 0.055555556 : f32
      %33 = vector.broadcast %cst_19 : f32 to vector<1x128xf32>
      %34 = arith.mulf %32, %33 : vector<1x128xf32>
      %35 = vector.broadcast %25 : vector<1x128xf32> to vector<32x128xf32>
      %36 = arith.subf %12, %35 : vector<32x128xf32>
      %cst_20 = arith.constant 9.99999974E-6 : f32
      %37 = vector.broadcast %cst_20 : f32 to vector<1x128xf32>
      %38 = arith.addf %34, %37 : vector<1x128xf32>
      %39 = math.rsqrt %38 : vector<1x128xf32>
      %40 = vector.broadcast %39 : vector<1x128xf32> to vector<32x128xf32>
      %41 = arith.mulf %36, %40 : vector<32x128xf32>
      %42 = vector.broadcast %13 : vector<1x128xf32> to vector<32x128xf32>
      %43 = arith.mulf %41, %42 : vector<32x128xf32>
      %44 = vector.broadcast %14 : vector<1x128xf32> to vector<32x128xf32>
      %45 = arith.addf %43, %44 : vector<32x128xf32>
      %cst_21 = arith.constant 0.000000e+00 : f32
      %46 = vector.broadcast %cst_21 : f32 to vector<32x128xf32>
      %47 = arith.maximumf %45, %46 : vector<32x128xf32>
      %c0_22 = arith.constant 0 : index
      %c0_23 = arith.constant 0 : index
      %48 = vector.load %arg6[%c0_22, %c0_23] : memref<32x128xf32, #tpu.memory_space<vmem>>, vector<32x128xf32>
      tpu.vector_store %arg6[%c0_22, %c0_23], %47 {strides = array<i32>} : memref<32x128xf32, #tpu.memory_space<vmem>>, vector<32x128xf32>,
    } else {
    }
    return
  }
  func.func @transform_0(%arg0: i32, %arg1: i32) -> (i32, i32) {
    %c0_i32 = arith.constant 0 : i32
    return %arg0, %arg1 : i32, i32
  }
  func.func @transform_1(%arg0: i32, %arg1: i32) -> (i32, i32) {
    %c0_i32 = arith.constant 0 : i32
    %c0_i32_0 = arith.constant 0 : i32
    return %arg1, %c0_i32 : i32, i32
  }
  func.func @transform_2(%arg0: i32, %arg1: i32) -> (i32, i32) {
    %c0_i32 = arith.constant 0 : i32
    %c0_i32_0 = arith.constant 0 : i32
    %c0_i32_1 = arith.constant 0 : i32
    return %c0_i32, %c0_i32_0 : i32, i32
  }
  func.func @transform_3(%arg0: i32, %arg1: i32) -> (i32, i32) {
    %c0_i32 = arith.constant 0 : i32
    %c0_i32_0 = arith.constant 0 : i32
    %c0_i32_1 = arith.constant 0 : i32
    return %c0_i32, %c0_i32_0 : i32, i32
  }
  func.func @transform_4(%arg0: i32, %arg1: i32) -> (i32, i32) {
    %c0_i32 = arith.constant 0 : i32
    %c0_i32_0 = arith.constant 0 : i32
    return %arg0, %c0_i32 : i32, i32
  }
}

module attributes {stable_mosaic.version = 11 : i64} {
  func.func @kernel(%arg0: i32, %arg1: i32, %arg2: memref<32x128xbf16, #tpu.memory_space<vmem>>, %arg3: memref<128x128xbf16, #tpu.memory_space<vmem>>, %arg4: memref<1x128xf32, #tpu.memory_space<vmem>>, %arg5: memref<32x128xf32, #tpu.memory_space<vmem>>) attributes {dimension_semantics = [#tpu.dimension_semantics<parallel>, #tpu.dimension_semantics<arbitrary>], iteration_bounds = array<i64: 1, 1>, scalar_prefetch = 0 : i64, scratch_operands = 0 : i64, tpu.core_type = #tpu.core_type<tc>, window_params = [{transform_indices = @transform_0, window_bounds = array<i64: 32, 128>}, {transform_indices = @transform_1, window_bounds = array<i64: 128, 128>}, {pipeline_mode = #tpu.pipeline_mode<synchronous>, transform_indices = @transform_2, window_bounds = array<i64: 1, 128>}, {transform_indices = @transform_3, window_bounds = array<i64: 32, 128>}]} {
    %c0_i32 = arith.constant 0 : i32
    %0 = arith.cmpi eq, %arg1, %c0_i32 : i32
    %1 = arith.extui %0 : i1 to i32
    %c0_i32_0 = arith.constant 0 : i32
    %2 = arith.cmpi ne, %1, %c0_i32_0 : i32
    scf.if %2 {
      %cst_10 = arith.constant 0.000000e+00 : f32
      %12 = vector.broadcast %cst_10 : f32 to vector<32x128xf32>
      %c0_11 = arith.constant 0 : index
      %c0_12 = arith.constant 0 : index
      %13 = vector.load %arg5[%c0_11, %c0_12] : memref<32x128xf32, #tpu.memory_space<vmem>>, vector<32x128xf32>
      tpu.vector_store %arg5[%c0_11, %c0_12], %12 {strides = array<i32>} : memref<32x128xf32, #tpu.memory_space<vmem>>, vector<32x128xf32>,
    } else {
    }
    %c0 = arith.constant 0 : index
    %c0_1 = arith.constant 0 : index
    %3 = vector.load %arg5[%c0, %c0_1] : memref<32x128xf32, #tpu.memory_space<vmem>>, vector<32x128xf32>
    %c0_2 = arith.constant 0 : index
    %c0_3 = arith.constant 0 : index
    %4 = vector.load %arg2[%c0_2, %c0_3] : memref<32x128xbf16, #tpu.memory_space<vmem>>, vector<32x128xbf16>
    %c0_4 = arith.constant 0 : index
    %c0_5 = arith.constant 0 : index
    %5 = vector.load %arg3[%c0_4, %c0_5] : memref<128x128xbf16, #tpu.memory_space<vmem>>, vector<128x128xbf16>
    %cst = arith.constant dense<0.000000e+00> : vector<32x128xf32>
    %6 = tpu.matmul %4, %5, %cst {dimension_numbers = #tpu.dot_dimension_numbers<[1], [0], [0], [1], [0, 0, 1, 1], [], []>} : vector<32x128xbf16>, vector<128x128xbf16>, vector<32x128xf32> -> vector<32x128xf32>
    %7 = arith.addf %3, %6 : vector<32x128xf32>
    %c0_6 = arith.constant 0 : index
    %c0_7 = arith.constant 0 : index
    %8 = vector.load %arg5[%c0_6, %c0_7] : memref<32x128xf32, #tpu.memory_space<vmem>>, vector<32x128xf32>
    tpu.vector_store %arg5[%c0_6, %c0_7], %7 {strides = array<i32>} : memref<32x128xf32, #tpu.memory_space<vmem>>, vector<32x128xf32>,
    %c0_i32_8 = arith.constant 0 : i32
    %9 = arith.cmpi eq, %arg1, %c0_i32_8 : i32
    %10 = arith.extui %9 : i1 to i32
    %c0_i32_9 = arith.constant 0 : i32
    %11 = arith.cmpi ne, %10, %c0_i32_9 : i32
    scf.if %11 {
      %c0_10 = arith.constant 0 : index
      %c0_11 = arith.constant 0 : index
      %12 = vector.load %arg5[%c0_10, %c0_11] : memref<32x128xf32, #tpu.memory_space<vmem>>, vector<32x128xf32>
      %c0_12 = arith.constant 0 : index
      %c0_13 = arith.constant 0 : index
      %13 = vector.load %arg4[%c0_12, %c0_13] : memref<1x128xf32, #tpu.memory_space<vmem>>, vector<1x128xf32>
      %14 = vector.broadcast %13 : vector<1x128xf32> to vector<32x128xf32>
      %15 = arith.addf %12, %14 : vector<32x128xf32>
      %c0_14 = arith.constant 0 : index
      %c0_15 = arith.constant 0 : index
      %16 = vector.load %arg5[%c0_14, %c0_15] : memref<32x128xf32, #tpu.memory_space<vmem>>, vector<32x128xf32>
      tpu.vector_store %arg5[%c0_14, %c0_15], %15 {strides = array<i32>} : memref<32x128xf32, #tpu.memory_space<vmem>>, vector<32x128xf32>,
    } else {
    }
    return
  }
  func.func @transform_0(%arg0: i32, %arg1: i32) -> (i32, i32) {
    %c0_i32 = arith.constant 0 : i32
    return %arg0, %arg1 : i32, i32
  }
  func.func @transform_1(%arg0: i32, %arg1: i32) -> (i32, i32) {
    %c0_i32 = arith.constant 0 : i32
    %c0_i32_0 = arith.constant 0 : i32
    return %arg1, %c0_i32 : i32, i32
  }
  func.func @transform_2(%arg0: i32, %arg1: i32) -> (i32, i32) {
    %c0_i32 = arith.constant 0 : i32
    %c0_i32_0 = arith.constant 0 : i32
    %c0_i32_1 = arith.constant 0 : i32
    return %c0_i32, %c0_i32_0 : i32, i32
  }
  func.func @transform_3(%arg0: i32, %arg1: i32) -> (i32, i32) {
    %c0_i32 = arith.constant 0 : i32
    %c0_i32_0 = arith.constant 0 : i32
    return %arg0, %c0_i32 : i32, i32
  }
}

module attributes {stable_mosaic.version = 11 : i64} {
  func.func @kernel(%arg0: i32, %arg1: i32, %arg2: memref<32x384xbf16, #tpu.memory_space<vmem>>, %arg3: memref<384x128xbf16, #tpu.memory_space<vmem>>, %arg4: memref<1x128xf32, #tpu.memory_space<vmem>>, %arg5: memref<1x128xf32, #tpu.memory_space<vmem>>, %arg6: memref<32x128xf32, #tpu.memory_space<vmem>>, %arg7: memref<32x128xf32, #tpu.memory_space<vmem>>) attributes {dimension_semantics = [#tpu.dimension_semantics<parallel>, #tpu.dimension_semantics<arbitrary>], iteration_bounds = array<i64: 1, 3>, scalar_prefetch = 0 : i64, scratch_operands = 0 : i64, tpu.core_type = #tpu.core_type<tc>, window_params = [{transform_indices = @transform_0, window_bounds = array<i64: 32, 384>}, {transform_indices = @transform_1, window_bounds = array<i64: 384, 128>}, {pipeline_mode = #tpu.pipeline_mode<synchronous>, transform_indices = @transform_2, window_bounds = array<i64: 1, 128>}, {pipeline_mode = #tpu.pipeline_mode<synchronous>, transform_indices = @transform_3, window_bounds = array<i64: 1, 128>}, {transform_indices = @transform_4, window_bounds = array<i64: 32, 128>}, {transform_indices = @transform_5, window_bounds = array<i64: 32, 128>}]} {
    %c0_i32 = arith.constant 0 : i32
    %0 = arith.cmpi eq, %arg1, %c0_i32 : i32
    %1 = arith.extui %0 : i1 to i32
    %c0_i32_0 = arith.constant 0 : i32
    %2 = arith.cmpi ne, %1, %c0_i32_0 : i32
    scf.if %2 {
      %cst_9 = arith.constant 0.000000e+00 : f32
      %12 = vector.broadcast %cst_9 : f32 to vector<32x128xf32>
      %c0_10 = arith.constant 0 : index
      %c0_11 = arith.constant 0 : index
      %13 = vector.load %arg7[%c0_10, %c0_11] : memref<32x128xf32, #tpu.memory_space<vmem>>, vector<32x128xf32>
      tpu.vector_store %arg7[%c0_10, %c0_11], %12 {strides = array<i32>} : memref<32x128xf32, #tpu.memory_space<vmem>>, vector<32x128xf32>,
    } else {
    }
    %c0 = arith.constant 0 : index
    %c0_1 = arith.constant 0 : index
    %3 = vector.load %arg7[%c0, %c0_1] : memref<32x128xf32, #tpu.memory_space<vmem>>, vector<32x128xf32>
    %c0_2 = arith.constant 0 : index
    %c0_3 = arith.constant 0 : index
    %4 = vector.load %arg2[%c0_2, %c0_3] : memref<32x384xbf16, #tpu.memory_space<vmem>>, vector<32x384xbf16>
    %c0_4 = arith.constant 0 : index
    %c0_5 = arith.constant 0 : index
    %5 = vector.load %arg3[%c0_4, %c0_5] : memref<384x128xbf16, #tpu.memory_space<vmem>>, vector<384x128xbf16>
    %cst = arith.constant dense<0.000000e+00> : vector<32x128xf32>
    %6 = tpu.matmul %4, %5, %cst {dimension_numbers = #tpu.dot_dimension_numbers<[1], [0], [0], [1], [0, 0, 1, 1], [], []>} : vector<32x384xbf16>, vector<384x128xbf16>, vector<32x128xf32> -> vector<32x128xf32>
    %7 = arith.addf %3, %6 : vector<32x128xf32>
    %c0_6 = arith.constant 0 : index
    %c0_7 = arith.constant 0 : index
    %8 = vector.load %arg7[%c0_6, %c0_7] : memref<32x128xf32, #tpu.memory_space<vmem>>, vector<32x128xf32>
    tpu.vector_store %arg7[%c0_6, %c0_7], %7 {strides = array<i32>} : memref<32x128xf32, #tpu.memory_space<vmem>>, vector<32x128xf32>,
    %c2_i32 = arith.constant 2 : i32
    %9 = arith.cmpi eq, %arg1, %c2_i32 : i32
    %10 = arith.extui %9 : i1 to i32
    %c0_i32_8 = arith.constant 0 : i32
    %11 = arith.cmpi ne, %10, %c0_i32_8 : i32
    scf.if %11 {
      %c0_9 = arith.constant 0 : index
      %c0_10 = arith.constant 0 : index
      %12 = vector.load %arg7[%c0_9, %c0_10] : memref<32x128xf32, #tpu.memory_space<vmem>>, vector<32x128xf32>
      %c0_11 = arith.constant 0 : index
      %c0_12 = arith.constant 0 : index
      %13 = vector.load %arg4[%c0_11, %c0_12] : memref<1x128xf32, #tpu.memory_space<vmem>>, vector<1x128xf32>
      %c0_13 = arith.constant 0 : index
      %c0_14 = arith.constant 0 : index
      %14 = vector.load %arg5[%c0_13, %c0_14] : memref<1x128xf32, #tpu.memory_space<vmem>>, vector<1x128xf32>
      %15 = tpu.iota {dimensions = array<i32: 0>} : vector<32x1xi32>
      %c18_i32 = arith.constant 18 : i32
      %16 = vector.broadcast %c18_i32 : i32 to vector<32x1xi32>
      %17 = arith.cmpi slt, %15, %16 : vector<32x1xi32>
      %18 = arith.extui %17 : vector<32x1xi1> to vector<32x1xi32>
      %19 = arith.sitofp %18 : vector<32x1xi32> to vector<32x1xf32>
      %20 = vector.broadcast %19 : vector<32x1xf32> to vector<32x128xf32>
      %21 = arith.mulf %12, %20 : vector<32x128xf32>
      %cst_15 = arith.constant dense<0.000000e+00> : vector<128xf32>
      %22 = vector.multi_reduction <add>, %21, %cst_15 [0] : vector<32x128xf32> to vector<128xf32>
      %23 = vector.shape_cast %22 : vector<128xf32> to vector<1x128xf32>
      %cst_16 = arith.constant 0.055555556 : f32
      %24 = vector.broadcast %cst_16 : f32 to vector<1x128xf32>
      %25 = arith.mulf %23, %24 : vector<1x128xf32>
      %26 = vector.broadcast %25 : vector<1x128xf32> to vector<32x128xf32>
      %27 = arith.subf %12, %26 : vector<32x128xf32>
      %28 = vector.broadcast %19 : vector<32x1xf32> to vector<32x128xf32>
      %29 = arith.mulf %27, %28 : vector<32x128xf32>
      %30 = arith.mulf %29, %29 : vector<32x128xf32>
      %cst_17 = arith.constant dense<0.000000e+00> : vector<128xf32>
      %31 = vector.multi_reduction <add>, %30, %cst_17 [0] : vector<32x128xf32> to vector<128xf32>
      %32 = vector.shape_cast %31 : vector<128xf32> to vector<1x128xf32>
      %cst_18 = arith.constant 0.055555556 : f32
      %33 = vector.broadcast %cst_18 : f32 to vector<1x128xf32>
      %34 = arith.mulf %32, %33 : vector<1x128xf32>
      %35 = vector.broadcast %25 : vector<1x128xf32> to vector<32x128xf32>
      %36 = arith.subf %12, %35 : vector<32x128xf32>
      %cst_19 = arith.constant 9.99999974E-6 : f32
      %37 = vector.broadcast %cst_19 : f32 to vector<1x128xf32>
      %38 = arith.addf %34, %37 : vector<1x128xf32>
      %39 = math.rsqrt %38 : vector<1x128xf32>
      %40 = vector.broadcast %39 : vector<1x128xf32> to vector<32x128xf32>
      %41 = arith.mulf %36, %40 : vector<32x128xf32>
      %42 = vector.broadcast %13 : vector<1x128xf32> to vector<32x128xf32>
      %43 = arith.mulf %41, %42 : vector<32x128xf32>
      %44 = vector.broadcast %14 : vector<1x128xf32> to vector<32x128xf32>
      %45 = arith.addf %43, %44 : vector<32x128xf32>
      %cst_20 = arith.constant 0.000000e+00 : f32
      %46 = vector.broadcast %cst_20 : f32 to vector<32x128xf32>
      %47 = arith.maximumf %45, %46 : vector<32x128xf32>
      %c0_21 = arith.constant 0 : index
      %c0_22 = arith.constant 0 : index
      %48 = vector.load %arg6[%c0_21, %c0_22] : memref<32x128xf32, #tpu.memory_space<vmem>>, vector<32x128xf32>
      %49 = arith.addf %47, %48 : vector<32x128xf32>
      %cst_23 = arith.constant 0.000000e+00 : f32
      %50 = vector.broadcast %cst_23 : f32 to vector<32x128xf32>
      %51 = arith.maximumf %49, %50 : vector<32x128xf32>
      %c0_24 = arith.constant 0 : index
      %c0_25 = arith.constant 0 : index
      %52 = vector.load %arg7[%c0_24, %c0_25] : memref<32x128xf32, #tpu.memory_space<vmem>>, vector<32x128xf32>
      tpu.vector_store %arg7[%c0_24, %c0_25], %51 {strides = array<i32>} : memref<32x128xf32, #tpu.memory_space<vmem>>, vector<32x128xf32>,
    } else {
    }
    return
  }
  func.func @transform_0(%arg0: i32, %arg1: i32) -> (i32, i32) {
    %c0_i32 = arith.constant 0 : i32
    return %arg0, %arg1 : i32, i32
  }
  func.func @transform_1(%arg0: i32, %arg1: i32) -> (i32, i32) {
    %c0_i32 = arith.constant 0 : i32
    %c0_i32_0 = arith.constant 0 : i32
    return %arg1, %c0_i32 : i32, i32
  }
  func.func @transform_2(%arg0: i32, %arg1: i32) -> (i32, i32) {
    %c0_i32 = arith.constant 0 : i32
    %c0_i32_0 = arith.constant 0 : i32
    %c0_i32_1 = arith.constant 0 : i32
    return %c0_i32, %c0_i32_0 : i32, i32
  }
  func.func @transform_3(%arg0: i32, %arg1: i32) -> (i32, i32) {
    %c0_i32 = arith.constant 0 : i32
    %c0_i32_0 = arith.constant 0 : i32
    %c0_i32_1 = arith.constant 0 : i32
    return %c0_i32, %c0_i32_0 : i32, i32
  }
  func.func @transform_4(%arg0: i32, %arg1: i32) -> (i32, i32) {
    %c0_i32 = arith.constant 0 : i32
    %c0_i32_0 = arith.constant 0 : i32
    return %arg0, %c0_i32 : i32, i32
  }
  func.func @transform_5(%arg0: i32, %arg1: i32) -> (i32, i32) {
    %c0_i32 = arith.constant 0 : i32
    %c0_i32_0 = arith.constant 0 : i32
    return %arg0, %c0_i32 : i32, i32
  }
}

module attributes {stable_mosaic.version = 11 : i64} {
  func.func @kernel(%arg0: i32, %arg1: i32, %arg2: memref<32x384xbf16, #tpu.memory_space<vmem>>, %arg3: memref<384x128xbf16, #tpu.memory_space<vmem>>, %arg4: memref<1x128xf32, #tpu.memory_space<vmem>>, %arg5: memref<1x128xf32, #tpu.memory_space<vmem>>, %arg6: memref<32x128xf32, #tpu.memory_space<vmem>>) attributes {dimension_semantics = [#tpu.dimension_semantics<parallel>, #tpu.dimension_semantics<arbitrary>], iteration_bounds = array<i64: 1, 3>, scalar_prefetch = 0 : i64, scratch_operands = 0 : i64, tpu.core_type = #tpu.core_type<tc>, window_params = [{transform_indices = @transform_0, window_bounds = array<i64: 32, 384>}, {transform_indices = @transform_1, window_bounds = array<i64: 384, 128>}, {pipeline_mode = #tpu.pipeline_mode<synchronous>, transform_indices = @transform_2, window_bounds = array<i64: 1, 128>}, {pipeline_mode = #tpu.pipeline_mode<synchronous>, transform_indices = @transform_3, window_bounds = array<i64: 1, 128>}, {transform_indices = @transform_4, window_bounds = array<i64: 32, 128>}]} {
    %c0_i32 = arith.constant 0 : i32
    %0 = arith.cmpi eq, %arg1, %c0_i32 : i32
    %1 = arith.extui %0 : i1 to i32
    %c0_i32_0 = arith.constant 0 : i32
    %2 = arith.cmpi ne, %1, %c0_i32_0 : i32
    scf.if %2 {
      %cst_9 = arith.constant 0.000000e+00 : f32
      %12 = vector.broadcast %cst_9 : f32 to vector<32x128xf32>
      %c0_10 = arith.constant 0 : index
      %c0_11 = arith.constant 0 : index
      %13 = vector.load %arg6[%c0_10, %c0_11] : memref<32x128xf32, #tpu.memory_space<vmem>>, vector<32x128xf32>
      tpu.vector_store %arg6[%c0_10, %c0_11], %12 {strides = array<i32>} : memref<32x128xf32, #tpu.memory_space<vmem>>, vector<32x128xf32>,
    } else {
    }
    %c0 = arith.constant 0 : index
    %c0_1 = arith.constant 0 : index
    %3 = vector.load %arg6[%c0, %c0_1] : memref<32x128xf32, #tpu.memory_space<vmem>>, vector<32x128xf32>
    %c0_2 = arith.constant 0 : index
    %c0_3 = arith.constant 0 : index
    %4 = vector.load %arg2[%c0_2, %c0_3] : memref<32x384xbf16, #tpu.memory_space<vmem>>, vector<32x384xbf16>
    %c0_4 = arith.constant 0 : index
    %c0_5 = arith.constant 0 : index
    %5 = vector.load %arg3[%c0_4, %c0_5] : memref<384x128xbf16, #tpu.memory_space<vmem>>, vector<384x128xbf16>
    %cst = arith.constant dense<0.000000e+00> : vector<32x128xf32>
    %6 = tpu.matmul %4, %5, %cst {dimension_numbers = #tpu.dot_dimension_numbers<[1], [0], [0], [1], [0, 0, 1, 1], [], []>} : vector<32x384xbf16>, vector<384x128xbf16>, vector<32x128xf32> -> vector<32x128xf32>
    %7 = arith.addf %3, %6 : vector<32x128xf32>
    %c0_6 = arith.constant 0 : index
    %c0_7 = arith.constant 0 : index
    %8 = vector.load %arg6[%c0_6, %c0_7] : memref<32x128xf32, #tpu.memory_space<vmem>>, vector<32x128xf32>
    tpu.vector_store %arg6[%c0_6, %c0_7], %7 {strides = array<i32>} : memref<32x128xf32, #tpu.memory_space<vmem>>, vector<32x128xf32>,
    %c2_i32 = arith.constant 2 : i32
    %9 = arith.cmpi eq, %arg1, %c2_i32 : i32
    %10 = arith.extui %9 : i1 to i32
    %c0_i32_8 = arith.constant 0 : i32
    %11 = arith.cmpi ne, %10, %c0_i32_8 : i32
    scf.if %11 {
      %c0_9 = arith.constant 0 : index
      %c0_10 = arith.constant 0 : index
      %12 = vector.load %arg6[%c0_9, %c0_10] : memref<32x128xf32, #tpu.memory_space<vmem>>, vector<32x128xf32>
      %c0_11 = arith.constant 0 : index
      %c0_12 = arith.constant 0 : index
      %13 = vector.load %arg4[%c0_11, %c0_12] : memref<1x128xf32, #tpu.memory_space<vmem>>, vector<1x128xf32>
      %c0_13 = arith.constant 0 : index
      %c0_14 = arith.constant 0 : index
      %14 = vector.load %arg5[%c0_13, %c0_14] : memref<1x128xf32, #tpu.memory_space<vmem>>, vector<1x128xf32>
      %15 = tpu.iota {dimensions = array<i32: 0>} : vector<32x1xi32>
      %c18_i32 = arith.constant 18 : i32
      %16 = vector.broadcast %c18_i32 : i32 to vector<32x1xi32>
      %17 = arith.cmpi slt, %15, %16 : vector<32x1xi32>
      %18 = arith.extui %17 : vector<32x1xi1> to vector<32x1xi32>
      %19 = arith.sitofp %18 : vector<32x1xi32> to vector<32x1xf32>
      %20 = vector.broadcast %19 : vector<32x1xf32> to vector<32x128xf32>
      %21 = arith.mulf %12, %20 : vector<32x128xf32>
      %cst_15 = arith.constant dense<0.000000e+00> : vector<128xf32>
      %22 = vector.multi_reduction <add>, %21, %cst_15 [0] : vector<32x128xf32> to vector<128xf32>
      %23 = vector.shape_cast %22 : vector<128xf32> to vector<1x128xf32>
      %cst_16 = arith.constant 0.055555556 : f32
      %24 = vector.broadcast %cst_16 : f32 to vector<1x128xf32>
      %25 = arith.mulf %23, %24 : vector<1x128xf32>
      %26 = vector.broadcast %25 : vector<1x128xf32> to vector<32x128xf32>
      %27 = arith.subf %12, %26 : vector<32x128xf32>
      %28 = vector.broadcast %19 : vector<32x1xf32> to vector<32x128xf32>
      %29 = arith.mulf %27, %28 : vector<32x128xf32>
      %30 = arith.mulf %29, %29 : vector<32x128xf32>
      %cst_17 = arith.constant dense<0.000000e+00> : vector<128xf32>
      %31 = vector.multi_reduction <add>, %30, %cst_17 [0] : vector<32x128xf32> to vector<128xf32>
      %32 = vector.shape_cast %31 : vector<128xf32> to vector<1x128xf32>
      %cst_18 = arith.constant 0.055555556 : f32
      %33 = vector.broadcast %cst_18 : f32 to vector<1x128xf32>
      %34 = arith.mulf %32, %33 : vector<1x128xf32>
      %35 = vector.broadcast %25 : vector<1x128xf32> to vector<32x128xf32>
      %36 = arith.subf %12, %35 : vector<32x128xf32>
      %cst_19 = arith.constant 9.99999974E-6 : f32
      %37 = vector.broadcast %cst_19 : f32 to vector<1x128xf32>
      %38 = arith.addf %34, %37 : vector<1x128xf32>
      %39 = math.rsqrt %38 : vector<1x128xf32>
      %40 = vector.broadcast %39 : vector<1x128xf32> to vector<32x128xf32>
      %41 = arith.mulf %36, %40 : vector<32x128xf32>
      %42 = vector.broadcast %13 : vector<1x128xf32> to vector<32x128xf32>
      %43 = arith.mulf %41, %42 : vector<32x128xf32>
      %44 = vector.broadcast %14 : vector<1x128xf32> to vector<32x128xf32>
      %45 = arith.addf %43, %44 : vector<32x128xf32>
      %cst_20 = arith.constant 0.000000e+00 : f32
      %46 = vector.broadcast %cst_20 : f32 to vector<32x128xf32>
      %47 = arith.maximumf %45, %46 : vector<32x128xf32>
      %c0_21 = arith.constant 0 : index
      %c0_22 = arith.constant 0 : index
      %48 = vector.load %arg6[%c0_21, %c0_22] : memref<32x128xf32, #tpu.memory_space<vmem>>, vector<32x128xf32>
      tpu.vector_store %arg6[%c0_21, %c0_22], %47 {strides = array<i32>} : memref<32x128xf32, #tpu.memory_space<vmem>>, vector<32x128xf32>,
    } else {
    }
    return
  }
  func.func @transform_0(%arg0: i32, %arg1: i32) -> (i32, i32) {
    %c0_i32 = arith.constant 0 : i32
    return %arg0, %arg1 : i32, i32
  }
  func.func @transform_1(%arg0: i32, %arg1: i32) -> (i32, i32) {
    %c0_i32 = arith.constant 0 : i32
    %c0_i32_0 = arith.constant 0 : i32
    return %arg1, %c0_i32 : i32, i32
  }
  func.func @transform_2(%arg0: i32, %arg1: i32) -> (i32, i32) {
    %c0_i32 = arith.constant 0 : i32
    %c0_i32_0 = arith.constant 0 : i32
    %c0_i32_1 = arith.constant 0 : i32
    return %c0_i32, %c0_i32_0 : i32, i32
  }
  func.func @transform_3(%arg0: i32, %arg1: i32) -> (i32, i32) {
    %c0_i32 = arith.constant 0 : i32
    %c0_i32_0 = arith.constant 0 : i32
    %c0_i32_1 = arith.constant 0 : i32
    return %c0_i32, %c0_i32_0 : i32, i32
  }
  func.func @transform_4(%arg0: i32, %arg1: i32) -> (i32, i32) {
    %c0_i32 = arith.constant 0 : i32
    %c0_i32_0 = arith.constant 0 : i32
    return %arg0, %c0_i32 : i32, i32
  }
}

module attributes {stable_mosaic.version = 11 : i64} {
  func.func @kernel(%arg0: i32, %arg1: i32, %arg2: memref<16x384xbf16, #tpu.memory_space<vmem>>, %arg3: memref<384x256xbf16, #tpu.memory_space<vmem>>, %arg4: memref<1x256xf32, #tpu.memory_space<vmem>>, %arg5: memref<1x256xf32, #tpu.memory_space<vmem>>, %arg6: memref<16x256xf32, #tpu.memory_space<vmem>>) attributes {dimension_semantics = [#tpu.dimension_semantics<parallel>, #tpu.dimension_semantics<arbitrary>], iteration_bounds = array<i64: 1, 3>, scalar_prefetch = 0 : i64, scratch_operands = 0 : i64, tpu.core_type = #tpu.core_type<tc>, window_params = [{transform_indices = @transform_0, window_bounds = array<i64: 16, 384>}, {transform_indices = @transform_1, window_bounds = array<i64: 384, 256>}, {pipeline_mode = #tpu.pipeline_mode<synchronous>, transform_indices = @transform_2, window_bounds = array<i64: 1, 256>}, {pipeline_mode = #tpu.pipeline_mode<synchronous>, transform_indices = @transform_3, window_bounds = array<i64: 1, 256>}, {transform_indices = @transform_4, window_bounds = array<i64: 16, 256>}]} {
    %c0_i32 = arith.constant 0 : i32
    %0 = arith.cmpi eq, %arg1, %c0_i32 : i32
    %1 = arith.extui %0 : i1 to i32
    %c0_i32_0 = arith.constant 0 : i32
    %2 = arith.cmpi ne, %1, %c0_i32_0 : i32
    scf.if %2 {
      %cst_9 = arith.constant 0.000000e+00 : f32
      %12 = vector.broadcast %cst_9 : f32 to vector<16x256xf32>
      %c0_10 = arith.constant 0 : index
      %c0_11 = arith.constant 0 : index
      %13 = vector.load %arg6[%c0_10, %c0_11] : memref<16x256xf32, #tpu.memory_space<vmem>>, vector<16x256xf32>
      tpu.vector_store %arg6[%c0_10, %c0_11], %12 {strides = array<i32>} : memref<16x256xf32, #tpu.memory_space<vmem>>, vector<16x256xf32>,
    } else {
    }
    %c0 = arith.constant 0 : index
    %c0_1 = arith.constant 0 : index
    %3 = vector.load %arg6[%c0, %c0_1] : memref<16x256xf32, #tpu.memory_space<vmem>>, vector<16x256xf32>
    %c0_2 = arith.constant 0 : index
    %c0_3 = arith.constant 0 : index
    %4 = vector.load %arg2[%c0_2, %c0_3] : memref<16x384xbf16, #tpu.memory_space<vmem>>, vector<16x384xbf16>
    %c0_4 = arith.constant 0 : index
    %c0_5 = arith.constant 0 : index
    %5 = vector.load %arg3[%c0_4, %c0_5] : memref<384x256xbf16, #tpu.memory_space<vmem>>, vector<384x256xbf16>
    %cst = arith.constant dense<0.000000e+00> : vector<16x256xf32>
    %6 = tpu.matmul %4, %5, %cst {dimension_numbers = #tpu.dot_dimension_numbers<[1], [0], [0], [1], [0, 0, 1, 1], [], []>} : vector<16x384xbf16>, vector<384x256xbf16>, vector<16x256xf32> -> vector<16x256xf32>
    %7 = arith.addf %3, %6 : vector<16x256xf32>
    %c0_6 = arith.constant 0 : index
    %c0_7 = arith.constant 0 : index
    %8 = vector.load %arg6[%c0_6, %c0_7] : memref<16x256xf32, #tpu.memory_space<vmem>>, vector<16x256xf32>
    tpu.vector_store %arg6[%c0_6, %c0_7], %7 {strides = array<i32>} : memref<16x256xf32, #tpu.memory_space<vmem>>, vector<16x256xf32>,
    %c2_i32 = arith.constant 2 : i32
    %9 = arith.cmpi eq, %arg1, %c2_i32 : i32
    %10 = arith.extui %9 : i1 to i32
    %c0_i32_8 = arith.constant 0 : i32
    %11 = arith.cmpi ne, %10, %c0_i32_8 : i32
    scf.if %11 {
      %c0_9 = arith.constant 0 : index
      %c0_10 = arith.constant 0 : index
      %12 = vector.load %arg6[%c0_9, %c0_10] : memref<16x256xf32, #tpu.memory_space<vmem>>, vector<16x256xf32>
      %c0_11 = arith.constant 0 : index
      %c0_12 = arith.constant 0 : index
      %13 = vector.load %arg4[%c0_11, %c0_12] : memref<1x256xf32, #tpu.memory_space<vmem>>, vector<1x256xf32>
      %c0_13 = arith.constant 0 : index
      %c0_14 = arith.constant 0 : index
      %14 = vector.load %arg5[%c0_13, %c0_14] : memref<1x256xf32, #tpu.memory_space<vmem>>, vector<1x256xf32>
      %15 = tpu.iota {dimensions = array<i32: 0>} : vector<16x1xi32>
      %c8_i32 = arith.constant 8 : i32
      %16 = vector.broadcast %c8_i32 : i32 to vector<16x1xi32>
      %17 = arith.cmpi slt, %15, %16 : vector<16x1xi32>
      %18 = arith.extui %17 : vector<16x1xi1> to vector<16x1xi32>
      %19 = arith.sitofp %18 : vector<16x1xi32> to vector<16x1xf32>
      %20 = vector.broadcast %19 : vector<16x1xf32> to vector<16x256xf32>
      %21 = arith.mulf %12, %20 : vector<16x256xf32>
      %cst_15 = arith.constant dense<0.000000e+00> : vector<256xf32>
      %22 = vector.multi_reduction <add>, %21, %cst_15 [0] : vector<16x256xf32> to vector<256xf32>
      %23 = vector.shape_cast %22 : vector<256xf32> to vector<1x256xf32>
      %cst_16 = arith.constant 1.250000e-01 : f32
      %24 = vector.broadcast %cst_16 : f32 to vector<1x256xf32>
      %25 = arith.mulf %23, %24 : vector<1x256xf32>
      %26 = vector.broadcast %25 : vector<1x256xf32> to vector<16x256xf32>
      %27 = arith.subf %12, %26 : vector<16x256xf32>
      %28 = vector.broadcast %19 : vector<16x1xf32> to vector<16x256xf32>
      %29 = arith.mulf %27, %28 : vector<16x256xf32>
      %30 = arith.mulf %29, %29 : vector<16x256xf32>
      %cst_17 = arith.constant dense<0.000000e+00> : vector<256xf32>
      %31 = vector.multi_reduction <add>, %30, %cst_17 [0] : vector<16x256xf32> to vector<256xf32>
      %32 = vector.shape_cast %31 : vector<256xf32> to vector<1x256xf32>
      %cst_18 = arith.constant 1.250000e-01 : f32
      %33 = vector.broadcast %cst_18 : f32 to vector<1x256xf32>
      %34 = arith.mulf %32, %33 : vector<1x256xf32>
      %35 = vector.broadcast %25 : vector<1x256xf32> to vector<16x256xf32>
      %36 = arith.subf %12, %35 : vector<16x256xf32>
      %cst_19 = arith.constant 9.99999974E-6 : f32
      %37 = vector.broadcast %cst_19 : f32 to vector<1x256xf32>
      %38 = arith.addf %34, %37 : vector<1x256xf32>
      %39 = math.rsqrt %38 : vector<1x256xf32>
      %40 = vector.broadcast %39 : vector<1x256xf32> to vector<16x256xf32>
      %41 = arith.mulf %36, %40 : vector<16x256xf32>
      %42 = vector.broadcast %13 : vector<1x256xf32> to vector<16x256xf32>
      %43 = arith.mulf %41, %42 : vector<16x256xf32>
      %44 = vector.broadcast %14 : vector<1x256xf32> to vector<16x256xf32>
      %45 = arith.addf %43, %44 : vector<16x256xf32>
      %cst_20 = arith.constant 0.000000e+00 : f32
      %46 = vector.broadcast %cst_20 : f32 to vector<16x256xf32>
      %47 = arith.maximumf %45, %46 : vector<16x256xf32>
      %c0_21 = arith.constant 0 : index
      %c0_22 = arith.constant 0 : index
      %48 = vector.load %arg6[%c0_21, %c0_22] : memref<16x256xf32, #tpu.memory_space<vmem>>, vector<16x256xf32>
      tpu.vector_store %arg6[%c0_21, %c0_22], %47 {strides = array<i32>} : memref<16x256xf32, #tpu.memory_space<vmem>>, vector<16x256xf32>,
    } else {
    }
    return
  }
  func.func @transform_0(%arg0: i32, %arg1: i32) -> (i32, i32) {
    %c0_i32 = arith.constant 0 : i32
    return %arg0, %arg1 : i32, i32
  }
  func.func @transform_1(%arg0: i32, %arg1: i32) -> (i32, i32) {
    %c0_i32 = arith.constant 0 : i32
    %c0_i32_0 = arith.constant 0 : i32
    return %arg1, %c0_i32 : i32, i32
  }
  func.func @transform_2(%arg0: i32, %arg1: i32) -> (i32, i32) {
    %c0_i32 = arith.constant 0 : i32
    %c0_i32_0 = arith.constant 0 : i32
    %c0_i32_1 = arith.constant 0 : i32
    return %c0_i32, %c0_i32_0 : i32, i32
  }
  func.func @transform_3(%arg0: i32, %arg1: i32) -> (i32, i32) {
    %c0_i32 = arith.constant 0 : i32
    %c0_i32_0 = arith.constant 0 : i32
    %c0_i32_1 = arith.constant 0 : i32
    return %c0_i32, %c0_i32_0 : i32, i32
  }
  func.func @transform_4(%arg0: i32, %arg1: i32) -> (i32, i32) {
    %c0_i32 = arith.constant 0 : i32
    %c0_i32_0 = arith.constant 0 : i32
    return %arg0, %c0_i32 : i32, i32
  }
}

module attributes {stable_mosaic.version = 11 : i64} {
  func.func @kernel(%arg0: i32, %arg1: i32, %arg2: memref<16x128xbf16, #tpu.memory_space<vmem>>, %arg3: memref<128x256xbf16, #tpu.memory_space<vmem>>, %arg4: memref<1x256xf32, #tpu.memory_space<vmem>>, %arg5: memref<16x256xf32, #tpu.memory_space<vmem>>) attributes {dimension_semantics = [#tpu.dimension_semantics<parallel>, #tpu.dimension_semantics<arbitrary>], iteration_bounds = array<i64: 1, 1>, scalar_prefetch = 0 : i64, scratch_operands = 0 : i64, tpu.core_type = #tpu.core_type<tc>, window_params = [{transform_indices = @transform_0, window_bounds = array<i64: 16, 128>}, {transform_indices = @transform_1, window_bounds = array<i64: 128, 256>}, {pipeline_mode = #tpu.pipeline_mode<synchronous>, transform_indices = @transform_2, window_bounds = array<i64: 1, 256>}, {transform_indices = @transform_3, window_bounds = array<i64: 16, 256>}]} {
    %c0_i32 = arith.constant 0 : i32
    %0 = arith.cmpi eq, %arg1, %c0_i32 : i32
    %1 = arith.extui %0 : i1 to i32
    %c0_i32_0 = arith.constant 0 : i32
    %2 = arith.cmpi ne, %1, %c0_i32_0 : i32
    scf.if %2 {
      %cst_10 = arith.constant 0.000000e+00 : f32
      %12 = vector.broadcast %cst_10 : f32 to vector<16x256xf32>
      %c0_11 = arith.constant 0 : index
      %c0_12 = arith.constant 0 : index
      %13 = vector.load %arg5[%c0_11, %c0_12] : memref<16x256xf32, #tpu.memory_space<vmem>>, vector<16x256xf32>
      tpu.vector_store %arg5[%c0_11, %c0_12], %12 {strides = array<i32>} : memref<16x256xf32, #tpu.memory_space<vmem>>, vector<16x256xf32>,
    } else {
    }
    %c0 = arith.constant 0 : index
    %c0_1 = arith.constant 0 : index
    %3 = vector.load %arg5[%c0, %c0_1] : memref<16x256xf32, #tpu.memory_space<vmem>>, vector<16x256xf32>
    %c0_2 = arith.constant 0 : index
    %c0_3 = arith.constant 0 : index
    %4 = vector.load %arg2[%c0_2, %c0_3] : memref<16x128xbf16, #tpu.memory_space<vmem>>, vector<16x128xbf16>
    %c0_4 = arith.constant 0 : index
    %c0_5 = arith.constant 0 : index
    %5 = vector.load %arg3[%c0_4, %c0_5] : memref<128x256xbf16, #tpu.memory_space<vmem>>, vector<128x256xbf16>
    %cst = arith.constant dense<0.000000e+00> : vector<16x256xf32>
    %6 = tpu.matmul %4, %5, %cst {dimension_numbers = #tpu.dot_dimension_numbers<[1], [0], [0], [1], [0, 0, 1, 1], [], []>} : vector<16x128xbf16>, vector<128x256xbf16>, vector<16x256xf32> -> vector<16x256xf32>
    %7 = arith.addf %3, %6 : vector<16x256xf32>
    %c0_6 = arith.constant 0 : index
    %c0_7 = arith.constant 0 : index
    %8 = vector.load %arg5[%c0_6, %c0_7] : memref<16x256xf32, #tpu.memory_space<vmem>>, vector<16x256xf32>
    tpu.vector_store %arg5[%c0_6, %c0_7], %7 {strides = array<i32>} : memref<16x256xf32, #tpu.memory_space<vmem>>, vector<16x256xf32>,
    %c0_i32_8 = arith.constant 0 : i32
    %9 = arith.cmpi eq, %arg1, %c0_i32_8 : i32
    %10 = arith.extui %9 : i1 to i32
    %c0_i32_9 = arith.constant 0 : i32
    %11 = arith.cmpi ne, %10, %c0_i32_9 : i32
    scf.if %11 {
      %c0_10 = arith.constant 0 : index
      %c0_11 = arith.constant 0 : index
      %12 = vector.load %arg5[%c0_10, %c0_11] : memref<16x256xf32, #tpu.memory_space<vmem>>, vector<16x256xf32>
      %c0_12 = arith.constant 0 : index
      %c0_13 = arith.constant 0 : index
      %13 = vector.load %arg4[%c0_12, %c0_13] : memref<1x256xf32, #tpu.memory_space<vmem>>, vector<1x256xf32>
      %14 = vector.broadcast %13 : vector<1x256xf32> to vector<16x256xf32>
      %15 = arith.addf %12, %14 : vector<16x256xf32>
      %c0_14 = arith.constant 0 : index
      %c0_15 = arith.constant 0 : index
      %16 = vector.load %arg5[%c0_14, %c0_15] : memref<16x256xf32, #tpu.memory_space<vmem>>, vector<16x256xf32>
      tpu.vector_store %arg5[%c0_14, %c0_15], %15 {strides = array<i32>} : memref<16x256xf32, #tpu.memory_space<vmem>>, vector<16x256xf32>,
    } else {
    }
    return
  }
  func.func @transform_0(%arg0: i32, %arg1: i32) -> (i32, i32) {
    %c0_i32 = arith.constant 0 : i32
    return %arg0, %arg1 : i32, i32
  }
  func.func @transform_1(%arg0: i32, %arg1: i32) -> (i32, i32) {
    %c0_i32 = arith.constant 0 : i32
    %c0_i32_0 = arith.constant 0 : i32
    return %arg1, %c0_i32 : i32, i32
  }
  func.func @transform_2(%arg0: i32, %arg1: i32) -> (i32, i32) {
    %c0_i32 = arith.constant 0 : i32
    %c0_i32_0 = arith.constant 0 : i32
    %c0_i32_1 = arith.constant 0 : i32
    return %c0_i32, %c0_i32_0 : i32, i32
  }
  func.func @transform_3(%arg0: i32, %arg1: i32) -> (i32, i32) {
    %c0_i32 = arith.constant 0 : i32
    %c0_i32_0 = arith.constant 0 : i32
    return %arg0, %c0_i32 : i32, i32
  }
}

module attributes {stable_mosaic.version = 11 : i64} {
  func.func @kernel(%arg0: i32, %arg1: i32, %arg2: memref<16x384xbf16, #tpu.memory_space<vmem>>, %arg3: memref<384x256xbf16, #tpu.memory_space<vmem>>, %arg4: memref<1x256xf32, #tpu.memory_space<vmem>>, %arg5: memref<1x256xf32, #tpu.memory_space<vmem>>, %arg6: memref<16x256xf32, #tpu.memory_space<vmem>>, %arg7: memref<16x256xf32, #tpu.memory_space<vmem>>) attributes {dimension_semantics = [#tpu.dimension_semantics<parallel>, #tpu.dimension_semantics<arbitrary>], iteration_bounds = array<i64: 1, 6>, scalar_prefetch = 0 : i64, scratch_operands = 0 : i64, tpu.core_type = #tpu.core_type<tc>, window_params = [{transform_indices = @transform_0, window_bounds = array<i64: 16, 384>}, {transform_indices = @transform_1, window_bounds = array<i64: 384, 256>}, {pipeline_mode = #tpu.pipeline_mode<synchronous>, transform_indices = @transform_2, window_bounds = array<i64: 1, 256>}, {pipeline_mode = #tpu.pipeline_mode<synchronous>, transform_indices = @transform_3, window_bounds = array<i64: 1, 256>}, {transform_indices = @transform_4, window_bounds = array<i64: 16, 256>}, {transform_indices = @transform_5, window_bounds = array<i64: 16, 256>}]} {
    %c0_i32 = arith.constant 0 : i32
    %0 = arith.cmpi eq, %arg1, %c0_i32 : i32
    %1 = arith.extui %0 : i1 to i32
    %c0_i32_0 = arith.constant 0 : i32
    %2 = arith.cmpi ne, %1, %c0_i32_0 : i32
    scf.if %2 {
      %cst_9 = arith.constant 0.000000e+00 : f32
      %12 = vector.broadcast %cst_9 : f32 to vector<16x256xf32>
      %c0_10 = arith.constant 0 : index
      %c0_11 = arith.constant 0 : index
      %13 = vector.load %arg7[%c0_10, %c0_11] : memref<16x256xf32, #tpu.memory_space<vmem>>, vector<16x256xf32>
      tpu.vector_store %arg7[%c0_10, %c0_11], %12 {strides = array<i32>} : memref<16x256xf32, #tpu.memory_space<vmem>>, vector<16x256xf32>,
    } else {
    }
    %c0 = arith.constant 0 : index
    %c0_1 = arith.constant 0 : index
    %3 = vector.load %arg7[%c0, %c0_1] : memref<16x256xf32, #tpu.memory_space<vmem>>, vector<16x256xf32>
    %c0_2 = arith.constant 0 : index
    %c0_3 = arith.constant 0 : index
    %4 = vector.load %arg2[%c0_2, %c0_3] : memref<16x384xbf16, #tpu.memory_space<vmem>>, vector<16x384xbf16>
    %c0_4 = arith.constant 0 : index
    %c0_5 = arith.constant 0 : index
    %5 = vector.load %arg3[%c0_4, %c0_5] : memref<384x256xbf16, #tpu.memory_space<vmem>>, vector<384x256xbf16>
    %cst = arith.constant dense<0.000000e+00> : vector<16x256xf32>
    %6 = tpu.matmul %4, %5, %cst {dimension_numbers = #tpu.dot_dimension_numbers<[1], [0], [0], [1], [0, 0, 1, 1], [], []>} : vector<16x384xbf16>, vector<384x256xbf16>, vector<16x256xf32> -> vector<16x256xf32>
    %7 = arith.addf %3, %6 : vector<16x256xf32>
    %c0_6 = arith.constant 0 : index
    %c0_7 = arith.constant 0 : index
    %8 = vector.load %arg7[%c0_6, %c0_7] : memref<16x256xf32, #tpu.memory_space<vmem>>, vector<16x256xf32>
    tpu.vector_store %arg7[%c0_6, %c0_7], %7 {strides = array<i32>} : memref<16x256xf32, #tpu.memory_space<vmem>>, vector<16x256xf32>,
    %c5_i32 = arith.constant 5 : i32
    %9 = arith.cmpi eq, %arg1, %c5_i32 : i32
    %10 = arith.extui %9 : i1 to i32
    %c0_i32_8 = arith.constant 0 : i32
    %11 = arith.cmpi ne, %10, %c0_i32_8 : i32
    scf.if %11 {
      %c0_9 = arith.constant 0 : index
      %c0_10 = arith.constant 0 : index
      %12 = vector.load %arg7[%c0_9, %c0_10] : memref<16x256xf32, #tpu.memory_space<vmem>>, vector<16x256xf32>
      %c0_11 = arith.constant 0 : index
      %c0_12 = arith.constant 0 : index
      %13 = vector.load %arg4[%c0_11, %c0_12] : memref<1x256xf32, #tpu.memory_space<vmem>>, vector<1x256xf32>
      %c0_13 = arith.constant 0 : index
      %c0_14 = arith.constant 0 : index
      %14 = vector.load %arg5[%c0_13, %c0_14] : memref<1x256xf32, #tpu.memory_space<vmem>>, vector<1x256xf32>
      %15 = tpu.iota {dimensions = array<i32: 0>} : vector<16x1xi32>
      %c8_i32 = arith.constant 8 : i32
      %16 = vector.broadcast %c8_i32 : i32 to vector<16x1xi32>
      %17 = arith.cmpi slt, %15, %16 : vector<16x1xi32>
      %18 = arith.extui %17 : vector<16x1xi1> to vector<16x1xi32>
      %19 = arith.sitofp %18 : vector<16x1xi32> to vector<16x1xf32>
      %20 = vector.broadcast %19 : vector<16x1xf32> to vector<16x256xf32>
      %21 = arith.mulf %12, %20 : vector<16x256xf32>
      %cst_15 = arith.constant dense<0.000000e+00> : vector<256xf32>
      %22 = vector.multi_reduction <add>, %21, %cst_15 [0] : vector<16x256xf32> to vector<256xf32>
      %23 = vector.shape_cast %22 : vector<256xf32> to vector<1x256xf32>
      %cst_16 = arith.constant 1.250000e-01 : f32
      %24 = vector.broadcast %cst_16 : f32 to vector<1x256xf32>
      %25 = arith.mulf %23, %24 : vector<1x256xf32>
      %26 = vector.broadcast %25 : vector<1x256xf32> to vector<16x256xf32>
      %27 = arith.subf %12, %26 : vector<16x256xf32>
      %28 = vector.broadcast %19 : vector<16x1xf32> to vector<16x256xf32>
      %29 = arith.mulf %27, %28 : vector<16x256xf32>
      %30 = arith.mulf %29, %29 : vector<16x256xf32>
      %cst_17 = arith.constant dense<0.000000e+00> : vector<256xf32>
      %31 = vector.multi_reduction <add>, %30, %cst_17 [0] : vector<16x256xf32> to vector<256xf32>
      %32 = vector.shape_cast %31 : vector<256xf32> to vector<1x256xf32>
      %cst_18 = arith.constant 1.250000e-01 : f32
      %33 = vector.broadcast %cst_18 : f32 to vector<1x256xf32>
      %34 = arith.mulf %32, %33 : vector<1x256xf32>
      %35 = vector.broadcast %25 : vector<1x256xf32> to vector<16x256xf32>
      %36 = arith.subf %12, %35 : vector<16x256xf32>
      %cst_19 = arith.constant 9.99999974E-6 : f32
      %37 = vector.broadcast %cst_19 : f32 to vector<1x256xf32>
      %38 = arith.addf %34, %37 : vector<1x256xf32>
      %39 = math.rsqrt %38 : vector<1x256xf32>
      %40 = vector.broadcast %39 : vector<1x256xf32> to vector<16x256xf32>
      %41 = arith.mulf %36, %40 : vector<16x256xf32>
      %42 = vector.broadcast %13 : vector<1x256xf32> to vector<16x256xf32>
      %43 = arith.mulf %41, %42 : vector<16x256xf32>
      %44 = vector.broadcast %14 : vector<1x256xf32> to vector<16x256xf32>
      %45 = arith.addf %43, %44 : vector<16x256xf32>
      %cst_20 = arith.constant 0.000000e+00 : f32
      %46 = vector.broadcast %cst_20 : f32 to vector<16x256xf32>
      %47 = arith.maximumf %45, %46 : vector<16x256xf32>
      %c0_21 = arith.constant 0 : index
      %c0_22 = arith.constant 0 : index
      %48 = vector.load %arg6[%c0_21, %c0_22] : memref<16x256xf32, #tpu.memory_space<vmem>>, vector<16x256xf32>
      %49 = arith.addf %47, %48 : vector<16x256xf32>
      %cst_23 = arith.constant 0.000000e+00 : f32
      %50 = vector.broadcast %cst_23 : f32 to vector<16x256xf32>
      %51 = arith.maximumf %49, %50 : vector<16x256xf32>
      %c0_24 = arith.constant 0 : index
      %c0_25 = arith.constant 0 : index
      %52 = vector.load %arg7[%c0_24, %c0_25] : memref<16x256xf32, #tpu.memory_space<vmem>>, vector<16x256xf32>
      tpu.vector_store %arg7[%c0_24, %c0_25], %51 {strides = array<i32>} : memref<16x256xf32, #tpu.memory_space<vmem>>, vector<16x256xf32>,
    } else {
    }
    return
  }
  func.func @transform_0(%arg0: i32, %arg1: i32) -> (i32, i32) {
    %c0_i32 = arith.constant 0 : i32
    return %arg0, %arg1 : i32, i32
  }
  func.func @transform_1(%arg0: i32, %arg1: i32) -> (i32, i32) {
    %c0_i32 = arith.constant 0 : i32
    %c0_i32_0 = arith.constant 0 : i32
    return %arg1, %c0_i32 : i32, i32
  }
  func.func @transform_2(%arg0: i32, %arg1: i32) -> (i32, i32) {
    %c0_i32 = arith.constant 0 : i32
    %c0_i32_0 = arith.constant 0 : i32
    %c0_i32_1 = arith.constant 0 : i32
    return %c0_i32, %c0_i32_0 : i32, i32
  }
  func.func @transform_3(%arg0: i32, %arg1: i32) -> (i32, i32) {
    %c0_i32 = arith.constant 0 : i32
    %c0_i32_0 = arith.constant 0 : i32
    %c0_i32_1 = arith.constant 0 : i32
    return %c0_i32, %c0_i32_0 : i32, i32
  }
  func.func @transform_4(%arg0: i32, %arg1: i32) -> (i32, i32) {
    %c0_i32 = arith.constant 0 : i32
    %c0_i32_0 = arith.constant 0 : i32
    return %arg0, %c0_i32 : i32, i32
  }
  func.func @transform_5(%arg0: i32, %arg1: i32) -> (i32, i32) {
    %c0_i32 = arith.constant 0 : i32
    %c0_i32_0 = arith.constant 0 : i32
    return %arg0, %c0_i32 : i32, i32
  }
}

module attributes {stable_mosaic.version = 11 : i64} {
  func.func @kernel(%arg0: i32, %arg1: i32, %arg2: memref<16x384xbf16, #tpu.memory_space<vmem>>, %arg3: memref<384x256xbf16, #tpu.memory_space<vmem>>, %arg4: memref<1x256xf32, #tpu.memory_space<vmem>>, %arg5: memref<1x256xf32, #tpu.memory_space<vmem>>, %arg6: memref<16x256xf32, #tpu.memory_space<vmem>>) attributes {dimension_semantics = [#tpu.dimension_semantics<parallel>, #tpu.dimension_semantics<arbitrary>], iteration_bounds = array<i64: 1, 6>, scalar_prefetch = 0 : i64, scratch_operands = 0 : i64, tpu.core_type = #tpu.core_type<tc>, window_params = [{transform_indices = @transform_0, window_bounds = array<i64: 16, 384>}, {transform_indices = @transform_1, window_bounds = array<i64: 384, 256>}, {pipeline_mode = #tpu.pipeline_mode<synchronous>, transform_indices = @transform_2, window_bounds = array<i64: 1, 256>}, {pipeline_mode = #tpu.pipeline_mode<synchronous>, transform_indices = @transform_3, window_bounds = array<i64: 1, 256>}, {transform_indices = @transform_4, window_bounds = array<i64: 16, 256>}]} {
    %c0_i32 = arith.constant 0 : i32
    %0 = arith.cmpi eq, %arg1, %c0_i32 : i32
    %1 = arith.extui %0 : i1 to i32
    %c0_i32_0 = arith.constant 0 : i32
    %2 = arith.cmpi ne, %1, %c0_i32_0 : i32
    scf.if %2 {
      %cst_9 = arith.constant 0.000000e+00 : f32
      %12 = vector.broadcast %cst_9 : f32 to vector<16x256xf32>
      %c0_10 = arith.constant 0 : index
      %c0_11 = arith.constant 0 : index
      %13 = vector.load %arg6[%c0_10, %c0_11] : memref<16x256xf32, #tpu.memory_space<vmem>>, vector<16x256xf32>
      tpu.vector_store %arg6[%c0_10, %c0_11], %12 {strides = array<i32>} : memref<16x256xf32, #tpu.memory_space<vmem>>, vector<16x256xf32>,
    } else {
    }
    %c0 = arith.constant 0 : index
    %c0_1 = arith.constant 0 : index
    %3 = vector.load %arg6[%c0, %c0_1] : memref<16x256xf32, #tpu.memory_space<vmem>>, vector<16x256xf32>
    %c0_2 = arith.constant 0 : index
    %c0_3 = arith.constant 0 : index
    %4 = vector.load %arg2[%c0_2, %c0_3] : memref<16x384xbf16, #tpu.memory_space<vmem>>, vector<16x384xbf16>
    %c0_4 = arith.constant 0 : index
    %c0_5 = arith.constant 0 : index
    %5 = vector.load %arg3[%c0_4, %c0_5] : memref<384x256xbf16, #tpu.memory_space<vmem>>, vector<384x256xbf16>
    %cst = arith.constant dense<0.000000e+00> : vector<16x256xf32>
    %6 = tpu.matmul %4, %5, %cst {dimension_numbers = #tpu.dot_dimension_numbers<[1], [0], [0], [1], [0, 0, 1, 1], [], []>} : vector<16x384xbf16>, vector<384x256xbf16>, vector<16x256xf32> -> vector<16x256xf32>
    %7 = arith.addf %3, %6 : vector<16x256xf32>
    %c0_6 = arith.constant 0 : index
    %c0_7 = arith.constant 0 : index
    %8 = vector.load %arg6[%c0_6, %c0_7] : memref<16x256xf32, #tpu.memory_space<vmem>>, vector<16x256xf32>
    tpu.vector_store %arg6[%c0_6, %c0_7], %7 {strides = array<i32>} : memref<16x256xf32, #tpu.memory_space<vmem>>, vector<16x256xf32>,
    %c5_i32 = arith.constant 5 : i32
    %9 = arith.cmpi eq, %arg1, %c5_i32 : i32
    %10 = arith.extui %9 : i1 to i32
    %c0_i32_8 = arith.constant 0 : i32
    %11 = arith.cmpi ne, %10, %c0_i32_8 : i32
    scf.if %11 {
      %c0_9 = arith.constant 0 : index
      %c0_10 = arith.constant 0 : index
      %12 = vector.load %arg6[%c0_9, %c0_10] : memref<16x256xf32, #tpu.memory_space<vmem>>, vector<16x256xf32>
      %c0_11 = arith.constant 0 : index
      %c0_12 = arith.constant 0 : index
      %13 = vector.load %arg4[%c0_11, %c0_12] : memref<1x256xf32, #tpu.memory_space<vmem>>, vector<1x256xf32>
      %c0_13 = arith.constant 0 : index
      %c0_14 = arith.constant 0 : index
      %14 = vector.load %arg5[%c0_13, %c0_14] : memref<1x256xf32, #tpu.memory_space<vmem>>, vector<1x256xf32>
      %15 = tpu.iota {dimensions = array<i32: 0>} : vector<16x1xi32>
      %c8_i32 = arith.constant 8 : i32
      %16 = vector.broadcast %c8_i32 : i32 to vector<16x1xi32>
      %17 = arith.cmpi slt, %15, %16 : vector<16x1xi32>
      %18 = arith.extui %17 : vector<16x1xi1> to vector<16x1xi32>
      %19 = arith.sitofp %18 : vector<16x1xi32> to vector<16x1xf32>
      %20 = vector.broadcast %19 : vector<16x1xf32> to vector<16x256xf32>
      %21 = arith.mulf %12, %20 : vector<16x256xf32>
      %cst_15 = arith.constant dense<0.000000e+00> : vector<256xf32>
      %22 = vector.multi_reduction <add>, %21, %cst_15 [0] : vector<16x256xf32> to vector<256xf32>
      %23 = vector.shape_cast %22 : vector<256xf32> to vector<1x256xf32>
      %cst_16 = arith.constant 1.250000e-01 : f32
      %24 = vector.broadcast %cst_16 : f32 to vector<1x256xf32>
      %25 = arith.mulf %23, %24 : vector<1x256xf32>
      %26 = vector.broadcast %25 : vector<1x256xf32> to vector<16x256xf32>
      %27 = arith.subf %12, %26 : vector<16x256xf32>
      %28 = vector.broadcast %19 : vector<16x1xf32> to vector<16x256xf32>
      %29 = arith.mulf %27, %28 : vector<16x256xf32>
      %30 = arith.mulf %29, %29 : vector<16x256xf32>
      %cst_17 = arith.constant dense<0.000000e+00> : vector<256xf32>
      %31 = vector.multi_reduction <add>, %30, %cst_17 [0] : vector<16x256xf32> to vector<256xf32>
      %32 = vector.shape_cast %31 : vector<256xf32> to vector<1x256xf32>
      %cst_18 = arith.constant 1.250000e-01 : f32
      %33 = vector.broadcast %cst_18 : f32 to vector<1x256xf32>
      %34 = arith.mulf %32, %33 : vector<1x256xf32>
      %35 = vector.broadcast %25 : vector<1x256xf32> to vector<16x256xf32>
      %36 = arith.subf %12, %35 : vector<16x256xf32>
      %cst_19 = arith.constant 9.99999974E-6 : f32
      %37 = vector.broadcast %cst_19 : f32 to vector<1x256xf32>
      %38 = arith.addf %34, %37 : vector<1x256xf32>
      %39 = math.rsqrt %38 : vector<1x256xf32>
      %40 = vector.broadcast %39 : vector<1x256xf32> to vector<16x256xf32>
      %41 = arith.mulf %36, %40 : vector<16x256xf32>
      %42 = vector.broadcast %13 : vector<1x256xf32> to vector<16x256xf32>
      %43 = arith.mulf %41, %42 : vector<16x256xf32>
      %44 = vector.broadcast %14 : vector<1x256xf32> to vector<16x256xf32>
      %45 = arith.addf %43, %44 : vector<16x256xf32>
      %cst_20 = arith.constant 0.000000e+00 : f32
      %46 = vector.broadcast %cst_20 : f32 to vector<16x256xf32>
      %47 = arith.maximumf %45, %46 : vector<16x256xf32>
      %c0_21 = arith.constant 0 : index
      %c0_22 = arith.constant 0 : index
      %48 = vector.load %arg6[%c0_21, %c0_22] : memref<16x256xf32, #tpu.memory_space<vmem>>, vector<16x256xf32>
      tpu.vector_store %arg6[%c0_21, %c0_22], %47 {strides = array<i32>} : memref<16x256xf32, #tpu.memory_space<vmem>>, vector<16x256xf32>,
    } else {
    }
    return
  }
  func.func @transform_0(%arg0: i32, %arg1: i32) -> (i32, i32) {
    %c0_i32 = arith.constant 0 : i32
    return %arg0, %arg1 : i32, i32
  }
  func.func @transform_1(%arg0: i32, %arg1: i32) -> (i32, i32) {
    %c0_i32 = arith.constant 0 : i32
    %c0_i32_0 = arith.constant 0 : i32
    return %arg1, %c0_i32 : i32, i32
  }
  func.func @transform_2(%arg0: i32, %arg1: i32) -> (i32, i32) {
    %c0_i32 = arith.constant 0 : i32
    %c0_i32_0 = arith.constant 0 : i32
    %c0_i32_1 = arith.constant 0 : i32
    return %c0_i32, %c0_i32_0 : i32, i32
  }
  func.func @transform_3(%arg0: i32, %arg1: i32) -> (i32, i32) {
    %c0_i32 = arith.constant 0 : i32
    %c0_i32_0 = arith.constant 0 : i32
    %c0_i32_1 = arith.constant 0 : i32
    return %c0_i32, %c0_i32_0 : i32, i32
  }
  func.func @transform_4(%arg0: i32, %arg1: i32) -> (i32, i32) {
    %c0_i32 = arith.constant 0 : i32
    %c0_i32_0 = arith.constant 0 : i32
    return %arg0, %c0_i32 : i32, i32
  }
}

module attributes {stable_mosaic.version = 11 : i64} {
  func.func @kernel(%arg0: i32, %arg1: i32, %arg2: memref<16x384xbf16, #tpu.memory_space<vmem>>, %arg3: memref<384x512xbf16, #tpu.memory_space<vmem>>, %arg4: memref<1x512xf32, #tpu.memory_space<vmem>>, %arg5: memref<1x512xf32, #tpu.memory_space<vmem>>, %arg6: memref<16x512xf32, #tpu.memory_space<vmem>>) attributes {dimension_semantics = [#tpu.dimension_semantics<parallel>, #tpu.dimension_semantics<arbitrary>], iteration_bounds = array<i64: 1, 6>, scalar_prefetch = 0 : i64, scratch_operands = 0 : i64, tpu.core_type = #tpu.core_type<tc>, window_params = [{transform_indices = @transform_0, window_bounds = array<i64: 16, 384>}, {transform_indices = @transform_1, window_bounds = array<i64: 384, 512>}, {pipeline_mode = #tpu.pipeline_mode<synchronous>, transform_indices = @transform_2, window_bounds = array<i64: 1, 512>}, {pipeline_mode = #tpu.pipeline_mode<synchronous>, transform_indices = @transform_3, window_bounds = array<i64: 1, 512>}, {transform_indices = @transform_4, window_bounds = array<i64: 16, 512>}]} {
    %c0_i32 = arith.constant 0 : i32
    %0 = arith.cmpi eq, %arg1, %c0_i32 : i32
    %1 = arith.extui %0 : i1 to i32
    %c0_i32_0 = arith.constant 0 : i32
    %2 = arith.cmpi ne, %1, %c0_i32_0 : i32
    scf.if %2 {
      %cst_9 = arith.constant 0.000000e+00 : f32
      %12 = vector.broadcast %cst_9 : f32 to vector<16x512xf32>
      %c0_10 = arith.constant 0 : index
      %c0_11 = arith.constant 0 : index
      %13 = vector.load %arg6[%c0_10, %c0_11] : memref<16x512xf32, #tpu.memory_space<vmem>>, vector<16x512xf32>
      tpu.vector_store %arg6[%c0_10, %c0_11], %12 {strides = array<i32>} : memref<16x512xf32, #tpu.memory_space<vmem>>, vector<16x512xf32>,
    } else {
    }
    %c0 = arith.constant 0 : index
    %c0_1 = arith.constant 0 : index
    %3 = vector.load %arg6[%c0, %c0_1] : memref<16x512xf32, #tpu.memory_space<vmem>>, vector<16x512xf32>
    %c0_2 = arith.constant 0 : index
    %c0_3 = arith.constant 0 : index
    %4 = vector.load %arg2[%c0_2, %c0_3] : memref<16x384xbf16, #tpu.memory_space<vmem>>, vector<16x384xbf16>
    %c0_4 = arith.constant 0 : index
    %c0_5 = arith.constant 0 : index
    %5 = vector.load %arg3[%c0_4, %c0_5] : memref<384x512xbf16, #tpu.memory_space<vmem>>, vector<384x512xbf16>
    %cst = arith.constant dense<0.000000e+00> : vector<16x512xf32>
    %6 = tpu.matmul %4, %5, %cst {dimension_numbers = #tpu.dot_dimension_numbers<[1], [0], [0], [1], [0, 0, 1, 1], [], []>} : vector<16x384xbf16>, vector<384x512xbf16>, vector<16x512xf32> -> vector<16x512xf32>
    %7 = arith.addf %3, %6 : vector<16x512xf32>
    %c0_6 = arith.constant 0 : index
    %c0_7 = arith.constant 0 : index
    %8 = vector.load %arg6[%c0_6, %c0_7] : memref<16x512xf32, #tpu.memory_space<vmem>>, vector<16x512xf32>
    tpu.vector_store %arg6[%c0_6, %c0_7], %7 {strides = array<i32>} : memref<16x512xf32, #tpu.memory_space<vmem>>, vector<16x512xf32>,
    %c5_i32 = arith.constant 5 : i32
    %9 = arith.cmpi eq, %arg1, %c5_i32 : i32
    %10 = arith.extui %9 : i1 to i32
    %c0_i32_8 = arith.constant 0 : i32
    %11 = arith.cmpi ne, %10, %c0_i32_8 : i32
    scf.if %11 {
      %c0_9 = arith.constant 0 : index
      %c0_10 = arith.constant 0 : index
      %12 = vector.load %arg6[%c0_9, %c0_10] : memref<16x512xf32, #tpu.memory_space<vmem>>, vector<16x512xf32>
      %c0_11 = arith.constant 0 : index
      %c0_12 = arith.constant 0 : index
      %13 = vector.load %arg4[%c0_11, %c0_12] : memref<1x512xf32, #tpu.memory_space<vmem>>, vector<1x512xf32>
      %c0_13 = arith.constant 0 : index
      %c0_14 = arith.constant 0 : index
      %14 = vector.load %arg5[%c0_13, %c0_14] : memref<1x512xf32, #tpu.memory_space<vmem>>, vector<1x512xf32>
      %15 = tpu.iota {dimensions = array<i32: 0>} : vector<16x1xi32>
      %c2_i32 = arith.constant 2 : i32
      %16 = vector.broadcast %c2_i32 : i32 to vector<16x1xi32>
      %17 = arith.cmpi slt, %15, %16 : vector<16x1xi32>
      %18 = arith.extui %17 : vector<16x1xi1> to vector<16x1xi32>
      %19 = arith.sitofp %18 : vector<16x1xi32> to vector<16x1xf32>
      %20 = vector.broadcast %19 : vector<16x1xf32> to vector<16x512xf32>
      %21 = arith.mulf %12, %20 : vector<16x512xf32>
      %cst_15 = arith.constant dense<0.000000e+00> : vector<512xf32>
      %22 = vector.multi_reduction <add>, %21, %cst_15 [0] : vector<16x512xf32> to vector<512xf32>
      %23 = vector.shape_cast %22 : vector<512xf32> to vector<1x512xf32>
      %cst_16 = arith.constant 5.000000e-01 : f32
      %24 = vector.broadcast %cst_16 : f32 to vector<1x512xf32>
      %25 = arith.mulf %23, %24 : vector<1x512xf32>
      %26 = vector.broadcast %25 : vector<1x512xf32> to vector<16x512xf32>
      %27 = arith.subf %12, %26 : vector<16x512xf32>
      %28 = vector.broadcast %19 : vector<16x1xf32> to vector<16x512xf32>
      %29 = arith.mulf %27, %28 : vector<16x512xf32>
      %30 = arith.mulf %29, %29 : vector<16x512xf32>
      %cst_17 = arith.constant dense<0.000000e+00> : vector<512xf32>
      %31 = vector.multi_reduction <add>, %30, %cst_17 [0] : vector<16x512xf32> to vector<512xf32>
      %32 = vector.shape_cast %31 : vector<512xf32> to vector<1x512xf32>
      %cst_18 = arith.constant 5.000000e-01 : f32
      %33 = vector.broadcast %cst_18 : f32 to vector<1x512xf32>
      %34 = arith.mulf %32, %33 : vector<1x512xf32>
      %35 = vector.broadcast %25 : vector<1x512xf32> to vector<16x512xf32>
      %36 = arith.subf %12, %35 : vector<16x512xf32>
      %cst_19 = arith.constant 9.99999974E-6 : f32
      %37 = vector.broadcast %cst_19 : f32 to vector<1x512xf32>
      %38 = arith.addf %34, %37 : vector<1x512xf32>
      %39 = math.rsqrt %38 : vector<1x512xf32>
      %40 = vector.broadcast %39 : vector<1x512xf32> to vector<16x512xf32>
      %41 = arith.mulf %36, %40 : vector<16x512xf32>
      %42 = vector.broadcast %13 : vector<1x512xf32> to vector<16x512xf32>
      %43 = arith.mulf %41, %42 : vector<16x512xf32>
      %44 = vector.broadcast %14 : vector<1x512xf32> to vector<16x512xf32>
      %45 = arith.addf %43, %44 : vector<16x512xf32>
      %cst_20 = arith.constant 0.000000e+00 : f32
      %46 = vector.broadcast %cst_20 : f32 to vector<16x512xf32>
      %47 = arith.maximumf %45, %46 : vector<16x512xf32>
      %c0_21 = arith.constant 0 : index
      %c0_22 = arith.constant 0 : index
      %48 = vector.load %arg6[%c0_21, %c0_22] : memref<16x512xf32, #tpu.memory_space<vmem>>, vector<16x512xf32>
      tpu.vector_store %arg6[%c0_21, %c0_22], %47 {strides = array<i32>} : memref<16x512xf32, #tpu.memory_space<vmem>>, vector<16x512xf32>,
    } else {
    }
    return
  }
  func.func @transform_0(%arg0: i32, %arg1: i32) -> (i32, i32) {
    %c0_i32 = arith.constant 0 : i32
    return %arg0, %arg1 : i32, i32
  }
  func.func @transform_1(%arg0: i32, %arg1: i32) -> (i32, i32) {
    %c0_i32 = arith.constant 0 : i32
    %c0_i32_0 = arith.constant 0 : i32
    return %arg1, %c0_i32 : i32, i32
  }
  func.func @transform_2(%arg0: i32, %arg1: i32) -> (i32, i32) {
    %c0_i32 = arith.constant 0 : i32
    %c0_i32_0 = arith.constant 0 : i32
    %c0_i32_1 = arith.constant 0 : i32
    return %c0_i32, %c0_i32_0 : i32, i32
  }
  func.func @transform_3(%arg0: i32, %arg1: i32) -> (i32, i32) {
    %c0_i32 = arith.constant 0 : i32
    %c0_i32_0 = arith.constant 0 : i32
    %c0_i32_1 = arith.constant 0 : i32
    return %c0_i32, %c0_i32_0 : i32, i32
  }
  func.func @transform_4(%arg0: i32, %arg1: i32) -> (i32, i32) {
    %c0_i32 = arith.constant 0 : i32
    %c0_i32_0 = arith.constant 0 : i32
    return %arg0, %c0_i32 : i32, i32
  }
}

module attributes {stable_mosaic.version = 11 : i64} {
  func.func @kernel(%arg0: i32, %arg1: i32, %arg2: memref<16x256xbf16, #tpu.memory_space<vmem>>, %arg3: memref<256x512xbf16, #tpu.memory_space<vmem>>, %arg4: memref<1x512xf32, #tpu.memory_space<vmem>>, %arg5: memref<16x512xf32, #tpu.memory_space<vmem>>) attributes {dimension_semantics = [#tpu.dimension_semantics<parallel>, #tpu.dimension_semantics<arbitrary>], iteration_bounds = array<i64: 1, 1>, scalar_prefetch = 0 : i64, scratch_operands = 0 : i64, tpu.core_type = #tpu.core_type<tc>, window_params = [{transform_indices = @transform_0, window_bounds = array<i64: 16, 256>}, {transform_indices = @transform_1, window_bounds = array<i64: 256, 512>}, {pipeline_mode = #tpu.pipeline_mode<synchronous>, transform_indices = @transform_2, window_bounds = array<i64: 1, 512>}, {transform_indices = @transform_3, window_bounds = array<i64: 16, 512>}]} {
    %c0_i32 = arith.constant 0 : i32
    %0 = arith.cmpi eq, %arg1, %c0_i32 : i32
    %1 = arith.extui %0 : i1 to i32
    %c0_i32_0 = arith.constant 0 : i32
    %2 = arith.cmpi ne, %1, %c0_i32_0 : i32
    scf.if %2 {
      %cst_10 = arith.constant 0.000000e+00 : f32
      %12 = vector.broadcast %cst_10 : f32 to vector<16x512xf32>
      %c0_11 = arith.constant 0 : index
      %c0_12 = arith.constant 0 : index
      %13 = vector.load %arg5[%c0_11, %c0_12] : memref<16x512xf32, #tpu.memory_space<vmem>>, vector<16x512xf32>
      tpu.vector_store %arg5[%c0_11, %c0_12], %12 {strides = array<i32>} : memref<16x512xf32, #tpu.memory_space<vmem>>, vector<16x512xf32>,
    } else {
    }
    %c0 = arith.constant 0 : index
    %c0_1 = arith.constant 0 : index
    %3 = vector.load %arg5[%c0, %c0_1] : memref<16x512xf32, #tpu.memory_space<vmem>>, vector<16x512xf32>
    %c0_2 = arith.constant 0 : index
    %c0_3 = arith.constant 0 : index
    %4 = vector.load %arg2[%c0_2, %c0_3] : memref<16x256xbf16, #tpu.memory_space<vmem>>, vector<16x256xbf16>
    %c0_4 = arith.constant 0 : index
    %c0_5 = arith.constant 0 : index
    %5 = vector.load %arg3[%c0_4, %c0_5] : memref<256x512xbf16, #tpu.memory_space<vmem>>, vector<256x512xbf16>
    %cst = arith.constant dense<0.000000e+00> : vector<16x512xf32>
    %6 = tpu.matmul %4, %5, %cst {dimension_numbers = #tpu.dot_dimension_numbers<[1], [0], [0], [1], [0, 0, 1, 1], [], []>} : vector<16x256xbf16>, vector<256x512xbf16>, vector<16x512xf32> -> vector<16x512xf32>
    %7 = arith.addf %3, %6 : vector<16x512xf32>
    %c0_6 = arith.constant 0 : index
    %c0_7 = arith.constant 0 : index
    %8 = vector.load %arg5[%c0_6, %c0_7] : memref<16x512xf32, #tpu.memory_space<vmem>>, vector<16x512xf32>
    tpu.vector_store %arg5[%c0_6, %c0_7], %7 {strides = array<i32>} : memref<16x512xf32, #tpu.memory_space<vmem>>, vector<16x512xf32>,
    %c0_i32_8 = arith.constant 0 : i32
    %9 = arith.cmpi eq, %arg1, %c0_i32_8 : i32
    %10 = arith.extui %9 : i1 to i32
    %c0_i32_9 = arith.constant 0 : i32
    %11 = arith.cmpi ne, %10, %c0_i32_9 : i32
    scf.if %11 {
      %c0_10 = arith.constant 0 : index
      %c0_11 = arith.constant 0 : index
      %12 = vector.load %arg5[%c0_10, %c0_11] : memref<16x512xf32, #tpu.memory_space<vmem>>, vector<16x512xf32>
      %c0_12 = arith.constant 0 : index
      %c0_13 = arith.constant 0 : index
      %13 = vector.load %arg4[%c0_12, %c0_13] : memref<1x512xf32, #tpu.memory_space<vmem>>, vector<1x512xf32>
      %14 = vector.broadcast %13 : vector<1x512xf32> to vector<16x512xf32>
      %15 = arith.addf %12, %14 : vector<16x512xf32>
      %c0_14 = arith.constant 0 : index
      %c0_15 = arith.constant 0 : index
      %16 = vector.load %arg5[%c0_14, %c0_15] : memref<16x512xf32, #tpu.memory_space<vmem>>, vector<16x512xf32>
      tpu.vector_store %arg5[%c0_14, %c0_15], %15 {strides = array<i32>} : memref<16x512xf32, #tpu.memory_space<vmem>>, vector<16x512xf32>,
    } else {
    }
    return
  }
  func.func @transform_0(%arg0: i32, %arg1: i32) -> (i32, i32) {
    %c0_i32 = arith.constant 0 : i32
    return %arg0, %arg1 : i32, i32
  }
  func.func @transform_1(%arg0: i32, %arg1: i32) -> (i32, i32) {
    %c0_i32 = arith.constant 0 : i32
    %c0_i32_0 = arith.constant 0 : i32
    return %arg1, %c0_i32 : i32, i32
  }
  func.func @transform_2(%arg0: i32, %arg1: i32) -> (i32, i32) {
    %c0_i32 = arith.constant 0 : i32
    %c0_i32_0 = arith.constant 0 : i32
    %c0_i32_1 = arith.constant 0 : i32
    return %c0_i32, %c0_i32_0 : i32, i32
  }
  func.func @transform_3(%arg0: i32, %arg1: i32) -> (i32, i32) {
    %c0_i32 = arith.constant 0 : i32
    %c0_i32_0 = arith.constant 0 : i32
    return %arg0, %c0_i32 : i32, i32
  }
}

module attributes {stable_mosaic.version = 11 : i64} {
  func.func @kernel(%arg0: i32, %arg1: i32, %arg2: memref<16x512xbf16, #tpu.memory_space<vmem>>, %arg3: memref<512x512xbf16, #tpu.memory_space<vmem>>, %arg4: memref<1x512xf32, #tpu.memory_space<vmem>>, %arg5: memref<1x512xf32, #tpu.memory_space<vmem>>, %arg6: memref<16x512xf32, #tpu.memory_space<vmem>>, %arg7: memref<16x512xf32, #tpu.memory_space<vmem>>) attributes {dimension_semantics = [#tpu.dimension_semantics<parallel>, #tpu.dimension_semantics<arbitrary>], iteration_bounds = array<i64: 1, 9>, scalar_prefetch = 0 : i64, scratch_operands = 0 : i64, tpu.core_type = #tpu.core_type<tc>, window_params = [{transform_indices = @transform_0, window_bounds = array<i64: 16, 512>}, {transform_indices = @transform_1, window_bounds = array<i64: 512, 512>}, {pipeline_mode = #tpu.pipeline_mode<synchronous>, transform_indices = @transform_2, window_bounds = array<i64: 1, 512>}, {pipeline_mode = #tpu.pipeline_mode<synchronous>, transform_indices = @transform_3, window_bounds = array<i64: 1, 512>}, {transform_indices = @transform_4, window_bounds = array<i64: 16, 512>}, {transform_indices = @transform_5, window_bounds = array<i64: 16, 512>}]} {
    %c0_i32 = arith.constant 0 : i32
    %0 = arith.cmpi eq, %arg1, %c0_i32 : i32
    %1 = arith.extui %0 : i1 to i32
    %c0_i32_0 = arith.constant 0 : i32
    %2 = arith.cmpi ne, %1, %c0_i32_0 : i32
    scf.if %2 {
      %cst_9 = arith.constant 0.000000e+00 : f32
      %12 = vector.broadcast %cst_9 : f32 to vector<16x512xf32>
      %c0_10 = arith.constant 0 : index
      %c0_11 = arith.constant 0 : index
      %13 = vector.load %arg7[%c0_10, %c0_11] : memref<16x512xf32, #tpu.memory_space<vmem>>, vector<16x512xf32>
      tpu.vector_store %arg7[%c0_10, %c0_11], %12 {strides = array<i32>} : memref<16x512xf32, #tpu.memory_space<vmem>>, vector<16x512xf32>,
    } else {
    }
    %c0 = arith.constant 0 : index
    %c0_1 = arith.constant 0 : index
    %3 = vector.load %arg7[%c0, %c0_1] : memref<16x512xf32, #tpu.memory_space<vmem>>, vector<16x512xf32>
    %c0_2 = arith.constant 0 : index
    %c0_3 = arith.constant 0 : index
    %4 = vector.load %arg2[%c0_2, %c0_3] : memref<16x512xbf16, #tpu.memory_space<vmem>>, vector<16x512xbf16>
    %c0_4 = arith.constant 0 : index
    %c0_5 = arith.constant 0 : index
    %5 = vector.load %arg3[%c0_4, %c0_5] : memref<512x512xbf16, #tpu.memory_space<vmem>>, vector<512x512xbf16>
    %cst = arith.constant dense<0.000000e+00> : vector<16x512xf32>
    %6 = tpu.matmul %4, %5, %cst {dimension_numbers = #tpu.dot_dimension_numbers<[1], [0], [0], [1], [0, 0, 1, 1], [], []>} : vector<16x512xbf16>, vector<512x512xbf16>, vector<16x512xf32> -> vector<16x512xf32>
    %7 = arith.addf %3, %6 : vector<16x512xf32>
    %c0_6 = arith.constant 0 : index
    %c0_7 = arith.constant 0 : index
    %8 = vector.load %arg7[%c0_6, %c0_7] : memref<16x512xf32, #tpu.memory_space<vmem>>, vector<16x512xf32>
    tpu.vector_store %arg7[%c0_6, %c0_7], %7 {strides = array<i32>} : memref<16x512xf32, #tpu.memory_space<vmem>>, vector<16x512xf32>,
    %c8_i32 = arith.constant 8 : i32
    %9 = arith.cmpi eq, %arg1, %c8_i32 : i32
    %10 = arith.extui %9 : i1 to i32
    %c0_i32_8 = arith.constant 0 : i32
    %11 = arith.cmpi ne, %10, %c0_i32_8 : i32
    scf.if %11 {
      %c0_9 = arith.constant 0 : index
      %c0_10 = arith.constant 0 : index
      %12 = vector.load %arg7[%c0_9, %c0_10] : memref<16x512xf32, #tpu.memory_space<vmem>>, vector<16x512xf32>
      %c0_11 = arith.constant 0 : index
      %c0_12 = arith.constant 0 : index
      %13 = vector.load %arg4[%c0_11, %c0_12] : memref<1x512xf32, #tpu.memory_space<vmem>>, vector<1x512xf32>
      %c0_13 = arith.constant 0 : index
      %c0_14 = arith.constant 0 : index
      %14 = vector.load %arg5[%c0_13, %c0_14] : memref<1x512xf32, #tpu.memory_space<vmem>>, vector<1x512xf32>
      %15 = tpu.iota {dimensions = array<i32: 0>} : vector<16x1xi32>
      %c2_i32 = arith.constant 2 : i32
      %16 = vector.broadcast %c2_i32 : i32 to vector<16x1xi32>
      %17 = arith.cmpi slt, %15, %16 : vector<16x1xi32>
      %18 = arith.extui %17 : vector<16x1xi1> to vector<16x1xi32>
      %19 = arith.sitofp %18 : vector<16x1xi32> to vector<16x1xf32>
      %20 = vector.broadcast %19 : vector<16x1xf32> to vector<16x512xf32>
      %21 = arith.mulf %12, %20 : vector<16x512xf32>
      %cst_15 = arith.constant dense<0.000000e+00> : vector<512xf32>
      %22 = vector.multi_reduction <add>, %21, %cst_15 [0] : vector<16x512xf32> to vector<512xf32>
      %23 = vector.shape_cast %22 : vector<512xf32> to vector<1x512xf32>
      %cst_16 = arith.constant 5.000000e-01 : f32
      %24 = vector.broadcast %cst_16 : f32 to vector<1x512xf32>
      %25 = arith.mulf %23, %24 : vector<1x512xf32>
      %26 = vector.broadcast %25 : vector<1x512xf32> to vector<16x512xf32>
      %27 = arith.subf %12, %26 : vector<16x512xf32>
      %28 = vector.broadcast %19 : vector<16x1xf32> to vector<16x512xf32>
      %29 = arith.mulf %27, %28 : vector<16x512xf32>
      %30 = arith.mulf %29, %29 : vector<16x512xf32>
      %cst_17 = arith.constant dense<0.000000e+00> : vector<512xf32>
      %31 = vector.multi_reduction <add>, %30, %cst_17 [0] : vector<16x512xf32> to vector<512xf32>
      %32 = vector.shape_cast %31 : vector<512xf32> to vector<1x512xf32>
      %cst_18 = arith.constant 5.000000e-01 : f32
      %33 = vector.broadcast %cst_18 : f32 to vector<1x512xf32>
      %34 = arith.mulf %32, %33 : vector<1x512xf32>
      %35 = vector.broadcast %25 : vector<1x512xf32> to vector<16x512xf32>
      %36 = arith.subf %12, %35 : vector<16x512xf32>
      %cst_19 = arith.constant 9.99999974E-6 : f32
      %37 = vector.broadcast %cst_19 : f32 to vector<1x512xf32>
      %38 = arith.addf %34, %37 : vector<1x512xf32>
      %39 = math.rsqrt %38 : vector<1x512xf32>
      %40 = vector.broadcast %39 : vector<1x512xf32> to vector<16x512xf32>
      %41 = arith.mulf %36, %40 : vector<16x512xf32>
      %42 = vector.broadcast %13 : vector<1x512xf32> to vector<16x512xf32>
      %43 = arith.mulf %41, %42 : vector<16x512xf32>
      %44 = vector.broadcast %14 : vector<1x512xf32> to vector<16x512xf32>
      %45 = arith.addf %43, %44 : vector<16x512xf32>
      %cst_20 = arith.constant 0.000000e+00 : f32
      %46 = vector.broadcast %cst_20 : f32 to vector<16x512xf32>
      %47 = arith.maximumf %45, %46 : vector<16x512xf32>
      %c0_21 = arith.constant 0 : index
      %c0_22 = arith.constant 0 : index
      %48 = vector.load %arg6[%c0_21, %c0_22] : memref<16x512xf32, #tpu.memory_space<vmem>>, vector<16x512xf32>
      %49 = arith.addf %47, %48 : vector<16x512xf32>
      %cst_23 = arith.constant 0.000000e+00 : f32
      %50 = vector.broadcast %cst_23 : f32 to vector<16x512xf32>
      %51 = arith.maximumf %49, %50 : vector<16x512xf32>
      %c0_24 = arith.constant 0 : index
      %c0_25 = arith.constant 0 : index
      %52 = vector.load %arg7[%c0_24, %c0_25] : memref<16x512xf32, #tpu.memory_space<vmem>>, vector<16x512xf32>
      tpu.vector_store %arg7[%c0_24, %c0_25], %51 {strides = array<i32>} : memref<16x512xf32, #tpu.memory_space<vmem>>, vector<16x512xf32>,
    } else {
    }
    return
  }
  func.func @transform_0(%arg0: i32, %arg1: i32) -> (i32, i32) {
    %c0_i32 = arith.constant 0 : i32
    return %arg0, %arg1 : i32, i32
  }
  func.func @transform_1(%arg0: i32, %arg1: i32) -> (i32, i32) {
    %c0_i32 = arith.constant 0 : i32
    %c0_i32_0 = arith.constant 0 : i32
    return %arg1, %c0_i32 : i32, i32
  }
  func.func @transform_2(%arg0: i32, %arg1: i32) -> (i32, i32) {
    %c0_i32 = arith.constant 0 : i32
    %c0_i32_0 = arith.constant 0 : i32
    %c0_i32_1 = arith.constant 0 : i32
    return %c0_i32, %c0_i32_0 : i32, i32
  }
  func.func @transform_3(%arg0: i32, %arg1: i32) -> (i32, i32) {
    %c0_i32 = arith.constant 0 : i32
    %c0_i32_0 = arith.constant 0 : i32
    %c0_i32_1 = arith.constant 0 : i32
    return %c0_i32, %c0_i32_0 : i32, i32
  }
  func.func @transform_4(%arg0: i32, %arg1: i32) -> (i32, i32) {
    %c0_i32 = arith.constant 0 : i32
    %c0_i32_0 = arith.constant 0 : i32
    return %arg0, %c0_i32 : i32, i32
  }
  func.func @transform_5(%arg0: i32, %arg1: i32) -> (i32, i32) {
    %c0_i32 = arith.constant 0 : i32
    %c0_i32_0 = arith.constant 0 : i32
    return %arg0, %c0_i32 : i32, i32
  }
}

module attributes {stable_mosaic.version = 11 : i64} {
  func.func @kernel(%arg0: i32, %arg1: i32, %arg2: memref<16x512xbf16, #tpu.memory_space<vmem>>, %arg3: memref<512x512xbf16, #tpu.memory_space<vmem>>, %arg4: memref<1x512xf32, #tpu.memory_space<vmem>>, %arg5: memref<1x512xf32, #tpu.memory_space<vmem>>, %arg6: memref<16x512xf32, #tpu.memory_space<vmem>>) attributes {dimension_semantics = [#tpu.dimension_semantics<parallel>, #tpu.dimension_semantics<arbitrary>], iteration_bounds = array<i64: 1, 9>, scalar_prefetch = 0 : i64, scratch_operands = 0 : i64, tpu.core_type = #tpu.core_type<tc>, window_params = [{transform_indices = @transform_0, window_bounds = array<i64: 16, 512>}, {transform_indices = @transform_1, window_bounds = array<i64: 512, 512>}, {pipeline_mode = #tpu.pipeline_mode<synchronous>, transform_indices = @transform_2, window_bounds = array<i64: 1, 512>}, {pipeline_mode = #tpu.pipeline_mode<synchronous>, transform_indices = @transform_3, window_bounds = array<i64: 1, 512>}, {transform_indices = @transform_4, window_bounds = array<i64: 16, 512>}]} {
    %c0_i32 = arith.constant 0 : i32
    %0 = arith.cmpi eq, %arg1, %c0_i32 : i32
    %1 = arith.extui %0 : i1 to i32
    %c0_i32_0 = arith.constant 0 : i32
    %2 = arith.cmpi ne, %1, %c0_i32_0 : i32
    scf.if %2 {
      %cst_9 = arith.constant 0.000000e+00 : f32
      %12 = vector.broadcast %cst_9 : f32 to vector<16x512xf32>
      %c0_10 = arith.constant 0 : index
      %c0_11 = arith.constant 0 : index
      %13 = vector.load %arg6[%c0_10, %c0_11] : memref<16x512xf32, #tpu.memory_space<vmem>>, vector<16x512xf32>
      tpu.vector_store %arg6[%c0_10, %c0_11], %12 {strides = array<i32>} : memref<16x512xf32, #tpu.memory_space<vmem>>, vector<16x512xf32>,
    } else {
    }
    %c0 = arith.constant 0 : index
    %c0_1 = arith.constant 0 : index
    %3 = vector.load %arg6[%c0, %c0_1] : memref<16x512xf32, #tpu.memory_space<vmem>>, vector<16x512xf32>
    %c0_2 = arith.constant 0 : index
    %c0_3 = arith.constant 0 : index
    %4 = vector.load %arg2[%c0_2, %c0_3] : memref<16x512xbf16, #tpu.memory_space<vmem>>, vector<16x512xbf16>
    %c0_4 = arith.constant 0 : index
    %c0_5 = arith.constant 0 : index
    %5 = vector.load %arg3[%c0_4, %c0_5] : memref<512x512xbf16, #tpu.memory_space<vmem>>, vector<512x512xbf16>
    %cst = arith.constant dense<0.000000e+00> : vector<16x512xf32>
    %6 = tpu.matmul %4, %5, %cst {dimension_numbers = #tpu.dot_dimension_numbers<[1], [0], [0], [1], [0, 0, 1, 1], [], []>} : vector<16x512xbf16>, vector<512x512xbf16>, vector<16x512xf32> -> vector<16x512xf32>
    %7 = arith.addf %3, %6 : vector<16x512xf32>
    %c0_6 = arith.constant 0 : index
    %c0_7 = arith.constant 0 : index
    %8 = vector.load %arg6[%c0_6, %c0_7] : memref<16x512xf32, #tpu.memory_space<vmem>>, vector<16x512xf32>
    tpu.vector_store %arg6[%c0_6, %c0_7], %7 {strides = array<i32>} : memref<16x512xf32, #tpu.memory_space<vmem>>, vector<16x512xf32>,
    %c8_i32 = arith.constant 8 : i32
    %9 = arith.cmpi eq, %arg1, %c8_i32 : i32
    %10 = arith.extui %9 : i1 to i32
    %c0_i32_8 = arith.constant 0 : i32
    %11 = arith.cmpi ne, %10, %c0_i32_8 : i32
    scf.if %11 {
      %c0_9 = arith.constant 0 : index
      %c0_10 = arith.constant 0 : index
      %12 = vector.load %arg6[%c0_9, %c0_10] : memref<16x512xf32, #tpu.memory_space<vmem>>, vector<16x512xf32>
      %c0_11 = arith.constant 0 : index
      %c0_12 = arith.constant 0 : index
      %13 = vector.load %arg4[%c0_11, %c0_12] : memref<1x512xf32, #tpu.memory_space<vmem>>, vector<1x512xf32>
      %c0_13 = arith.constant 0 : index
      %c0_14 = arith.constant 0 : index
      %14 = vector.load %arg5[%c0_13, %c0_14] : memref<1x512xf32, #tpu.memory_space<vmem>>, vector<1x512xf32>
      %15 = tpu.iota {dimensions = array<i32: 0>} : vector<16x1xi32>
      %c2_i32 = arith.constant 2 : i32
      %16 = vector.broadcast %c2_i32 : i32 to vector<16x1xi32>
      %17 = arith.cmpi slt, %15, %16 : vector<16x1xi32>
      %18 = arith.extui %17 : vector<16x1xi1> to vector<16x1xi32>
      %19 = arith.sitofp %18 : vector<16x1xi32> to vector<16x1xf32>
      %20 = vector.broadcast %19 : vector<16x1xf32> to vector<16x512xf32>
      %21 = arith.mulf %12, %20 : vector<16x512xf32>
      %cst_15 = arith.constant dense<0.000000e+00> : vector<512xf32>
      %22 = vector.multi_reduction <add>, %21, %cst_15 [0] : vector<16x512xf32> to vector<512xf32>
      %23 = vector.shape_cast %22 : vector<512xf32> to vector<1x512xf32>
      %cst_16 = arith.constant 5.000000e-01 : f32
      %24 = vector.broadcast %cst_16 : f32 to vector<1x512xf32>
      %25 = arith.mulf %23, %24 : vector<1x512xf32>
      %26 = vector.broadcast %25 : vector<1x512xf32> to vector<16x512xf32>
      %27 = arith.subf %12, %26 : vector<16x512xf32>
      %28 = vector.broadcast %19 : vector<16x1xf32> to vector<16x512xf32>
      %29 = arith.mulf %27, %28 : vector<16x512xf32>
      %30 = arith.mulf %29, %29 : vector<16x512xf32>
      %cst_17 = arith.constant dense<0.000000e+00> : vector<512xf32>
      %31 = vector.multi_reduction <add>, %30, %cst_17 [0] : vector<16x512xf32> to vector<512xf32>
      %32 = vector.shape_cast %31 : vector<512xf32> to vector<1x512xf32>
      %cst_18 = arith.constant 5.000000e-01 : f32
      %33 = vector.broadcast %cst_18 : f32 to vector<1x512xf32>
      %34 = arith.mulf %32, %33 : vector<1x512xf32>
      %35 = vector.broadcast %25 : vector<1x512xf32> to vector<16x512xf32>
      %36 = arith.subf %12, %35 : vector<16x512xf32>
      %cst_19 = arith.constant 9.99999974E-6 : f32
      %37 = vector.broadcast %cst_19 : f32 to vector<1x512xf32>
      %38 = arith.addf %34, %37 : vector<1x512xf32>
      %39 = math.rsqrt %38 : vector<1x512xf32>
      %40 = vector.broadcast %39 : vector<1x512xf32> to vector<16x512xf32>
      %41 = arith.mulf %36, %40 : vector<16x512xf32>
      %42 = vector.broadcast %13 : vector<1x512xf32> to vector<16x512xf32>
      %43 = arith.mulf %41, %42 : vector<16x512xf32>
      %44 = vector.broadcast %14 : vector<1x512xf32> to vector<16x512xf32>
      %45 = arith.addf %43, %44 : vector<16x512xf32>
      %cst_20 = arith.constant 0.000000e+00 : f32
      %46 = vector.broadcast %cst_20 : f32 to vector<16x512xf32>
      %47 = arith.maximumf %45, %46 : vector<16x512xf32>
      %c0_21 = arith.constant 0 : index
      %c0_22 = arith.constant 0 : index
      %48 = vector.load %arg6[%c0_21, %c0_22] : memref<16x512xf32, #tpu.memory_space<vmem>>, vector<16x512xf32>
      tpu.vector_store %arg6[%c0_21, %c0_22], %47 {strides = array<i32>} : memref<16x512xf32, #tpu.memory_space<vmem>>, vector<16x512xf32>,
    } else {
    }
    return
  }
  func.func @transform_0(%arg0: i32, %arg1: i32) -> (i32, i32) {
    %c0_i32 = arith.constant 0 : i32
    return %arg0, %arg1 : i32, i32
  }
  func.func @transform_1(%arg0: i32, %arg1: i32) -> (i32, i32) {
    %c0_i32 = arith.constant 0 : i32
    %c0_i32_0 = arith.constant 0 : i32
    return %arg1, %c0_i32 : i32, i32
  }
  func.func @transform_2(%arg0: i32, %arg1: i32) -> (i32, i32) {
    %c0_i32 = arith.constant 0 : i32
    %c0_i32_0 = arith.constant 0 : i32
    %c0_i32_1 = arith.constant 0 : i32
    return %c0_i32, %c0_i32_0 : i32, i32
  }
  func.func @transform_3(%arg0: i32, %arg1: i32) -> (i32, i32) {
    %c0_i32 = arith.constant 0 : i32
    %c0_i32_0 = arith.constant 0 : i32
    %c0_i32_1 = arith.constant 0 : i32
    return %c0_i32, %c0_i32_0 : i32, i32
  }
  func.func @transform_4(%arg0: i32, %arg1: i32) -> (i32, i32) {
    %c0_i32 = arith.constant 0 : i32
    %c0_i32_0 = arith.constant 0 : i32
    return %arg0, %c0_i32 : i32, i32
  }
}

</mosaic_0001>

<bundles_post_ra>
// kernel: resnet_forward.21
= control target key start
LH: loop header
LB: loop body
LE: loop exit
PB: predicated region body
PF: predicated region fallthrough
CT: control target
= control target key end

     0   :  { %s1133_s12 = smov 0   ;;  %s1135_s13 = smov 0   ;;  %s1450_s0 = inlined_call_operand.vmem [shape: bf16[352,256], index: 0, kind: input, shape index: {}]   ;;  %s1451_s1 = inlined_call_operand.vmem [shape: bf16[256,64], index: 1, kind: input, shape index: {}]   ;;  %s1452_s2 = inlined_call_operand.vmem [shape: f32[1,64], index: 2, kind: input, shape index: {}]   ;;  %s1453_s3 = inlined_call_operand.vmem [shape: f32[352,64], index: 3, kind: output, shape index: {}]  }
   0x1   :  { %s1137_s14 = smov 0  }
   0x2 LB: > { %s25_s15 = sadd.s32 1, %s1106_s13  ;;  %p870_p0 = scmp.ge.s32.totalorder %s1110_s14, 1  ;;  %s1110_s14 = sphi %s1137_s14, %s13_s14   ;;  %s1106_s13 = sphi %s1135_s13, %s1455_s13   ;;  %s1102_s12 = sphi %s1133_s12, %s1454_s12  }
   0x3   : > { %p27_p1 = scmp.ge.s32.totalorder %s25_s15, 2  ;;  %p169_p2 = scmp.lt.s32.totalorder %s1110_s14, 3 }
   0x5   : > { %s1457_s15 = smov (%p27_p1, %s25_s15), 0  ;;  %p170_p3 = pnand %p870_p0, %p169_p2 }
   0x6   : > { %s203_s18 = smul.u32 (!%p170_p3), 22, %s1102_s12 }
   0x7   : > { %173 = sbr.rel (%p170_p3) target bundleno = 299 (0x12b), region = 32 }
   0x8   : > { %p205_p4 = scmp.lt.s32.totalorder (!%p170_p3), %s203_s18, 43 }
   0xc   : > { %v1039_v0 = vld [vmem:[%s1451_s1 + $0x78] sm:$0xff]   ;;  %v1041_v2 = vld [vmem:[%s1451_s1 + $0x70] sm:$0xff]   ;;  %v1043_v4 = vld [vmem:[%s1451_s1 + $0x68] sm:$0xff]   ;;  %s1459_s18 = smov (!%p205_p4, %s203_s18), 43  ;;  %vm232_vm0 = vcmask 523264   ;;  %v1112_v38 = vmov 0.0  }
   0xd   : > { %v1040_v1 = vld [vmem:[%s1451_s1 + $0x38] sm:$0xff]   ;;  %916 = vmatprep.subr.bf16.mxu0 %v1039_v0  ;;  %998 = vmatprep.subr.bf16.mxu1 %v1039_v0  ;;  %v1042_v3 = vld [vmem:[%s1451_s1 + $0x30] sm:$0xff]   ;;  %v1044_v5 = vld [vmem:[%s1451_s1 + $0x28] sm:$0xff]   ;;  %s915_s6 = sshll.u32 %s1459_s18, 3 }
   0xe   : > { %917 = vmatpush3.bf16.msra.mxu0 %v1040_v1  ;;  %1006 = vmatpush3.bf16.msra.mxu1 %v1040_v1  ;;  %v1045_v6 = vld [vmem:[%s1451_s1 + $0x60] sm:$0xff]   ;;  %v1047_v8 = vld [vmem:[%s1451_s1 + $0x58] sm:$0xff]   ;;  %s1186_s11 = scalar_lea.vmem %s1450_s0, %s915_s6  ;;  %v1049_v10 = vld [vmem:[%s1451_s1 + $0x50] sm:$0xff]   ;;  %s1236_s5 = scalar_lea.vmem %s1453_s3, %s915_s6 }
   0xf   : > { %918 = vmatprep.subr.bf16.mxu0 %v1041_v2  ;;  %999 = vmatprep.subr.bf16.mxu1 %v1041_v2  ;;  %v1046_v7 = vld [vmem:[%s1451_s1 + $0x20] sm:$0xff]   ;;  %v1048_v9 = vld [vmem:[%s1451_s1 + $0x18] sm:$0xff]   ;;  %v1050_v13 = vld [vmem:[%s1451_s1 + $0x10] sm:$0xff]   ;;  %233 = vst.msk [vmem:[%s1236_s5] sm:$0xff] %vm232_vm0, %v1112_v38 }
  0x10   : > { %v1057_v11 = vld [vmem:[%s1186_s11 + $0x4] ss:$8 sps:$4 sm:$0xff]   ;;  %v1055_v18 = vld [vmem:[%s1186_s11] ss:$8 sps:$4 sm:$0xff]   ;;  %v1061_v20 = vld [vmem:[%s1186_s11 + $0x14] ss:$8 sps:$4 sm:$0xff]  }
  0x11   : > { %v1060_v12 = vld [vmem:[%s1186_s11 + $0x64] ss:$8 sps:$4 sm:$0xff]   ;;  %569 = vmatprep.mubr.bf16.mxu0 %v1057_v11  ;;  %v1058_v19 = vld [vmem:[%s1186_s11 + $0x60] ss:$8 sps:$4 sm:$0xff]   ;;  %v1064_v21 = vld [vmem:[%s1186_s11 + $0x74] ss:$8 sps:$4 sm:$0xff]  }
  0x12   : > { %919 = vmatpush3.bf16.msra.mxu0 %v1042_v3  ;;  %1007 = vmatpush3.bf16.msra.mxu1 %v1042_v3  ;;  %v1051_v14 = vld [vmem:[%s1451_s1 + $0x48] sm:$0xff]   ;;  %v1053_v16 = vld [vmem:[%s1451_s1 + $0x40] sm:$0xff]   ;;  %v1063_v22 = vld [vmem:[%s1186_s11 + $0x10] ss:$8 sps:$4 sm:$0xff]   ;;  %234 = vst.msk [vmem:[%s1236_s5 + $0x8] sm:$0xff] %vm232_vm0, %v1112_v38 }
  0x13   : > { %920 = vmatprep.subr.bf16.mxu0 %v1043_v4  ;;  %1000 = vmatprep.subr.bf16.mxu1 %v1043_v4  ;;  %v1052_v15 = vld [vmem:[%s1451_s1 + $0x8] sm:$0xff]   ;;  %v1054_v17 = vld [vmem:[%s1451_s1] sm:$0xff]   ;;  %v1066_v23 = vld [vmem:[%s1186_s11 + $0x70] ss:$8 sps:$4 sm:$0xff]   ;;  %235 = vst.msk [vmem:[%s1236_s5 + $0x10] sm:$0xff] %vm232_vm0, %v1112_v38 }
  0x14   : > { %617 = vmatprep.mubr.bf16.mxu1 %v1060_v12  ;;  %v1067_v24 = vld [vmem:[%s1186_s11 + $0x24] ss:$8 sps:$4 sm:$0xff]   ;;  %v1069_v26 = vld [vmem:[%s1186_s11 + $0x20] ss:$8 sps:$4 sm:$0xff]   ;;  %v1073_v28 = vld [vmem:[%s1186_s11 + $0x34] ss:$8 sps:$4 sm:$0xff]  }
  0x15   : > { %v1070_v25 = vld [vmem:[%s1186_s11 + $0x84] ss:$8 sps:$4 sm:$0xff]   ;;  %v1072_v27 = vld [vmem:[%s1186_s11 + $0x80] ss:$8 sps:$4 sm:$0xff]   ;;  %v1076_v29 = vld [vmem:[%s1186_s11 + $0x94] ss:$8 sps:$4 sm:$0xff]  }
  0x16   : > { %921 = vmatpush3.bf16.msra.mxu0 %v1044_v5  ;;  %1008 = vmatpush3.bf16.msra.mxu1 %v1044_v5  ;;  %v1075_v30 = vld [vmem:[%s1186_s11 + $0x30] ss:$8 sps:$4 sm:$0xff]   ;;  %v1079_v32 = vld [vmem:[%s1186_s11 + $0x44] ss:$8 sps:$4 sm:$0xff]   ;;  %v1081_v34 = vld [vmem:[%s1186_s11 + $0x40] ss:$8 sps:$4 sm:$0xff]  }
  0x17   : > { %922 = vmatprep.subr.bf16.mxu0 %v1045_v6  ;;  %1001 = vmatprep.subr.bf16.mxu1 %v1045_v6  ;;  %v1078_v31 = vld [vmem:[%s1186_s11 + $0x90] ss:$8 sps:$4 sm:$0xff]   ;;  %v1082_v33 = vld [vmem:[%s1186_s11 + $0xa4] ss:$8 sps:$4 sm:$0xff]   ;;  %v1084_v35 = vld [vmem:[%s1186_s11 + $0xa0] ss:$8 sps:$4 sm:$0xff]  }
  0x18   : > { %v1085_v36 = vld [vmem:[%s1186_s11 + $0x54] ss:$8 sps:$4 sm:$0xff]   ;;  %v1087_v37 = vld [vmem:[%s1186_s11 + $0x50] ss:$8 sps:$4 sm:$0xff]   ;;  %236 = vst.msk [vmem:[%s1236_s5 + $0x18] sm:$0xff] %vm232_vm0, %v1112_v38  ;;  %237 = vst.msk [vmem:[%s1236_s5 + $0x20] sm:$0xff] %vm232_vm0, %v1112_v38 }
  0x19   : > { %238 = vst.msk [vmem:[%s1236_s5 + $0x28] sm:$0xff] %vm232_vm0, %v1112_v38  ;;  %239 = vst.msk [vmem:[%s1236_s5 + $0x30] sm:$0xff] %vm232_vm0, %v1112_v38  ;;  %v255_v41 = vld [vmem:[%s1236_s5] sm:$0xff]  ;;  %v256_v51 = vld [vmem:[%s1236_s5 + $0x8] sm:$0xff] }
  0x1a   : > { %923 = vmatpush3.bf16.msra.mxu0 %v1046_v7  ;;  %1009 = vmatpush3.bf16.msra.mxu1 %v1046_v7  ;;  %240 = vst.msk [vmem:[%s1236_s5 + $0x38] sm:$0xff] %vm232_vm0, %v1112_v38  ;;  %241 = vst.msk [vmem:[%s1236_s5 + $0x40] sm:$0xff] %vm232_vm0, %v1112_v38  ;;  %v257_v61 = vld [vmem:[%s1236_s5 + $0x10] sm:$0xff]  ;;  %v1299_v3 = vld [vmem:[%s1452_s2] ss:$0 sm:$0xff] }
  0x1b   : > { %924 = vmatprep.subr.bf16.mxu0 %v1047_v8  ;;  %1002 = vmatprep.subr.bf16.mxu1 %v1047_v8  ;;  %242 = vst.msk [vmem:[%s1236_s5 + $0x48] sm:$0xff] %vm232_vm0, %v1112_v38  ;;  %243 = vst.msk [vmem:[%s1236_s5 + $0x50] sm:$0xff] %vm232_vm0, %v1112_v38 }
  0x1c   : > { %244 = vst.msk [vmem:[%s1236_s5 + $0x58] sm:$0xff] %vm232_vm0, %v1112_v38  ;;  %245 = vst.msk [vmem:[%s1236_s5 + $0x60] sm:$0xff] %vm232_vm0, %v1112_v38 }
  0x1d   : > { %246 = vst.msk [vmem:[%s1236_s5 + $0x68] sm:$0xff] %vm232_vm0, %v1112_v38  ;;  %247 = vst.msk [vmem:[%s1236_s5 + $0x70] sm:$0xff] %vm232_vm0, %v1112_v38 }
  0x1e   : > { %925 = vmatpush3.bf16.msra.mxu0 %v1048_v9  ;;  %1010 = vmatpush3.bf16.msra.mxu1 %v1048_v9  ;;  %248 = vst.msk [vmem:[%s1236_s5 + $0x78] sm:$0xff] %vm232_vm0, %v1112_v38  ;;  %249 = vst.msk [vmem:[%s1236_s5 + $0x80] sm:$0xff] %vm232_vm0, %v1112_v38 }
  0x1f   : > { %926 = vmatprep.subr.bf16.mxu0 %v1049_v10  ;;  %1003 = vmatprep.subr.bf16.mxu1 %v1049_v10  ;;  %250 = vst.msk [vmem:[%s1236_s5 + $0x88] sm:$0xff] %vm232_vm0, %v1112_v38  ;;  %251 = vst.msk [vmem:[%s1236_s5 + $0x90] sm:$0xff] %vm232_vm0, %v1112_v38  ;;  %v258_v8 = vld [vmem:[%s1236_s5 + $0x18] sm:$0xff] }
  0x20   : > { %252 = vst.msk [vmem:[%s1236_s5 + $0x98] sm:$0xff] %vm232_vm0, %v1112_v38  ;;  %253 = vst.msk [vmem:[%s1236_s5 + $0xa0] sm:$0xff] %vm232_vm0, %v1112_v38 }
  0x21   : > { %254 = vst.msk [vmem:[%s1236_s5 + $0xa8] sm:$0xff] %vm232_vm0, %v1112_v38 }
  0x22   : > { %927 = vmatpush3.bf16.msra.mxu0 %v1050_v13  ;;  %1011 = vmatpush3.bf16.msra.mxu1 %v1050_v13 }
  0x23   : > { %928 = vmatprep.subr.bf16.mxu0 %v1051_v14  ;;  %1004 = vmatprep.subr.bf16.mxu1 %v1051_v14  ;;  %v267_v43 = vld [vmem:[%s1236_s5 + $0x60] sm:$0xff] }
  0x24   : > { %v268_v53 = vld [vmem:[%s1236_s5 + $0x68] sm:$0xff]  ;;  %v269_v63 = vld [vmem:[%s1236_s5 + $0x70] sm:$0xff] }
  0x25   : > { %v270_v12 = vld [vmem:[%s1236_s5 + $0x78] sm:$0xff] }
  0x26   : > { %929 = vmatpush3.bf16.msra.mxu0 %v1052_v15  ;;  %1012 = vmatpush3.bf16.msra.mxu1 %v1052_v15 }
  0x27   : > { %930 = vmatprep.subr.bf16.mxu0 %v1053_v16  ;;  %1005 = vmatprep.subr.bf16.mxu1 %v1053_v16 }
  0x2a   : > { %931 = vmatpush3.bf16.msra.mxu0 %v1054_v17  ;;  %1013 = vmatpush3.bf16.msra.mxu1 %v1054_v17 }
  0x2d   : > { %570 = vmatmul.mubr.bf16.vlgmr.msra.gmra.mxu0 %v1055_v18  ;;  %618 = vmatmul.mubr.bf16.vlgmr.msra.gmra.mxu1 %v1058_v19 }
  0x2e   : > { %577 = vmatprep.mubr.bf16.mxu0 %v1061_v20  ;;  %625 = vmatprep.mubr.bf16.mxu1 %v1064_v21 }
  0x35   : > { %578 = vmatmul.mubr.bf16.gmra.mxu0 %v1063_v22  ;;  %626 = vmatmul.mubr.bf16.gmra.mxu1 %v1066_v23  ;;  %v259_v22 = vld [vmem:[%s1236_s5 + $0x20] sm:$0xff] }
  0x36   : > { %585 = vmatprep.mubr.bf16.mxu0 %v1067_v24  ;;  %633 = vmatprep.mubr.bf16.mxu1 %v1070_v25 }
  0x3d   : > { %586 = vmatmul.mubr.bf16.gmra.mxu0 %v1069_v26  ;;  %634 = vmatmul.mubr.bf16.gmra.mxu1 %v1072_v27  ;;  %v271_v26 = vld [vmem:[%s1236_s5 + $0x80] sm:$0xff] }
  0x3e   : > { %593 = vmatprep.mubr.bf16.mxu0 %v1073_v28  ;;  %641 = vmatprep.mubr.bf16.mxu1 %v1076_v29 }
  0x45   : > { %594 = vmatmul.mubr.bf16.gmra.mxu0 %v1075_v30  ;;  %642 = vmatmul.mubr.bf16.gmra.mxu1 %v1078_v31 }
  0x46   : > { %601 = vmatprep.mubr.bf16.mxu0 %v1079_v32  ;;  %649 = vmatprep.mubr.bf16.mxu1 %v1082_v33 }
  0x4d   : > { %602 = vmatmul.mubr.bf16.gmra.mxu0 %v1081_v34  ;;  %650 = vmatmul.mubr.bf16.gmra.mxu1 %v1084_v35 }
  0x4e   : > { %609 = vmatprep.mubr.bf16.mxu0 %v1085_v36  ;;  %v260_v36 = vld [vmem:[%s1236_s5 + $0x28] sm:$0xff] }
  0x55   : > { %610 = vmatmul.mubr.bf16.gmra.mxu0 %v1087_v37 }
  0xed   : > { %v932_v39 = vpop.f32.mrf.mxu0  ;;  %v968_v40 = vpop.f32.mrf.mxu1 }
  0xef   : > { %v933_v42 = vpop.f32.mrf.mxu0  ;;  %v969_v44 = vpop.f32.mrf.mxu1 }
  0xf0   : > { %v934_v45 = vadd.f32 %v933_v42, %v932_v39  ;;  %v970_v46 = vadd.f32 %v969_v44, %v968_v40  ;;  %v272_v40 = vld [vmem:[%s1236_s5 + $0x88] sm:$0xff] }
  0xf1   : > { %v935_v47 = vpop.f32.mrf.mxu0  ;;  %v971_v48 = vpop.f32.mrf.mxu1 }
  0xf2   : > { %v658_v49 = vadd.f32 %v934_v45, %v255_v41  ;;  %v670_v50 = vadd.f32 %v970_v46, %v267_v43 }
  0xf3   : > { %v936_v52 = vpop.f32.mrf.mxu0  ;;  %v972_v54 = vpop.f32.mrf.mxu1 }
  0xf4   : > { %681 = vst.msk [vmem:[%s1236_s5] sm:$0xff] %vm232_vm0, %v658_v49  ;;  %693 = vst.msk [vmem:[%s1236_s5 + $0x60] sm:$0xff] %vm232_vm0, %v670_v50  ;;  %v937_v55 = vadd.f32 %v936_v52, %v935_v47  ;;  %v973_v56 = vadd.f32 %v972_v54, %v971_v48  ;;  %v261_v50 = vld [vmem:[%s1236_s5 + $0x30] sm:$0xff] }
  0xf5   : > { %v938_v57 = vpop.f32.mrf.mxu0  ;;  %v974_v58 = vpop.f32.mrf.mxu1  ;;  %v273_v54 = vld [vmem:[%s1236_s5 + $0x90] sm:$0xff] }
  0xf6   : > { %v659_v59 = vadd.f32 %v937_v55, %v256_v51  ;;  %v671_v60 = vadd.f32 %v973_v56, %v268_v53 }
  0xf7   : > { %v939_v62 = vpop.f32.mrf.mxu0  ;;  %v975_v0 = vpop.f32.mrf.mxu1 }
  0xf8   : > { %682 = vst.msk [vmem:[%s1236_s5 + $0x8] sm:$0xff] %vm232_vm0, %v659_v59  ;;  %694 = vst.msk [vmem:[%s1236_s5 + $0x68] sm:$0xff] %vm232_vm0, %v671_v60  ;;  %v940_v1 = vadd.f32 %v939_v62, %v938_v57  ;;  %v976_v2 = vadd.f32 %v975_v0, %v974_v58  ;;  %v262_v0 = vld [vmem:[%s1236_s5 + $0x38] sm:$0xff] }
  0xf9   : > { %v941_v4 = vpop.f32.mrf.mxu0  ;;  %v977_v5 = vpop.f32.mrf.mxu1 }
  0xfa   : > { %v660_v6 = vadd.f32 %v940_v1, %v257_v61  ;;  %v672_v7 = vadd.f32 %v976_v2, %v269_v63 }
  0xfb   : > { %v706_v9 = vld [vmem:[%s1236_s5] sm:$0xff]  ;;  %v942_v11 = vpop.f32.mrf.mxu0  ;;  %v978_v13 = vpop.f32.mrf.mxu1 }
  0xfc   : > { %v718_v10 = vld [vmem:[%s1236_s5 + $0x60] sm:$0xff]  ;;  %v735_v14 = vadd.f32 %v1299_v3, %v706_v9  ;;  %683 = vst.msk [vmem:[%s1236_s5 + $0x10] sm:$0xff] %vm232_vm0, %v660_v6  ;;  %695 = vst.msk [vmem:[%s1236_s5 + $0x70] sm:$0xff] %vm232_vm0, %v672_v7  ;;  %v943_v16 = vadd.f32 %v942_v11, %v941_v4  ;;  %v979_v17 = vadd.f32 %v978_v13, %v977_v5  ;;  %v274_v5 = vld [vmem:[%s1236_s5 + $0x98] sm:$0xff] }
  0xfd   : > { %v747_v15 = vadd.f32 %v1299_v3, %v718_v10  ;;  %v944_v18 = vpop.f32.mrf.mxu0  ;;  %v980_v19 = vpop.f32.mrf.mxu1 }
  0xfe   : > { %757 = vst.msk [vmem:[%s1236_s5] sm:$0xff] %vm232_vm0, %v735_v14  ;;  %v661_v20 = vadd.f32 %v943_v16, %v258_v8  ;;  %v673_v21 = vadd.f32 %v979_v17, %v270_v12 }
  0xff   : > { %769 = vst.msk [vmem:[%s1236_s5 + $0x60] sm:$0xff] %vm232_vm0, %v747_v15  ;;  %v707_v23 = vld [vmem:[%s1236_s5 + $0x8] sm:$0xff]  ;;  %v945_v25 = vpop.f32.mrf.mxu0  ;;  %v981_v27 = vpop.f32.mrf.mxu1  ;;  %v263_v15 = vld [vmem:[%s1236_s5 + $0x40] sm:$0xff] }
 0x100   : > { %v719_v24 = vld [vmem:[%s1236_s5 + $0x68] sm:$0xff]  ;;  %v736_v28 = vadd.f32 %v1299_v3, %v707_v23  ;;  %684 = vst.msk [vmem:[%s1236_s5 + $0x18] sm:$0xff] %vm232_vm0, %v661_v20  ;;  %696 = vst.msk [vmem:[%s1236_s5 + $0x78] sm:$0xff] %vm232_vm0, %v673_v21  ;;  %v946_v30 = vadd.f32 %v945_v25, %v944_v18  ;;  %v982_v31 = vadd.f32 %v981_v27, %v980_v19  ;;  %v275_v19 = vld [vmem:[%s1236_s5 + $0xa0] sm:$0xff] }
 0x101   : > { %v748_v29 = vadd.f32 %v1299_v3, %v719_v24  ;;  %v947_v32 = vpop.f32.mrf.mxu0  ;;  %v983_v33 = vpop.f32.mrf.mxu1 }
 0x102   : > { %758 = vst.msk [vmem:[%s1236_s5 + $0x8] sm:$0xff] %vm232_vm0, %v736_v28  ;;  %v662_v34 = vadd.f32 %v946_v30, %v259_v22  ;;  %v674_v35 = vadd.f32 %v982_v31, %v271_v26 }
 0x103   : > { %770 = vst.msk [vmem:[%s1236_s5 + $0x68] sm:$0xff] %vm232_vm0, %v748_v29  ;;  %v708_v37 = vld [vmem:[%s1236_s5 + $0x10] sm:$0xff]  ;;  %v948_v39 = vpop.f32.mrf.mxu0  ;;  %v984_v41 = vpop.f32.mrf.mxu1  ;;  %v264_v29 = vld [vmem:[%s1236_s5 + $0x48] sm:$0xff] }
 0x104   : > { %v720_v38 = vld [vmem:[%s1236_s5 + $0x70] sm:$0xff]  ;;  %v737_v42 = vadd.f32 %v1299_v3, %v708_v37  ;;  %685 = vst.msk [vmem:[%s1236_s5 + $0x20] sm:$0xff] %vm232_vm0, %v662_v34  ;;  %697 = vst.msk [vmem:[%s1236_s5 + $0x80] sm:$0xff] %vm232_vm0, %v674_v35  ;;  %v949_v44 = vadd.f32 %v948_v39, %v947_v32  ;;  %v985_v45 = vadd.f32 %v984_v41, %v983_v33  ;;  %v276_v33 = vld [vmem:[%s1236_s5 + $0xa8] sm:$0xff] }
 0x105   : > { %v749_v43 = vadd.f32 %v1299_v3, %v720_v38  ;;  %v950_v46 = vpop.f32.mrf.mxu0  ;;  %v986_v47 = vpop.f32.mrf.mxu1 }
 0x106   : > { %759 = vst.msk [vmem:[%s1236_s5 + $0x10] sm:$0xff] %vm232_vm0, %v737_v42  ;;  %v663_v48 = vadd.f32 %v949_v44, %v260_v36  ;;  %v675_v49 = vadd.f32 %v985_v45, %v272_v40  ;;  %v265_v44 = vld [vmem:[%s1236_s5 + $0x50] sm:$0xff] }
 0x107   : > { %771 = vst.msk [vmem:[%s1236_s5 + $0x70] sm:$0xff] %vm232_vm0, %v749_v43  ;;  %v709_v51 = vld [vmem:[%s1236_s5 + $0x18] sm:$0xff]  ;;  %v951_v53 = vpop.f32.mrf.mxu0  ;;  %v987_v55 = vpop.f32.mrf.mxu1 }
 0x108   : > { %v721_v52 = vld [vmem:[%s1236_s5 + $0x78] sm:$0xff]  ;;  %v738_v56 = vadd.f32 %v1299_v3, %v709_v51  ;;  %686 = vst.msk [vmem:[%s1236_s5 + $0x28] sm:$0xff] %vm232_vm0, %v663_v48  ;;  %698 = vst.msk [vmem:[%s1236_s5 + $0x88] sm:$0xff] %vm232_vm0, %v675_v49  ;;  %v952_v58 = vadd.f32 %v951_v53, %v950_v46  ;;  %v988_v59 = vadd.f32 %v987_v55, %v986_v47 }
 0x109   : > { %v750_v57 = vadd.f32 %v1299_v3, %v721_v52  ;;  %v953_v60 = vpop.f32.mrf.mxu0  ;;  %v989_v61 = vpop.f32.mrf.mxu1  ;;  %v266_v53 = vld [vmem:[%s1236_s5 + $0x58] sm:$0xff] }
 0x10a   : > { %760 = vst.msk [vmem:[%s1236_s5 + $0x18] sm:$0xff] %vm232_vm0, %v738_v56  ;;  %v664_v62 = vadd.f32 %v952_v58, %v261_v50  ;;  %v676_v63 = vadd.f32 %v988_v59, %v273_v54 }
 0x10b   : > { %772 = vst.msk [vmem:[%s1236_s5 + $0x78] sm:$0xff] %vm232_vm0, %v750_v57  ;;  %v710_v1 = vld [vmem:[%s1236_s5 + $0x20] sm:$0xff]  ;;  %v954_v4 = vpop.f32.mrf.mxu0  ;;  %v990_v6 = vpop.f32.mrf.mxu1 }
 0x10c   : > { %v722_v2 = vld [vmem:[%s1236_s5 + $0x80] sm:$0xff]  ;;  %v739_v7 = vadd.f32 %v1299_v3, %v710_v1  ;;  %687 = vst.msk [vmem:[%s1236_s5 + $0x30] sm:$0xff] %vm232_vm0, %v664_v62  ;;  %699 = vst.msk [vmem:[%s1236_s5 + $0x90] sm:$0xff] %vm232_vm0, %v676_v63  ;;  %v955_v9 = vadd.f32 %v954_v4, %v953_v60  ;;  %v991_v10 = vadd.f32 %v990_v6, %v989_v61 }
 0x10d   : > { %v751_v8 = vadd.f32 %v1299_v3, %v722_v2  ;;  %v956_v11 = vpop.f32.mrf.mxu0  ;;  %v992_v12 = vpop.f32.mrf.mxu1 }
 0x10e   : > { %761 = vst.msk [vmem:[%s1236_s5 + $0x20] sm:$0xff] %vm232_vm0, %v739_v7  ;;  %v665_v13 = vadd.f32 %v955_v9, %v262_v0  ;;  %v677_v14 = vadd.f32 %v991_v10, %v274_v5 }
 0x10f   : > { %773 = vst.msk [vmem:[%s1236_s5 + $0x80] sm:$0xff] %vm232_vm0, %v751_v8  ;;  %v711_v16 = vld [vmem:[%s1236_s5 + $0x28] sm:$0xff]  ;;  %v957_v18 = vpop.f32.mrf.mxu0  ;;  %v993_v20 = vpop.f32.mrf.mxu1 }
 0x110   : > { %v723_v17 = vld [vmem:[%s1236_s5 + $0x88] sm:$0xff]  ;;  %v740_v21 = vadd.f32 %v1299_v3, %v711_v16  ;;  %688 = vst.msk [vmem:[%s1236_s5 + $0x38] sm:$0xff] %vm232_vm0, %v665_v13  ;;  %700 = vst.msk [vmem:[%s1236_s5 + $0x98] sm:$0xff] %vm232_vm0, %v677_v14  ;;  %v958_v23 = vadd.f32 %v957_v18, %v956_v11  ;;  %v994_v24 = vadd.f32 %v993_v20, %v992_v12 }
 0x111   : > { %v752_v22 = vadd.f32 %v1299_v3, %v723_v17  ;;  %v959_v25 = vpop.f32.mrf.mxu0  ;;  %v995_v26 = vpop.f32.mrf.mxu1 }
 0x112   : > { %762 = vst.msk [vmem:[%s1236_s5 + $0x28] sm:$0xff] %vm232_vm0, %v740_v21  ;;  %v666_v27 = vadd.f32 %v958_v23, %v263_v15  ;;  %v678_v28 = vadd.f32 %v994_v24, %v275_v19 }
 0x113   : > { %774 = vst.msk [vmem:[%s1236_s5 + $0x88] sm:$0xff] %vm232_vm0, %v752_v22  ;;  %v712_v30 = vld [vmem:[%s1236_s5 + $0x30] sm:$0xff]  ;;  %v960_v32 = vpop.f32.mrf.mxu0  ;;  %v996_v34 = vpop.f32.mrf.mxu1 }
 0x114   : > { %v724_v31 = vld [vmem:[%s1236_s5 + $0x90] sm:$0xff]  ;;  %v741_v35 = vadd.f32 %v1299_v3, %v712_v30  ;;  %689 = vst.msk [vmem:[%s1236_s5 + $0x40] sm:$0xff] %vm232_vm0, %v666_v27  ;;  %701 = vst.msk [vmem:[%s1236_s5 + $0xa0] sm:$0xff] %vm232_vm0, %v678_v28  ;;  %v961_v37 = vadd.f32 %v960_v32, %v959_v25  ;;  %v997_v38 = vadd.f32 %v996_v34, %v995_v26 }
 0x115   : > { %v753_v36 = vadd.f32 %v1299_v3, %v724_v31  ;;  %v962_v39 = vpop.f32.mrf.mxu0 }
 0x116   : > { %763 = vst.msk [vmem:[%s1236_s5 + $0x30] sm:$0xff] %vm232_vm0, %v741_v35  ;;  %v667_v40 = vadd.f32 %v961_v37, %v264_v29  ;;  %v679_v41 = vadd.f32 %v997_v38, %v276_v33 }
 0x117   : > { %775 = vst.msk [vmem:[%s1236_s5 + $0x90] sm:$0xff] %vm232_vm0, %v753_v36  ;;  %v713_v42 = vld [vmem:[%s1236_s5 + $0x38] sm:$0xff]  ;;  %v963_v45 = vpop.f32.mrf.mxu0 }
 0x118   : > { %v725_v43 = vld [vmem:[%s1236_s5 + $0x98] sm:$0xff]  ;;  %v742_v46 = vadd.f32 %v1299_v3, %v713_v42  ;;  %690 = vst.msk [vmem:[%s1236_s5 + $0x48] sm:$0xff] %vm232_vm0, %v667_v40  ;;  %702 = vst.msk [vmem:[%s1236_s5 + $0xa8] sm:$0xff] %vm232_vm0, %v679_v41  ;;  %v964_v48 = vadd.f32 %v963_v45, %v962_v39 }
 0x119   : > { %v754_v47 = vadd.f32 %v1299_v3, %v725_v43  ;;  %v965_v49 = vpop.f32.mrf.mxu0 }
 0x11a   : > { %764 = vst.msk [vmem:[%s1236_s5 + $0x38] sm:$0xff] %vm232_vm0, %v742_v46  ;;  %v668_v50 = vadd.f32 %v964_v48, %v265_v44 }
 0x11b   : > { %776 = vst.msk [vmem:[%s1236_s5 + $0x98] sm:$0xff] %vm232_vm0, %v754_v47  ;;  %v714_v51 = vld [vmem:[%s1236_s5 + $0x40] sm:$0xff]  ;;  %v966_v54 = vpop.f32.mrf.mxu0 }
 0x11c   : > { %v726_v52 = vld [vmem:[%s1236_s5 + $0xa0] sm:$0xff]  ;;  %v743_v55 = vadd.f32 %v1299_v3, %v714_v51  ;;  %691 = vst.msk [vmem:[%s1236_s5 + $0x50] sm:$0xff] %vm232_vm0, %v668_v50  ;;  %v967_v57 = vadd.f32 %v966_v54, %v965_v49 }
 0x11d   : > { %v755_v56 = vadd.f32 %v1299_v3, %v726_v52 }
 0x11e   : > { %765 = vst.msk [vmem:[%s1236_s5 + $0x40] sm:$0xff] %vm232_vm0, %v743_v55  ;;  %v669_v58 = vadd.f32 %v967_v57, %v266_v53 }
 0x11f   : > { %777 = vst.msk [vmem:[%s1236_s5 + $0xa0] sm:$0xff] %vm232_vm0, %v755_v56  ;;  %v715_v59 = vld [vmem:[%s1236_s5 + $0x48] sm:$0xff] }
 0x120   : > { %v727_v60 = vld [vmem:[%s1236_s5 + $0xa8] sm:$0xff]  ;;  %v744_v61 = vadd.f32 %v1299_v3, %v715_v59  ;;  %692 = vst.msk [vmem:[%s1236_s5 + $0x58] sm:$0xff] %vm232_vm0, %v669_v58 }
 0x121   : > { %v756_v62 = vadd.f32 %v1299_v3, %v727_v60 }
 0x122   : > { %766 = vst.msk [vmem:[%s1236_s5 + $0x48] sm:$0xff] %vm232_vm0, %v744_v61 }
 0x123   : > { %778 = vst.msk [vmem:[%s1236_s5 + $0xa8] sm:$0xff] %vm232_vm0, %v756_v62  ;;  %v716_v63 = vld [vmem:[%s1236_s5 + $0x50] sm:$0xff] }
 0x124   : > { %v745_v0 = vadd.f32 %v1299_v3, %v716_v63 }
 0x126   : > { %767 = vst.msk [vmem:[%s1236_s5 + $0x50] sm:$0xff] %vm232_vm0, %v745_v0 }
 0x127   : > { %v717_v1 = vld [vmem:[%s1236_s5 + $0x58] sm:$0xff] }
 0x128   : > { %v746_v2 = vadd.f32 %v1299_v3, %v717_v1 }
 0x12a   : > { %768 = vst.msk [vmem:[%s1236_s5 + $0x58] sm:$0xff] %vm232_vm0, %v746_v2 }
 0x12b PF: > { %s13_s14 = sadd.s32 1, %s1110_s14   ;;  %s1454_s12 = smov %s1106_s13 }
 0x12c   : > { %p10_p5 = scmp.ge.s32.totalorder %s13_s14, 4   ;;  %s1455_s13 = smov %s1457_s15 }
 0x12e   :  { %12 = sbr.rel (!%p10_p5) target bundleno = 2 (0x2), region = 73 }

// kernel: resnet_forward.22
= control target key start
LH: loop header
LB: loop body
LE: loop exit
PB: predicated region body
PF: predicated region fallthrough
CT: control target
= control target key end

     0   :  { %vm185_vm0 = vcmask 523264   ;;  %s528_s0 = inlined_call_operand.vmem [shape: f32[72,64], index: 0, kind: input, shape index: {}]   ;;  %s529_s1 = inlined_call_operand.vmem [shape: f32[72,64], index: 1, kind: input, shape index: {}]   ;;  %s530_s2 = inlined_call_operand.vmem [shape: f32[72,64], index: 2, kind: input, shape index: {}]   ;;  %s531_s3 = inlined_call_operand.vmem [shape: f32[72,64], index: 3, kind: input, shape index: {}]   ;;  %s532_s4 = inlined_call_operand.vmem [shape: f32[72,64], index: 4, kind: input, shape index: {}]   ;;  %s533_s5 = inlined_call_operand.vmem [shape: f32[72,64], index: 5, kind: input, shape index: {}]   ;;  %s534_s6 = inlined_call_operand.vmem [shape: f32[72,64], index: 6, kind: input, shape index: {}]   ;;  %s535_s7 = inlined_call_operand.vmem [shape: f32[72,64], index: 7, kind: input, shape index: {}]   ;;  %s536_s8 = inlined_call_operand.vmem [shape: f32[72,64], index: 8, kind: input, shape index: {}]   ;;  %s537_s9 = inlined_call_operand.vmem [shape: f32[72,64], index: 9, kind: output, shape index: {}]  }
   0x1   :  { %v32_v0 = vld [vmem:[%s528_s0] sm:$0xff]  ;;  %v33_v6 = vld [vmem:[%s528_s0 + $0x8] sm:$0xff]  ;;  %v34_v15 = vld [vmem:[%s528_s0 + $0x10] sm:$0xff] }
   0x2   :  { %v41_v1 = vld [vmem:[%s529_s1] sm:$0xff]  ;;  %v42_v7 = vld [vmem:[%s529_s1 + $0x8] sm:$0xff]  ;;  %v43_v16 = vld [vmem:[%s529_s1 + $0x10] sm:$0xff] }
   0x3   :  { %v59_v2 = vld [vmem:[%s530_s2] sm:$0xff]  ;;  %v50_v3 = vmax.f32 %v32_v0, %v41_v1  ;;  %v60_v8 = vld [vmem:[%s530_s2 + $0x8] sm:$0xff]  ;;  %v51_v10 = vmax.f32 %v33_v6, %v42_v7  ;;  %v61_v17 = vld [vmem:[%s530_s2 + $0x10] sm:$0xff]  ;;  %v52_v20 = vmax.f32 %v34_v15, %v43_v16 }
   0x4   :  { %v77_v4 = vld [vmem:[%s531_s3] sm:$0xff]  ;;  %v78_v13 = vld [vmem:[%s531_s3 + $0x8] sm:$0xff]  ;;  %v79_v24 = vld [vmem:[%s531_s3 + $0x10] sm:$0xff] }
   0x5   :  { %v68_v5 = vmax.f32 %v50_v3, %v59_v2  ;;  %v95_v9 = vld [vmem:[%s532_s4] sm:$0xff]  ;;  %v69_v14 = vmax.f32 %v51_v10, %v60_v8  ;;  %v96_v19 = vld [vmem:[%s532_s4 + $0x8] sm:$0xff]  ;;  %v70_v26 = vmax.f32 %v52_v20, %v61_v17  ;;  %v35_v27 = vld [vmem:[%s528_s0 + $0x18] sm:$0xff] }
   0x6   :  { %v113_v12 = vld [vmem:[%s533_s5] sm:$0xff]  ;;  %v114_v23 = vld [vmem:[%s533_s5 + $0x8] sm:$0xff]  ;;  %v44_v28 = vld [vmem:[%s529_s1 + $0x18] sm:$0xff] }
   0x7   :  { %v86_v11 = vmax.f32 %v68_v5, %v77_v4  ;;  %v131_v21 = vld [vmem:[%s534_s6] sm:$0xff]  ;;  %v87_v22 = vmax.f32 %v69_v14, %v78_v13  ;;  %v62_v29 = vld [vmem:[%s530_s2 + $0x18] sm:$0xff]  ;;  %v97_v33 = vld [vmem:[%s532_s4 + $0x10] sm:$0xff]  ;;  %v53_v34 = vmax.f32 %v35_v27, %v44_v28  ;;  %v88_v37 = vmax.f32 %v70_v26, %v79_v24 }
   0x8   :  { %v149_v30 = vld [vmem:[%s535_s7] sm:$0xff]  ;;  %v132_v36 = vld [vmem:[%s534_s6 + $0x8] sm:$0xff]  ;;  %v115_v38 = vld [vmem:[%s533_s5 + $0x10] sm:$0xff] }
   0x9   :  { %v104_v18 = vmax.f32 %v86_v11, %v95_v9  ;;  %v167_v31 = vld [vmem:[%s536_s8] sm:$0xff]  ;;  %v105_v32 = vmax.f32 %v87_v22, %v96_v19  ;;  %v80_v39 = vld [vmem:[%s531_s3 + $0x18] sm:$0xff]  ;;  %v71_v41 = vmax.f32 %v53_v34, %v62_v29  ;;  %v150_v46 = vld [vmem:[%s535_s7 + $0x8] sm:$0xff]  ;;  %v106_v48 = vmax.f32 %v88_v37, %v97_v33 }
   0xa   :  { %v36_v42 = vld [vmem:[%s528_s0 + $0x20] sm:$0xff]  ;;  %v168_v47 = vld [vmem:[%s536_s8 + $0x8] sm:$0xff]  ;;  %v98_v49 = vld [vmem:[%s532_s4 + $0x18] sm:$0xff] }
   0xb   :  { %v122_v25 = vmax.f32 %v104_v18, %v113_v12  ;;  %v123_v40 = vmax.f32 %v105_v32, %v114_v23  ;;  %v45_v43 = vld [vmem:[%s529_s1 + $0x20] sm:$0xff]  ;;  %v133_v52 = vld [vmem:[%s534_s6 + $0x10] sm:$0xff]  ;;  %v89_v53 = vmax.f32 %v71_v41, %v80_v39  ;;  %v116_v54 = vld [vmem:[%s533_s5 + $0x18] sm:$0xff]  ;;  %v124_v57 = vmax.f32 %v106_v48, %v115_v38 }
   0xc   :  { %v63_v44 = vld [vmem:[%s530_s2 + $0x20] sm:$0xff]  ;;  %v54_v50 = vmax.f32 %v36_v42, %v45_v43  ;;  %v37_v59 = vld [vmem:[%s528_s0 + $0x28] sm:$0xff]  ;;  %v151_v63 = vld [vmem:[%s535_s7 + $0x10] sm:$0xff] }
   0xd   :  { %v140_v35 = vmax.f32 %v122_v25, %v131_v21  ;;  %v141_v51 = vmax.f32 %v123_v40, %v132_v36  ;;  %v81_v55 = vld [vmem:[%s531_s3 + $0x20] sm:$0xff]  ;;  %v46_v60 = vld [vmem:[%s529_s1 + $0x28] sm:$0xff]  ;;  %v169_v0 = vld [vmem:[%s536_s8 + $0x10] sm:$0xff]  ;;  %v107_v1 = vmax.f32 %v89_v53, %v98_v49  ;;  %v142_v4 = vmax.f32 %v124_v57, %v133_v52 }
   0xe   :  { %v72_v58 = vmax.f32 %v54_v50, %v63_v44  ;;  %v64_v61 = vld [vmem:[%s530_s2 + $0x28] sm:$0xff]  ;;  %v99_v2 = vld [vmem:[%s532_s4 + $0x20] sm:$0xff]  ;;  %v55_v3 = vmax.f32 %v37_v59, %v46_v60  ;;  %v134_v5 = vld [vmem:[%s534_s6 + $0x18] sm:$0xff] }
   0xf   :  { %v158_v45 = vmax.f32 %v140_v35, %v149_v30  ;;  %v159_v62 = vmax.f32 %v141_v51, %v150_v46  ;;  %v117_v7 = vld [vmem:[%s533_s5 + $0x20] sm:$0xff]  ;;  %v82_v8 = vld [vmem:[%s531_s3 + $0x28] sm:$0xff]  ;;  %v125_v10 = vmax.f32 %v107_v1, %v116_v54  ;;  %v38_v12 = vld [vmem:[%s528_s0 + $0x30] sm:$0xff]  ;;  %v160_v15 = vmax.f32 %v142_v4, %v151_v63 }
  0x10   :  { %v90_v6 = vmax.f32 %v72_v58, %v81_v55  ;;  %v73_v11 = vmax.f32 %v55_v3, %v64_v61  ;;  %v47_v13 = vld [vmem:[%s529_s1 + $0x30] sm:$0xff]  ;;  %v152_v16 = vld [vmem:[%s535_s7 + $0x18] sm:$0xff]  ;;  %v100_v19 = vld [vmem:[%s532_s4 + $0x28] sm:$0xff] }
  0x11   :  { %v176_v56 = vmax.f32 %v158_v45, %v167_v31  ;;  %v177_v9 = vmax.f32 %v159_v62, %v168_v47  ;;  %v65_v14 = vld [vmem:[%s530_s2 + $0x30] sm:$0xff]  ;;  %v170_v17 = vld [vmem:[%s536_s8 + $0x18] sm:$0xff]  ;;  %v56_v20 = vmax.f32 %v38_v12, %v47_v13  ;;  %v143_v21 = vmax.f32 %v125_v10, %v134_v5  ;;  %v135_v22 = vld [vmem:[%s534_s6 + $0x20] sm:$0xff] }
  0x12   :  { %v108_v18 = vmax.f32 %v90_v6, %v99_v2  ;;  %v91_v23 = vmax.f32 %v73_v11, %v82_v8  ;;  %v118_v24 = vld [vmem:[%s533_s5 + $0x28] sm:$0xff]  ;;  %v83_v25 = vld [vmem:[%s531_s3 + $0x30] sm:$0xff]  ;;  %v178_v26 = vmax.f32 %v160_v15, %v169_v0  ;;  %v39_v29 = vld [vmem:[%s528_s0 + $0x38] sm:$0xff] }
  0x13   :  { %186 = vst.msk [vmem:[%s537_s9] sm:$0xff] %vm185_vm0, %v176_v56  ;;  %187 = vst.msk [vmem:[%s537_s9 + $0x8] sm:$0xff] %vm185_vm0, %v177_v9  ;;  %v74_v28 = vmax.f32 %v56_v20, %v65_v14  ;;  %v48_v30 = vld [vmem:[%s529_s1 + $0x38] sm:$0xff]  ;;  %v161_v32 = vmax.f32 %v143_v21, %v152_v16  ;;  %v153_v33 = vld [vmem:[%s535_s7 + $0x20] sm:$0xff] }
  0x14   :  { %v126_v27 = vmax.f32 %v108_v18, %v117_v7  ;;  %v66_v31 = vld [vmem:[%s530_s2 + $0x38] sm:$0xff]  ;;  %v171_v34 = vld [vmem:[%s536_s8 + $0x20] sm:$0xff]  ;;  %v109_v35 = vmax.f32 %v91_v23, %v100_v19  ;;  %v101_v36 = vld [vmem:[%s532_s4 + $0x30] sm:$0xff]  ;;  %v57_v37 = vmax.f32 %v39_v29, %v48_v30  ;;  %188 = vst.msk [vmem:[%s537_s9 + $0x10] sm:$0xff] %vm185_vm0, %v178_v26 }
  0x15   :  { %v136_v39 = vld [vmem:[%s534_s6 + $0x28] sm:$0xff]  ;;  %v92_v40 = vmax.f32 %v74_v28, %v83_v25  ;;  %v119_v41 = vld [vmem:[%s533_s5 + $0x30] sm:$0xff]  ;;  %v84_v42 = vld [vmem:[%s531_s3 + $0x38] sm:$0xff]  ;;  %v179_v43 = vmax.f32 %v161_v32, %v170_v17 }
  0x16   :  { %v144_v38 = vmax.f32 %v126_v27, %v135_v22  ;;  %v127_v44 = vmax.f32 %v109_v35, %v118_v24  ;;  %v75_v45 = vmax.f32 %v57_v37, %v66_v31  ;;  %v40_v46 = vld [vmem:[%s528_s0 + $0x40] sm:$0xff]  ;;  %v154_v50 = vld [vmem:[%s535_s7 + $0x28] sm:$0xff]  ;;  %v102_v52 = vld [vmem:[%s532_s4 + $0x38] sm:$0xff] }
  0x17   :  { %v49_v47 = vld [vmem:[%s529_s1 + $0x40] sm:$0xff]  ;;  %v110_v51 = vmax.f32 %v92_v40, %v101_v36  ;;  %189 = vst.msk [vmem:[%s537_s9 + $0x18] sm:$0xff] %vm185_vm0, %v179_v43  ;;  %v137_v55 = vld [vmem:[%s534_s6 + $0x30] sm:$0xff]  ;;  %v172_v59 = vld [vmem:[%s536_s8 + $0x28] sm:$0xff] }
  0x18   :  { %v67_v48 = vld [vmem:[%s530_s2 + $0x40] sm:$0xff]  ;;  %v162_v49 = vmax.f32 %v144_v38, %v153_v33  ;;  %v58_v53 = vmax.f32 %v40_v46, %v49_v47  ;;  %v145_v54 = vmax.f32 %v127_v44, %v136_v39  ;;  %v93_v56 = vmax.f32 %v75_v45, %v84_v42  ;;  %v120_v61 = vld [vmem:[%s533_s5 + $0x38] sm:$0xff]  ;;  %v155_v0 = vld [vmem:[%s535_s7 + $0x30] sm:$0xff] }
  0x19   :  { %v85_v57 = vld [vmem:[%s531_s3 + $0x40] sm:$0xff]  ;;  %v128_v60 = vmax.f32 %v110_v51, %v119_v41  ;;  %v138_v4 = vld [vmem:[%s534_s6 + $0x38] sm:$0xff]  ;;  %v173_v7 = vld [vmem:[%s536_s8 + $0x30] sm:$0xff] }
  0x1a   :  { %v180_v58 = vmax.f32 %v162_v49, %v171_v34  ;;  %v76_v62 = vmax.f32 %v58_v53, %v67_v48  ;;  %v163_v63 = vmax.f32 %v145_v54, %v154_v50  ;;  %v111_v1 = vmax.f32 %v93_v56, %v102_v52  ;;  %v103_v2 = vld [vmem:[%s532_s4 + $0x40] sm:$0xff]  ;;  %v156_v11 = vld [vmem:[%s535_s7 + $0x38] sm:$0xff] }
  0x1b   :  { %v146_v3 = vmax.f32 %v128_v60, %v137_v55  ;;  %v121_v9 = vld [vmem:[%s533_s5 + $0x40] sm:$0xff]  ;;  %v174_v16 = vld [vmem:[%s536_s8 + $0x38] sm:$0xff] }
  0x1c   :  { %190 = vst.msk [vmem:[%s537_s9 + $0x20] sm:$0xff] %vm185_vm0, %v180_v58  ;;  %v94_v5 = vmax.f32 %v76_v62, %v85_v57  ;;  %v181_v6 = vmax.f32 %v163_v63, %v172_v59  ;;  %v129_v8 = vmax.f32 %v111_v1, %v120_v61  ;;  %v139_v14 = vld [vmem:[%s534_s6 + $0x40] sm:$0xff] }
  0x1d   :  { %v164_v10 = vmax.f32 %v146_v3, %v155_v0  ;;  %v157_v19 = vld [vmem:[%s535_s7 + $0x40] sm:$0xff] }
  0x1e   :  { %v112_v12 = vmax.f32 %v94_v5, %v103_v2  ;;  %191 = vst.msk [vmem:[%s537_s9 + $0x28] sm:$0xff] %vm185_vm0, %v181_v6  ;;  %v147_v13 = vmax.f32 %v129_v8, %v138_v4  ;;  %v175_v22 = vld [vmem:[%s536_s8 + $0x40] sm:$0xff] }
  0x1f   :  { %v182_v15 = vmax.f32 %v164_v10, %v173_v7 }
  0x20   :  { %v130_v17 = vmax.f32 %v112_v12, %v121_v9  ;;  %v165_v18 = vmax.f32 %v147_v13, %v156_v11 }
  0x21   :  { %192 = vst.msk [vmem:[%s537_s9 + $0x30] sm:$0xff] %vm185_vm0, %v182_v15 }
  0x22   :  { %v148_v20 = vmax.f32 %v130_v17, %v139_v14  ;;  %v183_v21 = vmax.f32 %v165_v18, %v174_v16 }
  0x24   :  { %v166_v23 = vmax.f32 %v148_v20, %v157_v19  ;;  %193 = vst.msk [vmem:[%s537_s9 + $0x38] sm:$0xff] %vm185_vm0, %v183_v21 }
  0x26   :  { %v184_v24 = vmax.f32 %v166_v23, %v175_v22 }
  0x28   :  { %194 = vst.msk [vmem:[%s537_s9 + $0x40] sm:$0xff] %vm185_vm0, %v184_v24 }

// kernel: resnet_forward.23
= control target key start
LH: loop header
LB: loop body
LE: loop exit
PB: predicated region body
PF: predicated region fallthrough
CT: control target
= control target key end

     0   :  { %v1282_v34 = vmov 0.0   ;;  %vm1283_vm0 = vmmov 0   ;;  %vm22_vm1 = vcmask 523264   ;;  %s1771_s1 = inlined_call_operand.vmem [shape: bf16[640,64], index: 1, kind: input, shape index: {}]   ;;  %s1772_s0 = inlined_call_operand.vmem [shape: bf16[80,640], index: 0, kind: input, shape index: {}]   ;;  %s1773_s4 = inlined_call_operand.vmem [shape: f32[80,64], index: 4, kind: output, shape index: {}]   ;;  %s1774_s2 = inlined_call_operand.vmem [shape: f32[1,64], index: 2, kind: input, shape index: {}]   ;;  %s1775_s3 = inlined_call_operand.vmem [shape: f32[1,64], index: 3, kind: input, shape index: {}]  }
   0x1   :  { %v1205_v0 = vld [vmem:[%s1771_s1 + $0x78] sm:$0xff]   ;;  %v1209_v4 = vld [vmem:[%s1771_s1 + $0x70] sm:$0xff]   ;;  %v1213_v8 = vld [vmem:[%s1771_s1 + $0x68] sm:$0xff]   ;;  %23 = vst.msk [vmem:[%s1773_s4] sm:$0xff] %vm22_vm1, %v1282_v34 }
   0x2   :  { %v1206_v1 = vld [vmem:[%s1771_s1 + $0xf8] sm:$0xff]   ;;  %1046 = vmatprep.subr.bf16.mxu0 %v1205_v0  ;;  %v1210_v5 = vld [vmem:[%s1771_s1 + $0xf0] sm:$0xff]   ;;  %v1214_v9 = vld [vmem:[%s1771_s1 + $0xe8] sm:$0xff]   ;;  %24 = vst.msk [vmem:[%s1773_s4 + $0x8] sm:$0xff] %vm22_vm1, %v1282_v34 }
   0x3   :  { %v1207_v2 = vld [vmem:[%s1771_s1 + $0x38] sm:$0xff]   ;;  %1092 = vmatprep.subr.bf16.mxu1 %v1206_v1  ;;  %v1211_v6 = vld [vmem:[%s1771_s1 + $0x30] sm:$0xff]   ;;  %v1215_v10 = vld [vmem:[%s1771_s1 + $0x28] sm:$0xff]   ;;  %25 = vst.msk [vmem:[%s1773_s4 + $0x10] sm:$0xff] %vm22_vm1, %v1282_v34 }
   0x4   :  { %v1208_v3 = vld [vmem:[%s1771_s1 + $0xb8] sm:$0xff]   ;;  %1047 = vmatpush3.bf16.msra.mxu0 %v1207_v2  ;;  %v1212_v7 = vld [vmem:[%s1771_s1 + $0xb0] sm:$0xff]   ;;  %v1216_v11 = vld [vmem:[%s1771_s1 + $0xa8] sm:$0xff]   ;;  %26 = vst.msk [vmem:[%s1773_s4 + $0x18] sm:$0xff] %vm22_vm1, %v1282_v34 }
   0x5   :  { %1093 = vmatpush3.bf16.msra.mxu1 %v1208_v3  ;;  %1048 = vmatprep.subr.bf16.mxu0 %v1209_v4  ;;  %v1217_v12 = vld [vmem:[%s1771_s1 + $0x60] sm:$0xff]   ;;  %v1221_v16 = vld [vmem:[%s1771_s1 + $0x58] sm:$0xff]   ;;  %v1225_v20 = vld [vmem:[%s1771_s1 + $0x50] sm:$0xff]   ;;  %27 = vst.msk [vmem:[%s1773_s4 + $0x20] sm:$0xff] %vm22_vm1, %v1282_v34 }
   0x6   :  { %1094 = vmatprep.subr.bf16.mxu1 %v1210_v5  ;;  %v1218_v13 = vld [vmem:[%s1771_s1 + $0xe0] sm:$0xff]   ;;  %v1222_v17 = vld [vmem:[%s1771_s1 + $0xd8] sm:$0xff]   ;;  %v1226_v21 = vld [vmem:[%s1771_s1 + $0xd0] sm:$0xff]   ;;  %28 = vst.msk [vmem:[%s1773_s4 + $0x28] sm:$0xff] %vm22_vm1, %v1282_v34 }
   0x7   :  { %v1219_v14 = vld [vmem:[%s1771_s1 + $0x20] sm:$0xff]   ;;  %v1223_v18 = vld [vmem:[%s1771_s1 + $0x18] sm:$0xff]   ;;  %v1227_v22 = vld [vmem:[%s1771_s1 + $0x10] sm:$0xff]   ;;  %29 = vst.msk [vmem:[%s1773_s4 + $0x30] sm:$0xff] %vm22_vm1, %v1282_v34 }
   0x8   :  { %1049 = vmatpush3.bf16.msra.mxu0 %v1211_v6  ;;  %v1220_v15 = vld [vmem:[%s1771_s1 + $0xa0] sm:$0xff]   ;;  %v1224_v19 = vld [vmem:[%s1771_s1 + $0x98] sm:$0xff]   ;;  %v1228_v23 = vld [vmem:[%s1771_s1 + $0x90] sm:$0xff]   ;;  %30 = vst.msk [vmem:[%s1773_s4 + $0x38] sm:$0xff] %vm22_vm1, %v1282_v34 }
   0x9   :  { %1095 = vmatpush3.bf16.msra.mxu1 %v1212_v7  ;;  %1050 = vmatprep.subr.bf16.mxu0 %v1213_v8  ;;  %v1229_v24 = vld [vmem:[%s1771_s1 + $0x48] sm:$0xff]   ;;  %v1233_v28 = vld [vmem:[%s1771_s1 + $0x40] sm:$0xff]   ;;  %v1243_v37 = vld [vmem:[%s1771_s1 + $0x138] sm:$0xff]   ;;  %31 = vst.msk [vmem:[%s1773_s4 + $0x40] sm:$0xff] %vm22_vm1, %v1282_v34 }
   0xa   :  { %1096 = vmatprep.subr.bf16.mxu1 %v1214_v9  ;;  %v1230_v25 = vld [vmem:[%s1771_s1 + $0xc8] sm:$0xff]   ;;  %v1234_v29 = vld [vmem:[%s1771_s1 + $0xc0] sm:$0xff]   ;;  %v1244_v38 = vld [vmem:[%s1771_s1 + $0x130] sm:$0xff]   ;;  %32 = vst.msk [vmem:[%s1773_s4 + $0x48] sm:$0xff] %vm22_vm1, %v1282_v34 }
   0xb   :  { %v1231_v26 = vld [vmem:[%s1771_s1 + $0x8] sm:$0xff]   ;;  %v1235_v30 = vld [vmem:[%s1771_s1] sm:$0xff]   ;;  %v1254_v45 = vld [vmem:[%s1772_s0 + $0x5c] ss:$20 sps:$4 sm:$0xff]  }
   0xc   :  { %1051 = vmatpush3.bf16.msra.mxu0 %v1215_v10  ;;  %v1232_v27 = vld [vmem:[%s1771_s1 + $0x88] sm:$0xff]   ;;  %v1236_v31 = vld [vmem:[%s1771_s1 + $0x80] sm:$0xff]   ;;  %v1259_v49 = vld [vmem:[%s1771_s1 + $0x118] sm:$0xff]  }
   0xd   :  { %1097 = vmatpush3.bf16.msra.mxu1 %v1216_v11  ;;  %1052 = vmatprep.subr.bf16.mxu0 %v1217_v12  ;;  %v1237_v32 = vld [vmem:[%s1772_s0] ss:$20 sps:$4 sm:$0xff]   ;;  %v1239_v33 = vld [vmem:[%s1772_s0 + $0x4] ss:$20 sps:$4 sm:$0xff]   ;;  %v1240_v35 = vld [vmem:[%s1772_s0 + $0x8] ss:$20 sps:$4 sm:$0xff]  }
   0xe   :  { %1098 = vmatprep.subr.bf16.mxu1 %v1218_v13  ;;  %v1242_v36 = vld [vmem:[%s1772_s0 + $0xc] ss:$20 sps:$4 sm:$0xff]   ;;  %555 = vmatprep.mubr.bf16.mxu0 %v1239_v33  ;;  %v1247_v40 = vld [vmem:[%s1772_s0 + $0x34] ss:$20 sps:$4 sm:$0xff]   ;;  %v1250_v42 = vld [vmem:[%s1772_s0 + $0x30] ss:$20 sps:$4 sm:$0xff]  }
   0xf   :  { %628 = vmatprep.mubr.bf16.mxu1 %v1242_v36  ;;  %v1245_v39 = vld [vmem:[%s1772_s0 + $0x2c] ss:$20 sps:$4 sm:$0xff]   ;;  %v1249_v41 = vld [vmem:[%s1772_s0 + $0x28] ss:$20 sps:$4 sm:$0xff]   ;;  %v1256_v47 = vld [vmem:[%s1772_s0 + $0x50] ss:$20 sps:$4 sm:$0xff]  }
  0x10   :  { %1053 = vmatpush3.bf16.msra.mxu0 %v1219_v14  ;;  %v1251_v43 = vld [vmem:[%s1771_s1 + $0x128] sm:$0xff]   ;;  %v1258_v46 = vld [vmem:[%s1771_s1 + $0x120] sm:$0xff]   ;;  %v1260_v50 = vld [vmem:[%s1772_s0 + $0x7c] ss:$20 sps:$4 sm:$0xff]  }
  0x11   :  { %1099 = vmatpush3.bf16.msra.mxu1 %v1220_v15  ;;  %1054 = vmatprep.subr.bf16.mxu0 %v1221_v16  ;;  %v1252_v44 = vld [vmem:[%s1772_s0 + $0x54] ss:$20 sps:$4 sm:$0xff]   ;;  %v1257_v48 = vld [vmem:[%s1772_s0 + $0x58] ss:$20 sps:$4 sm:$0xff]   ;;  %v1274_v58 = vld [vmem:[%s1771_s1 + $0x100] sm:$0xff]  }
  0x12   :  { %1100 = vmatprep.subr.bf16.mxu1 %v1222_v17  ;;  %v1262_v51 = vld [vmem:[%s1772_s0 + $0x84] ss:$20 sps:$4 sm:$0xff]   ;;  %v1266_v52 = vld [vmem:[%s1771_s1 + $0x110] sm:$0xff]   ;;  %v1269_v56 = vld [vmem:[%s1772_s0 + $0xac] ss:$20 sps:$4 sm:$0xff]  }
  0x13   :  { %v1264_v53 = vld [vmem:[%s1772_s0 + $0x78] ss:$20 sps:$4 sm:$0xff]   ;;  %v1265_v54 = vld [vmem:[%s1772_s0 + $0x80] ss:$20 sps:$4 sm:$0xff]   ;;  %v1273_v60 = vld [vmem:[%s1772_s0 + $0xa8] ss:$20 sps:$4 sm:$0xff]  }
  0x14   :  { %1055 = vmatpush3.bf16.msra.mxu0 %v1223_v18  ;;  %v1267_v55 = vld [vmem:[%s1772_s0 + $0xa4] ss:$20 sps:$4 sm:$0xff]   ;;  %v1271_v57 = vld [vmem:[%s1771_s1 + $0x108] sm:$0xff]   ;;  %v1272_v59 = vld [vmem:[%s1772_s0 + $0xa0] ss:$20 sps:$4 sm:$0xff]  }
  0x15   :  { %1101 = vmatpush3.bf16.msra.mxu1 %v1224_v19  ;;  %1056 = vmatprep.subr.bf16.mxu0 %v1225_v20  ;;  %v1275_v61 = vld [vmem:[%s1772_s0 + $0x10] ss:$20 sps:$4 sm:$0xff]   ;;  %v1276_v62 = vld [vmem:[%s1772_s0 + $0x88] ss:$20 sps:$4 sm:$0xff]   ;;  %v1277_v63 = vld [vmem:[%s1772_s0 + $0x38] ss:$20 sps:$4 sm:$0xff]  }
  0x16   :  { %1102 = vmatprep.subr.bf16.mxu1 %v1226_v21  ;;  %v1278_v0 = vld [vmem:[%s1772_s0 + $0xb0] ss:$20 sps:$4 sm:$0xff]   ;;  %v1279_v1 = vld [vmem:[%s1772_s0 + $0x60] ss:$20 sps:$4 sm:$0xff]  }
  0x18   :  { %1057 = vmatpush3.bf16.msra.mxu0 %v1227_v22 }
  0x19   :  { %1103 = vmatpush3.bf16.msra.mxu1 %v1228_v23  ;;  %1058 = vmatprep.subr.bf16.mxu0 %v1229_v24 }
  0x1a   :  { %1104 = vmatprep.subr.bf16.mxu1 %v1230_v25 }
  0x1c   :  { %1059 = vmatpush3.bf16.msra.mxu0 %v1231_v26 }
  0x1d   :  { %1105 = vmatpush3.bf16.msra.mxu1 %v1232_v27  ;;  %1060 = vmatprep.subr.bf16.mxu0 %v1233_v28 }
  0x1e   :  { %1106 = vmatprep.subr.bf16.mxu1 %v1234_v29 }
  0x20   :  { %1061 = vmatpush3.bf16.msra.mxu0 %v1235_v30 }
  0x21   :  { %1107 = vmatpush3.bf16.msra.mxu1 %v1236_v31  ;;  %1151 = vmatprep.subr.bf16.mxu0 %v1282_v34 }
  0x22   :  { %1187 = vmatprep.subr.bf16.mxu1 %v1282_v34 }
  0x23   :  { %556 = vmatmul.mubr.bf16.vlgmr.msra.gmra.mxu0 %v1237_v32 }
  0x24   :  { %629 = vmatmul.mubr.bf16.vlgmr.msra.gmra.mxu1 %v1240_v35  ;;  %1152 = vmatpush3.bf16.msra.mxu0 %v1243_v37 }
  0x25   :  { %1153 = vmatprep.subr.bf16.mxu0 %v1282_v34  ;;  %1195 = vmatpush3.bf16.msra.mxu1 %v1243_v37 }
  0x26   :  { %563 = vmatprep.mubr.bf16.mxu0 %v1245_v39  ;;  %1188 = vmatprep.subr.bf16.mxu1 %v1282_v34 }
  0x27   :  { %636 = vmatprep.mubr.bf16.mxu1 %v1247_v40 }
  0x28   :  { %1154 = vmatpush3.bf16.msra.mxu0 %v1244_v38 }
  0x29   :  { %1155 = vmatprep.subr.bf16.mxu0 %v1282_v34  ;;  %1196 = vmatpush3.bf16.msra.mxu1 %v1244_v38 }
  0x2a   :  { %1189 = vmatprep.subr.bf16.mxu1 %v1282_v34 }
  0x2b   :  { %564 = vmatmul.mubr.bf16.gmra.mxu0 %v1249_v41 }
  0x2c   :  { %637 = vmatmul.mubr.bf16.gmra.mxu1 %v1250_v42  ;;  %1156 = vmatpush3.bf16.msra.mxu0 %v1251_v43 }
  0x2d   :  { %571 = vmatprep.mubr.bf16.mxu0 %v1252_v44  ;;  %644 = vmatprep.mubr.bf16.mxu1 %v1254_v45 }
  0x2e   :  { %1157 = vmatprep.subr.bf16.mxu0 %v1282_v34  ;;  %1197 = vmatpush3.bf16.msra.mxu1 %v1251_v43 }
  0x2f   :  { %1190 = vmatprep.subr.bf16.mxu1 %v1282_v34 }
  0x30   :  { %1158 = vmatpush3.bf16.msra.mxu0 %v1258_v46 }
  0x31   :  { %1159 = vmatprep.subr.bf16.mxu0 %v1282_v34 }
  0x32   :  { %1198 = vmatpush3.bf16.msra.mxu1 %v1258_v46 }
  0x33   :  { %572 = vmatmul.mubr.bf16.gmra.mxu0 %v1256_v47  ;;  %1191 = vmatprep.subr.bf16.mxu1 %v1282_v34 }
  0x34   :  { %645 = vmatmul.mubr.bf16.gmra.mxu1 %v1257_v48  ;;  %1160 = vmatpush3.bf16.msra.mxu0 %v1259_v49 }
  0x35   :  { %579 = vmatprep.mubr.bf16.mxu0 %v1260_v50  ;;  %652 = vmatprep.mubr.bf16.mxu1 %v1262_v51  ;;  %v33_v51 = vld [vmem:[%s1773_s4] sm:$0xff] }
  0x36   :  { %1199 = vmatpush3.bf16.msra.mxu1 %v1259_v49  ;;  %1161 = vmatprep.subr.bf16.mxu0 %v1282_v34 }
  0x37   :  { %1192 = vmatprep.subr.bf16.mxu1 %v1282_v34 }
  0x38   :  { %1162 = vmatpush3.bf16.msra.mxu0 %v1266_v52 }
  0x39   :  { %1163 = vmatprep.subr.bf16.mxu0 %v1282_v34 }
  0x3a   :  { %1200 = vmatpush3.bf16.msra.mxu1 %v1266_v52 }
  0x3b   :  { %580 = vmatmul.mubr.bf16.gmra.mxu0 %v1264_v53  ;;  %1193 = vmatprep.subr.bf16.mxu1 %v1282_v34 }
  0x3c   :  { %653 = vmatmul.mubr.bf16.gmra.mxu1 %v1265_v54  ;;  %587 = vmatprep.mubr.bf16.mxu0 %v1267_v55  ;;  %v39_v55 = vld [vmem:[%s1773_s4 + $0x30] sm:$0xff] }
  0x3d   :  { %660 = vmatprep.mubr.bf16.mxu1 %v1269_v56  ;;  %1164 = vmatpush3.bf16.msra.mxu0 %v1271_v57 }
  0x3e   :  { %1201 = vmatpush3.bf16.msra.mxu1 %v1271_v57  ;;  %1165 = vmatprep.subr.bf16.mxu0 %v1282_v34 }
  0x3f   :  { %1194 = vmatprep.subr.bf16.mxu1 %v1282_v34 }
  0x41   :  { %1166 = vmatpush3.bf16.msra.mxu0 %v1274_v58 }
  0x42   :  { %1202 = vmatpush3.bf16.msra.mxu1 %v1274_v58 }
  0x43   :  { %588 = vmatmul.mubr.bf16.gmra.mxu0 %v1272_v59 }
  0x44   :  { %661 = vmatmul.mubr.bf16.gmra.mxu1 %v1273_v60  ;;  %1167 = vmatprep.mubr.msk.bf16.mxu0 %vm1283_vm0, %v1282_v34 }
  0x45   :  { %1179 = vmatprep.mubr.msk.bf16.mxu1 %vm1283_vm0, %v1282_v34 }
  0x4b   :  { %1168 = vmatmul.mubr.bf16.vlgmr.msra.gmra.mxu0 %v1275_v61 }
  0x4c   :  { %1180 = vmatmul.mubr.bf16.vlgmr.msra.gmra.mxu1 %v1276_v62  ;;  %1171 = vmatprep.mubr.msk.bf16.mxu0 %vm1283_vm0, %v1282_v34 }
  0x4d   :  { %1183 = vmatprep.mubr.msk.bf16.mxu1 %vm1283_vm0, %v1282_v34 }
  0x53   :  { %1172 = vmatmul.mubr.bf16.gmra.mxu0 %v1277_v63 }
  0x54   :  { %1184 = vmatmul.mubr.bf16.gmra.mxu1 %v1278_v0  ;;  %1175 = vmatprep.mubr.msk.bf16.mxu0 %vm1283_vm0, %v1282_v34 }
  0x5b   :  { %1176 = vmatmul.mubr.bf16.gmra.mxu0 %v1279_v1 }
  0xe3   :  { %v1062_v2 = vpop.f32.mrf.mxu0 }
  0xe4   :  { %v1108_v3 = vpop.f32.mrf.mxu1 }
  0xe5   :  { %v1063_v4 = vpop.f32.mrf.mxu0 }
  0xe6   :  { %v1109_v5 = vpop.f32.mrf.mxu1  ;;  %v1064_v37 = vadd.f32 %v1063_v4, %v1062_v2 }
  0xe7   :  { %v1065_v6 = vpop.f32.mrf.mxu0  ;;  %v1110_v38 = vadd.f32 %v1109_v5, %v1108_v3  ;;  %v34_v3 = vld [vmem:[%s1773_s4 + $0x8] sm:$0xff] }
  0xe8   :  { %v1111_v7 = vpop.f32.mrf.mxu1 }
  0xe9   :  { %v1066_v8 = vpop.f32.mrf.mxu0  ;;  %v631_v48 = vadd.f32 %v1110_v38, %v1064_v37 }
  0xea   :  { %v1112_v9 = vpop.f32.mrf.mxu1  ;;  %v1067_v45 = vadd.f32 %v1066_v8, %v1065_v6 }
  0xeb   :  { %v1068_v10 = vpop.f32.mrf.mxu0  ;;  %v1113_v46 = vadd.f32 %v1112_v9, %v1111_v7  ;;  %v40_v7 = vld [vmem:[%s1773_s4 + $0x38] sm:$0xff] }
  0xec   :  { %v1114_v11 = vpop.f32.mrf.mxu1 }
  0xed   :  { %v1069_v12 = vpop.f32.mrf.mxu0  ;;  %v634_v63 = vadd.f32 %v1113_v46, %v1067_v45 }
  0xee   :  { %v1115_v13 = vpop.f32.mrf.mxu1  ;;  %v1070_v59 = vadd.f32 %v1069_v12, %v1068_v10 }
  0xef   :  { %v1575_v14 = vpop.f32.mrf.mxu0  ;;  %v1116_v60 = vadd.f32 %v1115_v13, %v1114_v11 }
  0xf0   :  { %v1577_v15 = vpop.f32.mrf.mxu1 }
  0xf1   :  { %v1072_v16 = vpop.f32.mrf.mxu0 }
  0xf2   :  { %v1118_v17 = vpop.f32.mrf.mxu1  ;;  %v1073_v11 = vadd.f32 %v1072_v16, %v1575_v14 }
  0xf3   :  { %v1579_v18 = vpop.f32.mrf.mxu0  ;;  %v1119_v12 = vadd.f32 %v1118_v17, %v1577_v15  ;;  %v41_v15 = vld [vmem:[%s1773_s4 + $0x40] sm:$0xff] }
  0xf4   :  { %v1581_v19 = vpop.f32.mrf.mxu1 }
  0xf5   :  { %v1583_v20 = vpop.f32.mrf.mxu0 }
  0xf6   :  { %v1585_v21 = vpop.f32.mrf.mxu1 }
  0xf7   :  { %v1587_v22 = vpop.f32.mrf.mxu0 }
  0xf8   :  { %v1589_v23 = vpop.f32.mrf.mxu1 }
  0xf9   :  { %v1591_v24 = vpop.f32.mrf.mxu0 }
  0xfa   :  { %v1593_v25 = vpop.f32.mrf.mxu1  ;;  %v1079_v45 = vadd.f32 %v1591_v24, %v1587_v22 }
  0xfb   :  { %v1080_v26 = vpop.f32.mrf.mxu0  ;;  %v1125_v46 = vadd.f32 %v1593_v25, %v1589_v23  ;;  %v38_v25 = vld [vmem:[%s1773_s4 + $0x28] sm:$0xff] }
  0xfc   :  { %v1126_v27 = vpop.f32.mrf.mxu1 }
  0xfd   :  { %v1081_v28 = vpop.f32.mrf.mxu0  ;;  %v650_v24 = vadd.f32 %v1125_v46, %v1079_v45 }
  0xfe   :  { %v1127_v29 = vpop.f32.mrf.mxu1  ;;  %v1082_v40 = vadd.f32 %v1081_v28, %v1080_v26 }
  0xff   :  { %v1083_v30 = vpop.f32.mrf.mxu0  ;;  %v1128_v41 = vadd.f32 %v1127_v29, %v1126_v27  ;;  %v639_v27 = vadd.f32 %v1116_v60, %v1070_v59 }
 0x100   :  { %v1129_v31 = vpop.f32.mrf.mxu1 }
 0x101   :  { %v1084_v32 = vpop.f32.mrf.mxu0  ;;  %v655_v53 = vadd.f32 %v1128_v41, %v1082_v40  ;;  %v36_v41 = vld [vmem:[%s1773_s4 + $0x18] sm:$0xff] }
 0x102   :  { %v1130_v33 = vpop.f32.mrf.mxu1  ;;  %v1085_v49 = vadd.f32 %v1084_v32, %v1083_v30 }
 0x103   :  { %v1086_v34 = vpop.f32.mrf.mxu0  ;;  %v1131_v50 = vadd.f32 %v1130_v33, %v1129_v31  ;;  %v35_v31 = vld [vmem:[%s1773_s4 + $0x10] sm:$0xff] }
 0x104   :  { %v1132_v35 = vpop.f32.mrf.mxu1 }
 0x105   :  { %v1087_v36 = vpop.f32.mrf.mxu0  ;;  %v658_v5 = vadd.f32 %v1131_v50, %v1085_v49 }
 0x106   :  { %v1133_v39 = vpop.f32.mrf.mxu1  ;;  %v1088_v0 = vadd.f32 %v1087_v36, %v1086_v34  ;;  %v1122_v36 = vadd.f32 %v1585_v21, %v1581_v19 }
 0x107   :  { %v1089_v42 = vpop.f32.mrf.mxu0  ;;  %v1134_v1 = vadd.f32 %v1133_v39, %v1132_v35  ;;  %v1076_v35 = vadd.f32 %v1583_v20, %v1579_v18  ;;  %v642_v39 = vadd.f32 %v1119_v12, %v1073_v11  ;;  %v42_v18 = vld [vmem:[%s1773_s4 + $0x48] sm:$0xff] }
 0x108   :  { %v1135_v43 = vpop.f32.mrf.mxu1 }
 0x109   :  { %v1090_v44 = vpop.f32.mrf.mxu0  ;;  %v663_v33 = vadd.f32 %v1134_v1, %v1088_v0 }
 0x10a   :  { %v1136_v47 = vpop.f32.mrf.mxu1  ;;  %v1091_v28 = vadd.f32 %v1090_v44, %v1089_v42 }
 0x10b   :  { %v703_v52 = vpop.f32.mrf.mxu0  ;;  %v1137_v29 = vadd.f32 %v1136_v47, %v1135_v43 }
 0x10c   :  { %v704_v54 = vadd.f32 %v703_v52, %v631_v48  ;;  %v727_v56 = vpop.f32.mrf.mxu1  ;;  %v647_v48 = vadd.f32 %v1122_v36, %v1076_v35 }
 0x10d   :  { %v728_v57 = vadd.f32 %v727_v56, %v655_v53  ;;  %v1169_v58 = vpop.f32.mrf.mxu0  ;;  %v666_v43 = vadd.f32 %v1137_v29, %v1091_v28 }
 0x10e   :  { %v742_v61 = vadd.f32 %v704_v54, %v33_v51  ;;  %v1181_v62 = vpop.f32.mrf.mxu1  ;;  %v37_v51 = vld [vmem:[%s1773_s4 + $0x20] sm:$0xff] }
 0x10f   :  { %v748_v2 = vadd.f32 %v728_v57, %v39_v55  ;;  %v706_v4 = vpop.f32.mrf.mxu0 }
 0x110   :  { %753 = vst.msk [vmem:[%s1773_s4] sm:$0xff] %vm22_vm1, %v742_v61  ;;  %v707_v6 = vadd.f32 %v706_v4, %v634_v63  ;;  %v730_v8 = vpop.f32.mrf.mxu1 }
 0x111   :  { %759 = vst.msk [vmem:[%s1773_s4 + $0x30] sm:$0xff] %vm22_vm1, %v748_v2  ;;  %v731_v9 = vadd.f32 %v730_v8, %v658_v5  ;;  %v1170_v10 = vpop.f32.mrf.mxu0 }
 0x112   :  { %v743_v13 = vadd.f32 %v707_v6, %v34_v3  ;;  %v1182_v26 = vpop.f32.mrf.mxu1 }
 0x113   :  { %v749_v30 = vadd.f32 %v731_v9, %v40_v7  ;;  %v711_v32 = vpop.f32.mrf.mxu0 }
 0x114   :  { %754 = vst.msk [vmem:[%s1773_s4 + $0x8] sm:$0xff] %vm22_vm1, %v743_v13  ;;  %v712_v14 = vadd.f32 %v711_v32, %v639_v27  ;;  %v735_v16 = vpop.f32.mrf.mxu1 }
 0x115   :  { %760 = vst.msk [vmem:[%s1773_s4 + $0x38] sm:$0xff] %vm22_vm1, %v749_v30  ;;  %v736_v17 = vadd.f32 %v735_v16, %v663_v33  ;;  %v1173_v34 = vpop.f32.mrf.mxu0 }
 0x116   :  { %v744_v37 = vadd.f32 %v712_v14, %v35_v31  ;;  %v1185_v38 = vpop.f32.mrf.mxu1 }
 0x117   :  { %v750_v40 = vadd.f32 %v736_v17, %v41_v15  ;;  %v714_v42 = vpop.f32.mrf.mxu0  ;;  %v766_v57 = vld [vmem:[%s1773_s4] sm:$0xff] }
 0x118   :  { %755 = vst.msk [vmem:[%s1773_s4 + $0x10] sm:$0xff] %vm22_vm1, %v744_v37  ;;  %v715_v44 = vadd.f32 %v714_v42, %v642_v39  ;;  %v738_v19 = vpop.f32.mrf.mxu1  ;;  %v829_v63 = vsel %vm22_vm1, %v766_v57, 0.0  ;;  %v772_v8 = vld [vmem:[%s1773_s4 + $0x30] sm:$0xff] }
 0x119   :  { %761 = vst.msk [vmem:[%s1773_s4 + $0x40] sm:$0xff] %vm22_vm1, %v750_v40  ;;  %v739_v20 = vadd.f32 %v738_v19, %v666_v43  ;;  %v1174_v21 = vpop.f32.mrf.mxu0  ;;  %v840_v26 = vsel %vm22_vm1, %v772_v8, 0.0 }
 0x11a   :  { %v745_v47 = vadd.f32 %v715_v44, %v36_v41  ;;  %v1186_v49 = vpop.f32.mrf.mxu1 }
 0x11b   :  { %v751_v50 = vadd.f32 %v739_v20, %v42_v18  ;;  %v719_v52 = vpop.f32.mrf.mxu0  ;;  %v767_v55 = vld [vmem:[%s1773_s4 + $0x8] sm:$0xff] }
 0x11c   :  { %756 = vst.msk [vmem:[%s1773_s4 + $0x18] sm:$0xff] %vm22_vm1, %v745_v47  ;;  %v720_v53 = vadd.f32 %v719_v52, %v647_v48  ;;  %v830_v61 = vsel %vm22_vm1, %v767_v55, 0.0  ;;  %v773_v11 = vld [vmem:[%s1773_s4 + $0x38] sm:$0xff] }
 0x11d   :  { %762 = vst.msk [vmem:[%s1773_s4 + $0x48] sm:$0xff] %vm22_vm1, %v751_v50  ;;  %v1177_v22 = vpop.f32.mrf.mxu0  ;;  %v831_v1 = vadd.f32 %v830_v61, %v829_v63  ;;  %v842_v30 = vsel %vm22_vm1, %v773_v11, 0.0 }
 0x11e   :  { %v746_v23 = vadd.f32 %v720_v53, %v37_v51 }
 0x11f   :  { %v722_v54 = vpop.f32.mrf.mxu0  ;;  %v768_v58 = vld [vmem:[%s1773_s4 + $0x10] sm:$0xff] }
 0x120   :  { %757 = vst.msk [vmem:[%s1773_s4 + $0x20] sm:$0xff] %vm22_vm1, %v746_v23  ;;  %v723_v56 = vadd.f32 %v722_v54, %v650_v24  ;;  %v832_v0 = vsel %vm22_vm1, %v768_v58, 0.0  ;;  %v774_v27 = vld [vmem:[%s1773_s4 + $0x40] sm:$0xff] }
 0x121   :  { %v1178_v59 = vpop.f32.mrf.mxu0  ;;  %v833_v4 = vadd.f32 %v832_v0, %v831_v1  ;;  %v844_v32 = vsel %vm22_vm1, %v774_v27, 0.0 }
 0x122   :  { %v747_v60 = vadd.f32 %v723_v56, %v38_v25 }
 0x123   :  { %v769_v62 = vld [vmem:[%s1773_s4 + $0x18] sm:$0xff] }
 0x124   :  { %758 = vst.msk [vmem:[%s1773_s4 + $0x28] sm:$0xff] %vm22_vm1, %v747_v60  ;;  %v834_v2 = vsel %vm22_vm1, %v769_v62, 0.0  ;;  %v775_v12 = vld [vmem:[%s1773_s4 + $0x48] sm:$0xff] }
 0x125   :  { %v835_v6 = vadd.f32 %v834_v2, %v833_v4  ;;  %v828_v29 = vmul.f32 0.0, %v775_v12 }
 0x127   :  { %v770_v3 = vld [vmem:[%s1773_s4 + $0x20] sm:$0xff]  ;;  %v846_v14 = vsel %vm22_vm1, %v828_v29, 0.0 }
 0x128   :  { %v836_v5 = vsel %vm22_vm1, %v770_v3, 0.0 }
 0x129   :  { %v837_v9 = vadd.f32 %v836_v5, %v835_v6 }
 0x12b   :  { %v771_v7 = vld [vmem:[%s1773_s4 + $0x28] sm:$0xff] }
 0x12c   :  { %v838_v10 = vsel %vm22_vm1, %v771_v7, 0.0 }
 0x12d   :  { %v839_v13 = vadd.f32 %v838_v10, %v837_v9 }
 0x12f   :  { %v841_v28 = vadd.f32 %v840_v26, %v839_v13 }
 0x131   :  { %v843_v31 = vadd.f32 %v842_v30, %v841_v28  ;;  %v1044_v28 = vld [vmem:[%s1774_s2] ss:$0 sm:$0xff] }
 0x133   :  { %v845_v33 = vadd.f32 %v844_v32, %v843_v31 }
 0x135   :  { %v847_v15 = vadd.f32 %v846_v14, %v845_v33 }
 0x137   :  { %v848_v16 = vrot.slane %v847_v15, 4 }
 0x139   :  { %v849_v17 = vadd.f32 %v848_v16, %v847_v15 }
 0x13b   :  { %v850_v34 = vrot.slane %v849_v17, 2 }
 0x13d   :  { %v851_v35 = vadd.f32 %v850_v34, %v849_v17  ;;  %v1045_v17 = vld [vmem:[%s1775_s3] ss:$0 sm:$0xff] }
 0x13f   :  { %v852_v36 = vrot.slane %v851_v35, 1 }
 0x141   :  { %v853_v37 = vadd.f32 %v852_v36, %v851_v35 }
 0x143   :  { %v854_v38 = vmul.f32 0.013888889, %v853_v37 }
 0x145   :  { %v855_v39 = vsub.f32 %v766_v57, %v854_v38  ;;  %v856_v40 = vsub.f32 %v767_v55, %v854_v38  ;;  %v857_v41 = vsub.f32 %v768_v58, %v854_v38  ;;  %v858_v42 = vsub.f32 %v769_v62, %v854_v38 }
 0x146   :  { %v859_v18 = vsub.f32 %v770_v3, %v854_v38  ;;  %v860_v20 = vsub.f32 %v771_v7, %v854_v38  ;;  %v861_v48 = vsub.f32 %v772_v8, %v854_v38  ;;  %v862_v52 = vsub.f32 %v773_v11, %v854_v38 }
 0x147   :  { %v875_v43 = vmul.f32 %v855_v39, %v855_v39  ;;  %v876_v44 = vmul.f32 %v856_v40, %v856_v40  ;;  %v877_v19 = vmul.f32 %v857_v41, %v857_v41  ;;  %v878_v21 = vmul.f32 %v858_v42, %v858_v42 }
 0x148   :  { %v879_v49 = vmul.f32 %v859_v18, %v859_v18  ;;  %v864_v53 = vsub.f32 %v775_v12, %v854_v38  ;;  %v880_v22 = vmul.f32 %v860_v20, %v860_v20  ;;  %v863_v25 = vsub.f32 %v774_v27, %v854_v38 }
 0x149   :  { %v885_v45 = vsel %vm22_vm1, %v875_v43, 0.0  ;;  %v886_v46 = vsel %vm22_vm1, %v876_v44, 0.0  ;;  %v888_v50 = vsel %vm22_vm1, %v877_v19, 0.0  ;;  %v890_v23 = vsel %vm22_vm1, %v878_v21, 0.0 }
 0x14a   :  { %v887_v47 = vadd.f32 %v886_v46, %v885_v45  ;;  %v881_v54 = vmul.f32 %v861_v48, %v861_v48  ;;  %v892_v55 = vsel %vm22_vm1, %v879_v49, 0.0  ;;  %v874_v57 = vmul.f32 0.0, %v864_v53 }
 0x14b   :  { %v882_v58 = vmul.f32 %v862_v52, %v862_v52  ;;  %v894_v59 = vsel %vm22_vm1, %v880_v22, 0.0  ;;  %v883_v61 = vmul.f32 %v863_v25, %v863_v25 }
 0x14c   :  { %v889_v51 = vadd.f32 %v888_v50, %v887_v47  ;;  %v896_v62 = vsel %vm22_vm1, %v881_v54, 0.0  ;;  %v884_v0 = vmul.f32 %v874_v57, %v874_v57 }
 0x14d   :  { %v898_v1 = vsel %vm22_vm1, %v882_v58, 0.0  ;;  %v900_v3 = vsel %vm22_vm1, %v883_v61, 0.0 }
 0x14e   :  { %v891_v24 = vadd.f32 %v890_v23, %v889_v51  ;;  %v902_v5 = vsel %vm22_vm1, %v884_v0, 0.0 }
 0x150   :  { %v893_v56 = vadd.f32 %v892_v55, %v891_v24 }
 0x152   :  { %v895_v60 = vadd.f32 %v894_v59, %v893_v56 }
 0x154   :  { %v897_v63 = vadd.f32 %v896_v62, %v895_v60 }
 0x156   :  { %v899_v2 = vadd.f32 %v898_v1, %v897_v63 }
 0x158   :  { %v901_v4 = vadd.f32 %v900_v3, %v899_v2 }
 0x15a   :  { %v903_v6 = vadd.f32 %v902_v5, %v901_v4 }
 0x15c   :  { %v904_v7 = vrot.slane %v903_v6, 4 }
 0x15e   :  { %v905_v8 = vadd.f32 %v904_v7, %v903_v6 }
 0x160   :  { %v906_v9 = vrot.slane %v905_v8, 2 }
 0x162   :  { %v907_v10 = vadd.f32 %v906_v9, %v905_v8 }
 0x164   :  { %v908_v11 = vrot.slane %v907_v10, 1 }
 0x166   :  { %v909_v12 = vadd.f32 %v908_v11, %v907_v10 }
 0x168   :  { %v910_v13 = vmul.f32 0.013888889, %v909_v12 }
 0x16a   :  { %v911_v26 = vadd.f32 1e-05, %v910_v13 }
 0x16c   :  { %1280 = vrsqrt.f32 %v911_v26 }
 0x179   :  { %v1281_v27 = vpop.eup %1280 }
 0x17a   :  { %v913_v29 = vmul.f32 %v1281_v27, %v855_v39  ;;  %v914_v30 = vmul.f32 %v1281_v27, %v856_v40  ;;  %v915_v31 = vmul.f32 %v1281_v27, %v857_v41  ;;  %v916_v32 = vmul.f32 %v1281_v27, %v858_v42 }
 0x17b   :  { %v917_v33 = vmul.f32 %v1281_v27, %v859_v18  ;;  %v918_v14 = vmul.f32 %v1281_v27, %v860_v20  ;;  %v919_v15 = vmul.f32 %v1281_v27, %v861_v48  ;;  %v920_v16 = vmul.f32 %v1281_v27, %v862_v52 }
 0x17c   :  { %v921_v34 = vmul.f32 %v1281_v27, %v863_v25  ;;  %v922_v35 = vmul.f32 %v1281_v27, %v864_v53  ;;  %v929_v36 = vmul.f32 %v1044_v28, %v913_v29  ;;  %v930_v37 = vmul.f32 %v1044_v28, %v914_v30 }
 0x17d   :  { %v931_v38 = vmul.f32 %v1044_v28, %v915_v31  ;;  %v932_v43 = vmul.f32 %v1044_v28, %v916_v32  ;;  %v933_v44 = vmul.f32 %v1044_v28, %v917_v33  ;;  %v934_v19 = vmul.f32 %v1044_v28, %v918_v14 }
 0x17e   :  { %v935_v39 = vmul.f32 %v1044_v28, %v919_v15  ;;  %v936_v40 = vmul.f32 %v1044_v28, %v920_v16  ;;  %v937_v41 = vmul.f32 %v1044_v28, %v921_v34  ;;  %v938_v42 = vmul.f32 %v1044_v28, %v922_v35 }
 0x17f   :  { %v945_v18 = vadd.f32 %v1045_v17, %v929_v36  ;;  %v946_v20 = vadd.f32 %v1045_v17, %v930_v37  ;;  %v947_v21 = vadd.f32 %v1045_v17, %v931_v38  ;;  %v948_v45 = vadd.f32 %v1045_v17, %v932_v43 }
 0x180   :  { %v949_v46 = vadd.f32 %v1045_v17, %v933_v44  ;;  %v950_v47 = vadd.f32 %v1045_v17, %v934_v19  ;;  %v951_v48 = vadd.f32 %v1045_v17, %v935_v39  ;;  %v952_v49 = vadd.f32 %v1045_v17, %v936_v40 }
 0x181   :  { %v953_v50 = vadd.f32 %v1045_v17, %v937_v41  ;;  %v954_v51 = vadd.f32 %v1045_v17, %v938_v42  ;;  %v955_v52 = vmax.f32 %v945_v18, 0.0  ;;  %v956_v53 = vmax.f32 %v946_v20, 0.0 }
 0x182   :  { %v957_v22 = vmax.f32 %v947_v21, 0.0  ;;  %v958_v23 = vmax.f32 %v948_v45, 0.0  ;;  %v959_v24 = vmax.f32 %v949_v46, 0.0  ;;  %v960_v25 = vmax.f32 %v950_v47, 0.0 }
 0x183   :  { %v961_v54 = vmax.f32 %v951_v48, 0.0  ;;  %v962_v55 = vmax.f32 %v952_v49, 0.0  ;;  %v963_v56 = vmax.f32 %v953_v50, 0.0  ;;  %v964_v57 = vmax.f32 %v954_v51, 0.0  ;;  %965 = vst.msk [vmem:[%s1773_s4] sm:$0xff] %vm22_vm1, %v955_v52  ;;  %966 = vst.msk [vmem:[%s1773_s4 + $0x8] sm:$0xff] %vm22_vm1, %v956_v53 }
 0x184   :  { %967 = vst.msk [vmem:[%s1773_s4 + $0x10] sm:$0xff] %vm22_vm1, %v957_v22  ;;  %968 = vst.msk [vmem:[%s1773_s4 + $0x18] sm:$0xff] %vm22_vm1, %v958_v23 }
 0x185   :  { %969 = vst.msk [vmem:[%s1773_s4 + $0x20] sm:$0xff] %vm22_vm1, %v959_v24  ;;  %970 = vst.msk [vmem:[%s1773_s4 + $0x28] sm:$0xff] %vm22_vm1, %v960_v25 }
 0x186   :  { %971 = vst.msk [vmem:[%s1773_s4 + $0x30] sm:$0xff] %vm22_vm1, %v961_v54  ;;  %972 = vst.msk [vmem:[%s1773_s4 + $0x38] sm:$0xff] %vm22_vm1, %v962_v55 }
 0x187   :  { %973 = vst.msk [vmem:[%s1773_s4 + $0x40] sm:$0xff] %vm22_vm1, %v963_v56  ;;  %974 = vst.msk [vmem:[%s1773_s4 + $0x48] sm:$0xff] %vm22_vm1, %v964_v57 }

// kernel: resnet_forward.24
= control target key start
LH: loop header
LB: loop body
LE: loop exit
PB: predicated region body
PF: predicated region fallthrough
CT: control target
= control target key end

     0   :  { %v1315_v34 = vmov 0.0   ;;  %vm1316_vm0 = vmmov 0   ;;  %vm25_vm1 = vcmask 523264   ;;  %s1839_s1 = inlined_call_operand.vmem [shape: bf16[640,64], index: 1, kind: input, shape index: {}]   ;;  %s1840_s0 = inlined_call_operand.vmem [shape: bf16[80,640], index: 0, kind: input, shape index: {}]   ;;  %s1841_s5 = inlined_call_operand.vmem [shape: f32[80,64], index: 5, kind: output, shape index: {}]   ;;  %s1842_s2 = inlined_call_operand.vmem [shape: f32[1,64], index: 2, kind: input, shape index: {}]   ;;  %s1843_s3 = inlined_call_operand.vmem [shape: f32[1,64], index: 3, kind: input, shape index: {}]   ;;  %s1844_s4 = inlined_call_operand.vmem [shape: f32[80,64], index: 4, kind: input, shape index: {}]  }
   0x1   :  { %v1238_v0 = vld [vmem:[%s1839_s1 + $0x78] sm:$0xff]   ;;  %v1242_v4 = vld [vmem:[%s1839_s1 + $0x70] sm:$0xff]   ;;  %v1246_v8 = vld [vmem:[%s1839_s1 + $0x68] sm:$0xff]   ;;  %26 = vst.msk [vmem:[%s1841_s5] sm:$0xff] %vm25_vm1, %v1315_v34 }
   0x2   :  { %v1239_v1 = vld [vmem:[%s1839_s1 + $0xf8] sm:$0xff]   ;;  %1079 = vmatprep.subr.bf16.mxu0 %v1238_v0  ;;  %v1243_v5 = vld [vmem:[%s1839_s1 + $0xf0] sm:$0xff]   ;;  %v1247_v9 = vld [vmem:[%s1839_s1 + $0xe8] sm:$0xff]   ;;  %27 = vst.msk [vmem:[%s1841_s5 + $0x8] sm:$0xff] %vm25_vm1, %v1315_v34 }
   0x3   :  { %v1240_v2 = vld [vmem:[%s1839_s1 + $0x38] sm:$0xff]   ;;  %1125 = vmatprep.subr.bf16.mxu1 %v1239_v1  ;;  %v1244_v6 = vld [vmem:[%s1839_s1 + $0x30] sm:$0xff]   ;;  %v1248_v10 = vld [vmem:[%s1839_s1 + $0x28] sm:$0xff]   ;;  %28 = vst.msk [vmem:[%s1841_s5 + $0x10] sm:$0xff] %vm25_vm1, %v1315_v34 }
   0x4   :  { %v1241_v3 = vld [vmem:[%s1839_s1 + $0xb8] sm:$0xff]   ;;  %1080 = vmatpush3.bf16.msra.mxu0 %v1240_v2  ;;  %v1245_v7 = vld [vmem:[%s1839_s1 + $0xb0] sm:$0xff]   ;;  %v1249_v11 = vld [vmem:[%s1839_s1 + $0xa8] sm:$0xff]   ;;  %29 = vst.msk [vmem:[%s1841_s5 + $0x18] sm:$0xff] %vm25_vm1, %v1315_v34 }
   0x5   :  { %1126 = vmatpush3.bf16.msra.mxu1 %v1241_v3  ;;  %1081 = vmatprep.subr.bf16.mxu0 %v1242_v4  ;;  %v1250_v12 = vld [vmem:[%s1839_s1 + $0x60] sm:$0xff]   ;;  %v1254_v16 = vld [vmem:[%s1839_s1 + $0x58] sm:$0xff]   ;;  %v1258_v20 = vld [vmem:[%s1839_s1 + $0x50] sm:$0xff]   ;;  %30 = vst.msk [vmem:[%s1841_s5 + $0x20] sm:$0xff] %vm25_vm1, %v1315_v34 }
   0x6   :  { %1127 = vmatprep.subr.bf16.mxu1 %v1243_v5  ;;  %v1251_v13 = vld [vmem:[%s1839_s1 + $0xe0] sm:$0xff]   ;;  %v1255_v17 = vld [vmem:[%s1839_s1 + $0xd8] sm:$0xff]   ;;  %v1259_v21 = vld [vmem:[%s1839_s1 + $0xd0] sm:$0xff]   ;;  %31 = vst.msk [vmem:[%s1841_s5 + $0x28] sm:$0xff] %vm25_vm1, %v1315_v34 }
   0x7   :  { %v1252_v14 = vld [vmem:[%s1839_s1 + $0x20] sm:$0xff]   ;;  %v1256_v18 = vld [vmem:[%s1839_s1 + $0x18] sm:$0xff]   ;;  %v1260_v22 = vld [vmem:[%s1839_s1 + $0x10] sm:$0xff]   ;;  %32 = vst.msk [vmem:[%s1841_s5 + $0x30] sm:$0xff] %vm25_vm1, %v1315_v34 }
   0x8   :  { %1082 = vmatpush3.bf16.msra.mxu0 %v1244_v6  ;;  %v1253_v15 = vld [vmem:[%s1839_s1 + $0xa0] sm:$0xff]   ;;  %v1257_v19 = vld [vmem:[%s1839_s1 + $0x98] sm:$0xff]   ;;  %v1261_v23 = vld [vmem:[%s1839_s1 + $0x90] sm:$0xff]   ;;  %33 = vst.msk [vmem:[%s1841_s5 + $0x38] sm:$0xff] %vm25_vm1, %v1315_v34 }
   0x9   :  { %1128 = vmatpush3.bf16.msra.mxu1 %v1245_v7  ;;  %1083 = vmatprep.subr.bf16.mxu0 %v1246_v8  ;;  %v1262_v24 = vld [vmem:[%s1839_s1 + $0x48] sm:$0xff]   ;;  %v1266_v28 = vld [vmem:[%s1839_s1 + $0x40] sm:$0xff]   ;;  %v1276_v37 = vld [vmem:[%s1839_s1 + $0x138] sm:$0xff]   ;;  %34 = vst.msk [vmem:[%s1841_s5 + $0x40] sm:$0xff] %vm25_vm1, %v1315_v34 }
   0xa   :  { %1129 = vmatprep.subr.bf16.mxu1 %v1247_v9  ;;  %v1263_v25 = vld [vmem:[%s1839_s1 + $0xc8] sm:$0xff]   ;;  %v1267_v29 = vld [vmem:[%s1839_s1 + $0xc0] sm:$0xff]   ;;  %v1277_v38 = vld [vmem:[%s1839_s1 + $0x130] sm:$0xff]   ;;  %35 = vst.msk [vmem:[%s1841_s5 + $0x48] sm:$0xff] %vm25_vm1, %v1315_v34 }
   0xb   :  { %v1264_v26 = vld [vmem:[%s1839_s1 + $0x8] sm:$0xff]   ;;  %v1268_v30 = vld [vmem:[%s1839_s1] sm:$0xff]   ;;  %v1287_v45 = vld [vmem:[%s1840_s0 + $0x5c] ss:$20 sps:$4 sm:$0xff]  }
   0xc   :  { %1084 = vmatpush3.bf16.msra.mxu0 %v1248_v10  ;;  %v1265_v27 = vld [vmem:[%s1839_s1 + $0x88] sm:$0xff]   ;;  %v1269_v31 = vld [vmem:[%s1839_s1 + $0x80] sm:$0xff]   ;;  %v1292_v49 = vld [vmem:[%s1839_s1 + $0x118] sm:$0xff]  }
   0xd   :  { %1130 = vmatpush3.bf16.msra.mxu1 %v1249_v11  ;;  %1085 = vmatprep.subr.bf16.mxu0 %v1250_v12  ;;  %v1270_v32 = vld [vmem:[%s1840_s0] ss:$20 sps:$4 sm:$0xff]   ;;  %v1272_v33 = vld [vmem:[%s1840_s0 + $0x4] ss:$20 sps:$4 sm:$0xff]   ;;  %v1273_v35 = vld [vmem:[%s1840_s0 + $0x8] ss:$20 sps:$4 sm:$0xff]  }
   0xe   :  { %1131 = vmatprep.subr.bf16.mxu1 %v1251_v13  ;;  %v1275_v36 = vld [vmem:[%s1840_s0 + $0xc] ss:$20 sps:$4 sm:$0xff]   ;;  %558 = vmatprep.mubr.bf16.mxu0 %v1272_v33  ;;  %v1280_v40 = vld [vmem:[%s1840_s0 + $0x34] ss:$20 sps:$4 sm:$0xff]   ;;  %v1283_v42 = vld [vmem:[%s1840_s0 + $0x30] ss:$20 sps:$4 sm:$0xff]  }
   0xf   :  { %631 = vmatprep.mubr.bf16.mxu1 %v1275_v36  ;;  %v1278_v39 = vld [vmem:[%s1840_s0 + $0x2c] ss:$20 sps:$4 sm:$0xff]   ;;  %v1282_v41 = vld [vmem:[%s1840_s0 + $0x28] ss:$20 sps:$4 sm:$0xff]   ;;  %v1289_v47 = vld [vmem:[%s1840_s0 + $0x50] ss:$20 sps:$4 sm:$0xff]  }
  0x10   :  { %1086 = vmatpush3.bf16.msra.mxu0 %v1252_v14  ;;  %v1284_v43 = vld [vmem:[%s1839_s1 + $0x128] sm:$0xff]   ;;  %v1291_v46 = vld [vmem:[%s1839_s1 + $0x120] sm:$0xff]   ;;  %v1293_v50 = vld [vmem:[%s1840_s0 + $0x7c] ss:$20 sps:$4 sm:$0xff]  }
  0x11   :  { %1132 = vmatpush3.bf16.msra.mxu1 %v1253_v15  ;;  %1087 = vmatprep.subr.bf16.mxu0 %v1254_v16  ;;  %v1285_v44 = vld [vmem:[%s1840_s0 + $0x54] ss:$20 sps:$4 sm:$0xff]   ;;  %v1290_v48 = vld [vmem:[%s1840_s0 + $0x58] ss:$20 sps:$4 sm:$0xff]   ;;  %v1307_v58 = vld [vmem:[%s1839_s1 + $0x100] sm:$0xff]  }
  0x12   :  { %1133 = vmatprep.subr.bf16.mxu1 %v1255_v17  ;;  %v1295_v51 = vld [vmem:[%s1840_s0 + $0x84] ss:$20 sps:$4 sm:$0xff]   ;;  %v1299_v52 = vld [vmem:[%s1839_s1 + $0x110] sm:$0xff]   ;;  %v1302_v56 = vld [vmem:[%s1840_s0 + $0xac] ss:$20 sps:$4 sm:$0xff]  }
  0x13   :  { %v1297_v53 = vld [vmem:[%s1840_s0 + $0x78] ss:$20 sps:$4 sm:$0xff]   ;;  %v1298_v54 = vld [vmem:[%s1840_s0 + $0x80] ss:$20 sps:$4 sm:$0xff]   ;;  %v1306_v60 = vld [vmem:[%s1840_s0 + $0xa8] ss:$20 sps:$4 sm:$0xff]  }
  0x14   :  { %1088 = vmatpush3.bf16.msra.mxu0 %v1256_v18  ;;  %v1300_v55 = vld [vmem:[%s1840_s0 + $0xa4] ss:$20 sps:$4 sm:$0xff]   ;;  %v1304_v57 = vld [vmem:[%s1839_s1 + $0x108] sm:$0xff]   ;;  %v1305_v59 = vld [vmem:[%s1840_s0 + $0xa0] ss:$20 sps:$4 sm:$0xff]  }
  0x15   :  { %1134 = vmatpush3.bf16.msra.mxu1 %v1257_v19  ;;  %1089 = vmatprep.subr.bf16.mxu0 %v1258_v20  ;;  %v1308_v61 = vld [vmem:[%s1840_s0 + $0x10] ss:$20 sps:$4 sm:$0xff]   ;;  %v1309_v62 = vld [vmem:[%s1840_s0 + $0x88] ss:$20 sps:$4 sm:$0xff]   ;;  %v1310_v63 = vld [vmem:[%s1840_s0 + $0x38] ss:$20 sps:$4 sm:$0xff]  }
  0x16   :  { %1135 = vmatprep.subr.bf16.mxu1 %v1259_v21  ;;  %v1311_v0 = vld [vmem:[%s1840_s0 + $0xb0] ss:$20 sps:$4 sm:$0xff]   ;;  %v1312_v1 = vld [vmem:[%s1840_s0 + $0x60] ss:$20 sps:$4 sm:$0xff]  }
  0x18   :  { %1090 = vmatpush3.bf16.msra.mxu0 %v1260_v22 }
  0x19   :  { %1136 = vmatpush3.bf16.msra.mxu1 %v1261_v23  ;;  %1091 = vmatprep.subr.bf16.mxu0 %v1262_v24 }
  0x1a   :  { %1137 = vmatprep.subr.bf16.mxu1 %v1263_v25 }
  0x1c   :  { %1092 = vmatpush3.bf16.msra.mxu0 %v1264_v26 }
  0x1d   :  { %1138 = vmatpush3.bf16.msra.mxu1 %v1265_v27  ;;  %1093 = vmatprep.subr.bf16.mxu0 %v1266_v28 }
  0x1e   :  { %1139 = vmatprep.subr.bf16.mxu1 %v1267_v29 }
  0x20   :  { %1094 = vmatpush3.bf16.msra.mxu0 %v1268_v30 }
  0x21   :  { %1140 = vmatpush3.bf16.msra.mxu1 %v1269_v31  ;;  %1184 = vmatprep.subr.bf16.mxu0 %v1315_v34 }
  0x22   :  { %1220 = vmatprep.subr.bf16.mxu1 %v1315_v34 }
  0x23   :  { %559 = vmatmul.mubr.bf16.vlgmr.msra.gmra.mxu0 %v1270_v32 }
  0x24   :  { %632 = vmatmul.mubr.bf16.vlgmr.msra.gmra.mxu1 %v1273_v35  ;;  %1185 = vmatpush3.bf16.msra.mxu0 %v1276_v37 }
  0x25   :  { %1186 = vmatprep.subr.bf16.mxu0 %v1315_v34  ;;  %1228 = vmatpush3.bf16.msra.mxu1 %v1276_v37 }
  0x26   :  { %566 = vmatprep.mubr.bf16.mxu0 %v1278_v39  ;;  %1221 = vmatprep.subr.bf16.mxu1 %v1315_v34 }
  0x27   :  { %639 = vmatprep.mubr.bf16.mxu1 %v1280_v40 }
  0x28   :  { %1187 = vmatpush3.bf16.msra.mxu0 %v1277_v38 }
  0x29   :  { %1188 = vmatprep.subr.bf16.mxu0 %v1315_v34  ;;  %1229 = vmatpush3.bf16.msra.mxu1 %v1277_v38 }
  0x2a   :  { %1222 = vmatprep.subr.bf16.mxu1 %v1315_v34 }
  0x2b   :  { %567 = vmatmul.mubr.bf16.gmra.mxu0 %v1282_v41 }
  0x2c   :  { %640 = vmatmul.mubr.bf16.gmra.mxu1 %v1283_v42  ;;  %1189 = vmatpush3.bf16.msra.mxu0 %v1284_v43 }
  0x2d   :  { %574 = vmatprep.mubr.bf16.mxu0 %v1285_v44  ;;  %647 = vmatprep.mubr.bf16.mxu1 %v1287_v45 }
  0x2e   :  { %1190 = vmatprep.subr.bf16.mxu0 %v1315_v34  ;;  %1230 = vmatpush3.bf16.msra.mxu1 %v1284_v43 }
  0x2f   :  { %1223 = vmatprep.subr.bf16.mxu1 %v1315_v34 }
  0x30   :  { %1191 = vmatpush3.bf16.msra.mxu0 %v1291_v46 }
  0x31   :  { %1192 = vmatprep.subr.bf16.mxu0 %v1315_v34 }
  0x32   :  { %1231 = vmatpush3.bf16.msra.mxu1 %v1291_v46 }
  0x33   :  { %575 = vmatmul.mubr.bf16.gmra.mxu0 %v1289_v47  ;;  %1224 = vmatprep.subr.bf16.mxu1 %v1315_v34 }
  0x34   :  { %648 = vmatmul.mubr.bf16.gmra.mxu1 %v1290_v48  ;;  %1193 = vmatpush3.bf16.msra.mxu0 %v1292_v49 }
  0x35   :  { %582 = vmatprep.mubr.bf16.mxu0 %v1293_v50  ;;  %655 = vmatprep.mubr.bf16.mxu1 %v1295_v51  ;;  %v36_v51 = vld [vmem:[%s1841_s5] sm:$0xff] }
  0x36   :  { %1232 = vmatpush3.bf16.msra.mxu1 %v1292_v49  ;;  %1194 = vmatprep.subr.bf16.mxu0 %v1315_v34 }
  0x37   :  { %1225 = vmatprep.subr.bf16.mxu1 %v1315_v34 }
  0x38   :  { %1195 = vmatpush3.bf16.msra.mxu0 %v1299_v52 }
  0x39   :  { %1196 = vmatprep.subr.bf16.mxu0 %v1315_v34 }
  0x3a   :  { %1233 = vmatpush3.bf16.msra.mxu1 %v1299_v52 }
  0x3b   :  { %583 = vmatmul.mubr.bf16.gmra.mxu0 %v1297_v53  ;;  %1226 = vmatprep.subr.bf16.mxu1 %v1315_v34 }
  0x3c   :  { %656 = vmatmul.mubr.bf16.gmra.mxu1 %v1298_v54  ;;  %590 = vmatprep.mubr.bf16.mxu0 %v1300_v55  ;;  %v42_v55 = vld [vmem:[%s1841_s5 + $0x30] sm:$0xff] }
  0x3d   :  { %663 = vmatprep.mubr.bf16.mxu1 %v1302_v56  ;;  %1197 = vmatpush3.bf16.msra.mxu0 %v1304_v57 }
  0x3e   :  { %1234 = vmatpush3.bf16.msra.mxu1 %v1304_v57  ;;  %1198 = vmatprep.subr.bf16.mxu0 %v1315_v34 }
  0x3f   :  { %1227 = vmatprep.subr.bf16.mxu1 %v1315_v34 }
  0x41   :  { %1199 = vmatpush3.bf16.msra.mxu0 %v1307_v58 }
  0x42   :  { %1235 = vmatpush3.bf16.msra.mxu1 %v1307_v58 }
  0x43   :  { %591 = vmatmul.mubr.bf16.gmra.mxu0 %v1305_v59 }
  0x44   :  { %664 = vmatmul.mubr.bf16.gmra.mxu1 %v1306_v60  ;;  %1200 = vmatprep.mubr.msk.bf16.mxu0 %vm1316_vm0, %v1315_v34 }
  0x45   :  { %1212 = vmatprep.mubr.msk.bf16.mxu1 %vm1316_vm0, %v1315_v34 }
  0x4b   :  { %1201 = vmatmul.mubr.bf16.vlgmr.msra.gmra.mxu0 %v1308_v61 }
  0x4c   :  { %1213 = vmatmul.mubr.bf16.vlgmr.msra.gmra.mxu1 %v1309_v62  ;;  %1204 = vmatprep.mubr.msk.bf16.mxu0 %vm1316_vm0, %v1315_v34 }
  0x4d   :  { %1216 = vmatprep.mubr.msk.bf16.mxu1 %vm1316_vm0, %v1315_v34 }
  0x53   :  { %1205 = vmatmul.mubr.bf16.gmra.mxu0 %v1310_v63 }
  0x54   :  { %1217 = vmatmul.mubr.bf16.gmra.mxu1 %v1311_v0  ;;  %1208 = vmatprep.mubr.msk.bf16.mxu0 %vm1316_vm0, %v1315_v34 }
  0x5b   :  { %1209 = vmatmul.mubr.bf16.gmra.mxu0 %v1312_v1 }
  0xe3   :  { %v1095_v2 = vpop.f32.mrf.mxu0 }
  0xe4   :  { %v1141_v3 = vpop.f32.mrf.mxu1 }
  0xe5   :  { %v1096_v4 = vpop.f32.mrf.mxu0 }
  0xe6   :  { %v1142_v5 = vpop.f32.mrf.mxu1  ;;  %v1097_v37 = vadd.f32 %v1096_v4, %v1095_v2 }
  0xe7   :  { %v1098_v6 = vpop.f32.mrf.mxu0  ;;  %v1143_v38 = vadd.f32 %v1142_v5, %v1141_v3  ;;  %v37_v3 = vld [vmem:[%s1841_s5 + $0x8] sm:$0xff] }
  0xe8   :  { %v1144_v7 = vpop.f32.mrf.mxu1 }
  0xe9   :  { %v1099_v8 = vpop.f32.mrf.mxu0  ;;  %v634_v48 = vadd.f32 %v1143_v38, %v1097_v37 }
  0xea   :  { %v1145_v9 = vpop.f32.mrf.mxu1  ;;  %v1100_v45 = vadd.f32 %v1099_v8, %v1098_v6 }
  0xeb   :  { %v1101_v10 = vpop.f32.mrf.mxu0  ;;  %v1146_v46 = vadd.f32 %v1145_v9, %v1144_v7  ;;  %v43_v7 = vld [vmem:[%s1841_s5 + $0x38] sm:$0xff] }
  0xec   :  { %v1147_v11 = vpop.f32.mrf.mxu1 }
  0xed   :  { %v1102_v12 = vpop.f32.mrf.mxu0  ;;  %v637_v63 = vadd.f32 %v1146_v46, %v1100_v45 }
  0xee   :  { %v1148_v13 = vpop.f32.mrf.mxu1  ;;  %v1103_v59 = vadd.f32 %v1102_v12, %v1101_v10 }
  0xef   :  { %v1613_v14 = vpop.f32.mrf.mxu0  ;;  %v1149_v60 = vadd.f32 %v1148_v13, %v1147_v11 }
  0xf0   :  { %v1615_v15 = vpop.f32.mrf.mxu1 }
  0xf1   :  { %v1105_v16 = vpop.f32.mrf.mxu0 }
  0xf2   :  { %v1151_v17 = vpop.f32.mrf.mxu1  ;;  %v1106_v11 = vadd.f32 %v1105_v16, %v1613_v14 }
  0xf3   :  { %v1617_v18 = vpop.f32.mrf.mxu0  ;;  %v1152_v12 = vadd.f32 %v1151_v17, %v1615_v15  ;;  %v44_v15 = vld [vmem:[%s1841_s5 + $0x40] sm:$0xff] }
  0xf4   :  { %v1619_v19 = vpop.f32.mrf.mxu1 }
  0xf5   :  { %v1621_v20 = vpop.f32.mrf.mxu0 }
  0xf6   :  { %v1623_v21 = vpop.f32.mrf.mxu1 }
  0xf7   :  { %v1625_v22 = vpop.f32.mrf.mxu0 }
  0xf8   :  { %v1627_v23 = vpop.f32.mrf.mxu1 }
  0xf9   :  { %v1629_v24 = vpop.f32.mrf.mxu0 }
  0xfa   :  { %v1631_v25 = vpop.f32.mrf.mxu1  ;;  %v1112_v45 = vadd.f32 %v1629_v24, %v1625_v22 }
  0xfb   :  { %v1113_v26 = vpop.f32.mrf.mxu0  ;;  %v1158_v46 = vadd.f32 %v1631_v25, %v1627_v23  ;;  %v41_v25 = vld [vmem:[%s1841_s5 + $0x28] sm:$0xff] }
  0xfc   :  { %v1159_v27 = vpop.f32.mrf.mxu1 }
  0xfd   :  { %v1114_v28 = vpop.f32.mrf.mxu0  ;;  %v653_v24 = vadd.f32 %v1158_v46, %v1112_v45 }
  0xfe   :  { %v1160_v29 = vpop.f32.mrf.mxu1  ;;  %v1115_v40 = vadd.f32 %v1114_v28, %v1113_v26 }
  0xff   :  { %v1116_v30 = vpop.f32.mrf.mxu0  ;;  %v1161_v41 = vadd.f32 %v1160_v29, %v1159_v27  ;;  %v642_v27 = vadd.f32 %v1149_v60, %v1103_v59 }
 0x100   :  { %v1162_v31 = vpop.f32.mrf.mxu1 }
 0x101   :  { %v1117_v32 = vpop.f32.mrf.mxu0  ;;  %v658_v53 = vadd.f32 %v1161_v41, %v1115_v40  ;;  %v39_v41 = vld [vmem:[%s1841_s5 + $0x18] sm:$0xff] }
 0x102   :  { %v1163_v33 = vpop.f32.mrf.mxu1  ;;  %v1118_v49 = vadd.f32 %v1117_v32, %v1116_v30 }
 0x103   :  { %v1119_v34 = vpop.f32.mrf.mxu0  ;;  %v1164_v50 = vadd.f32 %v1163_v33, %v1162_v31  ;;  %v38_v31 = vld [vmem:[%s1841_s5 + $0x10] sm:$0xff] }
 0x104   :  { %v1165_v35 = vpop.f32.mrf.mxu1 }
 0x105   :  { %v1120_v36 = vpop.f32.mrf.mxu0  ;;  %v661_v5 = vadd.f32 %v1164_v50, %v1118_v49 }
 0x106   :  { %v1166_v39 = vpop.f32.mrf.mxu1  ;;  %v1121_v0 = vadd.f32 %v1120_v36, %v1119_v34  ;;  %v1155_v36 = vadd.f32 %v1623_v21, %v1619_v19 }
 0x107   :  { %v1122_v42 = vpop.f32.mrf.mxu0  ;;  %v1167_v1 = vadd.f32 %v1166_v39, %v1165_v35  ;;  %v1109_v35 = vadd.f32 %v1621_v20, %v1617_v18  ;;  %v645_v39 = vadd.f32 %v1152_v12, %v1106_v11  ;;  %v45_v18 = vld [vmem:[%s1841_s5 + $0x48] sm:$0xff] }
 0x108   :  { %v1168_v43 = vpop.f32.mrf.mxu1 }
 0x109   :  { %v1123_v44 = vpop.f32.mrf.mxu0  ;;  %v666_v33 = vadd.f32 %v1167_v1, %v1121_v0 }
 0x10a   :  { %v1169_v47 = vpop.f32.mrf.mxu1  ;;  %v1124_v28 = vadd.f32 %v1123_v44, %v1122_v42 }
 0x10b   :  { %v706_v52 = vpop.f32.mrf.mxu0  ;;  %v1170_v29 = vadd.f32 %v1169_v47, %v1168_v43 }
 0x10c   :  { %v707_v54 = vadd.f32 %v706_v52, %v634_v48  ;;  %v730_v56 = vpop.f32.mrf.mxu1  ;;  %v650_v48 = vadd.f32 %v1155_v36, %v1109_v35 }
 0x10d   :  { %v731_v57 = vadd.f32 %v730_v56, %v658_v53  ;;  %v1202_v58 = vpop.f32.mrf.mxu0  ;;  %v669_v43 = vadd.f32 %v1170_v29, %v1124_v28 }
 0x10e   :  { %v745_v61 = vadd.f32 %v707_v54, %v36_v51  ;;  %v1214_v62 = vpop.f32.mrf.mxu1  ;;  %v40_v51 = vld [vmem:[%s1841_s5 + $0x20] sm:$0xff] }
 0x10f   :  { %v751_v2 = vadd.f32 %v731_v57, %v42_v55  ;;  %v709_v4 = vpop.f32.mrf.mxu0 }
 0x110   :  { %756 = vst.msk [vmem:[%s1841_s5] sm:$0xff] %vm25_vm1, %v745_v61  ;;  %v710_v6 = vadd.f32 %v709_v4, %v637_v63  ;;  %v733_v8 = vpop.f32.mrf.mxu1 }
 0x111   :  { %762 = vst.msk [vmem:[%s1841_s5 + $0x30] sm:$0xff] %vm25_vm1, %v751_v2  ;;  %v734_v9 = vadd.f32 %v733_v8, %v661_v5  ;;  %v1203_v10 = vpop.f32.mrf.mxu0 }
 0x112   :  { %v746_v13 = vadd.f32 %v710_v6, %v37_v3  ;;  %v1215_v26 = vpop.f32.mrf.mxu1 }
 0x113   :  { %v752_v30 = vadd.f32 %v734_v9, %v43_v7  ;;  %v714_v32 = vpop.f32.mrf.mxu0 }
 0x114   :  { %757 = vst.msk [vmem:[%s1841_s5 + $0x8] sm:$0xff] %vm25_vm1, %v746_v13  ;;  %v715_v14 = vadd.f32 %v714_v32, %v642_v27  ;;  %v738_v16 = vpop.f32.mrf.mxu1 }
 0x115   :  { %763 = vst.msk [vmem:[%s1841_s5 + $0x38] sm:$0xff] %vm25_vm1, %v752_v30  ;;  %v739_v17 = vadd.f32 %v738_v16, %v666_v33  ;;  %v1206_v34 = vpop.f32.mrf.mxu0 }
 0x116   :  { %v747_v37 = vadd.f32 %v715_v14, %v38_v31  ;;  %v1218_v38 = vpop.f32.mrf.mxu1 }
 0x117   :  { %v753_v40 = vadd.f32 %v739_v17, %v44_v15  ;;  %v717_v42 = vpop.f32.mrf.mxu0  ;;  %v769_v57 = vld [vmem:[%s1841_s5] sm:$0xff] }
 0x118   :  { %758 = vst.msk [vmem:[%s1841_s5 + $0x10] sm:$0xff] %vm25_vm1, %v747_v37  ;;  %v718_v44 = vadd.f32 %v717_v42, %v645_v39  ;;  %v741_v19 = vpop.f32.mrf.mxu1  ;;  %v832_v63 = vsel %vm25_vm1, %v769_v57, 0.0  ;;  %v775_v8 = vld [vmem:[%s1841_s5 + $0x30] sm:$0xff] }
 0x119   :  { %764 = vst.msk [vmem:[%s1841_s5 + $0x40] sm:$0xff] %vm25_vm1, %v753_v40  ;;  %v742_v20 = vadd.f32 %v741_v19, %v669_v43  ;;  %v1207_v21 = vpop.f32.mrf.mxu0  ;;  %v843_v26 = vsel %vm25_vm1, %v775_v8, 0.0 }
 0x11a   :  { %v748_v47 = vadd.f32 %v718_v44, %v39_v41  ;;  %v1219_v49 = vpop.f32.mrf.mxu1 }
 0x11b   :  { %v754_v50 = vadd.f32 %v742_v20, %v45_v18  ;;  %v722_v52 = vpop.f32.mrf.mxu0  ;;  %v770_v55 = vld [vmem:[%s1841_s5 + $0x8] sm:$0xff] }
 0x11c   :  { %759 = vst.msk [vmem:[%s1841_s5 + $0x18] sm:$0xff] %vm25_vm1, %v748_v47  ;;  %v723_v53 = vadd.f32 %v722_v52, %v650_v48  ;;  %v833_v61 = vsel %vm25_vm1, %v770_v55, 0.0  ;;  %v776_v11 = vld [vmem:[%s1841_s5 + $0x38] sm:$0xff] }
 0x11d   :  { %765 = vst.msk [vmem:[%s1841_s5 + $0x48] sm:$0xff] %vm25_vm1, %v754_v50  ;;  %v1210_v22 = vpop.f32.mrf.mxu0  ;;  %v834_v1 = vadd.f32 %v833_v61, %v832_v63  ;;  %v845_v30 = vsel %vm25_vm1, %v776_v11, 0.0 }
 0x11e   :  { %v749_v23 = vadd.f32 %v723_v53, %v40_v51 }
 0x11f   :  { %v725_v54 = vpop.f32.mrf.mxu0  ;;  %v771_v58 = vld [vmem:[%s1841_s5 + $0x10] sm:$0xff] }
 0x120   :  { %760 = vst.msk [vmem:[%s1841_s5 + $0x20] sm:$0xff] %vm25_vm1, %v749_v23  ;;  %v726_v56 = vadd.f32 %v725_v54, %v653_v24  ;;  %v835_v0 = vsel %vm25_vm1, %v771_v58, 0.0  ;;  %v777_v27 = vld [vmem:[%s1841_s5 + $0x40] sm:$0xff] }
 0x121   :  { %v1211_v59 = vpop.f32.mrf.mxu0  ;;  %v836_v4 = vadd.f32 %v835_v0, %v834_v1  ;;  %v847_v32 = vsel %vm25_vm1, %v777_v27, 0.0 }
 0x122   :  { %v750_v60 = vadd.f32 %v726_v56, %v41_v25 }
 0x123   :  { %v772_v62 = vld [vmem:[%s1841_s5 + $0x18] sm:$0xff] }
 0x124   :  { %761 = vst.msk [vmem:[%s1841_s5 + $0x28] sm:$0xff] %vm25_vm1, %v750_v60  ;;  %v837_v2 = vsel %vm25_vm1, %v772_v62, 0.0  ;;  %v778_v12 = vld [vmem:[%s1841_s5 + $0x48] sm:$0xff] }
 0x125   :  { %v838_v6 = vadd.f32 %v837_v2, %v836_v4  ;;  %v831_v29 = vmul.f32 0.0, %v778_v12 }
 0x127   :  { %v773_v3 = vld [vmem:[%s1841_s5 + $0x20] sm:$0xff]  ;;  %v849_v14 = vsel %vm25_vm1, %v831_v29, 0.0 }
 0x128   :  { %v839_v5 = vsel %vm25_vm1, %v773_v3, 0.0 }
 0x129   :  { %v840_v9 = vadd.f32 %v839_v5, %v838_v6 }
 0x12b   :  { %v774_v7 = vld [vmem:[%s1841_s5 + $0x28] sm:$0xff] }
 0x12c   :  { %v841_v10 = vsel %vm25_vm1, %v774_v7, 0.0 }
 0x12d   :  { %v842_v13 = vadd.f32 %v841_v10, %v840_v9 }
 0x12f   :  { %v844_v28 = vadd.f32 %v843_v26, %v842_v13 }
 0x131   :  { %v846_v31 = vadd.f32 %v845_v30, %v844_v28  ;;  %v1077_v28 = vld [vmem:[%s1842_s2] ss:$0 sm:$0xff] }
 0x133   :  { %v848_v33 = vadd.f32 %v847_v32, %v846_v31 }
 0x135   :  { %v850_v15 = vadd.f32 %v849_v14, %v848_v33 }
 0x137   :  { %v851_v16 = vrot.slane %v850_v15, 4 }
 0x139   :  { %v852_v17 = vadd.f32 %v851_v16, %v850_v15 }
 0x13b   :  { %v853_v34 = vrot.slane %v852_v17, 2 }
 0x13d   :  { %v854_v35 = vadd.f32 %v853_v34, %v852_v17  ;;  %v1078_v17 = vld [vmem:[%s1843_s3] ss:$0 sm:$0xff] }
 0x13f   :  { %v855_v36 = vrot.slane %v854_v35, 1 }
 0x141   :  { %v856_v37 = vadd.f32 %v855_v36, %v854_v35 }
 0x143   :  { %v857_v38 = vmul.f32 0.013888889, %v856_v37 }
 0x145   :  { %v858_v39 = vsub.f32 %v769_v57, %v857_v38  ;;  %v859_v40 = vsub.f32 %v770_v55, %v857_v38  ;;  %v860_v41 = vsub.f32 %v771_v58, %v857_v38  ;;  %v861_v42 = vsub.f32 %v772_v62, %v857_v38 }
 0x146   :  { %v862_v18 = vsub.f32 %v773_v3, %v857_v38  ;;  %v863_v20 = vsub.f32 %v774_v7, %v857_v38  ;;  %v864_v48 = vsub.f32 %v775_v8, %v857_v38  ;;  %v865_v52 = vsub.f32 %v776_v11, %v857_v38 }
 0x147   :  { %v878_v43 = vmul.f32 %v858_v39, %v858_v39  ;;  %v879_v44 = vmul.f32 %v859_v40, %v859_v40  ;;  %v880_v19 = vmul.f32 %v860_v41, %v860_v41  ;;  %v881_v21 = vmul.f32 %v861_v42, %v861_v42 }
 0x148   :  { %v882_v49 = vmul.f32 %v862_v18, %v862_v18  ;;  %v867_v53 = vsub.f32 %v778_v12, %v857_v38  ;;  %v883_v22 = vmul.f32 %v863_v20, %v863_v20  ;;  %v866_v25 = vsub.f32 %v777_v27, %v857_v38 }
 0x149   :  { %v888_v45 = vsel %vm25_vm1, %v878_v43, 0.0  ;;  %v889_v46 = vsel %vm25_vm1, %v879_v44, 0.0  ;;  %v891_v50 = vsel %vm25_vm1, %v880_v19, 0.0  ;;  %v893_v23 = vsel %vm25_vm1, %v881_v21, 0.0 }
 0x14a   :  { %v890_v47 = vadd.f32 %v889_v46, %v888_v45  ;;  %v884_v54 = vmul.f32 %v864_v48, %v864_v48  ;;  %v895_v55 = vsel %vm25_vm1, %v882_v49, 0.0  ;;  %v877_v57 = vmul.f32 0.0, %v867_v53 }
 0x14b   :  { %v885_v58 = vmul.f32 %v865_v52, %v865_v52  ;;  %v897_v59 = vsel %vm25_vm1, %v883_v22, 0.0  ;;  %v886_v61 = vmul.f32 %v866_v25, %v866_v25 }
 0x14c   :  { %v892_v51 = vadd.f32 %v891_v50, %v890_v47  ;;  %v899_v62 = vsel %vm25_vm1, %v884_v54, 0.0  ;;  %v887_v0 = vmul.f32 %v877_v57, %v877_v57  ;;  %v968_v50 = vld [vmem:[%s1844_s4] sm:$0xff] }
 0x14d   :  { %v901_v1 = vsel %vm25_vm1, %v885_v58, 0.0  ;;  %v903_v3 = vsel %vm25_vm1, %v886_v61, 0.0  ;;  %v972_v54 = vld [vmem:[%s1844_s4 + $0x20] sm:$0xff]  ;;  %v975_v61 = vld [vmem:[%s1844_s4 + $0x38] sm:$0xff] }
 0x14e   :  { %v894_v24 = vadd.f32 %v893_v23, %v892_v51  ;;  %v905_v5 = vsel %vm25_vm1, %v887_v0, 0.0  ;;  %v969_v51 = vld [vmem:[%s1844_s4 + $0x8] sm:$0xff] }
 0x150   :  { %v896_v56 = vadd.f32 %v895_v55, %v894_v24  ;;  %v973_v55 = vld [vmem:[%s1844_s4 + $0x28] sm:$0xff] }
 0x152   :  { %v898_v60 = vadd.f32 %v897_v59, %v896_v56 }
 0x154   :  { %v900_v63 = vadd.f32 %v899_v62, %v898_v60  ;;  %v974_v60 = vld [vmem:[%s1844_s4 + $0x30] sm:$0xff] }
 0x156   :  { %v902_v2 = vadd.f32 %v901_v1, %v900_v63 }
 0x158   :  { %v904_v4 = vadd.f32 %v903_v3, %v902_v2  ;;  %v976_v2 = vld [vmem:[%s1844_s4 + $0x40] sm:$0xff]  ;;  %v977_v3 = vld [vmem:[%s1844_s4 + $0x48] sm:$0xff] }
 0x15a   :  { %v906_v6 = vadd.f32 %v905_v5, %v904_v4 }
 0x15c   :  { %v907_v7 = vrot.slane %v906_v6, 4 }
 0x15e   :  { %v908_v8 = vadd.f32 %v907_v7, %v906_v6 }
 0x160   :  { %v909_v9 = vrot.slane %v908_v8, 2 }
 0x162   :  { %v910_v10 = vadd.f32 %v909_v9, %v908_v8 }
 0x164   :  { %v911_v11 = vrot.slane %v910_v10, 1 }
 0x166   :  { %v912_v12 = vadd.f32 %v911_v11, %v910_v10 }
 0x168   :  { %v913_v13 = vmul.f32 0.013888889, %v912_v12 }
 0x16a   :  { %v914_v26 = vadd.f32 1e-05, %v913_v13 }
 0x16c   :  { %1313 = vrsqrt.f32 %v914_v26 }
 0x179   :  { %v1314_v27 = vpop.eup %1313 }
 0x17a   :  { %v916_v29 = vmul.f32 %v1314_v27, %v858_v39  ;;  %v917_v30 = vmul.f32 %v1314_v27, %v859_v40  ;;  %v918_v31 = vmul.f32 %v1314_v27, %v860_v41  ;;  %v919_v32 = vmul.f32 %v1314_v27, %v861_v42 }
 0x17b   :  { %v920_v33 = vmul.f32 %v1314_v27, %v862_v18  ;;  %v921_v14 = vmul.f32 %v1314_v27, %v863_v20  ;;  %v922_v15 = vmul.f32 %v1314_v27, %v864_v48  ;;  %v923_v16 = vmul.f32 %v1314_v27, %v865_v52  ;;  %v970_v52 = vld [vmem:[%s1844_s4 + $0x10] sm:$0xff] }
 0x17c   :  { %v924_v34 = vmul.f32 %v1314_v27, %v866_v25  ;;  %v925_v35 = vmul.f32 %v1314_v27, %v867_v53  ;;  %v932_v36 = vmul.f32 %v1077_v28, %v916_v29  ;;  %v933_v37 = vmul.f32 %v1077_v28, %v917_v30  ;;  %v971_v25 = vld [vmem:[%s1844_s4 + $0x18] sm:$0xff] }
 0x17d   :  { %v934_v38 = vmul.f32 %v1077_v28, %v918_v31  ;;  %v935_v43 = vmul.f32 %v1077_v28, %v919_v32  ;;  %v936_v44 = vmul.f32 %v1077_v28, %v920_v33  ;;  %v937_v19 = vmul.f32 %v1077_v28, %v921_v14 }
 0x17e   :  { %v938_v39 = vmul.f32 %v1077_v28, %v922_v15  ;;  %v939_v40 = vmul.f32 %v1077_v28, %v923_v16  ;;  %v940_v41 = vmul.f32 %v1077_v28, %v924_v34  ;;  %v941_v42 = vmul.f32 %v1077_v28, %v925_v35 }
 0x17f   :  { %v948_v18 = vadd.f32 %v1078_v17, %v932_v36  ;;  %v949_v20 = vadd.f32 %v1078_v17, %v933_v37  ;;  %v950_v21 = vadd.f32 %v1078_v17, %v934_v38  ;;  %v951_v45 = vadd.f32 %v1078_v17, %v935_v43 }
 0x180   :  { %v952_v46 = vadd.f32 %v1078_v17, %v936_v44  ;;  %v953_v47 = vadd.f32 %v1078_v17, %v937_v19  ;;  %v954_v48 = vadd.f32 %v1078_v17, %v938_v39  ;;  %v955_v49 = vadd.f32 %v1078_v17, %v939_v40 }
 0x181   :  { %v956_v53 = vadd.f32 %v1078_v17, %v940_v41  ;;  %v957_v22 = vadd.f32 %v1078_v17, %v941_v42  ;;  %v958_v23 = vmax.f32 %v948_v18, 0.0  ;;  %v959_v24 = vmax.f32 %v949_v20, 0.0 }
 0x182   :  { %v960_v56 = vmax.f32 %v950_v21, 0.0  ;;  %v961_v57 = vmax.f32 %v951_v45, 0.0  ;;  %v962_v58 = vmax.f32 %v952_v46, 0.0  ;;  %v963_v59 = vmax.f32 %v953_v47, 0.0 }
 0x183   :  { %v964_v62 = vmax.f32 %v954_v48, 0.0  ;;  %v965_v63 = vmax.f32 %v955_v49, 0.0  ;;  %v966_v0 = vmax.f32 %v956_v53, 0.0  ;;  %v967_v1 = vmax.f32 %v957_v22, 0.0 }
 0x184   :  { %v978_v4 = vadd.f32 %v968_v50, %v958_v23  ;;  %v979_v5 = vadd.f32 %v969_v51, %v959_v24  ;;  %v980_v6 = vadd.f32 %v970_v52, %v960_v56  ;;  %v981_v7 = vadd.f32 %v971_v25, %v961_v57 }
 0x185   :  { %v982_v8 = vadd.f32 %v972_v54, %v962_v58  ;;  %v983_v9 = vadd.f32 %v973_v55, %v963_v59  ;;  %v984_v10 = vadd.f32 %v974_v60, %v964_v62  ;;  %v985_v11 = vadd.f32 %v975_v61, %v965_v63 }
 0x186   :  { %v986_v12 = vadd.f32 %v976_v2, %v966_v0  ;;  %v987_v13 = vadd.f32 %v977_v3, %v967_v1  ;;  %v988_v26 = vmax.f32 %v978_v4, 0.0  ;;  %v989_v27 = vmax.f32 %v979_v5, 0.0 }
 0x187   :  { %v990_v28 = vmax.f32 %v980_v6, 0.0  ;;  %v991_v29 = vmax.f32 %v981_v7, 0.0  ;;  %v992_v30 = vmax.f32 %v982_v8, 0.0  ;;  %v993_v31 = vmax.f32 %v983_v9, 0.0 }
 0x188   :  { %v994_v32 = vmax.f32 %v984_v10, 0.0  ;;  %v995_v33 = vmax.f32 %v985_v11, 0.0  ;;  %v996_v14 = vmax.f32 %v986_v12, 0.0  ;;  %v997_v15 = vmax.f32 %v987_v13, 0.0  ;;  %998 = vst.msk [vmem:[%s1841_s5] sm:$0xff] %vm25_vm1, %v988_v26  ;;  %999 = vst.msk [vmem:[%s1841_s5 + $0x8] sm:$0xff] %vm25_vm1, %v989_v27 }
 0x189   :  { %1000 = vst.msk [vmem:[%s1841_s5 + $0x10] sm:$0xff] %vm25_vm1, %v990_v28  ;;  %1001 = vst.msk [vmem:[%s1841_s5 + $0x18] sm:$0xff] %vm25_vm1, %v991_v29 }
 0x18a   :  { %1002 = vst.msk [vmem:[%s1841_s5 + $0x20] sm:$0xff] %vm25_vm1, %v992_v30  ;;  %1003 = vst.msk [vmem:[%s1841_s5 + $0x28] sm:$0xff] %vm25_vm1, %v993_v31 }
 0x18b   :  { %1004 = vst.msk [vmem:[%s1841_s5 + $0x30] sm:$0xff] %vm25_vm1, %v994_v32  ;;  %1005 = vst.msk [vmem:[%s1841_s5 + $0x38] sm:$0xff] %vm25_vm1, %v995_v33 }
 0x18c   :  { %1006 = vst.msk [vmem:[%s1841_s5 + $0x40] sm:$0xff] %vm25_vm1, %v996_v14  ;;  %1007 = vst.msk [vmem:[%s1841_s5 + $0x48] sm:$0xff] %vm25_vm1, %v997_v15 }

// kernel: resnet_forward.27
= control target key start
LH: loop header
LB: loop body
LE: loop exit
PB: predicated region body
PF: predicated region fallthrough
CT: control target
= control target key end

     0   :  { %s1059_s1 = inlined_call_operand.vmem [shape: bf16[640,128], index: 1, kind: input, shape index: {}]   ;;  %s1060_s0 = inlined_call_operand.vmem [shape: bf16[32,640], index: 0, kind: input, shape index: {}]   ;;  %s1061_s2 = inlined_call_operand.vmem [shape: f32[1,128], index: 2, kind: input, shape index: {}]   ;;  %s1062_s3 = inlined_call_operand.vmem [shape: f32[1,128], index: 3, kind: input, shape index: {}]   ;;  %s1063_s4 = inlined_call_operand.vmem [shape: f32[32,128], index: 4, kind: output, shape index: {}]  }
   0x1   :  { %v809_v0 = vld [vmem:[%s1059_s1 + $0x78] sm:$0xff]   ;;  %v813_v4 = vld [vmem:[%s1059_s1 + $0x70] sm:$0xff]   ;;  %v817_v8 = vld [vmem:[%s1059_s1 + $0x68] sm:$0xff]  }
   0x2   :  { %v810_v1 = vld [vmem:[%s1059_s1 + $0xf8] sm:$0xff]   ;;  %722 = vmatprep.subr.bf16.mxu0 %v809_v0  ;;  %v814_v5 = vld [vmem:[%s1059_s1 + $0xf0] sm:$0xff]   ;;  %v818_v9 = vld [vmem:[%s1059_s1 + $0xe8] sm:$0xff]   ;;  %v578_v0 = vlaneseq }
   0x3   :  { %v811_v2 = vld [vmem:[%s1059_s1 + $0x38] sm:$0xff]   ;;  %750 = vmatprep.subr.bf16.mxu1 %v810_v1  ;;  %v815_v6 = vld [vmem:[%s1059_s1 + $0x30] sm:$0xff]   ;;  %v819_v10 = vld [vmem:[%s1059_s1 + $0x28] sm:$0xff]  }
   0x4   :  { %v812_v3 = vld [vmem:[%s1059_s1 + $0xb8] sm:$0xff]   ;;  %723 = vmatpush3.bf16.msra.mxu0 %v811_v2  ;;  %v816_v7 = vld [vmem:[%s1059_s1 + $0xb0] sm:$0xff]   ;;  %v820_v11 = vld [vmem:[%s1059_s1 + $0xa8] sm:$0xff]  }
   0x5   :  { %751 = vmatpush3.bf16.msra.mxu1 %v812_v3  ;;  %724 = vmatprep.subr.bf16.mxu0 %v813_v4  ;;  %v821_v12 = vld [vmem:[%s1059_s1 + $0x60] sm:$0xff]   ;;  %v825_v16 = vld [vmem:[%s1059_s1 + $0x58] sm:$0xff]   ;;  %v829_v20 = vld [vmem:[%s1059_s1 + $0x50] sm:$0xff]  }
   0x6   :  { %752 = vmatprep.subr.bf16.mxu1 %v814_v5  ;;  %v822_v13 = vld [vmem:[%s1059_s1 + $0xe0] sm:$0xff]   ;;  %v826_v17 = vld [vmem:[%s1059_s1 + $0xd8] sm:$0xff]   ;;  %v830_v21 = vld [vmem:[%s1059_s1 + $0xd0] sm:$0xff]   ;;  %v579_v5 = vshrl.u32 %v578_v0, 7 }
   0x7   :  { %v823_v14 = vld [vmem:[%s1059_s1 + $0x20] sm:$0xff]   ;;  %v827_v18 = vld [vmem:[%s1059_s1 + $0x18] sm:$0xff]   ;;  %v831_v22 = vld [vmem:[%s1059_s1 + $0x10] sm:$0xff]  }
   0x8   :  { %725 = vmatpush3.bf16.msra.mxu0 %v815_v6  ;;  %v824_v15 = vld [vmem:[%s1059_s1 + $0xa0] sm:$0xff]   ;;  %v828_v19 = vld [vmem:[%s1059_s1 + $0x98] sm:$0xff]   ;;  %v832_v23 = vld [vmem:[%s1059_s1 + $0x90] sm:$0xff]  }
   0x9   :  { %753 = vmatpush3.bf16.msra.mxu1 %v816_v7  ;;  %726 = vmatprep.subr.bf16.mxu0 %v817_v8  ;;  %v833_v24 = vld [vmem:[%s1059_s1 + $0x48] sm:$0xff]   ;;  %v837_v28 = vld [vmem:[%s1059_s1 + $0x40] sm:$0xff]   ;;  %v847_v36 = vld [vmem:[%s1059_s1 + $0x138] sm:$0xff]  }
   0xa   :  { %754 = vmatprep.subr.bf16.mxu1 %v818_v9  ;;  %v834_v25 = vld [vmem:[%s1059_s1 + $0xc8] sm:$0xff]   ;;  %v838_v29 = vld [vmem:[%s1059_s1 + $0xc0] sm:$0xff]   ;;  %v848_v37 = vld [vmem:[%s1059_s1 + $0x130] sm:$0xff]  }
   0xb   :  { %v835_v26 = vld [vmem:[%s1059_s1 + $0x8] sm:$0xff]   ;;  %v839_v30 = vld [vmem:[%s1059_s1] sm:$0xff]   ;;  %v851_v45 = vld [vmem:[%s1059_s1 + $0x118] sm:$0xff]  }
   0xc   :  { %727 = vmatpush3.bf16.msra.mxu0 %v819_v10  ;;  %v836_v27 = vld [vmem:[%s1059_s1 + $0x88] sm:$0xff]   ;;  %v840_v31 = vld [vmem:[%s1059_s1 + $0x80] sm:$0xff]   ;;  %v858_v46 = vld [vmem:[%s1059_s1 + $0x110] sm:$0xff]  }
   0xd   :  { %755 = vmatpush3.bf16.msra.mxu1 %v820_v11  ;;  %728 = vmatprep.subr.bf16.mxu0 %v821_v12  ;;  %v841_v32 = vld [vmem:[%s1060_s0] ss:$20 sps:$4 sm:$0xff]   ;;  %v843_v33 = vld [vmem:[%s1060_s0 + $0x4] ss:$20 sps:$4 sm:$0xff]   ;;  %v844_v34 = vld [vmem:[%s1060_s0 + $0x8] ss:$20 sps:$4 sm:$0xff]  }
   0xe   :  { %756 = vmatprep.subr.bf16.mxu1 %v822_v13  ;;  %v846_v35 = vld [vmem:[%s1060_s0 + $0xc] ss:$20 sps:$4 sm:$0xff]   ;;  %446 = vmatprep.mubr.bf16.mxu0 %v843_v33  ;;  %v854_v40 = vld [vmem:[%s1060_s0 + $0x34] ss:$20 sps:$4 sm:$0xff]   ;;  %v857_v42 = vld [vmem:[%s1060_s0 + $0x30] ss:$20 sps:$4 sm:$0xff]  }
   0xf   :  { %495 = vmatprep.mubr.bf16.mxu1 %v846_v35  ;;  %v849_v38 = vld [vmem:[%s1059_s1 + $0x128] sm:$0xff]   ;;  %v850_v43 = vld [vmem:[%s1059_s1 + $0x120] sm:$0xff]  }
  0x10   :  { %729 = vmatpush3.bf16.msra.mxu0 %v823_v14  ;;  %v852_v39 = vld [vmem:[%s1060_s0 + $0x2c] ss:$20 sps:$4 sm:$0xff]   ;;  %v856_v41 = vld [vmem:[%s1060_s0 + $0x28] ss:$20 sps:$4 sm:$0xff]   ;;  %v861_v44 = vld [vmem:[%s1060_s0 + $0x10] ss:$20 sps:$4 sm:$0xff]  }
  0x11   :  { %757 = vmatpush3.bf16.msra.mxu1 %v824_v15  ;;  %730 = vmatprep.subr.bf16.mxu0 %v825_v16  ;;  %v859_v47 = vld [vmem:[%s1059_s1 + $0x108] sm:$0xff]   ;;  %v860_v48 = vld [vmem:[%s1059_s1 + $0x100] sm:$0xff]   ;;  %v581_v14 = vadd.s32 16, %v579_v5 }
  0x12   :  { %758 = vmatprep.subr.bf16.mxu1 %v826_v17  ;;  %v862_v49 = vld [vmem:[%s1060_s0 + $0x38] ss:$20 sps:$4 sm:$0xff]  }
  0x13   :  { %vm585_vm0 = vcmp.lt.s32.totalorder %v581_v14, 18 }
  0x14   :  { %731 = vmatpush3.bf16.msra.mxu0 %v827_v18 }
  0x15   :  { %759 = vmatpush3.bf16.msra.mxu1 %v828_v19  ;;  %732 = vmatprep.subr.bf16.mxu0 %v829_v20 }
  0x16   :  { %760 = vmatprep.subr.bf16.mxu1 %v830_v21 }
  0x18   :  { %733 = vmatpush3.bf16.msra.mxu0 %v831_v22 }
  0x19   :  { %761 = vmatpush3.bf16.msra.mxu1 %v832_v23  ;;  %734 = vmatprep.subr.bf16.mxu0 %v833_v24 }
  0x1a   :  { %762 = vmatprep.subr.bf16.mxu1 %v834_v25  ;;  %v865_v25 = vmov 0.0  }
  0x1c   :  { %735 = vmatpush3.bf16.msra.mxu0 %v835_v26  ;;  %v719_v26 = vsel %vm585_vm0, 1.0, %v865_v25 }
  0x1d   :  { %763 = vmatpush3.bf16.msra.mxu1 %v836_v27  ;;  %736 = vmatprep.subr.bf16.mxu0 %v837_v28 }
  0x1e   :  { %764 = vmatprep.subr.bf16.mxu1 %v838_v29 }
  0x20   :  { %737 = vmatpush3.bf16.msra.mxu0 %v839_v30 }
  0x21   :  { %765 = vmatpush3.bf16.msra.mxu1 %v840_v31  ;;  %788 = vmatprep.subr.bf16.mxu0 %v847_v36 }
  0x23   :  { %447 = vmatmul.mubr.bf16.vlgmr.msra.gmra.mxu0 %v841_v32 }
  0x24   :  { %496 = vmatmul.mubr.bf16.vlgmr.msra.gmra.mxu1 %v844_v34  ;;  %789 = vmatpush3.bf16.msra.mxu0 %v847_v36 }
  0x25   :  { %790 = vmatprep.subr.bf16.mxu0 %v848_v37  ;;  %454 = vmatprep.mubr.bf16.mxu0 %v852_v39 }
  0x26   :  { %503 = vmatprep.mubr.bf16.mxu1 %v854_v40 }
  0x28   :  { %791 = vmatpush3.bf16.msra.mxu0 %v848_v37 }
  0x29   :  { %792 = vmatprep.subr.bf16.mxu0 %v849_v38 }
  0x2b   :  { %455 = vmatmul.mubr.bf16.gmra.mxu0 %v856_v41 }
  0x2c   :  { %504 = vmatmul.mubr.bf16.gmra.mxu1 %v857_v42  ;;  %793 = vmatpush3.bf16.msra.mxu0 %v849_v38 }
  0x2d   :  { %794 = vmatprep.subr.bf16.mxu0 %v850_v43  ;;  %804 = vmatprep.mubr.bf16.mxu0 %v861_v44 }
  0x30   :  { %795 = vmatpush3.bf16.msra.mxu0 %v850_v43 }
  0x31   :  { %796 = vmatprep.subr.bf16.mxu0 %v851_v45 }
  0x34   :  { %797 = vmatpush3.bf16.msra.mxu0 %v851_v45 }
  0x35   :  { %798 = vmatprep.subr.bf16.mxu0 %v858_v46 }
  0x38   :  { %799 = vmatpush3.bf16.msra.mxu0 %v858_v46 }
  0x39   :  { %800 = vmatprep.subr.bf16.mxu0 %v859_v47 }
  0x3c   :  { %801 = vmatpush3.bf16.msra.mxu0 %v859_v47 }
  0x3d   :  { %802 = vmatprep.subr.bf16.mxu0 %v860_v48 }
  0x40   :  { %803 = vmatpush3.bf16.msra.mxu0 %v860_v48 }
  0x43   :  { %805 = vmatmul.mubr.bf16.vlgmr.msra.gmra.mxu0 %v862_v49 }
  0xe3   :  { %v738_v50 = vpop.f32.mrf.mxu0 }
  0xe4   :  { %v766_v51 = vpop.f32.mrf.mxu1 }
  0xe5   :  { %v739_v52 = vpop.f32.mrf.mxu0 }
  0xe6   :  { %v767_v53 = vpop.f32.mrf.mxu1  ;;  %v740_v6 = vadd.f32 %v739_v52, %v738_v50 }
  0xe7   :  { %v741_v54 = vpop.f32.mrf.mxu0  ;;  %v768_v7 = vadd.f32 %v767_v53, %v766_v51 }
  0xe8   :  { %v769_v55 = vpop.f32.mrf.mxu1 }
  0xe9   :  { %v742_v56 = vpop.f32.mrf.mxu0  ;;  %v498_v17 = vadd.f32 %v768_v7, %v740_v6 }
  0xea   :  { %v770_v57 = vpop.f32.mrf.mxu1  ;;  %v743_v11 = vadd.f32 %v742_v56, %v741_v54 }
  0xeb   :  { %v744_v58 = vpop.f32.mrf.mxu0  ;;  %v771_v12 = vadd.f32 %v770_v57, %v769_v55 }
  0xec   :  { %v772_v59 = vpop.f32.mrf.mxu1 }
  0xed   :  { %v745_v60 = vpop.f32.mrf.mxu0  ;;  %v501_v22 = vadd.f32 %v771_v12, %v743_v11 }
  0xee   :  { %v773_v61 = vpop.f32.mrf.mxu1  ;;  %v746_v3 = vadd.f32 %v745_v60, %v744_v58 }
  0xef   :  { %v747_v62 = vpop.f32.mrf.mxu0  ;;  %v774_v4 = vadd.f32 %v773_v61, %v772_v59  ;;  %v720_v61 = vld [vmem:[%s1061_s2] ss:$0 sm:$0xff] }
  0xf0   :  { %v775_v63 = vpop.f32.mrf.mxu1 }
  0xf1   :  { %v748_v1 = vpop.f32.mrf.mxu0  ;;  %v506_v13 = vadd.f32 %v774_v4, %v746_v3 }
  0xf2   :  { %v776_v2 = vpop.f32.mrf.mxu1  ;;  %v749_v8 = vadd.f32 %v748_v1, %v747_v62 }
  0xf3   :  { %v777_v9 = vadd.f32 %v776_v2, %v775_v63  ;;  %v721_v2 = vld [vmem:[%s1062_s3] ss:$0 sm:$0xff] }
  0xf5   :  { %v509_v18 = vadd.f32 %v777_v9, %v749_v8 }
 0x103   :  { %v806_v10 = vpop.f32.mrf.mxu0 }
 0x104   :  { %v555_v16 = vadd.f32 %v806_v10, %v506_v13 }
 0x105   :  { %v546_v15 = vpop.f32.mrf.mxu0 }
 0x106   :  { %v547_v20 = vadd.f32 %v546_v15, %v498_v17  ;;  %v597_v27 = vmul.f32 %v719_v26, %v555_v16 }
 0x107   :  { %v807_v19 = vpop.f32.mrf.mxu0 }
 0x108   :  { %v558_v21 = vadd.f32 %v807_v19, %v509_v18 }
 0x109   :  { %v549_v23 = vpop.f32.mrf.mxu0 }
 0x10a   :  { %v550_v24 = vadd.f32 %v549_v23, %v501_v22  ;;  %v598_v29 = vmul.f32 0.0, %v558_v21 }
 0x10c   :  { %v599_v28 = vadd.f32 %v550_v24, %v547_v20 }
 0x10e   :  { %v600_v30 = vadd.f32 %v599_v28, %v597_v27 }
 0x110   :  { %v601_v31 = vadd.f32 %v600_v30, %v598_v29 }
 0x112   :  { %v602_v32 = vrot.slane %v601_v31, 4 }
 0x114   :  { %v603_v33 = vadd.f32 %v602_v32, %v601_v31 }
 0x116   :  { %v604_v34 = vrot.slane %v603_v33, 2 }
 0x118   :  { %v605_v35 = vadd.f32 %v604_v34, %v603_v33 }
 0x11a   :  { %v606_v36 = vrot.slane %v605_v35, 1 }
 0x11c   :  { %v607_v37 = vadd.f32 %v606_v36, %v605_v35 }
 0x11e   :  { %v608_v38 = vmul.f32 0.055555556, %v607_v37 }
 0x120   :  { %v609_v39 = vsub.f32 %v547_v20, %v608_v38  ;;  %v610_v40 = vsub.f32 %v550_v24, %v608_v38  ;;  %v611_v41 = vsub.f32 %v555_v16, %v608_v38  ;;  %v612_v42 = vsub.f32 %v558_v21, %v608_v38 }
 0x122   :  { %v615_v43 = vmul.f32 %v719_v26, %v611_v41  ;;  %v616_v44 = vmul.f32 0.0, %v612_v42  ;;  %v617_v45 = vmul.f32 %v609_v39, %v609_v39  ;;  %v618_v46 = vmul.f32 %v610_v40, %v610_v40 }
 0x124   :  { %v619_v47 = vmul.f32 %v615_v43, %v615_v43  ;;  %v621_v48 = vadd.f32 %v618_v46, %v617_v45  ;;  %v620_v49 = vmul.f32 %v616_v44, %v616_v44 }
 0x126   :  { %v622_v50 = vadd.f32 %v621_v48, %v619_v47 }
 0x128   :  { %v623_v51 = vadd.f32 %v622_v50, %v620_v49 }
 0x12a   :  { %v624_v52 = vrot.slane %v623_v51, 4 }
 0x12c   :  { %v625_v53 = vadd.f32 %v624_v52, %v623_v51 }
 0x12e   :  { %v626_v54 = vrot.slane %v625_v53, 2 }
 0x130   :  { %v627_v55 = vadd.f32 %v626_v54, %v625_v53 }
 0x132   :  { %v628_v56 = vrot.slane %v627_v55, 1 }
 0x134   :  { %v629_v57 = vadd.f32 %v628_v56, %v627_v55 }
 0x136   :  { %v630_v58 = vmul.f32 0.055555556, %v629_v57 }
 0x138   :  { %v631_v59 = vadd.f32 1e-05, %v630_v58 }
 0x13a   :  { %863 = vrsqrt.f32 %v631_v59 }
 0x147   :  { %v864_v60 = vpop.eup %863 }
 0x148   :  { %v633_v62 = vmul.f32 %v864_v60, %v609_v39  ;;  %v634_v63 = vmul.f32 %v864_v60, %v610_v40  ;;  %v635_v0 = vmul.f32 %v864_v60, %v611_v41  ;;  %v636_v1 = vmul.f32 %v864_v60, %v612_v42 }
 0x14a   :  { %v643_v3 = vmul.f32 %v720_v61, %v633_v62  ;;  %v644_v4 = vmul.f32 %v720_v61, %v634_v63  ;;  %v645_v5 = vmul.f32 %v720_v61, %v635_v0  ;;  %v646_v6 = vmul.f32 %v720_v61, %v636_v1 }
 0x14c   :  { %v653_v7 = vadd.f32 %v721_v2, %v643_v3  ;;  %v654_v8 = vadd.f32 %v721_v2, %v644_v4  ;;  %v655_v9 = vadd.f32 %v721_v2, %v645_v5  ;;  %v656_v10 = vadd.f32 %v721_v2, %v646_v6 }
 0x14e   :  { %v657_v11 = vmax.f32 %v653_v7, 0.0  ;;  %v658_v12 = vmax.f32 %v654_v8, 0.0  ;;  %v659_v13 = vmax.f32 %v655_v9, 0.0  ;;  %v660_v14 = vmax.f32 %v656_v10, 0.0 }
 0x150   :  { %661 = vst [vmem:[%s1063_s4] sm:$0xff] %v657_v11  ;;  %662 = vst [vmem:[%s1063_s4 + $0x8] sm:$0xff] %v658_v12 }
 0x151   :  { %663 = vst [vmem:[%s1063_s4 + $0x10] sm:$0xff] %v659_v13  ;;  %664 = vst [vmem:[%s1063_s4 + $0x18] sm:$0xff] %v660_v14 }

// kernel: resnet_forward.28
= control target key start
LH: loop header
LB: loop body
LE: loop exit
PB: predicated region body
PF: predicated region fallthrough
CT: control target
= control target key end

     0   :  { %s307_s1 = inlined_call_operand.vmem [shape: bf16[128,128], index: 1, kind: input, shape index: {}]   ;;  %s308_s0 = inlined_call_operand.vmem [shape: bf16[32,128], index: 0, kind: input, shape index: {}]   ;;  %s309_s2 = inlined_call_operand.vmem [shape: f32[1,128], index: 2, kind: input, shape index: {}]   ;;  %s310_s3 = inlined_call_operand.vmem [shape: f32[32,128], index: 3, kind: output, shape index: {}]  }
   0x1   :  { %v232_v0 = vld [vmem:[%s307_s1 + $0x38] sm:$0xff]   ;;  %v233_v1 = vld [vmem:[%s307_s1 + $0x30] sm:$0xff]   ;;  %v234_v2 = vld [vmem:[%s307_s1 + $0x28] sm:$0xff]  }
   0x2   :  { %211 = vmatprep.subr.bf16.mxu0 %v232_v0  ;;  %v235_v3 = vld [vmem:[%s307_s1 + $0x20] sm:$0xff]   ;;  %v236_v5 = vld [vmem:[%s307_s1 + $0x18] sm:$0xff]   ;;  %v237_v6 = vld [vmem:[%s307_s1 + $0x10] sm:$0xff]  }
   0x3   :  { %212 = vmatpush3.bf16.msra.mxu0 %v232_v0  ;;  %v240_v4 = vld [vmem:[%s308_s0] sm:$0xff]   ;;  %v238_v7 = vld [vmem:[%s307_s1 + $0x8] sm:$0xff]  }
   0x4   :  { %213 = vmatprep.subr.bf16.mxu0 %v233_v1  ;;  %227 = vmatprep.mubr.bf16.mxu0 %v240_v4  ;;  %v239_v8 = vld [vmem:[%s307_s1] sm:$0xff]   ;;  %v241_v9 = vld [vmem:[%s308_s0 + $0x8] sm:$0xff]  }
   0x5   :  { %v200_v11 = vld [vmem:[%s309_s2] ss:$0 sm:$0xff] }
   0x7   :  { %214 = vmatpush3.bf16.msra.mxu0 %v233_v1 }
   0x8   :  { %215 = vmatprep.subr.bf16.mxu0 %v234_v2 }
   0xb   :  { %216 = vmatpush3.bf16.msra.mxu0 %v234_v2 }
   0xc   :  { %217 = vmatprep.subr.bf16.mxu0 %v235_v3 }
   0xf   :  { %218 = vmatpush3.bf16.msra.mxu0 %v235_v3 }
  0x10   :  { %219 = vmatprep.subr.bf16.mxu0 %v236_v5 }
  0x13   :  { %220 = vmatpush3.bf16.msra.mxu0 %v236_v5 }
  0x14   :  { %221 = vmatprep.subr.bf16.mxu0 %v237_v6 }
  0x17   :  { %222 = vmatpush3.bf16.msra.mxu0 %v237_v6 }
  0x18   :  { %223 = vmatprep.subr.bf16.mxu0 %v238_v7 }
  0x1b   :  { %224 = vmatpush3.bf16.msra.mxu0 %v238_v7 }
  0x1c   :  { %225 = vmatprep.subr.bf16.mxu0 %v239_v8 }
  0x1f   :  { %226 = vmatpush3.bf16.msra.mxu0 %v239_v8 }
  0x22   :  { %228 = vmatmul.mubr.bf16.vlgmr.msra.gmra.mxu0 %v241_v9 }
  0xe2   :  { %v229_v10 = vpop.f32.mrf.mxu0 }
  0xe3   :  { %v180_v13 = vadd.f32 %v229_v10, %v200_v11 }
  0xe4   :  { %v141_v12 = vpop.f32.mrf.mxu0 }
  0xe5   :  { %184 = vst [vmem:[%s310_s3 + $0x10] sm:$0xff] %v180_v13  ;;  %v178_v15 = vadd.f32 %v200_v11, %v141_v12 }
  0xe6   :  { %v230_v14 = vpop.f32.mrf.mxu0 }
  0xe7   :  { %182 = vst [vmem:[%s310_s3] sm:$0xff] %v178_v15  ;;  %v181_v17 = vadd.f32 %v230_v14, %v200_v11 }
  0xe8   :  { %v144_v16 = vpop.f32.mrf.mxu0 }
  0xe9   :  { %185 = vst [vmem:[%s310_s3 + $0x18] sm:$0xff] %v181_v17  ;;  %v179_v18 = vadd.f32 %v200_v11, %v144_v16 }
  0xeb   :  { %183 = vst [vmem:[%s310_s3 + $0x8] sm:$0xff] %v179_v18 }

// kernel: resnet_forward.29
= control target key start
LH: loop header
LB: loop body
LE: loop exit
PB: predicated region body
PF: predicated region fallthrough
CT: control target
= control target key end

     0   :  { %s1158_s18 = smov 0   ;;  %s1160_s19 = smov 0   ;;  %s1337_s0 = inlined_call_operand.vmem [shape: bf16[32,1152], index: 0, kind: input, shape index: {}]   ;;  %s1338_s1 = inlined_call_operand.vmem [shape: bf16[1152,128], index: 1, kind: input, shape index: {}]   ;;  %s1339_s2 = inlined_call_operand.vmem [shape: f32[1,128], index: 2, kind: input, shape index: {}]   ;;  %s1340_s3 = inlined_call_operand.vmem [shape: f32[1,128], index: 3, kind: input, shape index: {}]   ;;  %s1341_s4 = inlined_call_operand.vmem [shape: f32[32,128], index: 4, kind: input, shape index: {}]   ;;  %s1342_s5 = inlined_call_operand.vmem [shape: f32[32,128], index: 5, kind: output, shape index: {}]  }
   0x1   :  { %s1162_s20 = smov 0   ;;  %s1164_s21 = smov 0  }
   0x2   :  { %s1166_s22 = smov 0  }
   0x3 LB: > { %s24_s23 = sadd.s32 1, %s1120_s21  ;;  %p43_p1 = scmp.ne.s32.totalorder %s1112_s19, %s1108_s18  ;;  %s1124_s22 = sphi %s1166_s22, %s15_s22   ;;  %s1120_s21 = sphi %s1164_s21, %s1346_s21   ;;  %s1116_s20 = sphi %s1162_s20, %s1345_s20   ;;  %s1112_s19 = sphi %s1160_s19, %s1344_s19   ;;  %s1108_s18 = sphi %s1158_s18, %s1343_s18  }
   0x4   : > { %p25_p0 = scmp.ge.s32.totalorder %s24_s23, 3  ;;  %p44_p2 = scmp.eq.s32.totalorder %s1124_s22, 0 }
   0x5   : > { %s36_s25 = sadd.s32 1, %s1112_s19  ;;  %p898_p5 = scmp.ge.s32.totalorder %s1124_s22, 3 }
   0x6   : > { %s1348_s23 = smov (%p25_p0, %s24_s23), 0  ;;  %p45_p3 = por %p44_p2, %p43_p1 }
   0x7   : > { %s32_s24 = ssub.s32 %s1120_s21, %s1348_s23  ;;  %204 = sbr.rel (%p898_p5) target bundleno = 21 (0x15), region = 28 }
   0x8   : > { %p34_p4 = scmp.eq.s32.totalorder %s32_s24, 0 }
   0xa   : > { %s1193_s26 = scalar_select %p34_p4, %s1112_s19, %s36_s25  }
   0xc   : > { %207 = sbr.rel (!%p45_p3) target bundleno = 21 (0x15), region = 32  ;;  %s209_s27 = sand.u32 (%p45_p3), 1, %s1112_s19  }
   0xd   : > { %s949_s28 = smul.u32 (%p45_p3), 12, %s1120_s21 }
   0xe   : > { %s1008_s29 = smul.u32 (%p45_p3), 48, %s209_s27 }
   0xf   : > { %s217_s7 = scalar_lea.vmem (%p45_p3), %s1337_s0, %s949_s28 }
  0x10   : > { %v232_v0 = vld [vmem:[%s217_s7] sm:$0xff] (%p45_p3)  ;;  %v236_v2 = vld [vmem:[%s217_s7 + $0x48] sm:$0xff] (%p45_p3)  ;;  %s211_s8 = scalar_lea.vmem (%p45_p3), [#allocation2], %s1008_s29  ;;  %v904_v6 = vld [vmem:[%s217_s7 + $0x50] sm:$0xf] (%p45_p3) }
  0x11   : > { %v234_v1 = vld [vmem:[%s217_s7 + $0x24] sm:$0xff]  ;;  %233 = vst [vmem:[%s211_s8] sm:$0xff] %v232_v0  ;;  %237 = vst [vmem:[%s211_s8 + $0x18] sm:$0xff] %v236_v2  ;;  %v238_v3 = vld [vmem:[%s217_s7 + $0x6c] sm:$0xff] }
  0x12   : > { %235 = vst [vmem:[%s211_s8 + $0xc] sm:$0xff] %v234_v1  ;;  %v900_v4 = vld [vmem:[%s217_s7 + $0x8] sm:$0xf]  ;;  %v902_v5 = vld [vmem:[%s217_s7 + $0x2c] sm:$0xf]  ;;  %239 = vst [vmem:[%s211_s8 + $0x24] sm:$0xff] %v238_v3 }
  0x13   : > { %901 = vst [vmem:[%s211_s8 + $0x8] sm:$0xf] %v900_v4  ;;  %903 = vst [vmem:[%s211_s8 + $0x14] sm:$0xf] %v902_v5  ;;  %v906_v7 = vld [vmem:[%s217_s7 + $0x74] sm:$0xf] }
  0x14   : > { %905 = vst [vmem:[%s211_s8 + $0x20] sm:$0xf] %v904_v6  ;;  %907 = vst [vmem:[%s211_s8 + $0x2c] sm:$0xf] %v906_v7 }
  0x15 PF: > { %p908_p6 = scmp.ge.s32.totalorder %s1124_s22, 1  ;;  %p269_p7 = scmp.lt.s32.totalorder %s1124_s22, 4 }
  0x17   : > { %p270_p8 = pnand %p908_p6, %p269_p7 }
  0x18   : > { %s276_s9 = sand.u32 (!%p270_p8), 1, %s1108_s18   ;;  %s315_s10 = smul.u32 (!%p270_p8), 48, %s1116_s20 }
  0x19   : > { %273 = sbr.rel (%p270_p8) target bundleno = 367 (0x16f), region = 62  ;;  %p910_p10 = scmp.ne.s32.totalorder (!%p270_p8), %s1116_s20, 0 }
  0x1a   : > { %s1009_s11 = smul.u32 (!%p270_p8), 48, %s276_s9  ;;  %p316_p9 = scmp.lt.s32.totalorder (!%p270_p8), %s315_s10, 143 }
  0x1c   : > { %s1210_s16 = scalar_lea.vmem (!%p270_p8), [#allocation2], %s1009_s11 }
  0x1e   : > { %s1350_s10 = smov (!%p316_p9, %s315_s10), 143  ;;  %337 = sbr.rel (%p910_p10) target bundleno = 38 (0x26), region = 70 }
  0x1f   : > { %s909_s12 = sshll.u32 %s1350_s10, 2 }
  0x20   : > { %s1208_s15 = scalar_lea.vmem %s1338_s1, %s909_s12 }
  0x23   : > { %v1126_v8 = vmov 0.0  }
  0x24   : > { %338 = vst [vmem:[%s1342_s5] sm:$0xff] %v1126_v8  ;;  %339 = vst [vmem:[%s1342_s5 + $0x8] sm:$0xff] %v1126_v8 }
  0x25   : > { %340 = vst [vmem:[%s1342_s5 + $0x10] sm:$0xff] %v1126_v8  ;;  %341 = vst [vmem:[%s1342_s5 + $0x18] sm:$0xff] %v1126_v8 }
  0x26 PF: > { %v1052_v9 = vld [vmem:[%s1208_s15 + $0x78] sm:$0xff]   ;;  %v1055_v12 = vld [vmem:[%s1208_s15 + $0x70] sm:$0xff]   ;;  %v1058_v15 = vld [vmem:[%s1208_s15 + $0x68] sm:$0xff]   ;;  %p941_p11 = scmp.ne.s32.totalorder %s1116_s20, 2 }
  0x27   : > { %v1053_v10 = vld [vmem:[%s1208_s15 + $0x38] sm:$0xff]   ;;  %950 = vmatprep.subr.bf16.mxu0 %v1052_v9  ;;  %v1056_v13 = vld [vmem:[%s1208_s15 + $0x30] sm:$0xff]   ;;  %v1059_v16 = vld [vmem:[%s1208_s15 + $0x28] sm:$0xff]  }
  0x28   : > { %v1054_v11 = vld [vmem:[%s1208_s15 + $0xb8] sm:$0xff]   ;;  %951 = vmatpush3.bf16.msra.mxu0 %v1053_v10  ;;  %v1057_v14 = vld [vmem:[%s1208_s15 + $0xb0] sm:$0xff]   ;;  %v1060_v17 = vld [vmem:[%s1208_s15 + $0xa8] sm:$0xff]  }
  0x29   : > { %988 = vmatprep.subr.bf16.mxu1 %v1054_v11  ;;  %952 = vmatprep.subr.bf16.mxu0 %v1055_v12  ;;  %v1061_v18 = vld [vmem:[%s1208_s15 + $0x60] sm:$0xff]   ;;  %v1064_v21 = vld [vmem:[%s1208_s15 + $0x58] sm:$0xff]   ;;  %v1067_v24 = vld [vmem:[%s1208_s15 + $0x50] sm:$0xff]  }
  0x2a   : > { %989 = vmatpush3.bf16.msra.mxu1 %v1054_v11  ;;  %v1062_v19 = vld [vmem:[%s1208_s15 + $0x20] sm:$0xff]   ;;  %v1066_v22 = vld [vmem:[%s1208_s15 + $0x98] sm:$0xff]   ;;  %v1069_v25 = vld [vmem:[%s1208_s15 + $0x90] sm:$0xff]  }
  0x2b   : > { %990 = vmatprep.subr.bf16.mxu1 %v1057_v14  ;;  %v1063_v20 = vld [vmem:[%s1208_s15 + $0xa0] sm:$0xff]   ;;  %v1065_v23 = vld [vmem:[%s1208_s15 + $0x18] sm:$0xff]   ;;  %v1068_v26 = vld [vmem:[%s1208_s15 + $0x10] sm:$0xff]  }
  0x2c   : > { %953 = vmatpush3.bf16.msra.mxu0 %v1056_v13  ;;  %v1070_v27 = vld [vmem:[%s1208_s15 + $0x48] sm:$0xff]   ;;  %v1073_v30 = vld [vmem:[%s1208_s15 + $0x40] sm:$0xff]   ;;  %v344_v58 = vld [vmem:[%s1342_s5 + $0x10] sm:$0xff] }
  0x2d   : > { %954 = vmatprep.subr.bf16.mxu0 %v1058_v15  ;;  %v1071_v28 = vld [vmem:[%s1208_s15 + $0x8] sm:$0xff]   ;;  %v1075_v31 = vld [vmem:[%s1208_s15 + $0x80] sm:$0xff]   ;;  %v345_v0 = vld [vmem:[%s1342_s5 + $0x18] sm:$0xff] }
  0x2e   : > { %991 = vmatpush3.bf16.msra.mxu1 %v1057_v14  ;;  %v1072_v29 = vld [vmem:[%s1208_s15 + $0x88] sm:$0xff]   ;;  %v1078_v32 = vld [vmem:[%s1210_s16 + $0x4] ss:$12 sps:$4 sm:$0xff]  }
  0x2f   : > { %992 = vmatprep.subr.bf16.mxu1 %v1060_v17  ;;  %v1079_v33 = vld [vmem:[%s1210_s16 + $0x8] ss:$12 sps:$4 sm:$0xff]   ;;  %610 = vmatprep.mubr.bf16.mxu0 %v1078_v32  ;;  %v1076_v35 = vld [vmem:[%s1210_s16] ss:$12 sps:$4 sm:$0xff]   ;;  %v1083_v38 = vld [vmem:[%s1210_s16 + $0x18] ss:$12 sps:$4 sm:$0xff]  }
  0x30   : > { %955 = vmatpush3.bf16.msra.mxu0 %v1059_v16  ;;  %v1074_v34 = vld [vmem:[%s1208_s15] sm:$0xff]   ;;  %1004 = vmatprep.mubr.bf16.mxu1 %v1079_v33  ;;  %v1081_v36 = vld [vmem:[%s1210_s16 + $0x1c] ss:$12 sps:$4 sm:$0xff]  }
  0x31   : > { %956 = vmatprep.subr.bf16.mxu0 %v1061_v18  ;;  %v1080_v37 = vld [vmem:[%s1210_s16 + $0x20] ss:$12 sps:$4 sm:$0xff]  }
  0x32   : > { %993 = vmatpush3.bf16.msra.mxu1 %v1060_v17  ;;  %v342_v44 = vld [vmem:[%s1342_s5] sm:$0xff]  ;;  %v343_v52 = vld [vmem:[%s1342_s5 + $0x8] sm:$0xff] }
  0x33   : > { %994 = vmatprep.subr.bf16.mxu1 %v1063_v20 }
  0x34   : > { %957 = vmatpush3.bf16.msra.mxu0 %v1062_v19 }
  0x35   : > { %958 = vmatprep.subr.bf16.mxu0 %v1064_v21 }
  0x36   : > { %995 = vmatpush3.bf16.msra.mxu1 %v1063_v20 }
  0x37   : > { %996 = vmatprep.subr.bf16.mxu1 %v1066_v22 }
  0x38   : > { %959 = vmatpush3.bf16.msra.mxu0 %v1065_v23 }
  0x39   : > { %960 = vmatprep.subr.bf16.mxu0 %v1067_v24 }
  0x3a   : > { %997 = vmatpush3.bf16.msra.mxu1 %v1066_v22 }
  0x3b   : > { %998 = vmatprep.subr.bf16.mxu1 %v1069_v25 }
  0x3c   : > { %961 = vmatpush3.bf16.msra.mxu0 %v1068_v26 }
  0x3d   : > { %962 = vmatprep.subr.bf16.mxu0 %v1070_v27 }
  0x3e   : > { %999 = vmatpush3.bf16.msra.mxu1 %v1069_v25 }
  0x3f   : > { %1000 = vmatprep.subr.bf16.mxu1 %v1072_v29 }
  0x40   : > { %963 = vmatpush3.bf16.msra.mxu0 %v1071_v28 }
  0x41   : > { %964 = vmatprep.subr.bf16.mxu0 %v1073_v30 }
  0x42   : > { %1001 = vmatpush3.bf16.msra.mxu1 %v1072_v29 }
  0x43   : > { %1002 = vmatprep.subr.bf16.mxu1 %v1075_v31 }
  0x44   : > { %965 = vmatpush3.bf16.msra.mxu0 %v1074_v34 }
  0x46   : > { %1003 = vmatpush3.bf16.msra.mxu1 %v1075_v31 }
  0x47   : > { %611 = vmatmul.mubr.bf16.vlgmr.msra.gmra.mxu0 %v1076_v35 }
  0x48   : > { %618 = vmatprep.mubr.bf16.mxu0 %v1081_v36 }
  0x49   : > { %1005 = vmatmul.mubr.bf16.vlgmr.msra.gmra.mxu1 %v1080_v37 }
  0x4f   : > { %619 = vmatmul.mubr.bf16.gmra.mxu0 %v1083_v38 }
 0x107   : > { %v966_v39 = vpop.f32.mrf.mxu0 }
 0x109   : > { %v967_v40 = vpop.f32.mrf.mxu0  ;;  %v1006_v41 = vpop.f32.mrf.mxu1 }
 0x10a   : > { %v968_v42 = vadd.f32 %v967_v40, %v966_v39 }
 0x10b   : > { %v969_v43 = vpop.f32.mrf.mxu0  ;;  %v661_v45 = vpop.f32.mrf.mxu1 }
 0x10c   : > { %v662_v46 = vadd.f32 %v968_v42, %v661_v45 }
 0x10d   : > { %v970_v47 = vpop.f32.mrf.mxu0  ;;  %v1007_v48 = vpop.f32.mrf.mxu1 }
 0x10e   : > { %v676_v49 = vadd.f32 %v662_v46, %v342_v44  ;;  %v971_v50 = vadd.f32 %v970_v47, %v969_v43 }
 0x10f   : > { %v972_v51 = vpop.f32.mrf.mxu0  ;;  %v664_v53 = vpop.f32.mrf.mxu1 }
 0x110   : > { %680 = vst [vmem:[%s1342_s5] sm:$0xff] %v676_v49  ;;  %v665_v54 = vadd.f32 %v971_v50, %v664_v53 }
 0x111   : > { %v973_v55 = vpop.f32.mrf.mxu0 }
 0x112   : > { %v677_v56 = vadd.f32 %v665_v54, %v343_v52  ;;  %v974_v57 = vadd.f32 %v973_v55, %v972_v51 }
 0x113   : > { %v975_v59 = vpop.f32.mrf.mxu0 }
 0x114   : > { %681 = vst [vmem:[%s1342_s5 + $0x8] sm:$0xff] %v677_v56  ;;  %v670_v60 = vadd.f32 %v1006_v41, %v974_v57 }
 0x115   : > { %v976_v61 = vpop.f32.mrf.mxu0 }
 0x116   : > { %v678_v62 = vadd.f32 %v670_v60, %v344_v58  ;;  %v977_v63 = vadd.f32 %v976_v61, %v975_v59 }
 0x118   : > { %682 = vst [vmem:[%s1342_s5 + $0x10] sm:$0xff] %v678_v62  ;;  %v673_v1 = vadd.f32 %v1007_v48, %v977_v63  ;;  %687 = sbr.rel (%p941_p11) target bundleno = 367 (0x16f), region = 74 }
 0x11a   : > { %v679_v2 = vadd.f32 %v673_v1, %v345_v0 }
 0x11c   : > { %683 = vst [vmem:[%s1342_s5 + $0x18] sm:$0xff] %v679_v2 }
 0x11d   : > { %v694_v3 = vlaneseq  ;;  %v688_v5 = vld [vmem:[%s1342_s5] sm:$0xff]  ;;  %v689_v6 = vld [vmem:[%s1342_s5 + $0x8] sm:$0xff]  ;;  %v1127_v11 = vmov 0.0   ;;  %v779_v62 = vld [vmem:[%s1341_s4 + $0x10] sm:$0xff] }
 0x11e   : > { %v715_v10 = vadd.f32 %v689_v6, %v688_v5  ;;  %v943_v46 = vld [vmem:[%s1339_s2] ss:$0 sm:$0xff]  ;;  %v778_v61 = vld [vmem:[%s1341_s4 + $0x8] sm:$0xff]  ;;  %v780_v63 = vld [vmem:[%s1341_s4 + $0x18] sm:$0xff] }
 0x11f   : > { %v695_v4 = vshrl.u32 %v694_v3, 7  ;;  %v690_v8 = vld [vmem:[%s1342_s5 + $0x10] sm:$0xff]  ;;  %v944_v51 = vld [vmem:[%s1340_s3] ss:$0 sm:$0xff] }
 0x120   : > { %v777_v57 = vld [vmem:[%s1341_s4] sm:$0xff] }
 0x121   : > { %v697_v7 = vadd.s32 16, %v695_v4 }
 0x123   : > { %v691_v9 = vld [vmem:[%s1342_s5 + $0x18] sm:$0xff]  ;;  %vm701_vm0 = vcmp.lt.s32.totalorder %v697_v7, 18 }
 0x124   : > { %v942_v12 = vsel %vm701_vm0, 1.0, %v1127_v11  ;;  %v714_v14 = vmul.f32 0.0, %v691_v9 }
 0x125   : > { %v713_v13 = vmul.f32 %v942_v12, %v690_v8 }
 0x127   : > { %v716_v15 = vadd.f32 %v715_v10, %v713_v13 }
 0x129   : > { %v717_v16 = vadd.f32 %v716_v15, %v714_v14 }
 0x12b   : > { %v718_v17 = vrot.slane %v717_v16, 4 }
 0x12d   : > { %v719_v18 = vadd.f32 %v718_v17, %v717_v16 }
 0x12f   : > { %v720_v19 = vrot.slane %v719_v18, 2 }
 0x131   : > { %v721_v20 = vadd.f32 %v720_v19, %v719_v18 }
 0x133   : > { %v722_v21 = vrot.slane %v721_v20, 1 }
 0x135   : > { %v723_v22 = vadd.f32 %v722_v21, %v721_v20 }
 0x137   : > { %v724_v23 = vmul.f32 0.055555556, %v723_v22 }
 0x139   : > { %v725_v24 = vsub.f32 %v688_v5, %v724_v23  ;;  %v726_v25 = vsub.f32 %v689_v6, %v724_v23  ;;  %v727_v26 = vsub.f32 %v690_v8, %v724_v23  ;;  %v728_v27 = vsub.f32 %v691_v9, %v724_v23 }
 0x13b   : > { %v731_v28 = vmul.f32 %v942_v12, %v727_v26  ;;  %v732_v29 = vmul.f32 0.0, %v728_v27  ;;  %v733_v30 = vmul.f32 %v725_v24, %v725_v24  ;;  %v734_v31 = vmul.f32 %v726_v25, %v726_v25 }
 0x13d   : > { %v735_v32 = vmul.f32 %v731_v28, %v731_v28  ;;  %v736_v33 = vmul.f32 %v732_v29, %v732_v29  ;;  %v737_v34 = vadd.f32 %v734_v31, %v733_v30 }
 0x13f   : > { %v738_v35 = vadd.f32 %v737_v34, %v735_v32 }
 0x141   : > { %v739_v36 = vadd.f32 %v738_v35, %v736_v33 }
 0x143   : > { %v740_v37 = vrot.slane %v739_v36, 4 }
 0x145   : > { %v741_v38 = vadd.f32 %v740_v37, %v739_v36 }
 0x147   : > { %v742_v39 = vrot.slane %v741_v38, 2 }
 0x149   : > { %v743_v40 = vadd.f32 %v742_v39, %v741_v38 }
 0x14b   : > { %v744_v41 = vrot.slane %v743_v40, 1 }
 0x14d   : > { %v745_v42 = vadd.f32 %v744_v41, %v743_v40 }
 0x14f   : > { %v746_v43 = vmul.f32 0.055555556, %v745_v42 }
 0x151   : > { %v747_v44 = vadd.f32 1e-05, %v746_v43 }
 0x153   : > { %1084 = vrsqrt.f32 %v747_v44 }
 0x160   : > { %v1085_v45 = vpop.eup %1084 }
 0x161   : > { %v749_v47 = vmul.f32 %v1085_v45, %v725_v24  ;;  %v750_v48 = vmul.f32 %v1085_v45, %v726_v25  ;;  %v751_v49 = vmul.f32 %v1085_v45, %v727_v26  ;;  %v752_v50 = vmul.f32 %v1085_v45, %v728_v27 }
 0x163   : > { %v759_v52 = vmul.f32 %v943_v46, %v749_v47  ;;  %v760_v53 = vmul.f32 %v943_v46, %v750_v48  ;;  %v761_v54 = vmul.f32 %v943_v46, %v751_v49  ;;  %v762_v55 = vmul.f32 %v943_v46, %v752_v50 }
 0x165   : > { %v769_v56 = vadd.f32 %v944_v51, %v759_v52  ;;  %v770_v58 = vadd.f32 %v944_v51, %v760_v53  ;;  %v771_v59 = vadd.f32 %v944_v51, %v761_v54  ;;  %v772_v60 = vadd.f32 %v944_v51, %v762_v55 }
 0x167   : > { %v773_v0 = vmax.f32 %v769_v56, 0.0  ;;  %v774_v1 = vmax.f32 %v770_v58, 0.0  ;;  %v775_v2 = vmax.f32 %v771_v59, 0.0  ;;  %v776_v3 = vmax.f32 %v772_v60, 0.0 }
 0x169   : > { %v781_v4 = vadd.f32 %v777_v57, %v773_v0  ;;  %v782_v5 = vadd.f32 %v778_v61, %v774_v1  ;;  %v783_v6 = vadd.f32 %v779_v62, %v775_v2  ;;  %v784_v7 = vadd.f32 %v780_v63, %v776_v3 }
 0x16b   : > { %v785_v8 = vmax.f32 %v781_v4, 0.0  ;;  %v786_v9 = vmax.f32 %v782_v5, 0.0  ;;  %v787_v10 = vmax.f32 %v783_v6, 0.0  ;;  %v788_v11 = vmax.f32 %v784_v7, 0.0 }
 0x16d   : > { %789 = vst [vmem:[%s1342_s5] sm:$0xff] %v785_v8  ;;  %790 = vst [vmem:[%s1342_s5 + $0x8] sm:$0xff] %v786_v9 }
 0x16e   : > { %791 = vst [vmem:[%s1342_s5 + $0x10] sm:$0xff] %v787_v10  ;;  %792 = vst [vmem:[%s1342_s5 + $0x18] sm:$0xff] %v788_v11 }
 0x16f PF: > { %s15_s22 = sadd.s32 1, %s1124_s22   ;;  %s1343_s18 = smov %s1112_s19 }
 0x170   : > { %p12_p12 = scmp.ge.s32.totalorder %s15_s22, 5   ;;  %s1344_s19 = smov %s1193_s26 }
 0x171   : > { %s1345_s20 = smov %s1120_s21  ;;  %s1346_s21 = smov %s1348_s23 }
 0x172   :  { %14 = sbr.rel (!%p12_p12) target bundleno = 3 (0x3), region = 121 }

// kernel: resnet_forward.30
= control target key start
LH: loop header
LB: loop body
LE: loop exit
PB: predicated region body
PF: predicated region fallthrough
CT: control target
= control target key end

     0   :  { %s1076_s15 = smov 0   ;;  %s1078_s16 = smov 0   ;;  %s1243_s0 = inlined_call_operand.vmem [shape: bf16[32,1152], index: 0, kind: input, shape index: {}]   ;;  %s1244_s1 = inlined_call_operand.vmem [shape: bf16[1152,128], index: 1, kind: input, shape index: {}]   ;;  %s1245_s2 = inlined_call_operand.vmem [shape: f32[1,128], index: 2, kind: input, shape index: {}]   ;;  %s1246_s3 = inlined_call_operand.vmem [shape: f32[1,128], index: 3, kind: input, shape index: {}]   ;;  %s1247_s4 = inlined_call_operand.vmem [shape: f32[32,128], index: 4, kind: output, shape index: {}]  }
   0x1   :  { %s1080_s17 = smov 0   ;;  %s1082_s18 = smov 0  }
   0x2   :  { %s1084_s19 = smov 0  }
   0x3 LB: > { %s23_s20 = sadd.s32 1, %s1043_s18  ;;  %p42_p1 = scmp.ne.s32.totalorder %s1035_s16, %s1031_s15  ;;  %s1047_s19 = sphi %s1084_s19, %s14_s19   ;;  %s1043_s18 = sphi %s1082_s18, %s1251_s18   ;;  %s1039_s17 = sphi %s1080_s17, %s1250_s17   ;;  %s1035_s16 = sphi %s1078_s16, %s1249_s16   ;;  %s1031_s15 = sphi %s1076_s15, %s1248_s15  }
   0x4   : > { %p24_p0 = scmp.ge.s32.totalorder %s23_s20, 3  ;;  %p43_p2 = scmp.eq.s32.totalorder %s1047_s19, 0 }
   0x5   : > { %s35_s22 = sadd.s32 1, %s1035_s16  ;;  %p821_p5 = scmp.ge.s32.totalorder %s1047_s19, 3 }
   0x6   : > { %s1253_s20 = smov (%p24_p0, %s23_s20), 0  ;;  %p44_p3 = por %p43_p2, %p42_p1 }
   0x7   : > { %s31_s21 = ssub.s32 %s1043_s18, %s1253_s20  ;;  %168 = sbr.rel (%p821_p5) target bundleno = 21 (0x15), region = 24 }
   0x8   : > { %p33_p4 = scmp.eq.s32.totalorder %s31_s21, 0 }
   0xa   : > { %s1111_s23 = scalar_select %p33_p4, %s1035_s16, %s35_s22  }
   0xc   : > { %171 = sbr.rel (!%p44_p3) target bundleno = 21 (0x15), region = 28  ;;  %s173_s24 = sand.u32 (%p44_p3), 1, %s1035_s16  }
   0xd   : > { %s872_s25 = smul.u32 (%p44_p3), 12, %s1043_s18 }
   0xe   : > { %s931_s26 = smul.u32 (%p44_p3), 48, %s173_s24 }
   0xf   : > { %s181_s29 = scalar_lea.vmem (%p44_p3), %s1243_s0, %s872_s25 }
  0x10   : > { %v196_v0 = vld [vmem:[%s181_s29] sm:$0xff] (%p44_p3)  ;;  %v200_v2 = vld [vmem:[%s181_s29 + $0x48] sm:$0xff] (%p44_p3)  ;;  %s175_s30 = scalar_lea.vmem (%p44_p3), [#allocation2], %s931_s26  ;;  %v827_v6 = vld [vmem:[%s181_s29 + $0x50] sm:$0xf] (%p44_p3) }
  0x11   : > { %v198_v1 = vld [vmem:[%s181_s29 + $0x24] sm:$0xff]  ;;  %197 = vst [vmem:[%s175_s30] sm:$0xff] %v196_v0  ;;  %201 = vst [vmem:[%s175_s30 + $0x18] sm:$0xff] %v200_v2  ;;  %v202_v3 = vld [vmem:[%s181_s29 + $0x6c] sm:$0xff] }
  0x12   : > { %199 = vst [vmem:[%s175_s30 + $0xc] sm:$0xff] %v198_v1  ;;  %v823_v4 = vld [vmem:[%s181_s29 + $0x8] sm:$0xf]  ;;  %v825_v5 = vld [vmem:[%s181_s29 + $0x2c] sm:$0xf]  ;;  %203 = vst [vmem:[%s175_s30 + $0x24] sm:$0xff] %v202_v3 }
  0x13   : > { %824 = vst [vmem:[%s175_s30 + $0x8] sm:$0xf] %v823_v4  ;;  %826 = vst [vmem:[%s175_s30 + $0x14] sm:$0xf] %v825_v5  ;;  %v829_v7 = vld [vmem:[%s181_s29 + $0x74] sm:$0xf] }
  0x14   : > { %828 = vst [vmem:[%s175_s30 + $0x20] sm:$0xf] %v827_v6  ;;  %830 = vst [vmem:[%s175_s30 + $0x2c] sm:$0xf] %v829_v7 }
  0x15 PF: > { %p831_p6 = scmp.ge.s32.totalorder %s1047_s19, 1  ;;  %p233_p7 = scmp.lt.s32.totalorder %s1047_s19, 4 }
  0x17   : > { %p234_p8 = pnand %p831_p6, %p233_p7 }
  0x18   : > { %s240_s5 = sand.u32 (!%p234_p8), 1, %s1031_s15   ;;  %s272_s6 = smul.u32 (!%p234_p8), 48, %s1039_s17 }
  0x19   : > { %237 = sbr.rel (%p234_p8) target bundleno = 363 (0x16b), region = 58  ;;  %p833_p10 = scmp.ne.s32.totalorder (!%p234_p8), %s1039_s17, 0 }
  0x1a   : > { %s932_s7 = smul.u32 (!%p234_p8), 48, %s240_s5  ;;  %p273_p9 = scmp.lt.s32.totalorder (!%p234_p8), %s272_s6, 143 }
  0x1c   : > { %s1128_s12 = scalar_lea.vmem (!%p234_p8), [#allocation2], %s932_s7 }
  0x1e   : > { %s1255_s6 = smov (!%p273_p9, %s272_s6), 143  ;;  %288 = sbr.rel (%p833_p10) target bundleno = 38 (0x26), region = 66 }
  0x1f   : > { %s832_s8 = sshll.u32 %s1255_s6, 2 }
  0x20   : > { %s1126_s11 = scalar_lea.vmem %s1244_s1, %s832_s8 }
  0x23   : > { %v1049_v8 = vmov 0.0  }
  0x24   : > { %289 = vst [vmem:[%s1247_s4] sm:$0xff] %v1049_v8  ;;  %290 = vst [vmem:[%s1247_s4 + $0x8] sm:$0xff] %v1049_v8 }
  0x25   : > { %291 = vst [vmem:[%s1247_s4 + $0x10] sm:$0xff] %v1049_v8  ;;  %292 = vst [vmem:[%s1247_s4 + $0x18] sm:$0xff] %v1049_v8 }
  0x26 PF: > { %v975_v9 = vld [vmem:[%s1126_s11 + $0x78] sm:$0xff]   ;;  %v978_v12 = vld [vmem:[%s1126_s11 + $0x70] sm:$0xff]   ;;  %v981_v15 = vld [vmem:[%s1126_s11 + $0x68] sm:$0xff]   ;;  %p864_p11 = scmp.ne.s32.totalorder %s1039_s17, 2 }
  0x27   : > { %v976_v10 = vld [vmem:[%s1126_s11 + $0x38] sm:$0xff]   ;;  %873 = vmatprep.subr.bf16.mxu0 %v975_v9  ;;  %v979_v13 = vld [vmem:[%s1126_s11 + $0x30] sm:$0xff]   ;;  %v982_v16 = vld [vmem:[%s1126_s11 + $0x28] sm:$0xff]  }
  0x28   : > { %v977_v11 = vld [vmem:[%s1126_s11 + $0xb8] sm:$0xff]   ;;  %874 = vmatpush3.bf16.msra.mxu0 %v976_v10  ;;  %v980_v14 = vld [vmem:[%s1126_s11 + $0xb0] sm:$0xff]   ;;  %v983_v17 = vld [vmem:[%s1126_s11 + $0xa8] sm:$0xff]  }
  0x29   : > { %911 = vmatprep.subr.bf16.mxu1 %v977_v11  ;;  %875 = vmatprep.subr.bf16.mxu0 %v978_v12  ;;  %v984_v18 = vld [vmem:[%s1126_s11 + $0x60] sm:$0xff]   ;;  %v987_v21 = vld [vmem:[%s1126_s11 + $0x58] sm:$0xff]   ;;  %v990_v24 = vld [vmem:[%s1126_s11 + $0x50] sm:$0xff]  }
  0x2a   : > { %912 = vmatpush3.bf16.msra.mxu1 %v977_v11  ;;  %v985_v19 = vld [vmem:[%s1126_s11 + $0x20] sm:$0xff]   ;;  %v989_v22 = vld [vmem:[%s1126_s11 + $0x98] sm:$0xff]   ;;  %v992_v25 = vld [vmem:[%s1126_s11 + $0x90] sm:$0xff]  }
  0x2b   : > { %913 = vmatprep.subr.bf16.mxu1 %v980_v14  ;;  %v986_v20 = vld [vmem:[%s1126_s11 + $0xa0] sm:$0xff]   ;;  %v988_v23 = vld [vmem:[%s1126_s11 + $0x18] sm:$0xff]   ;;  %v991_v26 = vld [vmem:[%s1126_s11 + $0x10] sm:$0xff]  }
  0x2c   : > { %876 = vmatpush3.bf16.msra.mxu0 %v979_v13  ;;  %v993_v27 = vld [vmem:[%s1126_s11 + $0x48] sm:$0xff]   ;;  %v996_v30 = vld [vmem:[%s1126_s11 + $0x40] sm:$0xff]   ;;  %v295_v58 = vld [vmem:[%s1247_s4 + $0x10] sm:$0xff] }
  0x2d   : > { %877 = vmatprep.subr.bf16.mxu0 %v981_v15  ;;  %v994_v28 = vld [vmem:[%s1126_s11 + $0x8] sm:$0xff]   ;;  %v998_v31 = vld [vmem:[%s1126_s11 + $0x80] sm:$0xff]   ;;  %v296_v0 = vld [vmem:[%s1247_s4 + $0x18] sm:$0xff] }
  0x2e   : > { %914 = vmatpush3.bf16.msra.mxu1 %v980_v14  ;;  %v995_v29 = vld [vmem:[%s1126_s11 + $0x88] sm:$0xff]   ;;  %v1001_v32 = vld [vmem:[%s1128_s12 + $0x4] ss:$12 sps:$4 sm:$0xff]  }
  0x2f   : > { %915 = vmatprep.subr.bf16.mxu1 %v983_v17  ;;  %v1002_v33 = vld [vmem:[%s1128_s12 + $0x8] ss:$12 sps:$4 sm:$0xff]   ;;  %561 = vmatprep.mubr.bf16.mxu0 %v1001_v32  ;;  %v999_v35 = vld [vmem:[%s1128_s12] ss:$12 sps:$4 sm:$0xff]   ;;  %v1006_v38 = vld [vmem:[%s1128_s12 + $0x18] ss:$12 sps:$4 sm:$0xff]  }
  0x30   : > { %878 = vmatpush3.bf16.msra.mxu0 %v982_v16  ;;  %v997_v34 = vld [vmem:[%s1126_s11] sm:$0xff]   ;;  %927 = vmatprep.mubr.bf16.mxu1 %v1002_v33  ;;  %v1004_v36 = vld [vmem:[%s1128_s12 + $0x1c] ss:$12 sps:$4 sm:$0xff]  }
  0x31   : > { %879 = vmatprep.subr.bf16.mxu0 %v984_v18  ;;  %v1003_v37 = vld [vmem:[%s1128_s12 + $0x20] ss:$12 sps:$4 sm:$0xff]  }
  0x32   : > { %916 = vmatpush3.bf16.msra.mxu1 %v983_v17  ;;  %v293_v44 = vld [vmem:[%s1247_s4] sm:$0xff]  ;;  %v294_v52 = vld [vmem:[%s1247_s4 + $0x8] sm:$0xff] }
  0x33   : > { %917 = vmatprep.subr.bf16.mxu1 %v986_v20 }
  0x34   : > { %880 = vmatpush3.bf16.msra.mxu0 %v985_v19 }
  0x35   : > { %881 = vmatprep.subr.bf16.mxu0 %v987_v21 }
  0x36   : > { %918 = vmatpush3.bf16.msra.mxu1 %v986_v20 }
  0x37   : > { %919 = vmatprep.subr.bf16.mxu1 %v989_v22 }
  0x38   : > { %882 = vmatpush3.bf16.msra.mxu0 %v988_v23 }
  0x39   : > { %883 = vmatprep.subr.bf16.mxu0 %v990_v24 }
  0x3a   : > { %920 = vmatpush3.bf16.msra.mxu1 %v989_v22 }
  0x3b   : > { %921 = vmatprep.subr.bf16.mxu1 %v992_v25 }
  0x3c   : > { %884 = vmatpush3.bf16.msra.mxu0 %v991_v26 }
  0x3d   : > { %885 = vmatprep.subr.bf16.mxu0 %v993_v27 }
  0x3e   : > { %922 = vmatpush3.bf16.msra.mxu1 %v992_v25 }
  0x3f   : > { %923 = vmatprep.subr.bf16.mxu1 %v995_v29 }
  0x40   : > { %886 = vmatpush3.bf16.msra.mxu0 %v994_v28 }
  0x41   : > { %887 = vmatprep.subr.bf16.mxu0 %v996_v30 }
  0x42   : > { %924 = vmatpush3.bf16.msra.mxu1 %v995_v29 }
  0x43   : > { %925 = vmatprep.subr.bf16.mxu1 %v998_v31 }
  0x44   : > { %888 = vmatpush3.bf16.msra.mxu0 %v997_v34 }
  0x46   : > { %926 = vmatpush3.bf16.msra.mxu1 %v998_v31 }
  0x47   : > { %562 = vmatmul.mubr.bf16.vlgmr.msra.gmra.mxu0 %v999_v35 }
  0x48   : > { %569 = vmatprep.mubr.bf16.mxu0 %v1004_v36 }
  0x49   : > { %928 = vmatmul.mubr.bf16.vlgmr.msra.gmra.mxu1 %v1003_v37 }
  0x4f   : > { %570 = vmatmul.mubr.bf16.gmra.mxu0 %v1006_v38 }
 0x107   : > { %v889_v39 = vpop.f32.mrf.mxu0 }
 0x109   : > { %v890_v40 = vpop.f32.mrf.mxu0  ;;  %v929_v41 = vpop.f32.mrf.mxu1 }
 0x10a   : > { %v891_v42 = vadd.f32 %v890_v40, %v889_v39 }
 0x10b   : > { %v892_v43 = vpop.f32.mrf.mxu0  ;;  %v612_v45 = vpop.f32.mrf.mxu1 }
 0x10c   : > { %v613_v46 = vadd.f32 %v891_v42, %v612_v45 }
 0x10d   : > { %v893_v47 = vpop.f32.mrf.mxu0  ;;  %v930_v48 = vpop.f32.mrf.mxu1 }
 0x10e   : > { %v627_v49 = vadd.f32 %v613_v46, %v293_v44  ;;  %v894_v50 = vadd.f32 %v893_v47, %v892_v43 }
 0x10f   : > { %v895_v51 = vpop.f32.mrf.mxu0  ;;  %v615_v53 = vpop.f32.mrf.mxu1 }
 0x110   : > { %631 = vst [vmem:[%s1247_s4] sm:$0xff] %v627_v49  ;;  %v616_v54 = vadd.f32 %v894_v50, %v615_v53 }
 0x111   : > { %v896_v55 = vpop.f32.mrf.mxu0 }
 0x112   : > { %v628_v56 = vadd.f32 %v616_v54, %v294_v52  ;;  %v897_v57 = vadd.f32 %v896_v55, %v895_v51 }
 0x113   : > { %v898_v59 = vpop.f32.mrf.mxu0 }
 0x114   : > { %632 = vst [vmem:[%s1247_s4 + $0x8] sm:$0xff] %v628_v56  ;;  %v621_v60 = vadd.f32 %v929_v41, %v897_v57 }
 0x115   : > { %v899_v61 = vpop.f32.mrf.mxu0 }
 0x116   : > { %v629_v62 = vadd.f32 %v621_v60, %v295_v58  ;;  %v900_v63 = vadd.f32 %v899_v61, %v898_v59 }
 0x118   : > { %633 = vst [vmem:[%s1247_s4 + $0x10] sm:$0xff] %v629_v62  ;;  %v624_v1 = vadd.f32 %v930_v48, %v900_v63  ;;  %638 = sbr.rel (%p864_p11) target bundleno = 363 (0x16b), region = 70 }
 0x11a   : > { %v630_v2 = vadd.f32 %v624_v1, %v296_v0 }
 0x11c   : > { %634 = vst [vmem:[%s1247_s4 + $0x18] sm:$0xff] %v630_v2 }
 0x11d   : > { %v645_v3 = vlaneseq  ;;  %v639_v5 = vld [vmem:[%s1247_s4] sm:$0xff]  ;;  %v640_v6 = vld [vmem:[%s1247_s4 + $0x8] sm:$0xff]  ;;  %v1050_v11 = vmov 0.0  }
 0x11e   : > { %v666_v10 = vadd.f32 %v640_v6, %v639_v5  ;;  %v866_v46 = vld [vmem:[%s1245_s2] ss:$0 sm:$0xff] }
 0x11f   : > { %v646_v4 = vshrl.u32 %v645_v3, 7  ;;  %v641_v8 = vld [vmem:[%s1247_s4 + $0x10] sm:$0xff]  ;;  %v867_v51 = vld [vmem:[%s1246_s3] ss:$0 sm:$0xff] }
 0x121   : > { %v648_v7 = vadd.s32 16, %v646_v4 }
 0x123   : > { %v642_v9 = vld [vmem:[%s1247_s4 + $0x18] sm:$0xff]  ;;  %vm652_vm0 = vcmp.lt.s32.totalorder %v648_v7, 18 }
 0x124   : > { %v865_v12 = vsel %vm652_vm0, 1.0, %v1050_v11  ;;  %v665_v14 = vmul.f32 0.0, %v642_v9 }
 0x125   : > { %v664_v13 = vmul.f32 %v865_v12, %v641_v8 }
 0x127   : > { %v667_v15 = vadd.f32 %v666_v10, %v664_v13 }
 0x129   : > { %v668_v16 = vadd.f32 %v667_v15, %v665_v14 }
 0x12b   : > { %v669_v17 = vrot.slane %v668_v16, 4 }
 0x12d   : > { %v670_v18 = vadd.f32 %v669_v17, %v668_v16 }
 0x12f   : > { %v671_v19 = vrot.slane %v670_v18, 2 }
 0x131   : > { %v672_v20 = vadd.f32 %v671_v19, %v670_v18 }
 0x133   : > { %v673_v21 = vrot.slane %v672_v20, 1 }
 0x135   : > { %v674_v22 = vadd.f32 %v673_v21, %v672_v20 }
 0x137   : > { %v675_v23 = vmul.f32 0.055555556, %v674_v22 }
 0x139   : > { %v676_v24 = vsub.f32 %v639_v5, %v675_v23  ;;  %v677_v25 = vsub.f32 %v640_v6, %v675_v23  ;;  %v678_v26 = vsub.f32 %v641_v8, %v675_v23  ;;  %v679_v27 = vsub.f32 %v642_v9, %v675_v23 }
 0x13b   : > { %v682_v28 = vmul.f32 %v865_v12, %v678_v26  ;;  %v683_v29 = vmul.f32 0.0, %v679_v27  ;;  %v684_v30 = vmul.f32 %v676_v24, %v676_v24  ;;  %v685_v31 = vmul.f32 %v677_v25, %v677_v25 }
 0x13d   : > { %v686_v32 = vmul.f32 %v682_v28, %v682_v28  ;;  %v687_v33 = vmul.f32 %v683_v29, %v683_v29  ;;  %v688_v34 = vadd.f32 %v685_v31, %v684_v30 }
 0x13f   : > { %v689_v35 = vadd.f32 %v688_v34, %v686_v32 }
 0x141   : > { %v690_v36 = vadd.f32 %v689_v35, %v687_v33 }
 0x143   : > { %v691_v37 = vrot.slane %v690_v36, 4 }
 0x145   : > { %v692_v38 = vadd.f32 %v691_v37, %v690_v36 }
 0x147   : > { %v693_v39 = vrot.slane %v692_v38, 2 }
 0x149   : > { %v694_v40 = vadd.f32 %v693_v39, %v692_v38 }
 0x14b   : > { %v695_v41 = vrot.slane %v694_v40, 1 }
 0x14d   : > { %v696_v42 = vadd.f32 %v695_v41, %v694_v40 }
 0x14f   : > { %v697_v43 = vmul.f32 0.055555556, %v696_v42 }
 0x151   : > { %v698_v44 = vadd.f32 1e-05, %v697_v43 }
 0x153   : > { %1007 = vrsqrt.f32 %v698_v44 }
 0x160   : > { %v1008_v45 = vpop.eup %1007 }
 0x161   : > { %v700_v47 = vmul.f32 %v1008_v45, %v676_v24  ;;  %v701_v48 = vmul.f32 %v1008_v45, %v677_v25  ;;  %v702_v49 = vmul.f32 %v1008_v45, %v678_v26  ;;  %v703_v50 = vmul.f32 %v1008_v45, %v679_v27 }
 0x163   : > { %v710_v52 = vmul.f32 %v866_v46, %v700_v47  ;;  %v711_v53 = vmul.f32 %v866_v46, %v701_v48  ;;  %v712_v54 = vmul.f32 %v866_v46, %v702_v49  ;;  %v713_v55 = vmul.f32 %v866_v46, %v703_v50 }
 0x165   : > { %v720_v56 = vadd.f32 %v867_v51, %v710_v52  ;;  %v721_v57 = vadd.f32 %v867_v51, %v711_v53  ;;  %v722_v58 = vadd.f32 %v867_v51, %v712_v54  ;;  %v723_v59 = vadd.f32 %v867_v51, %v713_v55 }
 0x167   : > { %v724_v60 = vmax.f32 %v720_v56, 0.0  ;;  %v725_v61 = vmax.f32 %v721_v57, 0.0  ;;  %v726_v62 = vmax.f32 %v722_v58, 0.0  ;;  %v727_v63 = vmax.f32 %v723_v59, 0.0 }
 0x169   : > { %728 = vst [vmem:[%s1247_s4] sm:$0xff] %v724_v60  ;;  %729 = vst [vmem:[%s1247_s4 + $0x8] sm:$0xff] %v725_v61 }
 0x16a   : > { %730 = vst [vmem:[%s1247_s4 + $0x10] sm:$0xff] %v726_v62  ;;  %731 = vst [vmem:[%s1247_s4 + $0x18] sm:$0xff] %v727_v63 }
 0x16b PF: > { %s14_s19 = sadd.s32 1, %s1047_s19   ;;  %s1248_s15 = smov %s1035_s16 }
 0x16c   : > { %p11_p12 = scmp.ge.s32.totalorder %s14_s19, 5   ;;  %s1249_s16 = smov %s1111_s23 }
 0x16d   : > { %s1250_s17 = smov %s1043_s18  ;;  %s1251_s18 = smov %s1253_s20 }
 0x16e   :  { %13 = sbr.rel (!%p11_p12) target bundleno = 3 (0x3), region = 114 }

// kernel: resnet_forward.32
= control target key start
LH: loop header
LB: loop body
LE: loop exit
PB: predicated region body
PF: predicated region fallthrough
CT: control target
= control target key end

     0   :  { %s1159_s15 = smov 0   ;;  %s1161_s16 = smov 0   ;;  %s1347_s0 = inlined_call_operand.vmem [shape: bf16[16,1152], index: 0, kind: input, shape index: {}]   ;;  %s1348_s1 = inlined_call_operand.vmem [shape: bf16[1152,256], index: 1, kind: input, shape index: {}]   ;;  %s1349_s2 = inlined_call_operand.vmem [shape: f32[1,256], index: 2, kind: input, shape index: {}]   ;;  %s1350_s3 = inlined_call_operand.vmem [shape: f32[1,256], index: 3, kind: input, shape index: {}]   ;;  %s1351_s4 = inlined_call_operand.vmem [shape: f32[16,256], index: 4, kind: output, shape index: {}]  }
   0x1   :  { %s1163_s17 = smov 0   ;;  %s1165_s18 = smov 0  }
   0x2   :  { %s1167_s19 = smov 0  }
   0x3 LB: > { %s23_s20 = sadd.s32 1, %s1126_s18  ;;  %p42_p1 = scmp.ne.s32.totalorder %s1118_s16, %s1114_s15  ;;  %s1130_s19 = sphi %s1167_s19, %s14_s19   ;;  %s1126_s18 = sphi %s1165_s18, %s1355_s18   ;;  %s1122_s17 = sphi %s1163_s17, %s1354_s17   ;;  %s1118_s16 = sphi %s1161_s16, %s1353_s16   ;;  %s1114_s15 = sphi %s1159_s15, %s1352_s15  }
   0x4   : > { %p24_p0 = scmp.ge.s32.totalorder %s23_s20, 3  ;;  %p43_p2 = scmp.eq.s32.totalorder %s1130_s19, 0 }
   0x5   : > { %s35_s22 = sadd.s32 1, %s1118_s16  ;;  %p900_p5 = scmp.ge.s32.totalorder %s1130_s19, 3 }
   0x6   : > { %s1357_s20 = smov (%p24_p0, %s23_s20), 0  ;;  %p44_p3 = por %p43_p2, %p42_p1 }
   0x7   : > { %s31_s21 = ssub.s32 %s1126_s18, %s1357_s20  ;;  %168 = sbr.rel (%p900_p5) target bundleno = 19 (0x13), region = 24 }
   0x8   : > { %p33_p4 = scmp.eq.s32.totalorder %s31_s21, 0 }
   0xa   : > { %s1194_s23 = scalar_select %p33_p4, %s1118_s16, %s35_s22  }
   0xc   : > { %171 = sbr.rel (!%p44_p3) target bundleno = 19 (0x13), region = 28  ;;  %s173_s24 = sand.u32 (%p44_p3), 1, %s1118_s16  }
   0xd   : > { %s966_s25 = smul.u32 (%p44_p3), 12, %s1126_s18 }
   0xe   : > { %s968_s26 = smul.u32 (%p44_p3), 24, %s173_s24 }
   0xf   : > { %s181_s29 = scalar_lea.vmem (%p44_p3), %s1347_s0, %s966_s25 }
  0x10   : > { %v196_v0 = vld [vmem:[%s181_s29] sm:$0xff] (%p44_p3)  ;;  %v902_v2 = vld [vmem:[%s181_s29 + $0x8] sm:$0xf] (%p44_p3)  ;;  %s175_s30 = scalar_lea.vmem (%p44_p3), [#allocation2], %s968_s26  ;;  %v904_v3 = vld [vmem:[%s181_s29 + $0x2c] sm:$0xf] (%p44_p3) }
  0x11   : > { %v198_v1 = vld [vmem:[%s181_s29 + $0x24] sm:$0xff]  ;;  %197 = vst [vmem:[%s175_s30] sm:$0xff] %v196_v0  ;;  %903 = vst [vmem:[%s175_s30 + $0x8] sm:$0xf] %v902_v2 }
  0x12   : > { %199 = vst [vmem:[%s175_s30 + $0xc] sm:$0xff] %v198_v1  ;;  %905 = vst [vmem:[%s175_s30 + $0x14] sm:$0xf] %v904_v3 }
  0x13 PF: > { %p906_p6 = scmp.ge.s32.totalorder %s1130_s19, 1  ;;  %p226_p7 = scmp.lt.s32.totalorder %s1130_s19, 4 }
  0x15   : > { %p227_p8 = pnand %p906_p6, %p226_p7 }
  0x16   : > { %s233_s5 = sand.u32 (!%p227_p8), 1, %s1114_s15   ;;  %s267_s6 = smul.u32 (!%p227_p8), 48, %s1122_s17 }
  0x17   : > { %230 = sbr.rel (%p227_p8) target bundleno = 377 (0x179), region = 58  ;;  %p909_p10 = scmp.ne.s32.totalorder (!%p227_p8), %s1122_s17, 0 }
  0x18   : > { %s969_s7 = smul.u32 (!%p227_p8), 24, %s233_s5  ;;  %p268_p9 = scmp.lt.s32.totalorder (!%p227_p8), %s267_s6, 143 }
  0x1a   : > { %s1211_s12 = scalar_lea.vmem (!%p227_p8), [#allocation2], %s969_s7 }
  0x1c   : > { %s1359_s6 = smov (!%p268_p9, %s267_s6), 143  ;;  %285 = sbr.rel (%p909_p10) target bundleno = 36 (0x24), region = 66 }
  0x1d   : > { %s967_s8 = sshll.u32 %s1359_s6, 3 }
  0x1e   : > { %s1209_s11 = scalar_lea.vmem %s1348_s1, %s967_s8 }
  0x21   : > { %v1132_v4 = vmov 0.0  }
  0x22   : > { %286 = vst [vmem:[%s1351_s4] sm:$0xff] %v1132_v4  ;;  %287 = vst [vmem:[%s1351_s4 + $0x8] sm:$0xff] %v1132_v4 }
  0x23   : > { %288 = vst [vmem:[%s1351_s4 + $0x10] sm:$0xff] %v1132_v4  ;;  %289 = vst [vmem:[%s1351_s4 + $0x18] sm:$0xff] %v1132_v4 }
  0x24 PF: > { %v1012_v5 = vld [vmem:[%s1209_s11 + $0x74] ss:$8 sps:$4 sm:$0xff]   ;;  %v1014_v6 = vld [vmem:[%s1209_s11 + $0x70] ss:$8 sps:$4 sm:$0xff]   ;;  %v1133_v7 = vmov 0   ;;  %p961_p11 = scmp.ne.s32.totalorder %s1122_s17, 2 }
  0x25   : > { %677 = vmatprep.mubr.bf16.mxu1 %v1133_v7  ;;  %602 = vmatprep.subr.bf16.mxu0 %v1012_v5  ;;  %v1015_v8 = vld [vmem:[%s1209_s11 + $0x64] ss:$8 sps:$4 sm:$0xff]   ;;  %v1017_v9 = vld [vmem:[%s1209_s11 + $0x60] ss:$8 sps:$4 sm:$0xff]   ;;  %v1018_v10 = vld [vmem:[%s1209_s11 + $0x54] ss:$8 sps:$4 sm:$0xff]  }
  0x26   : > { %603 = vmatpush1.bf16.msra.mxu0 %v1014_v6  ;;  %v1020_v11 = vld [vmem:[%s1209_s11 + $0x50] ss:$8 sps:$4 sm:$0xff]   ;;  %v1021_v12 = vld [vmem:[%s1209_s11 + $0x44] ss:$8 sps:$4 sm:$0xff]   ;;  %v1033_v13 = vld [vmem:[%s1209_s11 + $0x174] ss:$8 sps:$4 sm:$0xff]  }
  0x27   : > { %604 = vmatprep.subr.bf16.mxu0 %v1015_v8  ;;  %v1035_v14 = vld [vmem:[%s1209_s11 + $0x170] ss:$8 sps:$4 sm:$0xff]   ;;  %v1023_v15 = vld [vmem:[%s1209_s11 + $0x40] ss:$8 sps:$4 sm:$0xff]   ;;  %v1024_v16 = vld [vmem:[%s1209_s11 + $0x34] ss:$8 sps:$4 sm:$0xff]   ;;  %645 = vmatprep.subr.bf16.mxu1 %v1033_v13 }
  0x28   : > { %v1039_v17 = vld [vmem:[%s1209_s11 + $0x164] ss:$8 sps:$4 sm:$0xff]   ;;  %646 = vmatpush1.bf16.msra.mxu1 %v1035_v14  ;;  %v1041_v18 = vld [vmem:[%s1209_s11 + $0x160] ss:$8 sps:$4 sm:$0xff]   ;;  %v1026_v19 = vld [vmem:[%s1209_s11 + $0x30] ss:$8 sps:$4 sm:$0xff]  }
  0x29   : > { %647 = vmatprep.subr.bf16.mxu1 %v1039_v17  ;;  %v1045_v20 = vld [vmem:[%s1209_s11 + $0x154] ss:$8 sps:$4 sm:$0xff]   ;;  %v1027_v21 = vld [vmem:[%s1209_s11 + $0x24] ss:$8 sps:$4 sm:$0xff]   ;;  %v1047_v22 = vld [vmem:[%s1209_s11 + $0x150] ss:$8 sps:$4 sm:$0xff]  }
  0x2a   : > { %605 = vmatpush1.bf16.msra.mxu0 %v1017_v9  ;;  %v1051_v23 = vld [vmem:[%s1209_s11 + $0x144] ss:$8 sps:$4 sm:$0xff]   ;;  %v1029_v24 = vld [vmem:[%s1209_s11 + $0x20] ss:$8 sps:$4 sm:$0xff]   ;;  %v1030_v25 = vld [vmem:[%s1209_s11 + $0x14] ss:$8 sps:$4 sm:$0xff]  }
  0x2b   : > { %606 = vmatprep.subr.bf16.mxu0 %v1018_v10  ;;  %v1053_v26 = vld [vmem:[%s1209_s11 + $0x140] ss:$8 sps:$4 sm:$0xff]   ;;  %v1057_v27 = vld [vmem:[%s1209_s11 + $0x134] ss:$8 sps:$4 sm:$0xff]   ;;  %v1032_v28 = vld [vmem:[%s1209_s11 + $0x10] ss:$8 sps:$4 sm:$0xff]  }
  0x2c   : > { %648 = vmatpush1.bf16.msra.mxu1 %v1041_v18  ;;  %v1036_v29 = vld [vmem:[%s1209_s11 + $0x4] ss:$8 sps:$4 sm:$0xff]   ;;  %v1059_v30 = vld [vmem:[%s1209_s11 + $0x130] ss:$8 sps:$4 sm:$0xff]   ;;  %v1038_v32 = vld [vmem:[%s1209_s11] ss:$8 sps:$4 sm:$0xff]  }
  0x2d   : > { %649 = vmatprep.subr.bf16.mxu1 %v1045_v20  ;;  %v1063_v31 = vld [vmem:[%s1209_s11 + $0x124] ss:$8 sps:$4 sm:$0xff]   ;;  %v1042_v33 = vld [vmem:[%s1209_s11 + $0xf4] ss:$8 sps:$4 sm:$0xff]   ;;  %v1065_v34 = vld [vmem:[%s1209_s11 + $0x120] ss:$8 sps:$4 sm:$0xff]  }
  0x2e   : > { %607 = vmatpush1.bf16.msra.mxu0 %v1020_v11  ;;  %v1069_v35 = vld [vmem:[%s1209_s11 + $0x114] ss:$8 sps:$4 sm:$0xff]   ;;  %v1044_v36 = vld [vmem:[%s1209_s11 + $0xf0] ss:$8 sps:$4 sm:$0xff]   ;;  %v1048_v37 = vld [vmem:[%s1209_s11 + $0xe4] ss:$8 sps:$4 sm:$0xff]  }
  0x2f   : > { %608 = vmatprep.subr.bf16.mxu0 %v1021_v12  ;;  %v1071_v38 = vld [vmem:[%s1209_s11 + $0x110] ss:$8 sps:$4 sm:$0xff]   ;;  %v1075_v39 = vld [vmem:[%s1209_s11 + $0x104] ss:$8 sps:$4 sm:$0xff]   ;;  %v1050_v41 = vld [vmem:[%s1209_s11 + $0xe0] ss:$8 sps:$4 sm:$0xff]  }
  0x30   : > { %650 = vmatpush1.bf16.msra.mxu1 %v1047_v22  ;;  %v1087_v40 = vld [vmem:[%s1211_s12 + $0x4] ss:$12 sps:$4 sm:$0xff]   ;;  %v1081_v46 = vld [vmem:[%s1211_s12 + $0x8] ss:$12 sps:$4 sm:$0xff]   ;;  %v1085_v56 = vld [vmem:[%s1211_s12] ss:$12 sps:$4 sm:$0xff]  }
  0x31   : > { %651 = vmatprep.subr.bf16.mxu1 %v1051_v23  ;;  %v1054_v42 = vld [vmem:[%s1209_s11 + $0xd4] ss:$8 sps:$4 sm:$0xff]   ;;  %634 = vmatprep.mubr.bf16.mxu0 %v1087_v40  ;;  %v1077_v43 = vld [vmem:[%s1209_s11 + $0x100] ss:$8 sps:$4 sm:$0xff]   ;;  %v1056_v44 = vld [vmem:[%s1209_s11 + $0xd0] ss:$8 sps:$4 sm:$0xff]  }
  0x32   : > { %609 = vmatpush1.bf16.msra.mxu0 %v1023_v15  ;;  %v1060_v45 = vld [vmem:[%s1209_s11 + $0xc4] ss:$8 sps:$4 sm:$0xff]   ;;  %v1062_v47 = vld [vmem:[%s1209_s11 + $0xc0] ss:$8 sps:$4 sm:$0xff]   ;;  %v1066_v48 = vld [vmem:[%s1209_s11 + $0xb4] ss:$8 sps:$4 sm:$0xff]  }
  0x33   : > { %610 = vmatprep.subr.bf16.mxu0 %v1024_v16  ;;  %v1068_v49 = vld [vmem:[%s1209_s11 + $0xb0] ss:$8 sps:$4 sm:$0xff]   ;;  %v1072_v50 = vld [vmem:[%s1209_s11 + $0xa4] ss:$8 sps:$4 sm:$0xff]   ;;  %v1074_v51 = vld [vmem:[%s1209_s11 + $0xa0] ss:$8 sps:$4 sm:$0xff]  }
  0x34   : > { %652 = vmatpush1.bf16.msra.mxu1 %v1053_v26  ;;  %v1078_v52 = vld [vmem:[%s1209_s11 + $0x94] ss:$8 sps:$4 sm:$0xff]   ;;  %v1080_v53 = vld [vmem:[%s1209_s11 + $0x90] ss:$8 sps:$4 sm:$0xff]   ;;  %v1082_v54 = vld [vmem:[%s1209_s11 + $0x84] ss:$8 sps:$4 sm:$0xff]  }
  0x35   : > { %653 = vmatprep.subr.bf16.mxu1 %v1057_v27  ;;  %v1084_v55 = vld [vmem:[%s1209_s11 + $0x80] ss:$8 sps:$4 sm:$0xff]   ;;  %v292_v3 = vld [vmem:[%s1351_s4 + $0x10] sm:$0xff]  ;;  %v293_v8 = vld [vmem:[%s1351_s4 + $0x18] sm:$0xff] }
  0x36   : > { %611 = vmatpush1.bf16.msra.mxu0 %v1026_v19  ;;  %v290_v59 = vld [vmem:[%s1351_s4] sm:$0xff]  ;;  %v291_v63 = vld [vmem:[%s1351_s4 + $0x8] sm:$0xff] }
  0x37   : > { %612 = vmatprep.subr.bf16.mxu0 %v1027_v21 }
  0x38   : > { %654 = vmatpush1.bf16.msra.mxu1 %v1059_v30 }
  0x39   : > { %655 = vmatprep.subr.bf16.mxu1 %v1063_v31 }
  0x3a   : > { %613 = vmatpush1.bf16.msra.mxu0 %v1029_v24 }
  0x3b   : > { %614 = vmatprep.subr.bf16.mxu0 %v1030_v25 }
  0x3c   : > { %656 = vmatpush1.bf16.msra.mxu1 %v1065_v34 }
  0x3d   : > { %657 = vmatprep.subr.bf16.mxu1 %v1069_v35 }
  0x3e   : > { %615 = vmatpush1.bf16.msra.mxu0 %v1032_v28 }
  0x3f   : > { %616 = vmatprep.subr.bf16.mxu0 %v1036_v29 }
  0x40   : > { %658 = vmatpush1.bf16.msra.mxu1 %v1071_v38 }
  0x41   : > { %659 = vmatprep.subr.bf16.mxu1 %v1075_v39 }
  0x42   : > { %617 = vmatpush1.bf16.msra.mxu0 %v1038_v32 }
  0x43   : > { %618 = vmatprep.subr.bf16.mxu0 %v1042_v33 }
  0x44   : > { %660 = vmatpush1.bf16.msra.mxu1 %v1077_v43 }
  0x46   : > { %619 = vmatpush2.bf16.msra.mxu0 %v1044_v36 }
  0x47   : > { %620 = vmatprep.subr.bf16.mxu0 %v1048_v37  ;;  %678 = vmatmul.mubr.bf16.vlgmr.msra.gmra.mxu1 %v1081_v46 }
  0x4a   : > { %621 = vmatpush2.bf16.msra.mxu0 %v1050_v41 }
  0x4b   : > { %622 = vmatprep.subr.bf16.mxu0 %v1054_v42 }
  0x4e   : > { %623 = vmatpush2.bf16.msra.mxu0 %v1056_v44 }
  0x4f   : > { %624 = vmatprep.subr.bf16.mxu0 %v1060_v45 }
  0x52   : > { %625 = vmatpush2.bf16.msra.mxu0 %v1062_v47 }
  0x53   : > { %626 = vmatprep.subr.bf16.mxu0 %v1066_v48 }
  0x56   : > { %627 = vmatpush2.bf16.msra.mxu0 %v1068_v49 }
  0x57   : > { %628 = vmatprep.subr.bf16.mxu0 %v1072_v50 }
  0x5a   : > { %629 = vmatpush2.bf16.msra.mxu0 %v1074_v51 }
  0x5b   : > { %630 = vmatprep.subr.bf16.mxu0 %v1078_v52 }
  0x5e   : > { %631 = vmatpush2.bf16.msra.mxu0 %v1080_v53 }
  0x5f   : > { %632 = vmatprep.subr.bf16.mxu0 %v1082_v54 }
  0x62   : > { %633 = vmatpush2.bf16.msra.mxu0 %v1084_v55 }
  0x65   : > { %635 = vmatmul.mubr.bf16.vlgmr.msra.gmra.mxu0 %v1085_v56 }
 0x107   : > { %v679_v57 = vpop.f32.mrf.mxu1 }
 0x109   : > { %v681_v58 = vpop.f32.mrf.mxu1 }
 0x10b   : > { %v683_v62 = vpop.f32.mrf.mxu1 }
 0x10d   : > { %v685_v7 = vpop.f32.mrf.mxu1 }
 0x125   : > { %v636_v60 = vpop.f32.mrf.mxu0 }
 0x126   : > { %v680_v61 = vadd.f32 %v679_v57, %v636_v60 }
 0x127   : > { %v638_v0 = vpop.f32.mrf.mxu0 }
 0x128   : > { %v688_v1 = vadd.f32 %v680_v61, %v290_v59  ;;  %v682_v2 = vadd.f32 %v681_v58, %v638_v0 }
 0x129   : > { %v640_v4 = vpop.f32.mrf.mxu0 }
 0x12a   : > { %692 = vst [vmem:[%s1351_s4] sm:$0xff] %v688_v1  ;;  %v689_v5 = vadd.f32 %v682_v2, %v291_v63  ;;  %v684_v6 = vadd.f32 %v683_v62, %v640_v4 }
 0x12b   : > { %v642_v9 = vpop.f32.mrf.mxu0 }
 0x12c   : > { %693 = vst [vmem:[%s1351_s4 + $0x8] sm:$0xff] %v689_v5  ;;  %v690_v10 = vadd.f32 %v684_v6, %v292_v3  ;;  %v686_v11 = vadd.f32 %v685_v7, %v642_v9  ;;  %699 = sbr.rel (%p961_p11) target bundleno = 377 (0x179), region = 70 }
 0x12e   : > { %694 = vst [vmem:[%s1351_s4 + $0x10] sm:$0xff] %v690_v10  ;;  %v691_v12 = vadd.f32 %v686_v11, %v293_v8 }
 0x130   : > { %695 = vst [vmem:[%s1351_s4 + $0x18] sm:$0xff] %v691_v12 }
 0x131   : > { %v700_v13 = vld [vmem:[%s1351_s4] sm:$0xff]  ;;  %v772_v63 = vlaneseq }
 0x132   : > { %v704_v2 = vld [vmem:[%s1349_s2] sm:$0x3] }
 0x133   : > { %v701_v16 = vld [vmem:[%s1351_s4 + $0x8] sm:$0xff]  ;;  %v773_v0 = vshrl.u32 %v772_v63, 7  ;;  %v705_v4 = vld [vmem:[%s1350_s3] sm:$0x3] }
 0x135   : > { %v702_v14 = vld [vmem:[%s1351_s4 + $0x10] sm:$0xff]  ;;  %v774_v1 = vsub.s32 0, %v773_v0  ;;  %v778_v3 = vsub.s32 1, %v773_v0 }
 0x136   : > { %v717_v15 = vmul.f32 0.0, %v702_v14 }
 0x137   : > { %v703_v17 = vld [vmem:[%s1351_s4 + $0x18] sm:$0xff]  ;;  %v775_v5 = vrot.slane %v704_v2, %v774_v1  ;;  %v779_v7 = vrot.slane %v704_v2, %v778_v3  ;;  %v790_v10 = vrot.slane %v705_v4, %v774_v1 }
 0x138   : > { %v718_v18 = vmul.f32 0.0, %v703_v17  ;;  %v719_v19 = vadd.f32 %v717_v15, %v700_v13 }
 0x13a   : > { %v726_v20 = vadd.f32 %v718_v18, %v701_v16  ;;  %v720_v21 = vrot.slane %v719_v19, 4 }
 0x13c   : > { %v727_v22 = vrot.slane %v726_v20, 4  ;;  %v721_v23 = vadd.f32 %v720_v21, %v719_v19 }
 0x13e   : > { %v728_v24 = vadd.f32 %v727_v22, %v726_v20  ;;  %v722_v25 = vrot.slane %v721_v23, 2 }
 0x140   : > { %v729_v26 = vrot.slane %v728_v24, 2  ;;  %v723_v27 = vadd.f32 %v722_v25, %v721_v23 }
 0x142   : > { %v730_v28 = vadd.f32 %v729_v26, %v728_v24  ;;  %v724_v29 = vrot.slane %v723_v27, 1 }
 0x144   : > { %v731_v30 = vrot.slane %v730_v28, 1  ;;  %v725_v31 = vadd.f32 %v724_v29, %v723_v27 }
 0x146   : > { %v732_v32 = vadd.f32 %v731_v30, %v730_v28  ;;  %v733_v33 = vmul.f32 0.125, %v725_v31 }
 0x148   : > { %v734_v34 = vmul.f32 0.125, %v732_v32  ;;  %v735_v35 = vsub.f32 %v700_v13, %v733_v33  ;;  %v737_v36 = vsub.f32 %v702_v14, %v733_v33  ;;  %v794_v13 = vrot.slane %v705_v4, %v778_v3 }
 0x14a   : > { %v736_v37 = vsub.f32 %v701_v16, %v734_v34  ;;  %v738_v38 = vsub.f32 %v703_v17, %v734_v34  ;;  %v741_v39 = vmul.f32 0.0, %v737_v36  ;;  %v743_v40 = vmul.f32 %v735_v35, %v735_v35 }
 0x14c   : > { %v742_v41 = vmul.f32 0.0, %v738_v38  ;;  %v744_v42 = vmul.f32 %v736_v37, %v736_v37  ;;  %v745_v43 = vmul.f32 %v741_v39, %v741_v39 }
 0x14e   : > { %v746_v44 = vmul.f32 %v742_v41, %v742_v41  ;;  %v747_v45 = vadd.f32 %v745_v43, %v743_v40 }
 0x150   : > { %v754_v46 = vadd.f32 %v746_v44, %v744_v42  ;;  %v748_v47 = vrot.slane %v747_v45, 4 }
 0x152   : > { %v755_v48 = vrot.slane %v754_v46, 4  ;;  %v749_v49 = vadd.f32 %v748_v47, %v747_v45 }
 0x154   : > { %v756_v50 = vadd.f32 %v755_v48, %v754_v46  ;;  %v750_v51 = vrot.slane %v749_v49, 2 }
 0x156   : > { %v757_v52 = vrot.slane %v756_v50, 2  ;;  %v751_v53 = vadd.f32 %v750_v51, %v749_v49 }
 0x158   : > { %v758_v54 = vadd.f32 %v757_v52, %v756_v50  ;;  %v752_v55 = vrot.slane %v751_v53, 1 }
 0x15a   : > { %v759_v56 = vrot.slane %v758_v54, 1  ;;  %v753_v57 = vadd.f32 %v752_v55, %v751_v53 }
 0x15c   : > { %v760_v58 = vadd.f32 %v759_v56, %v758_v54  ;;  %v761_v59 = vmul.f32 0.125, %v753_v57 }
 0x15e   : > { %v762_v60 = vmul.f32 0.125, %v760_v58  ;;  %v763_v61 = vadd.f32 1e-05, %v761_v59 }
 0x160   : > { %v764_v62 = vadd.f32 1e-05, %v762_v60  ;;  %1088 = vrsqrt.f32 %v763_v61 }
 0x162   : > { %1090 = vrsqrt.f32 %v764_v62 }
 0x16d   : > { %v1089_v6 = vpop.eup %1088 }
 0x16e   : > { %v767_v9 = vmul.f32 %v1089_v6, %v735_v35  ;;  %v769_v11 = vmul.f32 %v1089_v6, %v737_v36 }
 0x16f   : > { %v1091_v8 = vpop.eup %1090 }
 0x170   : > { %v768_v12 = vmul.f32 %v1091_v8, %v736_v37  ;;  %v770_v14 = vmul.f32 %v1091_v8, %v738_v38  ;;  %v782_v15 = vmul.f32 %v775_v5, %v767_v9  ;;  %v784_v16 = vmul.f32 %v775_v5, %v769_v11 }
 0x172   : > { %v783_v17 = vmul.f32 %v779_v7, %v768_v12  ;;  %v785_v18 = vmul.f32 %v779_v7, %v770_v14  ;;  %v797_v19 = vadd.f32 %v790_v10, %v782_v15  ;;  %v799_v20 = vadd.f32 %v790_v10, %v784_v16 }
 0x174   : > { %v798_v21 = vadd.f32 %v794_v13, %v783_v17  ;;  %v800_v22 = vadd.f32 %v794_v13, %v785_v18  ;;  %v801_v23 = vmax.f32 %v797_v19, 0.0  ;;  %v803_v24 = vmax.f32 %v799_v20, 0.0 }
 0x176   : > { %v802_v25 = vmax.f32 %v798_v21, 0.0  ;;  %v804_v26 = vmax.f32 %v800_v22, 0.0  ;;  %805 = vst [vmem:[%s1351_s4] sm:$0xff] %v801_v23  ;;  %807 = vst [vmem:[%s1351_s4 + $0x10] sm:$0xff] %v803_v24 }
 0x178   : > { %806 = vst [vmem:[%s1351_s4 + $0x8] sm:$0xff] %v802_v25  ;;  %808 = vst [vmem:[%s1351_s4 + $0x18] sm:$0xff] %v804_v26 }
 0x179 PF: > { %s14_s19 = sadd.s32 1, %s1130_s19   ;;  %s1352_s15 = smov %s1118_s16 }
 0x17a   : > { %p11_p12 = scmp.ge.s32.totalorder %s14_s19, 5   ;;  %s1353_s16 = smov %s1194_s23 }
 0x17b   : > { %s1354_s17 = smov %s1126_s18  ;;  %s1355_s18 = smov %s1357_s20 }
 0x17c   :  { %13 = sbr.rel (!%p11_p12) target bundleno = 3 (0x3), region = 114 }

// kernel: resnet_forward.33
= control target key start
LH: loop header
LB: loop body
LE: loop exit
PB: predicated region body
PF: predicated region fallthrough
CT: control target
= control target key end

     0   :  { %v257_v1 = vmov 0   ;;  %v191_v18 = vlaneseq  ;;  %s344_s1 = inlined_call_operand.vmem [shape: bf16[128,256], index: 1, kind: input, shape index: {}]   ;;  %s345_s0 = inlined_call_operand.vmem [shape: bf16[16,128], index: 0, kind: input, shape index: {}]   ;;  %s346_s2 = inlined_call_operand.vmem [shape: f32[1,256], index: 2, kind: input, shape index: {}]   ;;  %s347_s3 = inlined_call_operand.vmem [shape: f32[16,256], index: 3, kind: output, shape index: {}]  }
   0x1   :  { %v232_v0 = vld [vmem:[%s344_s1 + $0x74] ss:$8 sps:$4 sm:$0xff]   ;;  %163 = vmatprep.mubr.bf16.mxu0 %v257_v1  ;;  %v234_v2 = vld [vmem:[%s344_s1 + $0x70] ss:$8 sps:$4 sm:$0xff]   ;;  %v235_v3 = vld [vmem:[%s344_s1 + $0x64] ss:$8 sps:$4 sm:$0xff]  }
   0x2   :  { %131 = vmatprep.subr.bf16.mxu0 %v232_v0  ;;  %v237_v4 = vld [vmem:[%s344_s1 + $0x60] ss:$8 sps:$4 sm:$0xff]   ;;  %v238_v5 = vld [vmem:[%s344_s1 + $0x54] ss:$8 sps:$4 sm:$0xff]   ;;  %v240_v6 = vld [vmem:[%s344_s1 + $0x50] ss:$8 sps:$4 sm:$0xff]  }
   0x3   :  { %132 = vmatpush1.bf16.msra.mxu0 %v234_v2  ;;  %v241_v7 = vld [vmem:[%s344_s1 + $0x44] ss:$8 sps:$4 sm:$0xff]   ;;  %v243_v8 = vld [vmem:[%s344_s1 + $0x40] ss:$8 sps:$4 sm:$0xff]   ;;  %v244_v9 = vld [vmem:[%s344_s1 + $0x34] ss:$8 sps:$4 sm:$0xff]  }
   0x4   :  { %133 = vmatprep.subr.bf16.mxu0 %v235_v3  ;;  %v246_v10 = vld [vmem:[%s344_s1 + $0x30] ss:$8 sps:$4 sm:$0xff]   ;;  %v247_v11 = vld [vmem:[%s344_s1 + $0x24] ss:$8 sps:$4 sm:$0xff]   ;;  %v249_v12 = vld [vmem:[%s344_s1 + $0x20] ss:$8 sps:$4 sm:$0xff]  }
   0x5   :  { %v250_v13 = vld [vmem:[%s344_s1 + $0x14] ss:$8 sps:$4 sm:$0xff]   ;;  %v252_v14 = vld [vmem:[%s344_s1 + $0x10] ss:$8 sps:$4 sm:$0xff]   ;;  %v253_v15 = vld [vmem:[%s344_s1 + $0x4] ss:$8 sps:$4 sm:$0xff]  }
   0x6   :  { %v255_v16 = vld [vmem:[%s344_s1] ss:$8 sps:$4 sm:$0xff]   ;;  %v192_v19 = vshrl.u32 %v191_v18, 7 }
   0x7   :  { %134 = vmatpush1.bf16.msra.mxu0 %v237_v4  ;;  %v256_v17 = vld [vmem:[%s345_s0] sm:$0xff]  }
   0x8   :  { %135 = vmatprep.subr.bf16.mxu0 %v238_v5  ;;  %v193_v20 = vsub.s32 0, %v192_v19  ;;  %v189_v21 = vld [vmem:[%s346_s2] sm:$0x3]  ;;  %v197_v22 = vsub.s32 1, %v192_v19 }
   0xa   :  { %v194_v23 = vrot.slane %v189_v21, %v193_v20  ;;  %v198_v25 = vrot.slane %v189_v21, %v197_v22 }
   0xb   :  { %136 = vmatpush1.bf16.msra.mxu0 %v240_v6 }
   0xc   :  { %137 = vmatprep.subr.bf16.mxu0 %v241_v7 }
   0xf   :  { %138 = vmatpush1.bf16.msra.mxu0 %v243_v8 }
  0x10   :  { %139 = vmatprep.subr.bf16.mxu0 %v244_v9 }
  0x13   :  { %140 = vmatpush1.bf16.msra.mxu0 %v246_v10 }
  0x14   :  { %141 = vmatprep.subr.bf16.mxu0 %v247_v11 }
  0x17   :  { %142 = vmatpush1.bf16.msra.mxu0 %v249_v12 }
  0x18   :  { %143 = vmatprep.subr.bf16.mxu0 %v250_v13 }
  0x1b   :  { %144 = vmatpush1.bf16.msra.mxu0 %v252_v14 }
  0x1c   :  { %145 = vmatprep.subr.bf16.mxu0 %v253_v15 }
  0x1f   :  { %146 = vmatpush1.bf16.msra.mxu0 %v255_v16 }
  0x22   :  { %164 = vmatmul.mubr.bf16.vlgmr.msra.gmra.mxu0 %v256_v17 }
  0xe2   :  { %v165_v24 = vpop.f32.mrf.mxu0 }
  0xe3   :  { %v201_v27 = vadd.f32 %v194_v23, %v165_v24 }
  0xe4   :  { %v167_v26 = vpop.f32.mrf.mxu0 }
  0xe5   :  { %205 = vst [vmem:[%s347_s3] sm:$0xff] %v201_v27  ;;  %v202_v29 = vadd.f32 %v198_v25, %v167_v26 }
  0xe6   :  { %v169_v28 = vpop.f32.mrf.mxu0 }
  0xe7   :  { %206 = vst [vmem:[%s347_s3 + $0x8] sm:$0xff] %v202_v29  ;;  %v203_v31 = vadd.f32 %v194_v23, %v169_v28 }
  0xe8   :  { %v171_v30 = vpop.f32.mrf.mxu0 }
  0xe9   :  { %207 = vst [vmem:[%s347_s3 + $0x10] sm:$0xff] %v203_v31  ;;  %v204_v32 = vadd.f32 %v198_v25, %v171_v30 }
  0xeb   :  { %208 = vst [vmem:[%s347_s3 + $0x18] sm:$0xff] %v204_v32 }

// kernel: resnet_forward.34
= control target key start
LH: loop header
LB: loop body
LE: loop exit
PB: predicated region body
PF: predicated region fallthrough
CT: control target
= control target key end

     0   :  { %s1244_s18 = smov 0   ;;  %s1246_s19 = smov 0   ;;  %s1444_s0 = inlined_call_operand.vmem [shape: bf16[16,2304], index: 0, kind: input, shape index: {}]   ;;  %s1445_s1 = inlined_call_operand.vmem [shape: bf16[2304,256], index: 1, kind: input, shape index: {}]   ;;  %s1446_s2 = inlined_call_operand.vmem [shape: f32[1,256], index: 2, kind: input, shape index: {}]   ;;  %s1447_s3 = inlined_call_operand.vmem [shape: f32[1,256], index: 3, kind: input, shape index: {}]   ;;  %s1448_s4 = inlined_call_operand.vmem [shape: f32[16,256], index: 4, kind: input, shape index: {}]   ;;  %s1449_s5 = inlined_call_operand.vmem [shape: f32[16,256], index: 5, kind: output, shape index: {}]  }
   0x1   :  { %s1248_s20 = smov 0   ;;  %s1250_s21 = smov 0  }
   0x2   :  { %s1252_s22 = smov 0  }
   0x3 LB: > { %s24_s23 = sadd.s32 1, %s1206_s21  ;;  %p43_p1 = scmp.ne.s32.totalorder %s1198_s19, %s1194_s18  ;;  %s1210_s22 = sphi %s1252_s22, %s15_s22   ;;  %s1206_s21 = sphi %s1250_s21, %s1453_s21   ;;  %s1202_s20 = sphi %s1248_s20, %s1452_s20   ;;  %s1198_s19 = sphi %s1246_s19, %s1451_s19   ;;  %s1194_s18 = sphi %s1244_s18, %s1450_s18  }
   0x4   : > { %p25_p0 = scmp.ge.s32.totalorder %s24_s23, 6  ;;  %p44_p2 = scmp.eq.s32.totalorder %s1210_s22, 0 }
   0x5   : > { %s36_s25 = sadd.s32 1, %s1198_s19  ;;  %p980_p5 = scmp.ge.s32.totalorder %s1210_s22, 6 }
   0x6   : > { %s1455_s23 = smov (%p25_p0, %s24_s23), 0  ;;  %p45_p3 = por %p44_p2, %p43_p1 }
   0x7   : > { %s32_s24 = ssub.s32 %s1206_s21, %s1455_s23  ;;  %205 = sbr.rel (%p980_p5) target bundleno = 19 (0x13), region = 28 }
   0x8   : > { %p34_p4 = scmp.eq.s32.totalorder %s32_s24, 0 }
   0xa   : > { %s1279_s26 = scalar_select %p34_p4, %s1198_s19, %s36_s25  }
   0xc   : > { %208 = sbr.rel (!%p45_p3) target bundleno = 19 (0x13), region = 32  ;;  %s210_s27 = sand.u32 (%p45_p3), 1, %s1198_s19  }
   0xd   : > { %s1046_s28 = smul.u32 (%p45_p3), 12, %s1206_s21 }
   0xe   : > { %s1048_s29 = smul.u32 (%p45_p3), 24, %s210_s27 }
   0xf   : > { %s218_s7 = scalar_lea.vmem (%p45_p3), %s1444_s0, %s1046_s28 }
  0x10   : > { %v233_v0 = vld [vmem:[%s218_s7] sm:$0xff] (%p45_p3)  ;;  %v235_v1 = vld [vmem:[%s218_s7 + $0x48] sm:$0xff] (%p45_p3)  ;;  %s212_s8 = scalar_lea.vmem (%p45_p3), [#allocation2], %s1048_s29  ;;  %v984_v3 = vld [vmem:[%s218_s7 + $0x50] sm:$0xf] (%p45_p3) }
  0x11   : > { %v982_v2 = vld [vmem:[%s218_s7 + $0x8] sm:$0xf]  ;;  %234 = vst [vmem:[%s212_s8] sm:$0xff] %v233_v0  ;;  %236 = vst [vmem:[%s212_s8 + $0xc] sm:$0xff] %v235_v1 }
  0x12   : > { %983 = vst [vmem:[%s212_s8 + $0x8] sm:$0xf] %v982_v2  ;;  %985 = vst [vmem:[%s212_s8 + $0x14] sm:$0xf] %v984_v3 }
  0x13 PF: > { %p986_p6 = scmp.ge.s32.totalorder %s1210_s22, 1  ;;  %p263_p7 = scmp.lt.s32.totalorder %s1210_s22, 7 }
  0x15   : > { %p264_p8 = pnand %p986_p6, %p263_p7 }
  0x16   : > { %s270_s9 = sand.u32 (!%p264_p8), 1, %s1194_s18   ;;  %s312_s10 = smul.u32 (!%p264_p8), 48, %s1202_s20 }
  0x17   : > { %267 = sbr.rel (%p264_p8) target bundleno = 381 (0x17d), region = 62  ;;  %p989_p10 = scmp.ne.s32.totalorder (!%p264_p8), %s1202_s20, 0 }
  0x18   : > { %s1049_s11 = smul.u32 (!%p264_p8), 24, %s270_s9  ;;  %p313_p9 = scmp.lt.s32.totalorder (!%p264_p8), %s312_s10, 287 }
  0x1a   : > { %s1296_s16 = scalar_lea.vmem (!%p264_p8), [#allocation2], %s1049_s11 }
  0x1c   : > { %s1457_s10 = smov (!%p313_p9, %s312_s10), 287  ;;  %337 = sbr.rel (%p989_p10) target bundleno = 36 (0x24), region = 70 }
  0x1d   : > { %s1047_s12 = sshll.u32 %s1457_s10, 3 }
  0x1e   : > { %s1294_s15 = scalar_lea.vmem %s1445_s1, %s1047_s12 }
  0x21   : > { %v1212_v4 = vmov 0.0  }
  0x22   : > { %338 = vst [vmem:[%s1449_s5] sm:$0xff] %v1212_v4  ;;  %339 = vst [vmem:[%s1449_s5 + $0x8] sm:$0xff] %v1212_v4 }
  0x23   : > { %340 = vst [vmem:[%s1449_s5 + $0x10] sm:$0xff] %v1212_v4  ;;  %341 = vst [vmem:[%s1449_s5 + $0x18] sm:$0xff] %v1212_v4 }
  0x24 PF: > { %v1092_v5 = vld [vmem:[%s1294_s15 + $0x74] ss:$8 sps:$4 sm:$0xff]   ;;  %v1094_v6 = vld [vmem:[%s1294_s15 + $0x70] ss:$8 sps:$4 sm:$0xff]   ;;  %v1213_v7 = vmov 0   ;;  %p1041_p11 = scmp.ne.s32.totalorder %s1202_s20, 5 }
  0x25   : > { %729 = vmatprep.mubr.bf16.mxu1 %v1213_v7  ;;  %654 = vmatprep.subr.bf16.mxu0 %v1092_v5  ;;  %v1095_v8 = vld [vmem:[%s1294_s15 + $0x64] ss:$8 sps:$4 sm:$0xff]   ;;  %v1097_v9 = vld [vmem:[%s1294_s15 + $0x60] ss:$8 sps:$4 sm:$0xff]   ;;  %v1098_v10 = vld [vmem:[%s1294_s15 + $0x54] ss:$8 sps:$4 sm:$0xff]  }
  0x26   : > { %655 = vmatpush1.bf16.msra.mxu0 %v1094_v6  ;;  %v1100_v11 = vld [vmem:[%s1294_s15 + $0x50] ss:$8 sps:$4 sm:$0xff]   ;;  %v1101_v12 = vld [vmem:[%s1294_s15 + $0x44] ss:$8 sps:$4 sm:$0xff]   ;;  %v1113_v13 = vld [vmem:[%s1294_s15 + $0x174] ss:$8 sps:$4 sm:$0xff]  }
  0x27   : > { %656 = vmatprep.subr.bf16.mxu0 %v1095_v8  ;;  %v1115_v14 = vld [vmem:[%s1294_s15 + $0x170] ss:$8 sps:$4 sm:$0xff]   ;;  %v1103_v15 = vld [vmem:[%s1294_s15 + $0x40] ss:$8 sps:$4 sm:$0xff]   ;;  %v1104_v16 = vld [vmem:[%s1294_s15 + $0x34] ss:$8 sps:$4 sm:$0xff]   ;;  %697 = vmatprep.subr.bf16.mxu1 %v1113_v13 }
  0x28   : > { %v1119_v17 = vld [vmem:[%s1294_s15 + $0x164] ss:$8 sps:$4 sm:$0xff]   ;;  %698 = vmatpush1.bf16.msra.mxu1 %v1115_v14  ;;  %v1121_v18 = vld [vmem:[%s1294_s15 + $0x160] ss:$8 sps:$4 sm:$0xff]   ;;  %v1106_v19 = vld [vmem:[%s1294_s15 + $0x30] ss:$8 sps:$4 sm:$0xff]  }
  0x29   : > { %699 = vmatprep.subr.bf16.mxu1 %v1119_v17  ;;  %v1125_v20 = vld [vmem:[%s1294_s15 + $0x154] ss:$8 sps:$4 sm:$0xff]   ;;  %v1107_v21 = vld [vmem:[%s1294_s15 + $0x24] ss:$8 sps:$4 sm:$0xff]   ;;  %v1127_v22 = vld [vmem:[%s1294_s15 + $0x150] ss:$8 sps:$4 sm:$0xff]  }
  0x2a   : > { %657 = vmatpush1.bf16.msra.mxu0 %v1097_v9  ;;  %v1131_v23 = vld [vmem:[%s1294_s15 + $0x144] ss:$8 sps:$4 sm:$0xff]   ;;  %v1109_v24 = vld [vmem:[%s1294_s15 + $0x20] ss:$8 sps:$4 sm:$0xff]   ;;  %v1110_v25 = vld [vmem:[%s1294_s15 + $0x14] ss:$8 sps:$4 sm:$0xff]  }
  0x2b   : > { %658 = vmatprep.subr.bf16.mxu0 %v1098_v10  ;;  %v1133_v26 = vld [vmem:[%s1294_s15 + $0x140] ss:$8 sps:$4 sm:$0xff]   ;;  %v1137_v27 = vld [vmem:[%s1294_s15 + $0x134] ss:$8 sps:$4 sm:$0xff]   ;;  %v1112_v28 = vld [vmem:[%s1294_s15 + $0x10] ss:$8 sps:$4 sm:$0xff]  }
  0x2c   : > { %700 = vmatpush1.bf16.msra.mxu1 %v1121_v18  ;;  %v1116_v29 = vld [vmem:[%s1294_s15 + $0x4] ss:$8 sps:$4 sm:$0xff]   ;;  %v1139_v30 = vld [vmem:[%s1294_s15 + $0x130] ss:$8 sps:$4 sm:$0xff]   ;;  %v1118_v32 = vld [vmem:[%s1294_s15] ss:$8 sps:$4 sm:$0xff]  }
  0x2d   : > { %701 = vmatprep.subr.bf16.mxu1 %v1125_v20  ;;  %v1143_v31 = vld [vmem:[%s1294_s15 + $0x124] ss:$8 sps:$4 sm:$0xff]   ;;  %v1122_v33 = vld [vmem:[%s1294_s15 + $0xf4] ss:$8 sps:$4 sm:$0xff]   ;;  %v1145_v34 = vld [vmem:[%s1294_s15 + $0x120] ss:$8 sps:$4 sm:$0xff]  }
  0x2e   : > { %659 = vmatpush1.bf16.msra.mxu0 %v1100_v11  ;;  %v1149_v35 = vld [vmem:[%s1294_s15 + $0x114] ss:$8 sps:$4 sm:$0xff]   ;;  %v1124_v36 = vld [vmem:[%s1294_s15 + $0xf0] ss:$8 sps:$4 sm:$0xff]   ;;  %v1128_v37 = vld [vmem:[%s1294_s15 + $0xe4] ss:$8 sps:$4 sm:$0xff]  }
  0x2f   : > { %660 = vmatprep.subr.bf16.mxu0 %v1101_v12  ;;  %v1151_v38 = vld [vmem:[%s1294_s15 + $0x110] ss:$8 sps:$4 sm:$0xff]   ;;  %v1155_v39 = vld [vmem:[%s1294_s15 + $0x104] ss:$8 sps:$4 sm:$0xff]   ;;  %v1130_v41 = vld [vmem:[%s1294_s15 + $0xe0] ss:$8 sps:$4 sm:$0xff]  }
  0x30   : > { %702 = vmatpush1.bf16.msra.mxu1 %v1127_v22  ;;  %v1167_v40 = vld [vmem:[%s1296_s16 + $0x4] ss:$12 sps:$4 sm:$0xff]   ;;  %v1161_v46 = vld [vmem:[%s1296_s16 + $0x8] ss:$12 sps:$4 sm:$0xff]   ;;  %v1165_v56 = vld [vmem:[%s1296_s16] ss:$12 sps:$4 sm:$0xff]  }
  0x31   : > { %703 = vmatprep.subr.bf16.mxu1 %v1131_v23  ;;  %v1134_v42 = vld [vmem:[%s1294_s15 + $0xd4] ss:$8 sps:$4 sm:$0xff]   ;;  %686 = vmatprep.mubr.bf16.mxu0 %v1167_v40  ;;  %v1157_v43 = vld [vmem:[%s1294_s15 + $0x100] ss:$8 sps:$4 sm:$0xff]   ;;  %v1136_v44 = vld [vmem:[%s1294_s15 + $0xd0] ss:$8 sps:$4 sm:$0xff]  }
  0x32   : > { %661 = vmatpush1.bf16.msra.mxu0 %v1103_v15  ;;  %v1140_v45 = vld [vmem:[%s1294_s15 + $0xc4] ss:$8 sps:$4 sm:$0xff]   ;;  %v1142_v47 = vld [vmem:[%s1294_s15 + $0xc0] ss:$8 sps:$4 sm:$0xff]   ;;  %v1146_v48 = vld [vmem:[%s1294_s15 + $0xb4] ss:$8 sps:$4 sm:$0xff]  }
  0x33   : > { %662 = vmatprep.subr.bf16.mxu0 %v1104_v16  ;;  %v1148_v49 = vld [vmem:[%s1294_s15 + $0xb0] ss:$8 sps:$4 sm:$0xff]   ;;  %v1152_v50 = vld [vmem:[%s1294_s15 + $0xa4] ss:$8 sps:$4 sm:$0xff]   ;;  %v1154_v51 = vld [vmem:[%s1294_s15 + $0xa0] ss:$8 sps:$4 sm:$0xff]  }
  0x34   : > { %704 = vmatpush1.bf16.msra.mxu1 %v1133_v26  ;;  %v1158_v52 = vld [vmem:[%s1294_s15 + $0x94] ss:$8 sps:$4 sm:$0xff]   ;;  %v1160_v53 = vld [vmem:[%s1294_s15 + $0x90] ss:$8 sps:$4 sm:$0xff]   ;;  %v1162_v54 = vld [vmem:[%s1294_s15 + $0x84] ss:$8 sps:$4 sm:$0xff]  }
  0x35   : > { %705 = vmatprep.subr.bf16.mxu1 %v1137_v27  ;;  %v1164_v55 = vld [vmem:[%s1294_s15 + $0x80] ss:$8 sps:$4 sm:$0xff]   ;;  %v344_v3 = vld [vmem:[%s1449_s5 + $0x10] sm:$0xff]  ;;  %v345_v8 = vld [vmem:[%s1449_s5 + $0x18] sm:$0xff] }
  0x36   : > { %663 = vmatpush1.bf16.msra.mxu0 %v1106_v19  ;;  %v342_v59 = vld [vmem:[%s1449_s5] sm:$0xff]  ;;  %v343_v63 = vld [vmem:[%s1449_s5 + $0x8] sm:$0xff] }
  0x37   : > { %664 = vmatprep.subr.bf16.mxu0 %v1107_v21 }
  0x38   : > { %706 = vmatpush1.bf16.msra.mxu1 %v1139_v30 }
  0x39   : > { %707 = vmatprep.subr.bf16.mxu1 %v1143_v31 }
  0x3a   : > { %665 = vmatpush1.bf16.msra.mxu0 %v1109_v24 }
  0x3b   : > { %666 = vmatprep.subr.bf16.mxu0 %v1110_v25 }
  0x3c   : > { %708 = vmatpush1.bf16.msra.mxu1 %v1145_v34 }
  0x3d   : > { %709 = vmatprep.subr.bf16.mxu1 %v1149_v35 }
  0x3e   : > { %667 = vmatpush1.bf16.msra.mxu0 %v1112_v28 }
  0x3f   : > { %668 = vmatprep.subr.bf16.mxu0 %v1116_v29 }
  0x40   : > { %710 = vmatpush1.bf16.msra.mxu1 %v1151_v38 }
  0x41   : > { %711 = vmatprep.subr.bf16.mxu1 %v1155_v39 }
  0x42   : > { %669 = vmatpush1.bf16.msra.mxu0 %v1118_v32 }
  0x43   : > { %670 = vmatprep.subr.bf16.mxu0 %v1122_v33 }
  0x44   : > { %712 = vmatpush1.bf16.msra.mxu1 %v1157_v43 }
  0x46   : > { %671 = vmatpush2.bf16.msra.mxu0 %v1124_v36 }
  0x47   : > { %672 = vmatprep.subr.bf16.mxu0 %v1128_v37  ;;  %730 = vmatmul.mubr.bf16.vlgmr.msra.gmra.mxu1 %v1161_v46 }
  0x4a   : > { %673 = vmatpush2.bf16.msra.mxu0 %v1130_v41 }
  0x4b   : > { %674 = vmatprep.subr.bf16.mxu0 %v1134_v42 }
  0x4e   : > { %675 = vmatpush2.bf16.msra.mxu0 %v1136_v44 }
  0x4f   : > { %676 = vmatprep.subr.bf16.mxu0 %v1140_v45 }
  0x52   : > { %677 = vmatpush2.bf16.msra.mxu0 %v1142_v47 }
  0x53   : > { %678 = vmatprep.subr.bf16.mxu0 %v1146_v48 }
  0x56   : > { %679 = vmatpush2.bf16.msra.mxu0 %v1148_v49 }
  0x57   : > { %680 = vmatprep.subr.bf16.mxu0 %v1152_v50 }
  0x5a   : > { %681 = vmatpush2.bf16.msra.mxu0 %v1154_v51 }
  0x5b   : > { %682 = vmatprep.subr.bf16.mxu0 %v1158_v52 }
  0x5e   : > { %683 = vmatpush2.bf16.msra.mxu0 %v1160_v53 }
  0x5f   : > { %684 = vmatprep.subr.bf16.mxu0 %v1162_v54 }
  0x62   : > { %685 = vmatpush2.bf16.msra.mxu0 %v1164_v55 }
  0x65   : > { %687 = vmatmul.mubr.bf16.vlgmr.msra.gmra.mxu0 %v1165_v56 }
 0x107   : > { %v731_v57 = vpop.f32.mrf.mxu1 }
 0x109   : > { %v733_v58 = vpop.f32.mrf.mxu1 }
 0x10b   : > { %v735_v62 = vpop.f32.mrf.mxu1 }
 0x10d   : > { %v737_v7 = vpop.f32.mrf.mxu1 }
 0x125   : > { %v688_v60 = vpop.f32.mrf.mxu0 }
 0x126   : > { %v732_v61 = vadd.f32 %v731_v57, %v688_v60 }
 0x127   : > { %v690_v0 = vpop.f32.mrf.mxu0 }
 0x128   : > { %v740_v1 = vadd.f32 %v732_v61, %v342_v59  ;;  %v734_v2 = vadd.f32 %v733_v58, %v690_v0 }
 0x129   : > { %v692_v4 = vpop.f32.mrf.mxu0 }
 0x12a   : > { %744 = vst [vmem:[%s1449_s5] sm:$0xff] %v740_v1  ;;  %v741_v5 = vadd.f32 %v734_v2, %v343_v63  ;;  %v736_v6 = vadd.f32 %v735_v62, %v692_v4 }
 0x12b   : > { %v694_v9 = vpop.f32.mrf.mxu0 }
 0x12c   : > { %745 = vst [vmem:[%s1449_s5 + $0x8] sm:$0xff] %v741_v5  ;;  %v742_v10 = vadd.f32 %v736_v6, %v344_v3  ;;  %v738_v11 = vadd.f32 %v737_v7, %v694_v9  ;;  %751 = sbr.rel (%p1041_p11) target bundleno = 381 (0x17d), region = 74 }
 0x12e   : > { %746 = vst [vmem:[%s1449_s5 + $0x10] sm:$0xff] %v742_v10  ;;  %v743_v12 = vadd.f32 %v738_v11, %v345_v8 }
 0x130   : > { %747 = vst [vmem:[%s1449_s5 + $0x18] sm:$0xff] %v743_v12 }
 0x131   : > { %v752_v13 = vld [vmem:[%s1449_s5] sm:$0xff]  ;;  %v824_v62 = vlaneseq }
 0x132   : > { %v756_v2 = vld [vmem:[%s1446_s2] sm:$0x3] }
 0x133   : > { %v753_v16 = vld [vmem:[%s1449_s5 + $0x8] sm:$0xff]  ;;  %v825_v0 = vshrl.u32 %v824_v62, 7  ;;  %v757_v4 = vld [vmem:[%s1447_s3] sm:$0x3] }
 0x135   : > { %v754_v14 = vld [vmem:[%s1449_s5 + $0x10] sm:$0xff]  ;;  %v826_v1 = vsub.s32 0, %v825_v0  ;;  %v830_v3 = vsub.s32 1, %v825_v0 }
 0x136   : > { %v769_v15 = vmul.f32 0.0, %v754_v14 }
 0x137   : > { %v755_v17 = vld [vmem:[%s1449_s5 + $0x18] sm:$0xff]  ;;  %v827_v5 = vrot.slane %v756_v2, %v826_v1  ;;  %v842_v8 = vrot.slane %v757_v4, %v826_v1  ;;  %v831_v9 = vrot.slane %v756_v2, %v830_v3  ;;  %v846_v12 = vrot.slane %v757_v4, %v830_v3 }
 0x138   : > { %v771_v18 = vadd.f32 %v769_v15, %v752_v13  ;;  %v770_v19 = vmul.f32 0.0, %v755_v17 }
 0x13a   : > { %v772_v20 = vrot.slane %v771_v18, 4  ;;  %v778_v21 = vadd.f32 %v770_v19, %v753_v16 }
 0x13c   : > { %v773_v22 = vadd.f32 %v772_v20, %v771_v18  ;;  %v779_v23 = vrot.slane %v778_v21, 4 }
 0x13e   : > { %v774_v24 = vrot.slane %v773_v22, 2  ;;  %v780_v25 = vadd.f32 %v779_v23, %v778_v21  ;;  %v857_v21 = vld [vmem:[%s1448_s4] sm:$0xff] }
 0x140   : > { %v775_v26 = vadd.f32 %v774_v24, %v773_v22  ;;  %v781_v27 = vrot.slane %v780_v25, 2  ;;  %v859_v22 = vld [vmem:[%s1448_s4 + $0x10] sm:$0xff] }
 0x142   : > { %v776_v28 = vrot.slane %v775_v26, 1  ;;  %v782_v29 = vadd.f32 %v781_v27, %v780_v25  ;;  %v858_v27 = vld [vmem:[%s1448_s4 + $0x8] sm:$0xff] }
 0x144   : > { %v777_v30 = vadd.f32 %v776_v28, %v775_v26  ;;  %v783_v31 = vrot.slane %v782_v29, 1  ;;  %v860_v28 = vld [vmem:[%s1448_s4 + $0x18] sm:$0xff] }
 0x146   : > { %v785_v32 = vmul.f32 0.125, %v777_v30  ;;  %v784_v33 = vadd.f32 %v783_v31, %v782_v29 }
 0x148   : > { %v787_v34 = vsub.f32 %v752_v13, %v785_v32  ;;  %v789_v35 = vsub.f32 %v754_v14, %v785_v32  ;;  %v786_v36 = vmul.f32 0.125, %v784_v33 }
 0x14a   : > { %v793_v37 = vmul.f32 0.0, %v789_v35  ;;  %v795_v38 = vmul.f32 %v787_v34, %v787_v34  ;;  %v788_v39 = vsub.f32 %v753_v16, %v786_v36  ;;  %v790_v40 = vsub.f32 %v755_v17, %v786_v36 }
 0x14c   : > { %v797_v41 = vmul.f32 %v793_v37, %v793_v37  ;;  %v794_v42 = vmul.f32 0.0, %v790_v40  ;;  %v796_v43 = vmul.f32 %v788_v39, %v788_v39 }
 0x14e   : > { %v799_v44 = vadd.f32 %v797_v41, %v795_v38  ;;  %v798_v45 = vmul.f32 %v794_v42, %v794_v42 }
 0x150   : > { %v800_v46 = vrot.slane %v799_v44, 4  ;;  %v806_v47 = vadd.f32 %v798_v45, %v796_v43 }
 0x152   : > { %v801_v48 = vadd.f32 %v800_v46, %v799_v44  ;;  %v807_v49 = vrot.slane %v806_v47, 4 }
 0x154   : > { %v802_v50 = vrot.slane %v801_v48, 2  ;;  %v808_v51 = vadd.f32 %v807_v49, %v806_v47 }
 0x156   : > { %v803_v52 = vadd.f32 %v802_v50, %v801_v48  ;;  %v809_v53 = vrot.slane %v808_v51, 2 }
 0x158   : > { %v804_v54 = vrot.slane %v803_v52, 1  ;;  %v810_v55 = vadd.f32 %v809_v53, %v808_v51 }
 0x15a   : > { %v805_v56 = vadd.f32 %v804_v54, %v803_v52  ;;  %v811_v57 = vrot.slane %v810_v55, 1 }
 0x15c   : > { %v813_v58 = vmul.f32 0.125, %v805_v56  ;;  %v812_v59 = vadd.f32 %v811_v57, %v810_v55 }
 0x15e   : > { %v815_v60 = vadd.f32 1e-05, %v813_v58  ;;  %v814_v61 = vmul.f32 0.125, %v812_v59 }
 0x160   : > { %1168 = vrsqrt.f32 %v815_v60  ;;  %v816_v63 = vadd.f32 1e-05, %v814_v61 }
 0x162   : > { %1170 = vrsqrt.f32 %v816_v63 }
 0x16d   : > { %v1169_v6 = vpop.eup %1168 }
 0x16e   : > { %v819_v7 = vmul.f32 %v1169_v6, %v787_v34  ;;  %v821_v10 = vmul.f32 %v1169_v6, %v789_v35 }
 0x16f   : > { %v1171_v11 = vpop.eup %1170 }
 0x170   : > { %v834_v13 = vmul.f32 %v827_v5, %v819_v7  ;;  %v820_v14 = vmul.f32 %v1171_v11, %v788_v39  ;;  %v836_v15 = vmul.f32 %v827_v5, %v821_v10  ;;  %v822_v16 = vmul.f32 %v1171_v11, %v790_v40 }
 0x172   : > { %v849_v17 = vadd.f32 %v842_v8, %v834_v13  ;;  %v835_v18 = vmul.f32 %v831_v9, %v820_v14  ;;  %v851_v19 = vadd.f32 %v842_v8, %v836_v15  ;;  %v837_v20 = vmul.f32 %v831_v9, %v822_v16 }
 0x174   : > { %v853_v23 = vmax.f32 %v849_v17, 0.0  ;;  %v850_v24 = vadd.f32 %v846_v12, %v835_v18  ;;  %v855_v25 = vmax.f32 %v851_v19, 0.0  ;;  %v852_v26 = vadd.f32 %v846_v12, %v837_v20 }
 0x176   : > { %v861_v29 = vadd.f32 %v857_v21, %v853_v23  ;;  %v854_v30 = vmax.f32 %v850_v24, 0.0  ;;  %v863_v31 = vadd.f32 %v859_v22, %v855_v25  ;;  %v856_v32 = vmax.f32 %v852_v26, 0.0 }
 0x178   : > { %v865_v33 = vmax.f32 %v861_v29, 0.0  ;;  %v862_v34 = vadd.f32 %v858_v27, %v854_v30  ;;  %v867_v35 = vmax.f32 %v863_v31, 0.0  ;;  %v864_v36 = vadd.f32 %v860_v28, %v856_v32 }
 0x17a   : > { %869 = vst [vmem:[%s1449_s5] sm:$0xff] %v865_v33  ;;  %v866_v37 = vmax.f32 %v862_v34, 0.0  ;;  %871 = vst [vmem:[%s1449_s5 + $0x10] sm:$0xff] %v867_v35  ;;  %v868_v38 = vmax.f32 %v864_v36, 0.0 }
 0x17c   : > { %870 = vst [vmem:[%s1449_s5 + $0x8] sm:$0xff] %v866_v37  ;;  %872 = vst [vmem:[%s1449_s5 + $0x18] sm:$0xff] %v868_v38 }
 0x17d PF: > { %s15_s22 = sadd.s32 1, %s1210_s22   ;;  %s1450_s18 = smov %s1198_s19 }
 0x17e   : > { %p12_p12 = scmp.ge.s32.totalorder %s15_s22, 8   ;;  %s1451_s19 = smov %s1279_s26 }
 0x17f   : > { %s1452_s20 = smov %s1206_s21  ;;  %s1453_s21 = smov %s1455_s23 }
 0x180   :  { %14 = sbr.rel (!%p12_p12) target bundleno = 3 (0x3), region = 121 }

// kernel: resnet_forward.35
= control target key start
LH: loop header
LB: loop body
LE: loop exit
PB: predicated region body
PF: predicated region fallthrough
CT: control target
= control target key end

     0   :  { %s1159_s15 = smov 0   ;;  %s1161_s16 = smov 0   ;;  %s1347_s0 = inlined_call_operand.vmem [shape: bf16[16,2304], index: 0, kind: input, shape index: {}]   ;;  %s1348_s1 = inlined_call_operand.vmem [shape: bf16[2304,256], index: 1, kind: input, shape index: {}]   ;;  %s1349_s2 = inlined_call_operand.vmem [shape: f32[1,256], index: 2, kind: input, shape index: {}]   ;;  %s1350_s3 = inlined_call_operand.vmem [shape: f32[1,256], index: 3, kind: input, shape index: {}]   ;;  %s1351_s4 = inlined_call_operand.vmem [shape: f32[16,256], index: 4, kind: output, shape index: {}]  }
   0x1   :  { %s1163_s17 = smov 0   ;;  %s1165_s18 = smov 0  }
   0x2   :  { %s1167_s19 = smov 0  }
   0x3 LB: > { %s23_s20 = sadd.s32 1, %s1126_s18  ;;  %p42_p1 = scmp.ne.s32.totalorder %s1118_s16, %s1114_s15  ;;  %s1130_s19 = sphi %s1167_s19, %s14_s19   ;;  %s1126_s18 = sphi %s1165_s18, %s1355_s18   ;;  %s1122_s17 = sphi %s1163_s17, %s1354_s17   ;;  %s1118_s16 = sphi %s1161_s16, %s1353_s16   ;;  %s1114_s15 = sphi %s1159_s15, %s1352_s15  }
   0x4   : > { %p24_p0 = scmp.ge.s32.totalorder %s23_s20, 6  ;;  %p43_p2 = scmp.eq.s32.totalorder %s1130_s19, 0 }
   0x5   : > { %s35_s22 = sadd.s32 1, %s1118_s16  ;;  %p900_p5 = scmp.ge.s32.totalorder %s1130_s19, 6 }
   0x6   : > { %s1357_s20 = smov (%p24_p0, %s23_s20), 0  ;;  %p44_p3 = por %p43_p2, %p42_p1 }
   0x7   : > { %s31_s21 = ssub.s32 %s1126_s18, %s1357_s20  ;;  %168 = sbr.rel (%p900_p5) target bundleno = 19 (0x13), region = 24 }
   0x8   : > { %p33_p4 = scmp.eq.s32.totalorder %s31_s21, 0 }
   0xa   : > { %s1194_s23 = scalar_select %p33_p4, %s1118_s16, %s35_s22  }
   0xc   : > { %171 = sbr.rel (!%p44_p3) target bundleno = 19 (0x13), region = 28  ;;  %s173_s24 = sand.u32 (%p44_p3), 1, %s1118_s16  }
   0xd   : > { %s966_s25 = smul.u32 (%p44_p3), 12, %s1126_s18 }
   0xe   : > { %s968_s26 = smul.u32 (%p44_p3), 24, %s173_s24 }
   0xf   : > { %s181_s29 = scalar_lea.vmem (%p44_p3), %s1347_s0, %s966_s25 }
  0x10   : > { %v196_v0 = vld [vmem:[%s181_s29] sm:$0xff] (%p44_p3)  ;;  %v198_v1 = vld [vmem:[%s181_s29 + $0x48] sm:$0xff] (%p44_p3)  ;;  %s175_s30 = scalar_lea.vmem (%p44_p3), [#allocation2], %s968_s26  ;;  %v904_v3 = vld [vmem:[%s181_s29 + $0x50] sm:$0xf] (%p44_p3) }
  0x11   : > { %v902_v2 = vld [vmem:[%s181_s29 + $0x8] sm:$0xf]  ;;  %197 = vst [vmem:[%s175_s30] sm:$0xff] %v196_v0  ;;  %199 = vst [vmem:[%s175_s30 + $0xc] sm:$0xff] %v198_v1 }
  0x12   : > { %903 = vst [vmem:[%s175_s30 + $0x8] sm:$0xf] %v902_v2  ;;  %905 = vst [vmem:[%s175_s30 + $0x14] sm:$0xf] %v904_v3 }
  0x13 PF: > { %p906_p6 = scmp.ge.s32.totalorder %s1130_s19, 1  ;;  %p226_p7 = scmp.lt.s32.totalorder %s1130_s19, 7 }
  0x15   : > { %p227_p8 = pnand %p906_p6, %p226_p7 }
  0x16   : > { %s233_s5 = sand.u32 (!%p227_p8), 1, %s1114_s15   ;;  %s267_s6 = smul.u32 (!%p227_p8), 48, %s1122_s17 }
  0x17   : > { %230 = sbr.rel (%p227_p8) target bundleno = 377 (0x179), region = 58  ;;  %p909_p10 = scmp.ne.s32.totalorder (!%p227_p8), %s1122_s17, 0 }
  0x18   : > { %s969_s7 = smul.u32 (!%p227_p8), 24, %s233_s5  ;;  %p268_p9 = scmp.lt.s32.totalorder (!%p227_p8), %s267_s6, 287 }
  0x1a   : > { %s1211_s12 = scalar_lea.vmem (!%p227_p8), [#allocation2], %s969_s7 }
  0x1c   : > { %s1359_s6 = smov (!%p268_p9, %s267_s6), 287  ;;  %285 = sbr.rel (%p909_p10) target bundleno = 36 (0x24), region = 66 }
  0x1d   : > { %s967_s8 = sshll.u32 %s1359_s6, 3 }
  0x1e   : > { %s1209_s11 = scalar_lea.vmem %s1348_s1, %s967_s8 }
  0x21   : > { %v1132_v4 = vmov 0.0  }
  0x22   : > { %286 = vst [vmem:[%s1351_s4] sm:$0xff] %v1132_v4  ;;  %287 = vst [vmem:[%s1351_s4 + $0x8] sm:$0xff] %v1132_v4 }
  0x23   : > { %288 = vst [vmem:[%s1351_s4 + $0x10] sm:$0xff] %v1132_v4  ;;  %289 = vst [vmem:[%s1351_s4 + $0x18] sm:$0xff] %v1132_v4 }
  0x24 PF: > { %v1012_v5 = vld [vmem:[%s1209_s11 + $0x74] ss:$8 sps:$4 sm:$0xff]   ;;  %v1014_v6 = vld [vmem:[%s1209_s11 + $0x70] ss:$8 sps:$4 sm:$0xff]   ;;  %v1133_v7 = vmov 0   ;;  %p961_p11 = scmp.ne.s32.totalorder %s1122_s17, 5 }
  0x25   : > { %677 = vmatprep.mubr.bf16.mxu1 %v1133_v7  ;;  %602 = vmatprep.subr.bf16.mxu0 %v1012_v5  ;;  %v1015_v8 = vld [vmem:[%s1209_s11 + $0x64] ss:$8 sps:$4 sm:$0xff]   ;;  %v1017_v9 = vld [vmem:[%s1209_s11 + $0x60] ss:$8 sps:$4 sm:$0xff]   ;;  %v1018_v10 = vld [vmem:[%s1209_s11 + $0x54] ss:$8 sps:$4 sm:$0xff]  }
  0x26   : > { %603 = vmatpush1.bf16.msra.mxu0 %v1014_v6  ;;  %v1020_v11 = vld [vmem:[%s1209_s11 + $0x50] ss:$8 sps:$4 sm:$0xff]   ;;  %v1021_v12 = vld [vmem:[%s1209_s11 + $0x44] ss:$8 sps:$4 sm:$0xff]   ;;  %v1033_v13 = vld [vmem:[%s1209_s11 + $0x174] ss:$8 sps:$4 sm:$0xff]  }
  0x27   : > { %604 = vmatprep.subr.bf16.mxu0 %v1015_v8  ;;  %v1035_v14 = vld [vmem:[%s1209_s11 + $0x170] ss:$8 sps:$4 sm:$0xff]   ;;  %v1023_v15 = vld [vmem:[%s1209_s11 + $0x40] ss:$8 sps:$4 sm:$0xff]   ;;  %v1024_v16 = vld [vmem:[%s1209_s11 + $0x34] ss:$8 sps:$4 sm:$0xff]   ;;  %645 = vmatprep.subr.bf16.mxu1 %v1033_v13 }
  0x28   : > { %v1039_v17 = vld [vmem:[%s1209_s11 + $0x164] ss:$8 sps:$4 sm:$0xff]   ;;  %646 = vmatpush1.bf16.msra.mxu1 %v1035_v14  ;;  %v1041_v18 = vld [vmem:[%s1209_s11 + $0x160] ss:$8 sps:$4 sm:$0xff]   ;;  %v1026_v19 = vld [vmem:[%s1209_s11 + $0x30] ss:$8 sps:$4 sm:$0xff]  }
  0x29   : > { %647 = vmatprep.subr.bf16.mxu1 %v1039_v17  ;;  %v1045_v20 = vld [vmem:[%s1209_s11 + $0x154] ss:$8 sps:$4 sm:$0xff]   ;;  %v1027_v21 = vld [vmem:[%s1209_s11 + $0x24] ss:$8 sps:$4 sm:$0xff]   ;;  %v1047_v22 = vld [vmem:[%s1209_s11 + $0x150] ss:$8 sps:$4 sm:$0xff]  }
  0x2a   : > { %605 = vmatpush1.bf16.msra.mxu0 %v1017_v9  ;;  %v1051_v23 = vld [vmem:[%s1209_s11 + $0x144] ss:$8 sps:$4 sm:$0xff]   ;;  %v1029_v24 = vld [vmem:[%s1209_s11 + $0x20] ss:$8 sps:$4 sm:$0xff]   ;;  %v1030_v25 = vld [vmem:[%s1209_s11 + $0x14] ss:$8 sps:$4 sm:$0xff]  }
  0x2b   : > { %606 = vmatprep.subr.bf16.mxu0 %v1018_v10  ;;  %v1053_v26 = vld [vmem:[%s1209_s11 + $0x140] ss:$8 sps:$4 sm:$0xff]   ;;  %v1057_v27 = vld [vmem:[%s1209_s11 + $0x134] ss:$8 sps:$4 sm:$0xff]   ;;  %v1032_v28 = vld [vmem:[%s1209_s11 + $0x10] ss:$8 sps:$4 sm:$0xff]  }
  0x2c   : > { %648 = vmatpush1.bf16.msra.mxu1 %v1041_v18  ;;  %v1036_v29 = vld [vmem:[%s1209_s11 + $0x4] ss:$8 sps:$4 sm:$0xff]   ;;  %v1059_v30 = vld [vmem:[%s1209_s11 + $0x130] ss:$8 sps:$4 sm:$0xff]   ;;  %v1038_v32 = vld [vmem:[%s1209_s11] ss:$8 sps:$4 sm:$0xff]  }
  0x2d   : > { %649 = vmatprep.subr.bf16.mxu1 %v1045_v20  ;;  %v1063_v31 = vld [vmem:[%s1209_s11 + $0x124] ss:$8 sps:$4 sm:$0xff]   ;;  %v1042_v33 = vld [vmem:[%s1209_s11 + $0xf4] ss:$8 sps:$4 sm:$0xff]   ;;  %v1065_v34 = vld [vmem:[%s1209_s11 + $0x120] ss:$8 sps:$4 sm:$0xff]  }
  0x2e   : > { %607 = vmatpush1.bf16.msra.mxu0 %v1020_v11  ;;  %v1069_v35 = vld [vmem:[%s1209_s11 + $0x114] ss:$8 sps:$4 sm:$0xff]   ;;  %v1044_v36 = vld [vmem:[%s1209_s11 + $0xf0] ss:$8 sps:$4 sm:$0xff]   ;;  %v1048_v37 = vld [vmem:[%s1209_s11 + $0xe4] ss:$8 sps:$4 sm:$0xff]  }
  0x2f   : > { %608 = vmatprep.subr.bf16.mxu0 %v1021_v12  ;;  %v1071_v38 = vld [vmem:[%s1209_s11 + $0x110] ss:$8 sps:$4 sm:$0xff]   ;;  %v1075_v39 = vld [vmem:[%s1209_s11 + $0x104] ss:$8 sps:$4 sm:$0xff]   ;;  %v1050_v41 = vld [vmem:[%s1209_s11 + $0xe0] ss:$8 sps:$4 sm:$0xff]  }
  0x30   : > { %650 = vmatpush1.bf16.msra.mxu1 %v1047_v22  ;;  %v1087_v40 = vld [vmem:[%s1211_s12 + $0x4] ss:$12 sps:$4 sm:$0xff]   ;;  %v1081_v46 = vld [vmem:[%s1211_s12 + $0x8] ss:$12 sps:$4 sm:$0xff]   ;;  %v1085_v56 = vld [vmem:[%s1211_s12] ss:$12 sps:$4 sm:$0xff]  }
  0x31   : > { %651 = vmatprep.subr.bf16.mxu1 %v1051_v23  ;;  %v1054_v42 = vld [vmem:[%s1209_s11 + $0xd4] ss:$8 sps:$4 sm:$0xff]   ;;  %634 = vmatprep.mubr.bf16.mxu0 %v1087_v40  ;;  %v1077_v43 = vld [vmem:[%s1209_s11 + $0x100] ss:$8 sps:$4 sm:$0xff]   ;;  %v1056_v44 = vld [vmem:[%s1209_s11 + $0xd0] ss:$8 sps:$4 sm:$0xff]  }
  0x32   : > { %609 = vmatpush1.bf16.msra.mxu0 %v1023_v15  ;;  %v1060_v45 = vld [vmem:[%s1209_s11 + $0xc4] ss:$8 sps:$4 sm:$0xff]   ;;  %v1062_v47 = vld [vmem:[%s1209_s11 + $0xc0] ss:$8 sps:$4 sm:$0xff]   ;;  %v1066_v48 = vld [vmem:[%s1209_s11 + $0xb4] ss:$8 sps:$4 sm:$0xff]  }
  0x33   : > { %610 = vmatprep.subr.bf16.mxu0 %v1024_v16  ;;  %v1068_v49 = vld [vmem:[%s1209_s11 + $0xb0] ss:$8 sps:$4 sm:$0xff]   ;;  %v1072_v50 = vld [vmem:[%s1209_s11 + $0xa4] ss:$8 sps:$4 sm:$0xff]   ;;  %v1074_v51 = vld [vmem:[%s1209_s11 + $0xa0] ss:$8 sps:$4 sm:$0xff]  }
  0x34   : > { %652 = vmatpush1.bf16.msra.mxu1 %v1053_v26  ;;  %v1078_v52 = vld [vmem:[%s1209_s11 + $0x94] ss:$8 sps:$4 sm:$0xff]   ;;  %v1080_v53 = vld [vmem:[%s1209_s11 + $0x90] ss:$8 sps:$4 sm:$0xff]   ;;  %v1082_v54 = vld [vmem:[%s1209_s11 + $0x84] ss:$8 sps:$4 sm:$0xff]  }
  0x35   : > { %653 = vmatprep.subr.bf16.mxu1 %v1057_v27  ;;  %v1084_v55 = vld [vmem:[%s1209_s11 + $0x80] ss:$8 sps:$4 sm:$0xff]   ;;  %v292_v3 = vld [vmem:[%s1351_s4 + $0x10] sm:$0xff]  ;;  %v293_v8 = vld [vmem:[%s1351_s4 + $0x18] sm:$0xff] }
  0x36   : > { %611 = vmatpush1.bf16.msra.mxu0 %v1026_v19  ;;  %v290_v59 = vld [vmem:[%s1351_s4] sm:$0xff]  ;;  %v291_v63 = vld [vmem:[%s1351_s4 + $0x8] sm:$0xff] }
  0x37   : > { %612 = vmatprep.subr.bf16.mxu0 %v1027_v21 }
  0x38   : > { %654 = vmatpush1.bf16.msra.mxu1 %v1059_v30 }
  0x39   : > { %655 = vmatprep.subr.bf16.mxu1 %v1063_v31 }
  0x3a   : > { %613 = vmatpush1.bf16.msra.mxu0 %v1029_v24 }
  0x3b   : > { %614 = vmatprep.subr.bf16.mxu0 %v1030_v25 }
  0x3c   : > { %656 = vmatpush1.bf16.msra.mxu1 %v1065_v34 }
  0x3d   : > { %657 = vmatprep.subr.bf16.mxu1 %v1069_v35 }
  0x3e   : > { %615 = vmatpush1.bf16.msra.mxu0 %v1032_v28 }
  0x3f   : > { %616 = vmatprep.subr.bf16.mxu0 %v1036_v29 }
  0x40   : > { %658 = vmatpush1.bf16.msra.mxu1 %v1071_v38 }
  0x41   : > { %659 = vmatprep.subr.bf16.mxu1 %v1075_v39 }
  0x42   : > { %617 = vmatpush1.bf16.msra.mxu0 %v1038_v32 }
  0x43   : > { %618 = vmatprep.subr.bf16.mxu0 %v1042_v33 }
  0x44   : > { %660 = vmatpush1.bf16.msra.mxu1 %v1077_v43 }
  0x46   : > { %619 = vmatpush2.bf16.msra.mxu0 %v1044_v36 }
  0x47   : > { %620 = vmatprep.subr.bf16.mxu0 %v1048_v37  ;;  %678 = vmatmul.mubr.bf16.vlgmr.msra.gmra.mxu1 %v1081_v46 }
  0x4a   : > { %621 = vmatpush2.bf16.msra.mxu0 %v1050_v41 }
  0x4b   : > { %622 = vmatprep.subr.bf16.mxu0 %v1054_v42 }
  0x4e   : > { %623 = vmatpush2.bf16.msra.mxu0 %v1056_v44 }
  0x4f   : > { %624 = vmatprep.subr.bf16.mxu0 %v1060_v45 }
  0x52   : > { %625 = vmatpush2.bf16.msra.mxu0 %v1062_v47 }
  0x53   : > { %626 = vmatprep.subr.bf16.mxu0 %v1066_v48 }
  0x56   : > { %627 = vmatpush2.bf16.msra.mxu0 %v1068_v49 }
  0x57   : > { %628 = vmatprep.subr.bf16.mxu0 %v1072_v50 }
  0x5a   : > { %629 = vmatpush2.bf16.msra.mxu0 %v1074_v51 }
  0x5b   : > { %630 = vmatprep.subr.bf16.mxu0 %v1078_v52 }
  0x5e   : > { %631 = vmatpush2.bf16.msra.mxu0 %v1080_v53 }
  0x5f   : > { %632 = vmatprep.subr.bf16.mxu0 %v1082_v54 }
  0x62   : > { %633 = vmatpush2.bf16.msra.mxu0 %v1084_v55 }
  0x65   : > { %635 = vmatmul.mubr.bf16.vlgmr.msra.gmra.mxu0 %v1085_v56 }
 0x107   : > { %v679_v57 = vpop.f32.mrf.mxu1 }
 0x109   : > { %v681_v58 = vpop.f32.mrf.mxu1 }
 0x10b   : > { %v683_v62 = vpop.f32.mrf.mxu1 }
 0x10d   : > { %v685_v7 = vpop.f32.mrf.mxu1 }
 0x125   : > { %v636_v60 = vpop.f32.mrf.mxu0 }
 0x126   : > { %v680_v61 = vadd.f32 %v679_v57, %v636_v60 }
 0x127   : > { %v638_v0 = vpop.f32.mrf.mxu0 }
 0x128   : > { %v688_v1 = vadd.f32 %v680_v61, %v290_v59  ;;  %v682_v2 = vadd.f32 %v681_v58, %v638_v0 }
 0x129   : > { %v640_v4 = vpop.f32.mrf.mxu0 }
 0x12a   : > { %692 = vst [vmem:[%s1351_s4] sm:$0xff] %v688_v1  ;;  %v689_v5 = vadd.f32 %v682_v2, %v291_v63  ;;  %v684_v6 = vadd.f32 %v683_v62, %v640_v4 }
 0x12b   : > { %v642_v9 = vpop.f32.mrf.mxu0 }
 0x12c   : > { %693 = vst [vmem:[%s1351_s4 + $0x8] sm:$0xff] %v689_v5  ;;  %v690_v10 = vadd.f32 %v684_v6, %v292_v3  ;;  %v686_v11 = vadd.f32 %v685_v7, %v642_v9  ;;  %699 = sbr.rel (%p961_p11) target bundleno = 377 (0x179), region = 70 }
 0x12e   : > { %694 = vst [vmem:[%s1351_s4 + $0x10] sm:$0xff] %v690_v10  ;;  %v691_v12 = vadd.f32 %v686_v11, %v293_v8 }
 0x130   : > { %695 = vst [vmem:[%s1351_s4 + $0x18] sm:$0xff] %v691_v12 }
 0x131   : > { %v700_v13 = vld [vmem:[%s1351_s4] sm:$0xff]  ;;  %v772_v63 = vlaneseq }
 0x132   : > { %v704_v2 = vld [vmem:[%s1349_s2] sm:$0x3] }
 0x133   : > { %v701_v16 = vld [vmem:[%s1351_s4 + $0x8] sm:$0xff]  ;;  %v773_v0 = vshrl.u32 %v772_v63, 7  ;;  %v705_v4 = vld [vmem:[%s1350_s3] sm:$0x3] }
 0x135   : > { %v702_v14 = vld [vmem:[%s1351_s4 + $0x10] sm:$0xff]  ;;  %v774_v1 = vsub.s32 0, %v773_v0  ;;  %v778_v3 = vsub.s32 1, %v773_v0 }
 0x136   : > { %v717_v15 = vmul.f32 0.0, %v702_v14 }
 0x137   : > { %v703_v17 = vld [vmem:[%s1351_s4 + $0x18] sm:$0xff]  ;;  %v775_v5 = vrot.slane %v704_v2, %v774_v1  ;;  %v779_v7 = vrot.slane %v704_v2, %v778_v3  ;;  %v790_v10 = vrot.slane %v705_v4, %v774_v1 }
 0x138   : > { %v718_v18 = vmul.f32 0.0, %v703_v17  ;;  %v719_v19 = vadd.f32 %v717_v15, %v700_v13 }
 0x13a   : > { %v726_v20 = vadd.f32 %v718_v18, %v701_v16  ;;  %v720_v21 = vrot.slane %v719_v19, 4 }
 0x13c   : > { %v727_v22 = vrot.slane %v726_v20, 4  ;;  %v721_v23 = vadd.f32 %v720_v21, %v719_v19 }
 0x13e   : > { %v728_v24 = vadd.f32 %v727_v22, %v726_v20  ;;  %v722_v25 = vrot.slane %v721_v23, 2 }
 0x140   : > { %v729_v26 = vrot.slane %v728_v24, 2  ;;  %v723_v27 = vadd.f32 %v722_v25, %v721_v23 }
 0x142   : > { %v730_v28 = vadd.f32 %v729_v26, %v728_v24  ;;  %v724_v29 = vrot.slane %v723_v27, 1 }
 0x144   : > { %v731_v30 = vrot.slane %v730_v28, 1  ;;  %v725_v31 = vadd.f32 %v724_v29, %v723_v27 }
 0x146   : > { %v732_v32 = vadd.f32 %v731_v30, %v730_v28  ;;  %v733_v33 = vmul.f32 0.125, %v725_v31 }
 0x148   : > { %v734_v34 = vmul.f32 0.125, %v732_v32  ;;  %v735_v35 = vsub.f32 %v700_v13, %v733_v33  ;;  %v737_v36 = vsub.f32 %v702_v14, %v733_v33  ;;  %v794_v13 = vrot.slane %v705_v4, %v778_v3 }
 0x14a   : > { %v736_v37 = vsub.f32 %v701_v16, %v734_v34  ;;  %v738_v38 = vsub.f32 %v703_v17, %v734_v34  ;;  %v741_v39 = vmul.f32 0.0, %v737_v36  ;;  %v743_v40 = vmul.f32 %v735_v35, %v735_v35 }
 0x14c   : > { %v742_v41 = vmul.f32 0.0, %v738_v38  ;;  %v744_v42 = vmul.f32 %v736_v37, %v736_v37  ;;  %v745_v43 = vmul.f32 %v741_v39, %v741_v39 }
 0x14e   : > { %v746_v44 = vmul.f32 %v742_v41, %v742_v41  ;;  %v747_v45 = vadd.f32 %v745_v43, %v743_v40 }
 0x150   : > { %v754_v46 = vadd.f32 %v746_v44, %v744_v42  ;;  %v748_v47 = vrot.slane %v747_v45, 4 }
 0x152   : > { %v755_v48 = vrot.slane %v754_v46, 4  ;;  %v749_v49 = vadd.f32 %v748_v47, %v747_v45 }
 0x154   : > { %v756_v50 = vadd.f32 %v755_v48, %v754_v46  ;;  %v750_v51 = vrot.slane %v749_v49, 2 }
 0x156   : > { %v757_v52 = vrot.slane %v756_v50, 2  ;;  %v751_v53 = vadd.f32 %v750_v51, %v749_v49 }
 0x158   : > { %v758_v54 = vadd.f32 %v757_v52, %v756_v50  ;;  %v752_v55 = vrot.slane %v751_v53, 1 }
 0x15a   : > { %v759_v56 = vrot.slane %v758_v54, 1  ;;  %v753_v57 = vadd.f32 %v752_v55, %v751_v53 }
 0x15c   : > { %v760_v58 = vadd.f32 %v759_v56, %v758_v54  ;;  %v761_v59 = vmul.f32 0.125, %v753_v57 }
 0x15e   : > { %v762_v60 = vmul.f32 0.125, %v760_v58  ;;  %v763_v61 = vadd.f32 1e-05, %v761_v59 }
 0x160   : > { %v764_v62 = vadd.f32 1e-05, %v762_v60  ;;  %1088 = vrsqrt.f32 %v763_v61 }
 0x162   : > { %1090 = vrsqrt.f32 %v764_v62 }
 0x16d   : > { %v1089_v6 = vpop.eup %1088 }
 0x16e   : > { %v767_v9 = vmul.f32 %v1089_v6, %v735_v35  ;;  %v769_v11 = vmul.f32 %v1089_v6, %v737_v36 }
 0x16f   : > { %v1091_v8 = vpop.eup %1090 }
 0x170   : > { %v768_v12 = vmul.f32 %v1091_v8, %v736_v37  ;;  %v770_v14 = vmul.f32 %v1091_v8, %v738_v38  ;;  %v782_v15 = vmul.f32 %v775_v5, %v767_v9  ;;  %v784_v16 = vmul.f32 %v775_v5, %v769_v11 }
 0x172   : > { %v783_v17 = vmul.f32 %v779_v7, %v768_v12  ;;  %v785_v18 = vmul.f32 %v779_v7, %v770_v14  ;;  %v797_v19 = vadd.f32 %v790_v10, %v782_v15  ;;  %v799_v20 = vadd.f32 %v790_v10, %v784_v16 }
 0x174   : > { %v798_v21 = vadd.f32 %v794_v13, %v783_v17  ;;  %v800_v22 = vadd.f32 %v794_v13, %v785_v18  ;;  %v801_v23 = vmax.f32 %v797_v19, 0.0  ;;  %v803_v24 = vmax.f32 %v799_v20, 0.0 }
 0x176   : > { %v802_v25 = vmax.f32 %v798_v21, 0.0  ;;  %v804_v26 = vmax.f32 %v800_v22, 0.0  ;;  %805 = vst [vmem:[%s1351_s4] sm:$0xff] %v801_v23  ;;  %807 = vst [vmem:[%s1351_s4 + $0x10] sm:$0xff] %v803_v24 }
 0x178   : > { %806 = vst [vmem:[%s1351_s4 + $0x8] sm:$0xff] %v802_v25  ;;  %808 = vst [vmem:[%s1351_s4 + $0x18] sm:$0xff] %v804_v26 }
 0x179 PF: > { %s14_s19 = sadd.s32 1, %s1130_s19   ;;  %s1352_s15 = smov %s1118_s16 }
 0x17a   : > { %p11_p12 = scmp.ge.s32.totalorder %s14_s19, 8   ;;  %s1353_s16 = smov %s1194_s23 }
 0x17b   : > { %s1354_s17 = smov %s1126_s18  ;;  %s1355_s18 = smov %s1357_s20 }
 0x17c   :  { %13 = sbr.rel (!%p11_p12) target bundleno = 3 (0x3), region = 114 }

// kernel: resnet_forward.37
= control target key start
LH: loop header
LB: loop body
LE: loop exit
PB: predicated region body
PF: predicated region fallthrough
CT: control target
= control target key end

     0   :  { %s1772_s15 = smov 0   ;;  %s1774_s16 = smov 0   ;;  %s2117_s0 = inlined_call_operand.vmem [shape: bf16[16,2304], index: 0, kind: input, shape index: {}]   ;;  %s2118_s1 = inlined_call_operand.vmem [shape: bf16[2304,512], index: 1, kind: input, shape index: {}]   ;;  %s2119_s2 = inlined_call_operand.vmem [shape: f32[1,512], index: 2, kind: input, shape index: {}]   ;;  %s2120_s3 = inlined_call_operand.vmem [shape: f32[1,512], index: 3, kind: input, shape index: {}]   ;;  %s2121_s4 = inlined_call_operand.vmem [shape: f32[16,512], index: 4, kind: output, shape index: {}]  }
   0x1   :  { %s1776_s17 = smov 0   ;;  %s1778_s18 = smov 0  }
   0x2   :  { %s1780_s19 = smov 0  }
   0x3 LB: > { %s23_s20 = sadd.s32 1, %s1738_s18  ;;  %p42_p1 = scmp.ne.s32.totalorder %s1730_s16, %s1726_s15  ;;  %s1742_s19 = sphi %s1780_s19, %s14_s19   ;;  %s1738_s18 = sphi %s1778_s18, %s2125_s18   ;;  %s1734_s17 = sphi %s1776_s17, %s2124_s17   ;;  %s1730_s16 = sphi %s1774_s16, %s2123_s16   ;;  %s1726_s15 = sphi %s1772_s15, %s2122_s15  }
   0x4   : > { %p24_p0 = scmp.ge.s32.totalorder %s23_s20, 6  ;;  %p43_p2 = scmp.eq.s32.totalorder %s1742_s19, 0 }
   0x5   : > { %s35_s22 = sadd.s32 1, %s1730_s16  ;;  %p1386_p5 = scmp.ge.s32.totalorder %s1742_s19, 6 }
   0x6   : > { %s2127_s20 = smov (%p24_p0, %s23_s20), 0  ;;  %p44_p3 = por %p43_p2, %p42_p1 }
   0x7   : > { %s31_s21 = ssub.s32 %s1738_s18, %s2127_s20  ;;  %168 = sbr.rel (%p1386_p5) target bundleno = 19 (0x13), region = 24 }
   0x8   : > { %p33_p4 = scmp.eq.s32.totalorder %s31_s21, 0 }
   0xa   : > { %s1807_s23 = scalar_select %p33_p4, %s1730_s16, %s35_s22  }
   0xc   : > { %171 = sbr.rel (!%p44_p3) target bundleno = 19 (0x13), region = 28  ;;  %s173_s24 = sand.u32 (%p44_p3), 1, %s1730_s16  }
   0xd   : > { %s1501_s25 = smul.u32 (%p44_p3), 12, %s1738_s18 }
   0xe   : > { %s1503_s26 = smul.u32 (%p44_p3), 24, %s173_s24 }
   0xf   : > { %s181_s29 = scalar_lea.vmem (%p44_p3), %s2117_s0, %s1501_s25 }
  0x10   : > { %v196_v0 = vld [vmem:[%s181_s29] sm:$0xff] (%p44_p3)  ;;  %v198_v1 = vld [vmem:[%s181_s29 + $0x48] sm:$0xff] (%p44_p3)  ;;  %s175_s30 = scalar_lea.vmem (%p44_p3), [#allocation2], %s1503_s26  ;;  %v1390_v3 = vld [vmem:[%s181_s29 + $0x50] sm:$0xf] (%p44_p3) }
  0x11   : > { %v1388_v2 = vld [vmem:[%s181_s29 + $0x8] sm:$0xf]  ;;  %197 = vst [vmem:[%s175_s30] sm:$0xff] %v196_v0  ;;  %199 = vst [vmem:[%s175_s30 + $0xc] sm:$0xff] %v198_v1 }
  0x12   : > { %1389 = vst [vmem:[%s175_s30 + $0x8] sm:$0xf] %v1388_v2  ;;  %1391 = vst [vmem:[%s175_s30 + $0x14] sm:$0xf] %v1390_v3 }
  0x13 PF: > { %p1392_p6 = scmp.ge.s32.totalorder %s1742_s19, 1  ;;  %p226_p7 = scmp.lt.s32.totalorder %s1742_s19, 7 }
  0x15   : > { %p227_p8 = pnand %p1392_p6, %p226_p7 }
  0x16   : > { %s233_s5 = sand.u32 (!%p227_p8), 1, %s1726_s15   ;;  %s267_s6 = smul.u32 (!%p227_p8), 48, %s1734_s17 }
  0x17   : > { %230 = sbr.rel (%p227_p8) target bundleno = 414 (0x19e), region = 58  ;;  %p1395_p10 = scmp.ne.s32.totalorder (!%p227_p8), %s1734_s17, 0 }
  0x18   : > { %s1504_s7 = smul.u32 (!%p227_p8), 24, %s233_s5  ;;  %p268_p9 = scmp.lt.s32.totalorder (!%p227_p8), %s267_s6, 287 }
  0x1a   : > { %s1824_s12 = scalar_lea.vmem (!%p227_p8), [#allocation2], %s1504_s7 }
  0x1c   : > { %s2129_s6 = smov (!%p268_p9, %s267_s6), 287  ;;  %285 = sbr.rel (%p1395_p10) target bundleno = 38 (0x26), region = 66 }
  0x1d   : > { %s1502_s8 = sshll.u32 %s2129_s6, 4 }
  0x1e   : > { %s1822_s11 = scalar_lea.vmem %s2118_s1, %s1502_s8 }
  0x21   : > { %v1744_v4 = vmov 0.0  }
  0x22   : > { %286 = vst [vmem:[%s2121_s4] sm:$0xff] %v1744_v4  ;;  %287 = vst [vmem:[%s2121_s4 + $0x8] sm:$0xff] %v1744_v4 }
  0x23   : > { %288 = vst [vmem:[%s2121_s4 + $0x10] sm:$0xff] %v1744_v4  ;;  %289 = vst [vmem:[%s2121_s4 + $0x18] sm:$0xff] %v1744_v4 }
  0x24   : > { %290 = vst [vmem:[%s2121_s4 + $0x20] sm:$0xff] %v1744_v4  ;;  %291 = vst [vmem:[%s2121_s4 + $0x28] sm:$0xff] %v1744_v4 }
  0x25   : > { %292 = vst [vmem:[%s2121_s4 + $0x30] sm:$0xff] %v1744_v4  ;;  %293 = vst [vmem:[%s2121_s4 + $0x38] sm:$0xff] %v1744_v4 }
  0x26 PF: > { %v1548_v5 = vld [vmem:[%s1822_s11 + $0xe4] ss:$16 sps:$4 sm:$0xff]   ;;  %v1745_v7 = vmov 0   ;;  %v1552_v8 = vld [vmem:[%s1822_s11 + $0xe0] ss:$16 sps:$4 sm:$0xff]   ;;  %p1495_p11 = scmp.ne.s32.totalorder %s1734_s17, 5 }
  0x27   : > { %v1550_v6 = vld [vmem:[%s1822_s11 + $0x2e4] ss:$16 sps:$4 sm:$0xff]   ;;  %973 = vmatprep.mubr.bf16.mxu1 %v1745_v7  ;;  %898 = vmatprep.subr.bf16.mxu0 %v1548_v5  ;;  %v1553_v9 = vld [vmem:[%s1822_s11 + $0x2e0] ss:$16 sps:$4 sm:$0xff]   ;;  %v1601_v39 = vld [vmem:[%s1822_s11 + $0xec] ss:$16 sps:$4 sm:$0xff]  }
  0x28   : > { %941 = vmatprep.subr.bf16.mxu1 %v1550_v6  ;;  %v1554_v10 = vld [vmem:[%s1822_s11 + $0xc4] ss:$16 sps:$4 sm:$0xff]   ;;  %899 = vmatpush1.bf16.msra.mxu0 %v1552_v8  ;;  %v1558_v12 = vld [vmem:[%s1822_s11 + $0xc0] ss:$16 sps:$4 sm:$0xff]   ;;  %v1599_v41 = vld [vmem:[%s1822_s11 + $0xe8] ss:$16 sps:$4 sm:$0xff]  }
  0x29   : > { %942 = vmatpush1.bf16.msra.mxu1 %v1553_v9  ;;  %v1556_v11 = vld [vmem:[%s1822_s11 + $0x2c4] ss:$16 sps:$4 sm:$0xff]   ;;  %900 = vmatprep.subr.bf16.mxu0 %v1554_v10  ;;  %v1559_v13 = vld [vmem:[%s1822_s11 + $0x2c0] ss:$16 sps:$4 sm:$0xff]   ;;  %v1607_v44 = vld [vmem:[%s1822_s11 + $0xcc] ss:$16 sps:$4 sm:$0xff]  }
  0x2a   : > { %943 = vmatprep.subr.bf16.mxu1 %v1556_v11  ;;  %v1560_v14 = vld [vmem:[%s1822_s11 + $0xa4] ss:$16 sps:$4 sm:$0xff]   ;;  %v1564_v16 = vld [vmem:[%s1822_s11 + $0xa0] ss:$16 sps:$4 sm:$0xff]   ;;  %v1605_v45 = vld [vmem:[%s1822_s11 + $0xc8] ss:$16 sps:$4 sm:$0xff]  }
  0x2b   : > { %v1562_v15 = vld [vmem:[%s1822_s11 + $0x2a4] ss:$16 sps:$4 sm:$0xff]   ;;  %v1565_v17 = vld [vmem:[%s1822_s11 + $0x2a0] ss:$16 sps:$4 sm:$0xff]   ;;  %v1613_v48 = vld [vmem:[%s1822_s11 + $0xac] ss:$16 sps:$4 sm:$0xff]  }
  0x2c   : > { %901 = vmatpush1.bf16.msra.mxu0 %v1558_v12  ;;  %v1566_v18 = vld [vmem:[%s1822_s11 + $0x84] ss:$16 sps:$4 sm:$0xff]   ;;  %v1570_v20 = vld [vmem:[%s1822_s11 + $0x80] ss:$16 sps:$4 sm:$0xff]   ;;  %v1611_v49 = vld [vmem:[%s1822_s11 + $0xa8] ss:$16 sps:$4 sm:$0xff]  }
  0x2d   : > { %944 = vmatpush1.bf16.msra.mxu1 %v1559_v13  ;;  %902 = vmatprep.subr.bf16.mxu0 %v1560_v14  ;;  %v1568_v19 = vld [vmem:[%s1822_s11 + $0x284] ss:$16 sps:$4 sm:$0xff]   ;;  %v1571_v21 = vld [vmem:[%s1822_s11 + $0x280] ss:$16 sps:$4 sm:$0xff]   ;;  %v1619_v52 = vld [vmem:[%s1822_s11 + $0x8c] ss:$16 sps:$4 sm:$0xff]  }
  0x2e   : > { %945 = vmatprep.subr.bf16.mxu1 %v1562_v15  ;;  %v1572_v22 = vld [vmem:[%s1822_s11 + $0x64] ss:$16 sps:$4 sm:$0xff]   ;;  %v1576_v24 = vld [vmem:[%s1822_s11 + $0x60] ss:$16 sps:$4 sm:$0xff]   ;;  %v1617_v53 = vld [vmem:[%s1822_s11 + $0x88] ss:$16 sps:$4 sm:$0xff]  }
  0x2f   : > { %v1574_v23 = vld [vmem:[%s1822_s11 + $0x264] ss:$16 sps:$4 sm:$0xff]   ;;  %v1577_v25 = vld [vmem:[%s1822_s11 + $0x260] ss:$16 sps:$4 sm:$0xff]   ;;  %v1625_v57 = vld [vmem:[%s1822_s11 + $0x6c] ss:$16 sps:$4 sm:$0xff]  }
  0x30   : > { %903 = vmatpush1.bf16.msra.mxu0 %v1564_v16  ;;  %v1578_v26 = vld [vmem:[%s1822_s11 + $0x44] ss:$16 sps:$4 sm:$0xff]   ;;  %v1582_v28 = vld [vmem:[%s1822_s11 + $0x40] ss:$16 sps:$4 sm:$0xff]   ;;  %v1623_v58 = vld [vmem:[%s1822_s11 + $0x68] ss:$16 sps:$4 sm:$0xff]  }
  0x31   : > { %946 = vmatpush1.bf16.msra.mxu1 %v1565_v17  ;;  %904 = vmatprep.subr.bf16.mxu0 %v1566_v18  ;;  %v1580_v27 = vld [vmem:[%s1822_s11 + $0x244] ss:$16 sps:$4 sm:$0xff]   ;;  %v1583_v29 = vld [vmem:[%s1822_s11 + $0x240] ss:$16 sps:$4 sm:$0xff]   ;;  %v1631_v61 = vld [vmem:[%s1822_s11 + $0x4c] ss:$16 sps:$4 sm:$0xff]  }
  0x32   : > { %947 = vmatprep.subr.bf16.mxu1 %v1568_v19  ;;  %v1584_v30 = vld [vmem:[%s1822_s11 + $0x24] ss:$16 sps:$4 sm:$0xff]   ;;  %v1588_v32 = vld [vmem:[%s1822_s11 + $0x20] ss:$16 sps:$4 sm:$0xff]   ;;  %v1629_v62 = vld [vmem:[%s1822_s11 + $0x48] ss:$16 sps:$4 sm:$0xff]  }
  0x33   : > { %v1586_v31 = vld [vmem:[%s1822_s11 + $0x224] ss:$16 sps:$4 sm:$0xff]   ;;  %v1589_v33 = vld [vmem:[%s1822_s11 + $0x220] ss:$16 sps:$4 sm:$0xff]   ;;  %v1637_v1 = vld [vmem:[%s1822_s11 + $0x2c] ss:$16 sps:$4 sm:$0xff]  }
  0x34   : > { %905 = vmatpush1.bf16.msra.mxu0 %v1570_v20  ;;  %v1590_v34 = vld [vmem:[%s1822_s11 + $0x4] ss:$16 sps:$4 sm:$0xff]   ;;  %v1594_v36 = vld [vmem:[%s1822_s11] ss:$16 sps:$4 sm:$0xff]   ;;  %v1635_v2 = vld [vmem:[%s1822_s11 + $0x28] ss:$16 sps:$4 sm:$0xff]  }
  0x35   : > { %948 = vmatpush1.bf16.msra.mxu1 %v1571_v21  ;;  %906 = vmatprep.subr.bf16.mxu0 %v1572_v22  ;;  %v1592_v35 = vld [vmem:[%s1822_s11 + $0x204] ss:$16 sps:$4 sm:$0xff]   ;;  %v1595_v37 = vld [vmem:[%s1822_s11 + $0x200] ss:$16 sps:$4 sm:$0xff]   ;;  %v1643_v5 = vld [vmem:[%s1822_s11 + $0xc] ss:$16 sps:$4 sm:$0xff]  }
  0x36   : > { %949 = vmatprep.subr.bf16.mxu1 %v1574_v23  ;;  %v1596_v38 = vld [vmem:[%s1822_s11 + $0x1e4] ss:$16 sps:$4 sm:$0xff]   ;;  %v1602_v42 = vld [vmem:[%s1822_s11 + $0x1e0] ss:$16 sps:$4 sm:$0xff]   ;;  %v1641_v6 = vld [vmem:[%s1822_s11 + $0x8] ss:$16 sps:$4 sm:$0xff]  }
  0x37   : > { %v1887_v40 = vld [vmem:[%s1824_s12 + $0x8] ss:$12 sps:$4 sm:$0xff]   ;;  %v1647_v56 = vld [vmem:[%s1824_s12 + $0x4] ss:$12 sps:$4 sm:$0xff]   ;;  %v1924_v11 = vld [vmem:[%s1824_s12] ss:$12 sps:$4 sm:$0xff]  }
  0x38   : > { %907 = vmatpush1.bf16.msra.mxu0 %v1576_v24  ;;  %v1603_v43 = vld [vmem:[%s1822_s11 + $0x1c4] ss:$16 sps:$4 sm:$0xff]   ;;  %v1608_v46 = vld [vmem:[%s1822_s11 + $0x1c0] ss:$16 sps:$4 sm:$0xff]   ;;  %930 = vmatprep.mubr.bf16.mxu0 %v1647_v56  ;;  %v1650_v9 = vld [vmem:[%s1822_s11 + $0x1ec] ss:$16 sps:$4 sm:$0xff]  }
  0x39   : > { %950 = vmatpush1.bf16.msra.mxu1 %v1577_v25  ;;  %908 = vmatprep.subr.bf16.mxu0 %v1578_v26  ;;  %v1609_v47 = vld [vmem:[%s1822_s11 + $0x1a4] ss:$16 sps:$4 sm:$0xff]   ;;  %v1614_v50 = vld [vmem:[%s1822_s11 + $0x1a0] ss:$16 sps:$4 sm:$0xff]   ;;  %v1653_v10 = vld [vmem:[%s1822_s11 + $0x2ec] ss:$16 sps:$4 sm:$0xff]  }
  0x3a   : > { %951 = vmatprep.subr.bf16.mxu1 %v1580_v27  ;;  %v1615_v51 = vld [vmem:[%s1822_s11 + $0x184] ss:$16 sps:$4 sm:$0xff]   ;;  %v1620_v54 = vld [vmem:[%s1822_s11 + $0x180] ss:$16 sps:$4 sm:$0xff]   ;;  %v1648_v12 = vld [vmem:[%s1822_s11 + $0x1e8] ss:$16 sps:$4 sm:$0xff]  }
  0x3b   : > { %v1621_v55 = vld [vmem:[%s1822_s11 + $0x164] ss:$16 sps:$4 sm:$0xff]   ;;  %v1626_v59 = vld [vmem:[%s1822_s11 + $0x160] ss:$16 sps:$4 sm:$0xff]   ;;  %v1651_v13 = vld [vmem:[%s1822_s11 + $0x2e8] ss:$16 sps:$4 sm:$0xff]  }
  0x3c   : > { %909 = vmatpush1.bf16.msra.mxu0 %v1582_v28  ;;  %v1627_v60 = vld [vmem:[%s1822_s11 + $0x144] ss:$16 sps:$4 sm:$0xff]   ;;  %v1632_v63 = vld [vmem:[%s1822_s11 + $0x140] ss:$16 sps:$4 sm:$0xff]   ;;  %v1656_v14 = vld [vmem:[%s1822_s11 + $0x1cc] ss:$16 sps:$4 sm:$0xff]  }
  0x3d   : > { %952 = vmatpush1.bf16.msra.mxu1 %v1583_v29  ;;  %910 = vmatprep.subr.bf16.mxu0 %v1584_v30  ;;  %v1633_v0 = vld [vmem:[%s1822_s11 + $0x124] ss:$16 sps:$4 sm:$0xff]   ;;  %v1638_v3 = vld [vmem:[%s1822_s11 + $0x120] ss:$16 sps:$4 sm:$0xff]   ;;  %v1659_v15 = vld [vmem:[%s1822_s11 + $0x2cc] ss:$16 sps:$4 sm:$0xff]  }
  0x3e   : > { %953 = vmatprep.subr.bf16.mxu1 %v1586_v31  ;;  %v1639_v4 = vld [vmem:[%s1822_s11 + $0x104] ss:$16 sps:$4 sm:$0xff]   ;;  %v1644_v8 = vld [vmem:[%s1822_s11 + $0x100] ss:$16 sps:$4 sm:$0xff]   ;;  %v1654_v16 = vld [vmem:[%s1822_s11 + $0x1c8] ss:$16 sps:$4 sm:$0xff]  }
  0x3f   : > { %v1657_v17 = vld [vmem:[%s1822_s11 + $0x2c8] ss:$16 sps:$4 sm:$0xff]   ;;  %v1662_v18 = vld [vmem:[%s1822_s11 + $0x1ac] ss:$16 sps:$4 sm:$0xff]  }
  0x40   : > { %911 = vmatpush1.bf16.msra.mxu0 %v1588_v32  ;;  %v1665_v19 = vld [vmem:[%s1822_s11 + $0x2ac] ss:$16 sps:$4 sm:$0xff]   ;;  %v1660_v20 = vld [vmem:[%s1822_s11 + $0x1a8] ss:$16 sps:$4 sm:$0xff]  }
  0x41   : > { %954 = vmatpush1.bf16.msra.mxu1 %v1589_v33  ;;  %912 = vmatprep.subr.bf16.mxu0 %v1590_v34  ;;  %v1663_v21 = vld [vmem:[%s1822_s11 + $0x2a8] ss:$16 sps:$4 sm:$0xff]   ;;  %v1668_v22 = vld [vmem:[%s1822_s11 + $0x18c] ss:$16 sps:$4 sm:$0xff]  }
  0x42   : > { %955 = vmatprep.subr.bf16.mxu1 %v1592_v35  ;;  %v1671_v23 = vld [vmem:[%s1822_s11 + $0x28c] ss:$16 sps:$4 sm:$0xff]   ;;  %v1666_v24 = vld [vmem:[%s1822_s11 + $0x188] ss:$16 sps:$4 sm:$0xff]  }
  0x43   : > { %v1669_v25 = vld [vmem:[%s1822_s11 + $0x288] ss:$16 sps:$4 sm:$0xff]   ;;  %v1677_v26 = vld [vmem:[%s1822_s11 + $0x26c] ss:$16 sps:$4 sm:$0xff]  }
  0x44   : > { %913 = vmatpush1.bf16.msra.mxu0 %v1594_v36  ;;  %v1672_v27 = vld [vmem:[%s1822_s11 + $0x168] ss:$16 sps:$4 sm:$0xff]   ;;  %v1680_v29 = vld [vmem:[%s1822_s11 + $0x14c] ss:$16 sps:$4 sm:$0xff]  }
  0x45   : > { %956 = vmatpush1.bf16.msra.mxu1 %v1595_v37  ;;  %914 = vmatprep.subr.bf16.mxu0 %v1596_v38  ;;  %v1675_v28 = vld [vmem:[%s1822_s11 + $0x268] ss:$16 sps:$4 sm:$0xff]   ;;  %v1683_v30 = vld [vmem:[%s1822_s11 + $0x24c] ss:$16 sps:$4 sm:$0xff]  }
  0x46   : > { %984 = vmatprep.subr.bf16.mxu1 %v1601_v39  ;;  %v1678_v31 = vld [vmem:[%s1822_s11 + $0x148] ss:$16 sps:$4 sm:$0xff]   ;;  %v1686_v33 = vld [vmem:[%s1822_s11 + $0x12c] ss:$16 sps:$4 sm:$0xff]  }
  0x47   : > { %v1681_v32 = vld [vmem:[%s1822_s11 + $0x248] ss:$16 sps:$4 sm:$0xff]   ;;  %v1689_v34 = vld [vmem:[%s1822_s11 + $0x22c] ss:$16 sps:$4 sm:$0xff]  }
  0x48   : > { %974 = vmatmul.mubr.bf16.vlgmr.msra.gmra.mxu1 %v1887_v40  ;;  %915 = vmatpush2.bf16.msra.mxu0 %v1602_v42  ;;  %v1684_v35 = vld [vmem:[%s1822_s11 + $0x128] ss:$16 sps:$4 sm:$0xff]   ;;  %v1692_v37 = vld [vmem:[%s1822_s11 + $0x10c] ss:$16 sps:$4 sm:$0xff]  }
  0x49   : > { %985 = vmatpush1.bf16.msra.mxu1 %v1599_v41  ;;  %916 = vmatprep.subr.bf16.mxu0 %v1603_v43  ;;  %v1687_v36 = vld [vmem:[%s1822_s11 + $0x228] ss:$16 sps:$4 sm:$0xff]   ;;  %v1695_v38 = vld [vmem:[%s1822_s11 + $0x20c] ss:$16 sps:$4 sm:$0xff]  }
  0x4a   : > { %986 = vmatprep.subr.bf16.mxu1 %v1607_v44  ;;  %1016 = vmatprep.mubr.bf16.mxu1 %v1647_v56  ;;  %v1690_v39 = vld [vmem:[%s1822_s11 + $0x108] ss:$16 sps:$4 sm:$0xff]   ;;  %v294_v44 = vld [vmem:[%s2121_s4] sm:$0xff] }
  0x4b   : > { %v1693_v41 = vld [vmem:[%s1822_s11 + $0x208] ss:$16 sps:$4 sm:$0xff]  }
  0x4c   : > { %917 = vmatpush2.bf16.msra.mxu0 %v1608_v46  ;;  %v299_v56 = vld [vmem:[%s2121_s4 + $0x28] sm:$0xff] }
  0x4d   : > { %987 = vmatpush1.bf16.msra.mxu1 %v1605_v45  ;;  %918 = vmatprep.subr.bf16.mxu0 %v1609_v47 }
  0x4e   : > { %988 = vmatprep.subr.bf16.mxu1 %v1613_v48  ;;  %v295_v48 = vld [vmem:[%s2121_s4 + $0x8] sm:$0xff] }
  0x50   : > { %919 = vmatpush2.bf16.msra.mxu0 %v1614_v50 }
  0x51   : > { %989 = vmatpush1.bf16.msra.mxu1 %v1611_v49  ;;  %920 = vmatprep.subr.bf16.mxu0 %v1615_v51 }
  0x52   : > { %990 = vmatprep.subr.bf16.mxu1 %v1619_v52 }
  0x54   : > { %921 = vmatpush2.bf16.msra.mxu0 %v1620_v54 }
  0x55   : > { %991 = vmatpush1.bf16.msra.mxu1 %v1617_v53  ;;  %922 = vmatprep.subr.bf16.mxu0 %v1621_v55 }
  0x56   : > { %992 = vmatprep.subr.bf16.mxu1 %v1625_v57 }
  0x58   : > { %923 = vmatpush2.bf16.msra.mxu0 %v1626_v59 }
  0x59   : > { %993 = vmatpush1.bf16.msra.mxu1 %v1623_v58  ;;  %924 = vmatprep.subr.bf16.mxu0 %v1627_v60 }
  0x5a   : > { %994 = vmatprep.subr.bf16.mxu1 %v1631_v61 }
  0x5c   : > { %925 = vmatpush2.bf16.msra.mxu0 %v1632_v63 }
  0x5d   : > { %995 = vmatpush1.bf16.msra.mxu1 %v1629_v62  ;;  %926 = vmatprep.subr.bf16.mxu0 %v1633_v0  ;;  %v296_v62 = vld [vmem:[%s2121_s4 + $0x10] sm:$0xff] }
  0x5e   : > { %996 = vmatprep.subr.bf16.mxu1 %v1637_v1 }
  0x60   : > { %927 = vmatpush2.bf16.msra.mxu0 %v1638_v3 }
  0x61   : > { %997 = vmatpush1.bf16.msra.mxu1 %v1635_v2  ;;  %928 = vmatprep.subr.bf16.mxu0 %v1639_v4  ;;  %v297_v2 = vld [vmem:[%s2121_s4 + $0x18] sm:$0xff] }
  0x62   : > { %998 = vmatprep.subr.bf16.mxu1 %v1643_v5 }
  0x64   : > { %929 = vmatpush2.bf16.msra.mxu0 %v1644_v8  ;;  %v300_v8 = vld [vmem:[%s2121_s4 + $0x30] sm:$0xff] }
  0x65   : > { %999 = vmatpush1.bf16.msra.mxu1 %v1641_v6  ;;  %1027 = vmatprep.subr.bf16.mxu0 %v1653_v10 }
  0x66   : > { %1000 = vmatprep.subr.bf16.mxu1 %v1650_v9 }
  0x67   : > { %931 = vmatmul.mubr.bf16.vlgmr.msra.gmra.mxu0 %v1924_v11 }
  0x68   : > { %1028 = vmatpush1.bf16.msra.mxu0 %v1651_v13  ;;  %1059 = vmatprep.mubr.bf16.mxu0 %v1745_v7  ;;  %v1674_v7 = vld [vmem:[%s1822_s11 + $0x16c] ss:$16 sps:$4 sm:$0xff]  }
  0x69   : > { %1001 = vmatpush2.bf16.msra.mxu1 %v1648_v12  ;;  %1029 = vmatprep.subr.bf16.mxu0 %v1659_v15  ;;  %v301_v13 = vld [vmem:[%s2121_s4 + $0x38] sm:$0xff] }
  0x6a   : > { %1002 = vmatprep.subr.bf16.mxu1 %v1656_v14 }
  0x6c   : > { %1030 = vmatpush1.bf16.msra.mxu0 %v1657_v17 }
  0x6d   : > { %1003 = vmatpush2.bf16.msra.mxu1 %v1654_v16  ;;  %1031 = vmatprep.subr.bf16.mxu0 %v1665_v19 }
  0x6e   : > { %1004 = vmatprep.subr.bf16.mxu1 %v1662_v18 }
  0x70   : > { %1032 = vmatpush1.bf16.msra.mxu0 %v1663_v21 }
  0x71   : > { %1005 = vmatpush2.bf16.msra.mxu1 %v1660_v20  ;;  %1033 = vmatprep.subr.bf16.mxu0 %v1671_v23 }
  0x72   : > { %1006 = vmatprep.subr.bf16.mxu1 %v1668_v22 }
  0x74   : > { %1034 = vmatpush1.bf16.msra.mxu0 %v1669_v25 }
  0x75   : > { %1007 = vmatpush2.bf16.msra.mxu1 %v1666_v24  ;;  %1035 = vmatprep.subr.bf16.mxu0 %v1677_v26 }
  0x76   : > { %1008 = vmatprep.subr.bf16.mxu1 %v1674_v7 }
  0x78   : > { %1036 = vmatpush1.bf16.msra.mxu0 %v1675_v28 }
  0x79   : > { %1009 = vmatpush2.bf16.msra.mxu1 %v1672_v27  ;;  %1037 = vmatprep.subr.bf16.mxu0 %v1683_v30 }
  0x7a   : > { %1010 = vmatprep.subr.bf16.mxu1 %v1680_v29 }
  0x7c   : > { %1038 = vmatpush1.bf16.msra.mxu0 %v1681_v32 }
  0x7d   : > { %1011 = vmatpush2.bf16.msra.mxu1 %v1678_v31  ;;  %1039 = vmatprep.subr.bf16.mxu0 %v1689_v34 }
  0x7e   : > { %1012 = vmatprep.subr.bf16.mxu1 %v1686_v33 }
  0x80   : > { %1040 = vmatpush1.bf16.msra.mxu0 %v1687_v36 }
  0x81   : > { %1013 = vmatpush2.bf16.msra.mxu1 %v1684_v35  ;;  %1041 = vmatprep.subr.bf16.mxu0 %v1695_v38 }
  0x82   : > { %1014 = vmatprep.subr.bf16.mxu1 %v1692_v37 }
  0x84   : > { %1042 = vmatpush1.bf16.msra.mxu0 %v1693_v41 }
  0x85   : > { %1015 = vmatpush2.bf16.msra.mxu1 %v1690_v39 }
  0x87   : > { %1060 = vmatmul.mubr.bf16.vlgmr.msra.gmra.mxu0 %v1887_v40  ;;  %v298_v40 = vld [vmem:[%s2121_s4 + $0x20] sm:$0xff] }
  0x88   : > { %1017 = vmatmul.mubr.bf16.vlgmr.msra.gmra.mxu1 %v1924_v11 }
 0x108   : > { %v975_v42 = vpop.f32.mrf.mxu1 }
 0x10a   : > { %v977_v43 = vpop.f32.mrf.mxu1 }
 0x10c   : > { %v979_v47 = vpop.f32.mrf.mxu1 }
 0x10e   : > { %v981_v55 = vpop.f32.mrf.mxu1 }
 0x127   : > { %v932_v45 = vpop.f32.mrf.mxu0 }
 0x128   : > { %v976_v46 = vadd.f32 %v975_v42, %v932_v45 }
 0x129   : > { %v934_v49 = vpop.f32.mrf.mxu0 }
 0x12a   : > { %v1070_v50 = vadd.f32 %v976_v46, %v294_v44  ;;  %v978_v51 = vadd.f32 %v977_v43, %v934_v49 }
 0x12b   : > { %v936_v52 = vpop.f32.mrf.mxu0 }
 0x12c   : > { %1078 = vst [vmem:[%s2121_s4] sm:$0xff] %v1070_v50  ;;  %v1071_v53 = vadd.f32 %v978_v51, %v295_v48  ;;  %v980_v54 = vadd.f32 %v979_v47, %v936_v52 }
 0x12d   : > { %v938_v57 = vpop.f32.mrf.mxu0 }
 0x12e   : > { %1079 = vst [vmem:[%s2121_s4 + $0x8] sm:$0xff] %v1071_v53  ;;  %v1074_v58 = vadd.f32 %v980_v54, %v298_v40  ;;  %v982_v59 = vadd.f32 %v981_v55, %v938_v57 }
 0x130   : > { %1082 = vst [vmem:[%s2121_s4 + $0x20] sm:$0xff] %v1074_v58  ;;  %v1075_v60 = vadd.f32 %v982_v59, %v299_v56 }
 0x132   : > { %1083 = vst [vmem:[%s2121_s4 + $0x28] sm:$0xff] %v1075_v60 }
 0x147   : > { %v1061_v63 = vpop.f32.mrf.mxu0 }
 0x148   : > { %v1018_v61 = vpop.f32.mrf.mxu1 }
 0x149   : > { %v1062_v0 = vadd.f32 %v1061_v63, %v1018_v61  ;;  %v1063_v3 = vpop.f32.mrf.mxu0 }
 0x14a   : > { %v1020_v1 = vpop.f32.mrf.mxu1 }
 0x14b   : > { %v1072_v4 = vadd.f32 %v1062_v0, %v296_v62  ;;  %v1064_v5 = vadd.f32 %v1063_v3, %v1020_v1  ;;  %v1065_v9 = vpop.f32.mrf.mxu0 }
 0x14c   : > { %v1022_v6 = vpop.f32.mrf.mxu1 }
 0x14d   : > { %1080 = vst [vmem:[%s2121_s4 + $0x10] sm:$0xff] %v1072_v4  ;;  %v1073_v10 = vadd.f32 %v1064_v5, %v297_v2  ;;  %v1066_v11 = vadd.f32 %v1065_v9, %v1022_v6  ;;  %v1067_v14 = vpop.f32.mrf.mxu0 }
 0x14e   : > { %v1024_v12 = vpop.f32.mrf.mxu1 }
 0x14f   : > { %1081 = vst [vmem:[%s2121_s4 + $0x18] sm:$0xff] %v1073_v10  ;;  %v1076_v15 = vadd.f32 %v1066_v11, %v300_v8  ;;  %v1068_v16 = vadd.f32 %v1067_v14, %v1024_v12  ;;  %1089 = sbr.rel (%p1495_p11) target bundleno = 414 (0x19e), region = 70 }
 0x151   : > { %1084 = vst [vmem:[%s2121_s4 + $0x30] sm:$0xff] %v1076_v15  ;;  %v1077_v17 = vadd.f32 %v1068_v16, %v301_v13 }
 0x153   : > { %1085 = vst [vmem:[%s2121_s4 + $0x38] sm:$0xff] %v1077_v17 }
 0x154   : > { %v1100_v18 = vlaneseq  ;;  %v1094_v19 = vld [vmem:[%s2121_s4 + $0x20] sm:$0xff]  ;;  %v1095_v20 = vld [vmem:[%s2121_s4 + $0x28] sm:$0xff]  ;;  %v1092_v27 = vld [vmem:[%s2121_s4 + $0x10] sm:$0xff]  ;;  %v1746_v28 = vmov 0.0  }
 0x155   : > { %v1090_v23 = vld [vmem:[%s2121_s4] sm:$0xff]  ;;  %v1091_v24 = vld [vmem:[%s2121_s4 + $0x8] sm:$0xff]  ;;  %v1113_v7 = vmul.f32 0.0, %v1094_v19  ;;  %v1114_v26 = vmul.f32 0.0, %v1095_v20 }
 0x156   : > { %v2015_v21 = vshrl.u32 %v1100_v18, 7  ;;  %v1093_v31 = vld [vmem:[%s2121_s4 + $0x18] sm:$0xff] }
 0x158   : > { %v1096_v22 = vld [vmem:[%s2121_s4 + $0x30] sm:$0xff]  ;;  %vm1103_vm0 = vcmp.lt.s32.totalorder %v2015_v21, 2 }
 0x159   : > { %v1496_v29 = vsel %vm1103_vm0, 1.0, %v1746_v28  ;;  %v1115_v30 = vmul.f32 0.0, %v1096_v22 }
 0x15a   : > { %v1097_v25 = vld [vmem:[%s2121_s4 + $0x38] sm:$0xff]  ;;  %v1109_v32 = vmul.f32 %v1496_v29, %v1090_v23  ;;  %v1110_v33 = vmul.f32 %v1496_v29, %v1091_v24  ;;  %v1111_v35 = vmul.f32 %v1496_v29, %v1092_v27  ;;  %v1112_v38 = vmul.f32 %v1496_v29, %v1093_v31 }
 0x15b   : > { %v1116_v34 = vmul.f32 0.0, %v1097_v25 }
 0x15c   : > { %v1117_v36 = vadd.f32 %v1113_v7, %v1109_v32  ;;  %v1124_v37 = vadd.f32 %v1114_v26, %v1110_v33  ;;  %v1131_v39 = vadd.f32 %v1115_v30, %v1111_v35 }
 0x15d   : > { %v1138_v43 = vadd.f32 %v1116_v34, %v1112_v38 }
 0x15e   : > { %v1118_v41 = vrot.slane %v1117_v36, 4  ;;  %v1125_v42 = vrot.slane %v1124_v37, 4  ;;  %v1132_v44 = vrot.slane %v1131_v39, 4 }
 0x15f   : > { %v1139_v47 = vrot.slane %v1138_v43, 4 }
 0x160   : > { %v1119_v45 = vadd.f32 %v1118_v41, %v1117_v36  ;;  %v1126_v46 = vadd.f32 %v1125_v42, %v1124_v37  ;;  %v1133_v48 = vadd.f32 %v1132_v44, %v1131_v39 }
 0x161   : > { %v1140_v51 = vadd.f32 %v1139_v47, %v1138_v43 }
 0x162   : > { %v1120_v49 = vrot.slane %v1119_v45, 2  ;;  %v1127_v50 = vrot.slane %v1126_v46, 2  ;;  %v1134_v40 = vrot.slane %v1133_v48, 2 }
 0x163   : > { %v1141_v54 = vrot.slane %v1140_v51, 2 }
 0x164   : > { %v1121_v52 = vadd.f32 %v1120_v49, %v1119_v45  ;;  %v1128_v53 = vadd.f32 %v1127_v50, %v1126_v46  ;;  %v1135_v55 = vadd.f32 %v1134_v40, %v1133_v48 }
 0x165   : > { %v1142_v58 = vadd.f32 %v1141_v54, %v1140_v51 }
 0x166   : > { %v1122_v56 = vrot.slane %v1121_v52, 1  ;;  %v1129_v57 = vrot.slane %v1128_v53, 1  ;;  %v1136_v59 = vrot.slane %v1135_v55, 1 }
 0x167   : > { %v1143_v62 = vrot.slane %v1142_v58, 1 }
 0x168   : > { %v1123_v60 = vadd.f32 %v1122_v56, %v1121_v52  ;;  %v1130_v61 = vadd.f32 %v1129_v57, %v1128_v53  ;;  %v1137_v63 = vadd.f32 %v1136_v59, %v1135_v55 }
 0x169   : > { %v1144_v2 = vadd.f32 %v1143_v62, %v1142_v58 }
 0x16a   : > { %v1145_v0 = vmul.f32 0.5, %v1123_v60  ;;  %v1146_v1 = vmul.f32 0.5, %v1130_v61  ;;  %v1147_v3 = vmul.f32 0.5, %v1137_v63 }
 0x16b   : > { %v1148_v11 = vmul.f32 0.5, %v1144_v2  ;;  %v1224_v2 = vsub.s32 0, %v2015_v21 }
 0x16c   : > { %v2036_v4 = vsub.f32 %v1090_v23, %v1145_v0  ;;  %v2038_v5 = vsub.f32 %v1094_v19, %v1145_v0  ;;  %v2040_v6 = vsub.f32 %v1091_v24, %v1146_v1  ;;  %v2042_v8 = vsub.f32 %v1095_v20, %v1146_v1 }
 0x16d   : > { %v2044_v9 = vsub.f32 %v1092_v27, %v1147_v3  ;;  %v2046_v10 = vsub.f32 %v1096_v22, %v1147_v3  ;;  %v2054_v18 = vsub.f32 %v1093_v31, %v1148_v11  ;;  %v2056_v19 = vsub.f32 %v1097_v25, %v1148_v11  ;;  %v1098_v3 = vld [vmem:[%s2119_s2] sm:$0xf] }
 0x16e   : > { %v1157_v12 = vmul.f32 %v1496_v29, %v2036_v4  ;;  %v1161_v13 = vmul.f32 0.0, %v2038_v5  ;;  %v1158_v14 = vmul.f32 %v1496_v29, %v2040_v6  ;;  %v1162_v15 = vmul.f32 0.0, %v2042_v8 }
 0x16f   : > { %v1159_v16 = vmul.f32 %v1496_v29, %v2044_v9  ;;  %v1163_v17 = vmul.f32 0.0, %v2046_v10  ;;  %v1160_v27 = vmul.f32 %v1496_v29, %v2054_v18  ;;  %v1164_v28 = vmul.f32 0.0, %v2056_v19 }
 0x170   : > { %v1165_v20 = vmul.f32 %v1157_v12, %v1157_v12  ;;  %v1169_v22 = vmul.f32 %v1161_v13, %v1161_v13  ;;  %v1166_v23 = vmul.f32 %v1158_v14, %v1158_v14  ;;  %v1170_v24 = vmul.f32 %v1162_v15, %v1162_v15  ;;  %v1099_v12 = vld [vmem:[%s2120_s3] sm:$0xf] }
 0x171   : > { %v1167_v7 = vmul.f32 %v1159_v16, %v1159_v16  ;;  %v1171_v26 = vmul.f32 %v1163_v17, %v1163_v17  ;;  %v1168_v34 = vmul.f32 %v1160_v27, %v1160_v27  ;;  %v1172_v35 = vmul.f32 %v1164_v28, %v1164_v28 }
 0x172   : > { %v1173_v30 = vadd.f32 %v1169_v22, %v1165_v20  ;;  %v1180_v32 = vadd.f32 %v1170_v24, %v1166_v23  ;;  %v1228_v11 = vsub.s32 1, %v2015_v21  ;;  %v1232_v13 = vsub.s32 2, %v2015_v21 }
 0x173   : > { %v1187_v33 = vadd.f32 %v1171_v26, %v1167_v7  ;;  %v1194_v25 = vadd.f32 %v1172_v35, %v1168_v34  ;;  %v1236_v14 = vsub.s32 3, %v2015_v21  ;;  %v1225_v15 = vrot.slane %v1098_v3, %v1224_v2 }
 0x174   : > { %v1174_v36 = vrot.slane %v1173_v30, 4  ;;  %v1181_v31 = vrot.slane %v1180_v32, 4  ;;  %v1254_v17 = vrot.slane %v1099_v12, %v1224_v2  ;;  %v1229_v20 = vrot.slane %v1098_v3, %v1228_v11 }
 0x175   : > { %v1188_v37 = vrot.slane %v1187_v33, 4  ;;  %v1195_v42 = vrot.slane %v1194_v25, 4  ;;  %v1258_v22 = vrot.slane %v1099_v12, %v1228_v11  ;;  %v1233_v7 = vrot.slane %v1098_v3, %v1232_v13 }
 0x176   : > { %v1175_v38 = vadd.f32 %v1174_v36, %v1173_v30  ;;  %v1182_v39 = vadd.f32 %v1181_v31, %v1180_v32  ;;  %v1262_v26 = vrot.slane %v1099_v12, %v1232_v13  ;;  %v1237_v32 = vrot.slane %v1098_v3, %v1236_v14 }
 0x177   : > { %v1189_v41 = vadd.f32 %v1188_v37, %v1187_v33  ;;  %v1196_v46 = vadd.f32 %v1195_v42, %v1194_v25  ;;  %v1266_v33 = vrot.slane %v1099_v12, %v1236_v14 }
 0x178   : > { %v1176_v43 = vrot.slane %v1175_v38, 2  ;;  %v1183_v44 = vrot.slane %v1182_v39, 2 }
 0x179   : > { %v1190_v45 = vrot.slane %v1189_v41, 2  ;;  %v1197_v49 = vrot.slane %v1196_v46, 2 }
 0x17a   : > { %v1177_v29 = vadd.f32 %v1176_v43, %v1175_v38  ;;  %v1184_v47 = vadd.f32 %v1183_v44, %v1182_v39 }
 0x17b   : > { %v1191_v48 = vadd.f32 %v1190_v45, %v1189_v41  ;;  %v1198_v52 = vadd.f32 %v1197_v49, %v1196_v46 }
 0x17c   : > { %v1178_v50 = vrot.slane %v1177_v29, 1  ;;  %v1185_v51 = vrot.slane %v1184_v47, 1 }
 0x17d   : > { %v1192_v40 = vrot.slane %v1191_v48, 1  ;;  %v1199_v56 = vrot.slane %v1198_v52, 1 }
 0x17e   : > { %v1179_v53 = vadd.f32 %v1178_v50, %v1177_v29  ;;  %v1186_v54 = vadd.f32 %v1185_v51, %v1184_v47 }
 0x17f   : > { %v1193_v55 = vadd.f32 %v1192_v40, %v1191_v48  ;;  %v1200_v60 = vadd.f32 %v1199_v56, %v1198_v52 }
 0x180   : > { %v1201_v57 = vmul.f32 0.5, %v1179_v53  ;;  %v1202_v58 = vmul.f32 0.5, %v1186_v54 }
 0x181   : > { %v1203_v59 = vmul.f32 0.5, %v1193_v55  ;;  %v1204_v0 = vmul.f32 0.5, %v1200_v60 }
 0x182   : > { %v1205_v61 = vadd.f32 1e-05, %v1201_v57  ;;  %v1206_v62 = vadd.f32 1e-05, %v1202_v58 }
 0x183   : > { %v1207_v63 = vadd.f32 1e-05, %v1203_v59  ;;  %v1208_v1 = vadd.f32 1e-05, %v1204_v0 }
 0x184   : > { %1696 = vrsqrt.f32 %v1205_v61 }
 0x185   : > { %1698 = vrsqrt.f32 %v1206_v62 }
 0x186   : > { %1700 = vrsqrt.f32 %v1207_v63 }
 0x187   : > { %1702 = vrsqrt.f32 %v1208_v1 }
 0x191   : > { %v1697_v16 = vpop.eup %1696 }
 0x192   : > { %v1699_v23 = vpop.eup %1698  ;;  %v1213_v24 = vmul.f32 %v1697_v16, %v2036_v4  ;;  %v1217_v27 = vmul.f32 %v1697_v16, %v2038_v5 }
 0x193   : > { %v1701_v28 = vpop.eup %1700  ;;  %v1214_v30 = vmul.f32 %v1699_v23, %v2040_v6  ;;  %v1218_v34 = vmul.f32 %v1699_v23, %v2042_v8 }
 0x194   : > { %v1703_v21 = vpop.eup %1702  ;;  %v1242_v35 = vmul.f32 %v1225_v15, %v1213_v24  ;;  %v1215_v36 = vmul.f32 %v1701_v28, %v2044_v9  ;;  %v1246_v31 = vmul.f32 %v1225_v15, %v1217_v27  ;;  %v1219_v37 = vmul.f32 %v1701_v28, %v2046_v10 }
 0x195   : > { %v1243_v25 = vmul.f32 %v1229_v20, %v1214_v30  ;;  %v1216_v4 = vmul.f32 %v1703_v21, %v2054_v18  ;;  %v1247_v38 = vmul.f32 %v1229_v20, %v1218_v34  ;;  %v1220_v5 = vmul.f32 %v1703_v21, %v2056_v19 }
 0x196   : > { %v1271_v39 = vadd.f32 %v1254_v17, %v1242_v35  ;;  %v1244_v41 = vmul.f32 %v1233_v7, %v1215_v36  ;;  %v1275_v6 = vadd.f32 %v1254_v17, %v1246_v31  ;;  %v1248_v42 = vmul.f32 %v1233_v7, %v1219_v37 }
 0x197   : > { %v1272_v43 = vadd.f32 %v1258_v22, %v1243_v25  ;;  %v1245_v44 = vmul.f32 %v1237_v32, %v1216_v4  ;;  %v1276_v8 = vadd.f32 %v1258_v22, %v1247_v38  ;;  %v1249_v45 = vmul.f32 %v1237_v32, %v1220_v5 }
 0x198   : > { %v1279_v46 = vmax.f32 %v1271_v39, 0.0  ;;  %v1273_v29 = vadd.f32 %v1262_v26, %v1244_v41  ;;  %v1283_v9 = vmax.f32 %v1275_v6, 0.0  ;;  %v1277_v47 = vadd.f32 %v1262_v26, %v1248_v42 }
 0x199   : > { %v1280_v48 = vmax.f32 %v1272_v43, 0.0  ;;  %v1274_v10 = vadd.f32 %v1266_v33, %v1245_v44  ;;  %v1284_v49 = vmax.f32 %v1276_v8, 0.0  ;;  %v1278_v50 = vadd.f32 %v1266_v33, %v1249_v45 }
 0x19a   : > { %1287 = vst [vmem:[%s2121_s4] sm:$0xff] %v1279_v46  ;;  %v1281_v18 = vmax.f32 %v1273_v29, 0.0  ;;  %1291 = vst [vmem:[%s2121_s4 + $0x20] sm:$0xff] %v1283_v9  ;;  %v1285_v19 = vmax.f32 %v1277_v47, 0.0 }
 0x19b   : > { %1288 = vst [vmem:[%s2121_s4 + $0x8] sm:$0xff] %v1280_v48  ;;  %v1282_v51 = vmax.f32 %v1274_v10, 0.0  ;;  %1292 = vst [vmem:[%s2121_s4 + $0x28] sm:$0xff] %v1284_v49  ;;  %v1286_v40 = vmax.f32 %v1278_v50, 0.0 }
 0x19c   : > { %1289 = vst [vmem:[%s2121_s4 + $0x10] sm:$0xff] %v1281_v18  ;;  %1293 = vst [vmem:[%s2121_s4 + $0x30] sm:$0xff] %v1285_v19 }
 0x19d   : > { %1290 = vst [vmem:[%s2121_s4 + $0x18] sm:$0xff] %v1282_v51  ;;  %1294 = vst [vmem:[%s2121_s4 + $0x38] sm:$0xff] %v1286_v40 }
 0x19e PF: > { %s14_s19 = sadd.s32 1, %s1742_s19   ;;  %s2122_s15 = smov %s1730_s16 }
 0x19f   : > { %p11_p12 = scmp.ge.s32.totalorder %s14_s19, 8   ;;  %s2123_s16 = smov %s1807_s23 }
 0x1a0   : > { %s2124_s17 = smov %s1738_s18  ;;  %s2125_s18 = smov %s2127_s20 }
 0x1a1   :  { %13 = sbr.rel (!%p11_p12) target bundleno = 3 (0x3), region = 114 }

// kernel: resnet_forward.38
= control target key start
LH: loop header
LB: loop body
LE: loop exit
PB: predicated region body
PF: predicated region fallthrough
CT: control target
= control target key end

     0   :  { %s996_s1 = inlined_call_operand.vmem [shape: bf16[256,512], index: 1, kind: input, shape index: {}]   ;;  %s997_s0 = inlined_call_operand.vmem [shape: bf16[16,256], index: 0, kind: input, shape index: {}]   ;;  %s998_s2 = inlined_call_operand.vmem [shape: f32[1,512], index: 2, kind: input, shape index: {}]   ;;  %s999_s3 = inlined_call_operand.vmem [shape: f32[16,512], index: 3, kind: output, shape index: {}]  }
   0x1   :  { %v652_v0 = vld [vmem:[%s996_s1 + $0xe4] ss:$16 sps:$4 sm:$0xff]   ;;  %v654_v1 = vld [vmem:[%s996_s1 + $0xec] ss:$16 sps:$4 sm:$0xff]   ;;  %v656_v2 = vld [vmem:[%s996_s1 + $0xe0] ss:$16 sps:$4 sm:$0xff]  }
   0x2   :  { %430 = vmatprep.subr.bf16.mxu0 %v652_v0  ;;  %v657_v3 = vld [vmem:[%s996_s1 + $0xe8] ss:$16 sps:$4 sm:$0xff]   ;;  %473 = vmatprep.subr.bf16.mxu1 %v654_v1  ;;  %v658_v4 = vld [vmem:[%s996_s1 + $0xc4] ss:$16 sps:$4 sm:$0xff]   ;;  %v660_v5 = vld [vmem:[%s996_s1 + $0xcc] ss:$16 sps:$4 sm:$0xff]  }
   0x3   :  { %431 = vmatpush1.bf16.msra.mxu0 %v656_v2  ;;  %474 = vmatpush1.bf16.msra.mxu1 %v657_v3  ;;  %v662_v6 = vld [vmem:[%s996_s1 + $0xc0] ss:$16 sps:$4 sm:$0xff]   ;;  %v663_v7 = vld [vmem:[%s996_s1 + $0xc8] ss:$16 sps:$4 sm:$0xff]   ;;  %v664_v8 = vld [vmem:[%s996_s1 + $0xa4] ss:$16 sps:$4 sm:$0xff]   ;;  %v545_v2 = vlaneseq }
   0x4   :  { %432 = vmatprep.subr.bf16.mxu0 %v658_v4  ;;  %475 = vmatprep.subr.bf16.mxu1 %v660_v5  ;;  %v666_v9 = vld [vmem:[%s996_s1 + $0xac] ss:$16 sps:$4 sm:$0xff]   ;;  %v668_v10 = vld [vmem:[%s996_s1 + $0xa0] ss:$16 sps:$4 sm:$0xff]   ;;  %v669_v11 = vld [vmem:[%s996_s1 + $0xa8] ss:$16 sps:$4 sm:$0xff]  }
   0x5   :  { %v670_v12 = vld [vmem:[%s996_s1 + $0x84] ss:$16 sps:$4 sm:$0xff]   ;;  %v672_v13 = vld [vmem:[%s996_s1 + $0x8c] ss:$16 sps:$4 sm:$0xff]   ;;  %v674_v14 = vld [vmem:[%s996_s1 + $0x80] ss:$16 sps:$4 sm:$0xff]  }
   0x6   :  { %v675_v15 = vld [vmem:[%s996_s1 + $0x88] ss:$16 sps:$4 sm:$0xff]   ;;  %v676_v16 = vld [vmem:[%s996_s1 + $0x64] ss:$16 sps:$4 sm:$0xff]   ;;  %v678_v17 = vld [vmem:[%s996_s1 + $0x6c] ss:$16 sps:$4 sm:$0xff]  }
   0x7   :  { %433 = vmatpush1.bf16.msra.mxu0 %v662_v6  ;;  %476 = vmatpush1.bf16.msra.mxu1 %v663_v7  ;;  %v680_v18 = vld [vmem:[%s996_s1 + $0x60] ss:$16 sps:$4 sm:$0xff]   ;;  %v681_v19 = vld [vmem:[%s996_s1 + $0x68] ss:$16 sps:$4 sm:$0xff]   ;;  %v682_v20 = vld [vmem:[%s996_s1 + $0x44] ss:$16 sps:$4 sm:$0xff]  }
   0x8   :  { %434 = vmatprep.subr.bf16.mxu0 %v664_v8  ;;  %477 = vmatprep.subr.bf16.mxu1 %v666_v9  ;;  %v684_v21 = vld [vmem:[%s996_s1 + $0x4c] ss:$16 sps:$4 sm:$0xff]   ;;  %v686_v22 = vld [vmem:[%s996_s1 + $0x40] ss:$16 sps:$4 sm:$0xff]   ;;  %v687_v23 = vld [vmem:[%s996_s1 + $0x48] ss:$16 sps:$4 sm:$0xff]  }
   0x9   :  { %v688_v24 = vld [vmem:[%s996_s1 + $0x24] ss:$16 sps:$4 sm:$0xff]   ;;  %v690_v25 = vld [vmem:[%s996_s1 + $0x2c] ss:$16 sps:$4 sm:$0xff]   ;;  %v692_v26 = vld [vmem:[%s996_s1 + $0x20] ss:$16 sps:$4 sm:$0xff]  }
   0xa   :  { %v693_v27 = vld [vmem:[%s996_s1 + $0x28] ss:$16 sps:$4 sm:$0xff]   ;;  %v694_v28 = vld [vmem:[%s996_s1 + $0x4] ss:$16 sps:$4 sm:$0xff]   ;;  %v696_v29 = vld [vmem:[%s996_s1 + $0xc] ss:$16 sps:$4 sm:$0xff]  }
   0xb   :  { %435 = vmatpush1.bf16.msra.mxu0 %v668_v10  ;;  %478 = vmatpush1.bf16.msra.mxu1 %v669_v11  ;;  %v698_v30 = vld [vmem:[%s996_s1] ss:$16 sps:$4 sm:$0xff]   ;;  %v699_v31 = vld [vmem:[%s996_s1 + $0x8] ss:$16 sps:$4 sm:$0xff]   ;;  %v700_v32 = vld [vmem:[%s996_s1 + $0x1e4] ss:$16 sps:$4 sm:$0xff]  }
   0xc   :  { %436 = vmatprep.subr.bf16.mxu0 %v670_v12  ;;  %479 = vmatprep.subr.bf16.mxu1 %v672_v13  ;;  %v702_v33 = vld [vmem:[%s996_s1 + $0x1ec] ss:$16 sps:$4 sm:$0xff]   ;;  %v704_v34 = vld [vmem:[%s996_s1 + $0x1e0] ss:$16 sps:$4 sm:$0xff]   ;;  %v705_v35 = vld [vmem:[%s996_s1 + $0x1e8] ss:$16 sps:$4 sm:$0xff]  }
   0xd   :  { %v706_v36 = vld [vmem:[%s996_s1 + $0x1c4] ss:$16 sps:$4 sm:$0xff]   ;;  %v708_v37 = vld [vmem:[%s996_s1 + $0x1cc] ss:$16 sps:$4 sm:$0xff]   ;;  %v710_v38 = vld [vmem:[%s996_s1 + $0x1c0] ss:$16 sps:$4 sm:$0xff]  }
   0xe   :  { %v711_v39 = vld [vmem:[%s996_s1 + $0x1c8] ss:$16 sps:$4 sm:$0xff]   ;;  %v712_v40 = vld [vmem:[%s996_s1 + $0x1a4] ss:$16 sps:$4 sm:$0xff]   ;;  %v714_v41 = vld [vmem:[%s996_s1 + $0x1ac] ss:$16 sps:$4 sm:$0xff]  }
   0xf   :  { %437 = vmatpush1.bf16.msra.mxu0 %v674_v14  ;;  %480 = vmatpush1.bf16.msra.mxu1 %v675_v15  ;;  %v716_v42 = vld [vmem:[%s996_s1 + $0x1a0] ss:$16 sps:$4 sm:$0xff]   ;;  %v717_v43 = vld [vmem:[%s996_s1 + $0x1a8] ss:$16 sps:$4 sm:$0xff]   ;;  %v718_v44 = vld [vmem:[%s996_s1 + $0x184] ss:$16 sps:$4 sm:$0xff]  }
  0x10   :  { %438 = vmatprep.subr.bf16.mxu0 %v676_v16  ;;  %481 = vmatprep.subr.bf16.mxu1 %v678_v17  ;;  %v720_v45 = vld [vmem:[%s996_s1 + $0x18c] ss:$16 sps:$4 sm:$0xff]   ;;  %v722_v47 = vld [vmem:[%s996_s1 + $0x180] ss:$16 sps:$4 sm:$0xff]   ;;  %v723_v48 = vld [vmem:[%s996_s1 + $0x188] ss:$16 sps:$4 sm:$0xff]  }
  0x11   :  { %v750_v46 = vld [vmem:[%s997_s0 + $0x4] ss:$8 sps:$4 sm:$0xff]   ;;  %v728_v51 = vld [vmem:[%s996_s1 + $0x160] ss:$16 sps:$4 sm:$0xff]   ;;  %v729_v52 = vld [vmem:[%s996_s1 + $0x168] ss:$16 sps:$4 sm:$0xff]  }
  0x12   :  { %v724_v49 = vld [vmem:[%s996_s1 + $0x164] ss:$16 sps:$4 sm:$0xff]   ;;  %v726_v50 = vld [vmem:[%s996_s1 + $0x16c] ss:$16 sps:$4 sm:$0xff]   ;;  %462 = vmatprep.mubr.bf16.mxu0 %v750_v46  ;;  %505 = vmatprep.mubr.bf16.mxu1 %v750_v46  ;;  %v734_v55 = vld [vmem:[%s996_s1 + $0x140] ss:$16 sps:$4 sm:$0xff]  }
  0x13   :  { %439 = vmatpush1.bf16.msra.mxu0 %v680_v18  ;;  %482 = vmatpush1.bf16.msra.mxu1 %v681_v19  ;;  %v730_v53 = vld [vmem:[%s996_s1 + $0x144] ss:$16 sps:$4 sm:$0xff]   ;;  %v732_v54 = vld [vmem:[%s996_s1 + $0x14c] ss:$16 sps:$4 sm:$0xff]   ;;  %v735_v56 = vld [vmem:[%s996_s1 + $0x148] ss:$16 sps:$4 sm:$0xff]  }
  0x14   :  { %440 = vmatprep.subr.bf16.mxu0 %v682_v20  ;;  %483 = vmatprep.subr.bf16.mxu1 %v684_v21  ;;  %v736_v57 = vld [vmem:[%s996_s1 + $0x124] ss:$16 sps:$4 sm:$0xff]   ;;  %v738_v58 = vld [vmem:[%s996_s1 + $0x12c] ss:$16 sps:$4 sm:$0xff]   ;;  %v740_v59 = vld [vmem:[%s996_s1 + $0x120] ss:$16 sps:$4 sm:$0xff]  }
  0x15   :  { %v741_v60 = vld [vmem:[%s996_s1 + $0x128] ss:$16 sps:$4 sm:$0xff]   ;;  %v742_v61 = vld [vmem:[%s996_s1 + $0x104] ss:$16 sps:$4 sm:$0xff]   ;;  %v744_v62 = vld [vmem:[%s996_s1 + $0x10c] ss:$16 sps:$4 sm:$0xff]  }
  0x16   :  { %v746_v63 = vld [vmem:[%s996_s1 + $0x100] ss:$16 sps:$4 sm:$0xff]   ;;  %v747_v0 = vld [vmem:[%s996_s1 + $0x108] ss:$16 sps:$4 sm:$0xff]   ;;  %v546_v3 = vshrl.u32 %v545_v2, 7 }
  0x17   :  { %441 = vmatpush1.bf16.msra.mxu0 %v686_v22  ;;  %484 = vmatpush1.bf16.msra.mxu1 %v687_v23  ;;  %v748_v1 = vld [vmem:[%s997_s0] ss:$8 sps:$4 sm:$0xff]  }
  0x18   :  { %442 = vmatprep.subr.bf16.mxu0 %v688_v24  ;;  %485 = vmatprep.subr.bf16.mxu1 %v690_v25  ;;  %v547_v4 = vsub.s32 0, %v546_v3  ;;  %v555_v5 = vsub.s32 2, %v546_v3  ;;  %v543_v6 = vld [vmem:[%s998_s2] sm:$0xf]  ;;  %v551_v7 = vsub.s32 1, %v546_v3  ;;  %v559_v8 = vsub.s32 3, %v546_v3 }
  0x1a   :  { %v548_v9 = vrot.slane %v543_v6, %v547_v4  ;;  %v556_v10 = vrot.slane %v543_v6, %v555_v5  ;;  %v552_v13 = vrot.slane %v543_v6, %v551_v7  ;;  %v560_v14 = vrot.slane %v543_v6, %v559_v8 }
  0x1b   :  { %443 = vmatpush1.bf16.msra.mxu0 %v692_v26  ;;  %486 = vmatpush1.bf16.msra.mxu1 %v693_v27 }
  0x1c   :  { %444 = vmatprep.subr.bf16.mxu0 %v694_v28  ;;  %487 = vmatprep.subr.bf16.mxu1 %v696_v29 }
  0x1f   :  { %445 = vmatpush1.bf16.msra.mxu0 %v698_v30  ;;  %488 = vmatpush1.bf16.msra.mxu1 %v699_v31 }
  0x20   :  { %446 = vmatprep.subr.bf16.mxu0 %v700_v32  ;;  %489 = vmatprep.subr.bf16.mxu1 %v702_v33 }
  0x23   :  { %447 = vmatpush2.bf16.msra.mxu0 %v704_v34  ;;  %490 = vmatpush2.bf16.msra.mxu1 %v705_v35 }
  0x24   :  { %448 = vmatprep.subr.bf16.mxu0 %v706_v36  ;;  %491 = vmatprep.subr.bf16.mxu1 %v708_v37 }
  0x27   :  { %449 = vmatpush2.bf16.msra.mxu0 %v710_v38  ;;  %492 = vmatpush2.bf16.msra.mxu1 %v711_v39 }
  0x28   :  { %450 = vmatprep.subr.bf16.mxu0 %v712_v40  ;;  %493 = vmatprep.subr.bf16.mxu1 %v714_v41 }
  0x2b   :  { %451 = vmatpush2.bf16.msra.mxu0 %v716_v42  ;;  %494 = vmatpush2.bf16.msra.mxu1 %v717_v43 }
  0x2c   :  { %452 = vmatprep.subr.bf16.mxu0 %v718_v44  ;;  %495 = vmatprep.subr.bf16.mxu1 %v720_v45 }
  0x2f   :  { %453 = vmatpush2.bf16.msra.mxu0 %v722_v47  ;;  %496 = vmatpush2.bf16.msra.mxu1 %v723_v48 }
  0x30   :  { %454 = vmatprep.subr.bf16.mxu0 %v724_v49  ;;  %497 = vmatprep.subr.bf16.mxu1 %v726_v50 }
  0x33   :  { %455 = vmatpush2.bf16.msra.mxu0 %v728_v51  ;;  %498 = vmatpush2.bf16.msra.mxu1 %v729_v52 }
  0x34   :  { %456 = vmatprep.subr.bf16.mxu0 %v730_v53  ;;  %499 = vmatprep.subr.bf16.mxu1 %v732_v54 }
  0x37   :  { %457 = vmatpush2.bf16.msra.mxu0 %v734_v55  ;;  %500 = vmatpush2.bf16.msra.mxu1 %v735_v56 }
  0x38   :  { %458 = vmatprep.subr.bf16.mxu0 %v736_v57  ;;  %501 = vmatprep.subr.bf16.mxu1 %v738_v58 }
  0x3b   :  { %459 = vmatpush2.bf16.msra.mxu0 %v740_v59  ;;  %502 = vmatpush2.bf16.msra.mxu1 %v741_v60 }
  0x3c   :  { %460 = vmatprep.subr.bf16.mxu0 %v742_v61  ;;  %503 = vmatprep.subr.bf16.mxu1 %v744_v62 }
  0x3f   :  { %461 = vmatpush2.bf16.msra.mxu0 %v746_v63  ;;  %504 = vmatpush2.bf16.msra.mxu1 %v747_v0 }
  0x42   :  { %463 = vmatmul.mubr.bf16.vlgmr.msra.gmra.mxu0 %v748_v1  ;;  %506 = vmatmul.mubr.bf16.vlgmr.msra.gmra.mxu1 %v748_v1 }
 0x102   :  { %v464_v11 = vpop.f32.mrf.mxu0  ;;  %v507_v12 = vpop.f32.mrf.mxu1 }
 0x103   :  { %v565_v17 = vadd.f32 %v548_v9, %v464_v11  ;;  %v567_v18 = vadd.f32 %v556_v10, %v507_v12 }
 0x104   :  { %v466_v15 = vpop.f32.mrf.mxu0  ;;  %v509_v16 = vpop.f32.mrf.mxu1 }
 0x105   :  { %573 = vst [vmem:[%s999_s3] sm:$0xff] %v565_v17  ;;  %575 = vst [vmem:[%s999_s3 + $0x10] sm:$0xff] %v567_v18  ;;  %v566_v21 = vadd.f32 %v552_v13, %v466_v15  ;;  %v568_v22 = vadd.f32 %v560_v14, %v509_v16 }
 0x106   :  { %v468_v19 = vpop.f32.mrf.mxu0  ;;  %v511_v20 = vpop.f32.mrf.mxu1 }
 0x107   :  { %574 = vst [vmem:[%s999_s3 + $0x8] sm:$0xff] %v566_v21  ;;  %576 = vst [vmem:[%s999_s3 + $0x18] sm:$0xff] %v568_v22  ;;  %v569_v25 = vadd.f32 %v548_v9, %v468_v19  ;;  %v571_v26 = vadd.f32 %v556_v10, %v511_v20 }
 0x108   :  { %v470_v23 = vpop.f32.mrf.mxu0  ;;  %v513_v24 = vpop.f32.mrf.mxu1 }
 0x109   :  { %577 = vst [vmem:[%s999_s3 + $0x20] sm:$0xff] %v569_v25  ;;  %579 = vst [vmem:[%s999_s3 + $0x30] sm:$0xff] %v571_v26  ;;  %v570_v27 = vadd.f32 %v552_v13, %v470_v23  ;;  %v572_v28 = vadd.f32 %v560_v14, %v513_v24 }
 0x10b   :  { %578 = vst [vmem:[%s999_s3 + $0x28] sm:$0xff] %v570_v27  ;;  %580 = vst [vmem:[%s999_s3 + $0x38] sm:$0xff] %v572_v28 }

// kernel: resnet_forward.39
= control target key start
LH: loop header
LB: loop body
LE: loop exit
PB: predicated region body
PF: predicated region fallthrough
CT: control target
= control target key end

     0   :  { %s2129_s18 = smov 0   ;;  %s2131_s19 = smov 0   ;;  %s2529_s0 = inlined_call_operand.vmem [shape: bf16[16,4608], index: 0, kind: input, shape index: {}]   ;;  %s2530_s1 = inlined_call_operand.vmem [shape: bf16[4608,512], index: 1, kind: input, shape index: {}]   ;;  %s2531_s2 = inlined_call_operand.vmem [shape: f32[1,512], index: 2, kind: input, shape index: {}]   ;;  %s2532_s3 = inlined_call_operand.vmem [shape: f32[1,512], index: 3, kind: input, shape index: {}]   ;;  %s2533_s4 = inlined_call_operand.vmem [shape: f32[16,512], index: 4, kind: input, shape index: {}]   ;;  %s2534_s5 = inlined_call_operand.vmem [shape: f32[16,512], index: 5, kind: output, shape index: {}]  }
   0x1   :  { %s2133_s20 = smov 0   ;;  %s2135_s21 = smov 0  }
   0x2   :  { %s2137_s22 = smov 0  }
   0x3 LB: > { %s24_s23 = sadd.s32 1, %s2091_s21  ;;  %p43_p1 = scmp.ne.s32.totalorder %s2083_s19, %s2079_s18  ;;  %s2095_s22 = sphi %s2137_s22, %s15_s22   ;;  %s2091_s21 = sphi %s2135_s21, %s2538_s21   ;;  %s2087_s20 = sphi %s2133_s20, %s2537_s20   ;;  %s2083_s19 = sphi %s2131_s19, %s2536_s19   ;;  %s2079_s18 = sphi %s2129_s18, %s2535_s18  }
   0x4   : > { %p25_p0 = scmp.ge.s32.totalorder %s24_s23, 9  ;;  %p44_p2 = scmp.eq.s32.totalorder %s2095_s22, 0 }
   0x5   : > { %s36_s25 = sadd.s32 1, %s2083_s19  ;;  %p1659_p5 = scmp.ge.s32.totalorder %s2095_s22, 9 }
   0x6   : > { %s2540_s23 = smov (%p25_p0, %s24_s23), 0  ;;  %p45_p3 = por %p44_p2, %p43_p1 }
   0x7   : > { %s32_s24 = ssub.s32 %s2091_s21, %s2540_s23  ;;  %205 = sbr.rel (%p1659_p5) target bundleno = 18 (0x12), region = 28 }
   0x8   : > { %p34_p4 = scmp.eq.s32.totalorder %s32_s24, 0 }
   0xa   : > { %s2164_s26 = scalar_select %p34_p4, %s2083_s19, %s36_s25  }
   0xc   : > { %208 = sbr.rel (!%p45_p3) target bundleno = 18 (0x12), region = 32  ;;  %s210_s27 = sand.u32 (%p45_p3), 1, %s2083_s19  }
   0xd   : > { %s1807_s28 = sshll.u32 (%p45_p3), %s2091_s21, 4  ;;  %s1660_s29 = sshll.u32 (%p45_p3), %s210_s27, 5 }
   0xe   : > { %s218_s7 = scalar_lea.vmem (%p45_p3), %s2529_s0, %s1807_s28  ;;  %s212_s8 = scalar_lea.vmem (%p45_p3), [#allocation2], %s1660_s29 }
   0xf   : > { %v231_v0 = vld [vmem:[%s218_s7] sm:$0xff] (%p45_p3)  ;;  %v233_v1 = vld [vmem:[%s218_s7 + $0x8] sm:$0xff] (%p45_p3)  ;;  %v235_v2 = vld [vmem:[%s218_s7 + $0x90] sm:$0xff] (%p45_p3) }
  0x10   : > { %232 = vst [vmem:[%s212_s8] sm:$0xff] (%p45_p3), %v231_v0  ;;  %234 = vst [vmem:[%s212_s8 + $0x8] sm:$0xff] (%p45_p3), %v233_v1  ;;  %v237_v3 = vld [vmem:[%s218_s7 + $0x98] sm:$0xff] (%p45_p3) }
  0x11   : > { %236 = vst [vmem:[%s212_s8 + $0x10] sm:$0xff] %v235_v2  ;;  %238 = vst [vmem:[%s212_s8 + $0x18] sm:$0xff] %v237_v3 }
  0x12 PF: > { %p1663_p6 = scmp.ge.s32.totalorder %s2095_s22, 1  ;;  %p253_p7 = scmp.lt.s32.totalorder %s2095_s22, 10 }
  0x14   : > { %p254_p8 = pnand %p1663_p6, %p253_p7 }
  0x15   : > { %s260_s9 = sand.u32 (!%p254_p8), 1, %s2079_s18   ;;  %s1665_s10 = sshll.u32 (!%p254_p8), %s2087_s20, 6 }
  0x16   : > { %257 = sbr.rel (%p254_p8) target bundleno = 449 (0x1c1), region = 59  ;;  %s1664_s11 = sshll.u32 (!%p254_p8), %s260_s9, 5 }
  0x17   : > { %p303_p9 = scmp.lt.s32.totalorder (!%p254_p8), %s1665_s10, 575  ;;  %s2181_s16 = scalar_lea.vmem (!%p254_p8), [#allocation2], %s1664_s11 }
  0x18   : > { %p1668_p10 = scmp.ne.s32.totalorder (!%p254_p8), %s2087_s20, 0 }
  0x1b   : > { %s2542_s10 = smov (!%p303_p9, %s1665_s10), 575  ;;  %326 = sbr.rel (%p1668_p10) target bundleno = 37 (0x25), region = 67 }
  0x1c   : > { %s1808_s12 = sshll.u32 %s2542_s10, 4 }
  0x1d   : > { %s2179_s15 = scalar_lea.vmem %s2530_s1, %s1808_s12 }
  0x20   : > { %v2097_v4 = vmov 0.0  }
  0x21   : > { %327 = vst [vmem:[%s2534_s5] sm:$0xff] %v2097_v4  ;;  %328 = vst [vmem:[%s2534_s5 + $0x8] sm:$0xff] %v2097_v4 }
  0x22   : > { %329 = vst [vmem:[%s2534_s5 + $0x10] sm:$0xff] %v2097_v4  ;;  %330 = vst [vmem:[%s2534_s5 + $0x18] sm:$0xff] %v2097_v4 }
  0x23   : > { %331 = vst [vmem:[%s2534_s5 + $0x20] sm:$0xff] %v2097_v4  ;;  %332 = vst [vmem:[%s2534_s5 + $0x28] sm:$0xff] %v2097_v4 }
  0x24   : > { %333 = vst [vmem:[%s2534_s5 + $0x30] sm:$0xff] %v2097_v4  ;;  %334 = vst [vmem:[%s2534_s5 + $0x38] sm:$0xff] %v2097_v4 }
  0x25 PF: > { %v1851_v5 = vld [vmem:[%s2179_s15 + $0xe4] ss:$16 sps:$4 sm:$0xff]   ;;  %v1855_v7 = vld [vmem:[%s2179_s15 + $0xe0] ss:$16 sps:$4 sm:$0xff]   ;;  %v1952_v56 = vld [vmem:[%s2181_s16 + $0xc] ss:$16 sps:$4 sm:$0xff]  }
  0x26   : > { %v1853_v6 = vld [vmem:[%s2179_s15 + $0x2e4] ss:$16 sps:$4 sm:$0xff]   ;;  %1135 = vmatprep.subr.bf16.mxu0 %v1851_v5  ;;  %v1856_v8 = vld [vmem:[%s2179_s15 + $0x2e0] ss:$16 sps:$4 sm:$0xff]   ;;  %1210 = vmatprep.mubr.bf16.mxu1 %v1952_v56  ;;  %p1801_p11 = scmp.ne.s32.totalorder %s2087_s20, 8 }
  0x27   : > { %1178 = vmatprep.subr.bf16.mxu1 %v1853_v6  ;;  %v1857_v9 = vld [vmem:[%s2179_s15 + $0xc4] ss:$16 sps:$4 sm:$0xff]   ;;  %1136 = vmatpush1.bf16.msra.mxu0 %v1855_v7  ;;  %v1861_v11 = vld [vmem:[%s2179_s15 + $0xc0] ss:$16 sps:$4 sm:$0xff]   ;;  %v1955_v7 = vld [vmem:[%s2179_s15 + $0xec] ss:$16 sps:$4 sm:$0xff]  }
  0x28   : > { %1179 = vmatpush1.bf16.msra.mxu1 %v1856_v8  ;;  %v1859_v10 = vld [vmem:[%s2179_s15 + $0x2c4] ss:$16 sps:$4 sm:$0xff]   ;;  %1137 = vmatprep.subr.bf16.mxu0 %v1857_v9  ;;  %v1862_v12 = vld [vmem:[%s2179_s15 + $0x2c0] ss:$16 sps:$4 sm:$0xff]   ;;  %v1958_v8 = vld [vmem:[%s2179_s15 + $0x2ec] ss:$16 sps:$4 sm:$0xff]  }
  0x29   : > { %1180 = vmatprep.subr.bf16.mxu1 %v1859_v10  ;;  %v1863_v13 = vld [vmem:[%s2179_s15 + $0xa4] ss:$16 sps:$4 sm:$0xff]   ;;  %v1867_v15 = vld [vmem:[%s2179_s15 + $0xa0] ss:$16 sps:$4 sm:$0xff]   ;;  %v2280_v10 = vld [vmem:[%s2181_s16 + $0x8] ss:$16 sps:$4 sm:$0xff]  }
  0x2a   : > { %v1865_v14 = vld [vmem:[%s2179_s15 + $0x2a4] ss:$16 sps:$4 sm:$0xff]   ;;  %v1868_v16 = vld [vmem:[%s2179_s15 + $0x2a0] ss:$16 sps:$4 sm:$0xff]  }
  0x2b   : > { %1138 = vmatpush1.bf16.msra.mxu0 %v1861_v11  ;;  %v1869_v17 = vld [vmem:[%s2179_s15 + $0x84] ss:$16 sps:$4 sm:$0xff]   ;;  %v1873_v19 = vld [vmem:[%s2179_s15 + $0x80] ss:$16 sps:$4 sm:$0xff]   ;;  %v1953_v11 = vld [vmem:[%s2179_s15 + $0xe8] ss:$16 sps:$4 sm:$0xff]  }
  0x2c   : > { %1181 = vmatpush1.bf16.msra.mxu1 %v1862_v12  ;;  %1139 = vmatprep.subr.bf16.mxu0 %v1863_v13  ;;  %v1871_v18 = vld [vmem:[%s2179_s15 + $0x284] ss:$16 sps:$4 sm:$0xff]   ;;  %v1874_v20 = vld [vmem:[%s2179_s15 + $0x280] ss:$16 sps:$4 sm:$0xff]   ;;  %v1956_v12 = vld [vmem:[%s2179_s15 + $0x2e8] ss:$16 sps:$4 sm:$0xff]  }
  0x2d   : > { %1182 = vmatprep.subr.bf16.mxu1 %v1865_v14  ;;  %v1875_v21 = vld [vmem:[%s2179_s15 + $0x64] ss:$16 sps:$4 sm:$0xff]   ;;  %v1879_v23 = vld [vmem:[%s2179_s15 + $0x60] ss:$16 sps:$4 sm:$0xff]   ;;  %v1961_v13 = vld [vmem:[%s2179_s15 + $0xcc] ss:$16 sps:$4 sm:$0xff]  }
  0x2e   : > { %v1877_v22 = vld [vmem:[%s2179_s15 + $0x264] ss:$16 sps:$4 sm:$0xff]   ;;  %v1880_v24 = vld [vmem:[%s2179_s15 + $0x260] ss:$16 sps:$4 sm:$0xff]   ;;  %v1964_v14 = vld [vmem:[%s2179_s15 + $0x2cc] ss:$16 sps:$4 sm:$0xff]  }
  0x2f   : > { %1140 = vmatpush1.bf16.msra.mxu0 %v1867_v15  ;;  %v1881_v25 = vld [vmem:[%s2179_s15 + $0x44] ss:$16 sps:$4 sm:$0xff]   ;;  %v1885_v27 = vld [vmem:[%s2179_s15 + $0x40] ss:$16 sps:$4 sm:$0xff]   ;;  %v1959_v15 = vld [vmem:[%s2179_s15 + $0xc8] ss:$16 sps:$4 sm:$0xff]  }
  0x30   : > { %1183 = vmatpush1.bf16.msra.mxu1 %v1868_v16  ;;  %1141 = vmatprep.subr.bf16.mxu0 %v1869_v17  ;;  %v1883_v26 = vld [vmem:[%s2179_s15 + $0x244] ss:$16 sps:$4 sm:$0xff]   ;;  %v1886_v28 = vld [vmem:[%s2179_s15 + $0x240] ss:$16 sps:$4 sm:$0xff]   ;;  %v1962_v16 = vld [vmem:[%s2179_s15 + $0x2c8] ss:$16 sps:$4 sm:$0xff]  }
  0x31   : > { %1184 = vmatprep.subr.bf16.mxu1 %v1871_v18  ;;  %v1887_v29 = vld [vmem:[%s2179_s15 + $0x24] ss:$16 sps:$4 sm:$0xff]   ;;  %v1891_v31 = vld [vmem:[%s2179_s15 + $0x20] ss:$16 sps:$4 sm:$0xff]   ;;  %v1967_v17 = vld [vmem:[%s2179_s15 + $0xac] ss:$16 sps:$4 sm:$0xff]  }
  0x32   : > { %v1889_v30 = vld [vmem:[%s2179_s15 + $0x224] ss:$16 sps:$4 sm:$0xff]   ;;  %v1892_v32 = vld [vmem:[%s2179_s15 + $0x220] ss:$16 sps:$4 sm:$0xff]   ;;  %v1970_v18 = vld [vmem:[%s2179_s15 + $0x2ac] ss:$16 sps:$4 sm:$0xff]  }
  0x33   : > { %1142 = vmatpush1.bf16.msra.mxu0 %v1873_v19  ;;  %v1893_v33 = vld [vmem:[%s2179_s15 + $0x4] ss:$16 sps:$4 sm:$0xff]   ;;  %v1897_v35 = vld [vmem:[%s2179_s15] ss:$16 sps:$4 sm:$0xff]   ;;  %v1965_v19 = vld [vmem:[%s2179_s15 + $0xa8] ss:$16 sps:$4 sm:$0xff]  }
  0x34   : > { %1185 = vmatpush1.bf16.msra.mxu1 %v1874_v20  ;;  %1143 = vmatprep.subr.bf16.mxu0 %v1875_v21  ;;  %v1895_v34 = vld [vmem:[%s2179_s15 + $0x204] ss:$16 sps:$4 sm:$0xff]   ;;  %v1898_v36 = vld [vmem:[%s2179_s15 + $0x200] ss:$16 sps:$4 sm:$0xff]   ;;  %v1968_v20 = vld [vmem:[%s2179_s15 + $0x2a8] ss:$16 sps:$4 sm:$0xff]  }
  0x35   : > { %1186 = vmatprep.subr.bf16.mxu1 %v1877_v22  ;;  %v1899_v37 = vld [vmem:[%s2179_s15 + $0x1e4] ss:$16 sps:$4 sm:$0xff]   ;;  %v1903_v39 = vld [vmem:[%s2179_s15 + $0x1e0] ss:$16 sps:$4 sm:$0xff]   ;;  %v1973_v21 = vld [vmem:[%s2179_s15 + $0x8c] ss:$16 sps:$4 sm:$0xff]  }
  0x36   : > { %v1901_v38 = vld [vmem:[%s2179_s15 + $0x3e4] ss:$16 sps:$4 sm:$0xff]   ;;  %v1904_v40 = vld [vmem:[%s2179_s15 + $0x3e0] ss:$16 sps:$4 sm:$0xff]   ;;  %v1976_v22 = vld [vmem:[%s2179_s15 + $0x28c] ss:$16 sps:$4 sm:$0xff]  }
  0x37   : > { %1144 = vmatpush1.bf16.msra.mxu0 %v1879_v23  ;;  %v1905_v41 = vld [vmem:[%s2179_s15 + $0x1c4] ss:$16 sps:$4 sm:$0xff]   ;;  %v1909_v43 = vld [vmem:[%s2179_s15 + $0x1c0] ss:$16 sps:$4 sm:$0xff]   ;;  %v1971_v23 = vld [vmem:[%s2179_s15 + $0x88] ss:$16 sps:$4 sm:$0xff]  }
  0x38   : > { %1187 = vmatpush1.bf16.msra.mxu1 %v1880_v24  ;;  %1145 = vmatprep.subr.bf16.mxu0 %v1881_v25  ;;  %v1907_v42 = vld [vmem:[%s2179_s15 + $0x3c4] ss:$16 sps:$4 sm:$0xff]   ;;  %v1910_v44 = vld [vmem:[%s2179_s15 + $0x3c0] ss:$16 sps:$4 sm:$0xff]   ;;  %v1974_v24 = vld [vmem:[%s2179_s15 + $0x288] ss:$16 sps:$4 sm:$0xff]  }
  0x39   : > { %1188 = vmatprep.subr.bf16.mxu1 %v1883_v26  ;;  %v1911_v45 = vld [vmem:[%s2179_s15 + $0x1a4] ss:$16 sps:$4 sm:$0xff]   ;;  %v1915_v47 = vld [vmem:[%s2179_s15 + $0x1a0] ss:$16 sps:$4 sm:$0xff]   ;;  %v1979_v25 = vld [vmem:[%s2179_s15 + $0x6c] ss:$16 sps:$4 sm:$0xff]  }
  0x3a   : > { %v1913_v46 = vld [vmem:[%s2179_s15 + $0x3a4] ss:$16 sps:$4 sm:$0xff]   ;;  %v1916_v48 = vld [vmem:[%s2179_s15 + $0x3a0] ss:$16 sps:$4 sm:$0xff]   ;;  %v1982_v26 = vld [vmem:[%s2179_s15 + $0x26c] ss:$16 sps:$4 sm:$0xff]  }
  0x3b   : > { %1146 = vmatpush1.bf16.msra.mxu0 %v1885_v27  ;;  %v1917_v49 = vld [vmem:[%s2179_s15 + $0x184] ss:$16 sps:$4 sm:$0xff]   ;;  %v1921_v51 = vld [vmem:[%s2179_s15 + $0x180] ss:$16 sps:$4 sm:$0xff]   ;;  %v1977_v27 = vld [vmem:[%s2179_s15 + $0x68] ss:$16 sps:$4 sm:$0xff]  }
  0x3c   : > { %1189 = vmatpush1.bf16.msra.mxu1 %v1886_v28  ;;  %1147 = vmatprep.subr.bf16.mxu0 %v1887_v29  ;;  %v1919_v50 = vld [vmem:[%s2179_s15 + $0x384] ss:$16 sps:$4 sm:$0xff]   ;;  %v1922_v52 = vld [vmem:[%s2179_s15 + $0x380] ss:$16 sps:$4 sm:$0xff]   ;;  %v1980_v28 = vld [vmem:[%s2179_s15 + $0x268] ss:$16 sps:$4 sm:$0xff]  }
  0x3d   : > { %1190 = vmatprep.subr.bf16.mxu1 %v1889_v30  ;;  %v1923_v53 = vld [vmem:[%s2179_s15 + $0x164] ss:$16 sps:$4 sm:$0xff]   ;;  %v1927_v57 = vld [vmem:[%s2179_s15 + $0x160] ss:$16 sps:$4 sm:$0xff]   ;;  %v1985_v29 = vld [vmem:[%s2179_s15 + $0x4c] ss:$16 sps:$4 sm:$0xff]  }
  0x3e   : > { %v1949_v54 = vld [vmem:[%s2181_s16 + $0x4] ss:$16 sps:$4 sm:$0xff]   ;;  %v1928_v58 = vld [vmem:[%s2179_s15 + $0x360] ss:$16 sps:$4 sm:$0xff]   ;;  %v1988_v30 = vld [vmem:[%s2179_s15 + $0x24c] ss:$16 sps:$4 sm:$0xff]  }
  0x3f   : > { %1148 = vmatpush1.bf16.msra.mxu0 %v1891_v31  ;;  %v1925_v55 = vld [vmem:[%s2179_s15 + $0x364] ss:$16 sps:$4 sm:$0xff]   ;;  %1167 = vmatprep.mubr.bf16.mxu0 %v1949_v54  ;;  %v1933_v61 = vld [vmem:[%s2179_s15 + $0x140] ss:$16 sps:$4 sm:$0xff]   ;;  %v1983_v31 = vld [vmem:[%s2179_s15 + $0x48] ss:$16 sps:$4 sm:$0xff]  }
  0x40   : > { %1191 = vmatpush1.bf16.msra.mxu1 %v1892_v32  ;;  %1149 = vmatprep.subr.bf16.mxu0 %v1893_v33  ;;  %v1929_v59 = vld [vmem:[%s2179_s15 + $0x144] ss:$16 sps:$4 sm:$0xff]   ;;  %v1934_v62 = vld [vmem:[%s2179_s15 + $0x340] ss:$16 sps:$4 sm:$0xff]   ;;  %v1986_v32 = vld [vmem:[%s2179_s15 + $0x248] ss:$16 sps:$4 sm:$0xff]  }
  0x41   : > { %1192 = vmatprep.subr.bf16.mxu1 %v1895_v34  ;;  %v1931_v60 = vld [vmem:[%s2179_s15 + $0x344] ss:$16 sps:$4 sm:$0xff]   ;;  %v1939_v1 = vld [vmem:[%s2179_s15 + $0x120] ss:$16 sps:$4 sm:$0xff]   ;;  %v1991_v33 = vld [vmem:[%s2179_s15 + $0x2c] ss:$16 sps:$4 sm:$0xff]  }
  0x42   : > { %v1935_v63 = vld [vmem:[%s2179_s15 + $0x124] ss:$16 sps:$4 sm:$0xff]   ;;  %v1940_v2 = vld [vmem:[%s2179_s15 + $0x320] ss:$16 sps:$4 sm:$0xff]   ;;  %v1994_v34 = vld [vmem:[%s2179_s15 + $0x22c] ss:$16 sps:$4 sm:$0xff]  }
  0x43   : > { %1150 = vmatpush1.bf16.msra.mxu0 %v1897_v35  ;;  %v1937_v0 = vld [vmem:[%s2179_s15 + $0x324] ss:$16 sps:$4 sm:$0xff]   ;;  %v1945_v5 = vld [vmem:[%s2179_s15 + $0x100] ss:$16 sps:$4 sm:$0xff]   ;;  %v1989_v35 = vld [vmem:[%s2179_s15 + $0x28] ss:$16 sps:$4 sm:$0xff]  }
  0x44   : > { %1193 = vmatpush1.bf16.msra.mxu1 %v1898_v36  ;;  %1151 = vmatprep.subr.bf16.mxu0 %v1899_v37  ;;  %v1941_v3 = vld [vmem:[%s2179_s15 + $0x104] ss:$16 sps:$4 sm:$0xff]   ;;  %v1946_v6 = vld [vmem:[%s2179_s15 + $0x300] ss:$16 sps:$4 sm:$0xff]   ;;  %v1992_v36 = vld [vmem:[%s2179_s15 + $0x228] ss:$16 sps:$4 sm:$0xff]  }
  0x45   : > { %1194 = vmatprep.subr.bf16.mxu1 %v1901_v38  ;;  %v1943_v4 = vld [vmem:[%s2179_s15 + $0x304] ss:$16 sps:$4 sm:$0xff]   ;;  %v2277_v9 = vld [vmem:[%s2181_s16] ss:$16 sps:$4 sm:$0xff]   ;;  %v1997_v37 = vld [vmem:[%s2179_s15 + $0xc] ss:$16 sps:$4 sm:$0xff]  }
  0x46   : > { %v2000_v38 = vld [vmem:[%s2179_s15 + $0x20c] ss:$16 sps:$4 sm:$0xff]  }
  0x47   : > { %1152 = vmatpush2.bf16.msra.mxu0 %v1903_v39  ;;  %v1995_v39 = vld [vmem:[%s2179_s15 + $0x8] ss:$16 sps:$4 sm:$0xff]  }
  0x48   : > { %1195 = vmatpush2.bf16.msra.mxu1 %v1904_v40  ;;  %1153 = vmatprep.subr.bf16.mxu0 %v1905_v41  ;;  %v1998_v40 = vld [vmem:[%s2179_s15 + $0x208] ss:$16 sps:$4 sm:$0xff]   ;;  %v2003_v41 = vld [vmem:[%s2179_s15 + $0x1ec] ss:$16 sps:$4 sm:$0xff]  }
  0x49   : > { %1196 = vmatprep.subr.bf16.mxu1 %v1907_v42  ;;  %v2006_v42 = vld [vmem:[%s2179_s15 + $0x3ec] ss:$16 sps:$4 sm:$0xff]  }
  0x4b   : > { %1154 = vmatpush2.bf16.msra.mxu0 %v1909_v43  ;;  %v2001_v43 = vld [vmem:[%s2179_s15 + $0x1e8] ss:$16 sps:$4 sm:$0xff]  }
  0x4c   : > { %1197 = vmatpush2.bf16.msra.mxu1 %v1910_v44  ;;  %1155 = vmatprep.subr.bf16.mxu0 %v1911_v45  ;;  %v2004_v44 = vld [vmem:[%s2179_s15 + $0x3e8] ss:$16 sps:$4 sm:$0xff]   ;;  %v2009_v45 = vld [vmem:[%s2179_s15 + $0x1cc] ss:$16 sps:$4 sm:$0xff]  }
  0x4d   : > { %1198 = vmatprep.subr.bf16.mxu1 %v1913_v46  ;;  %v2012_v46 = vld [vmem:[%s2179_s15 + $0x3cc] ss:$16 sps:$4 sm:$0xff]  }
  0x4f   : > { %1156 = vmatpush2.bf16.msra.mxu0 %v1915_v47  ;;  %v2007_v47 = vld [vmem:[%s2179_s15 + $0x1c8] ss:$16 sps:$4 sm:$0xff]  }
  0x50   : > { %1199 = vmatpush2.bf16.msra.mxu1 %v1916_v48  ;;  %1157 = vmatprep.subr.bf16.mxu0 %v1917_v49  ;;  %v2010_v48 = vld [vmem:[%s2179_s15 + $0x3c8] ss:$16 sps:$4 sm:$0xff]   ;;  %v2015_v49 = vld [vmem:[%s2179_s15 + $0x1ac] ss:$16 sps:$4 sm:$0xff]  }
  0x51   : > { %1200 = vmatprep.subr.bf16.mxu1 %v1919_v50  ;;  %v2018_v50 = vld [vmem:[%s2179_s15 + $0x3ac] ss:$16 sps:$4 sm:$0xff]  }
  0x53   : > { %1158 = vmatpush2.bf16.msra.mxu0 %v1921_v51  ;;  %v2013_v51 = vld [vmem:[%s2179_s15 + $0x1a8] ss:$16 sps:$4 sm:$0xff]  }
  0x54   : > { %1201 = vmatpush2.bf16.msra.mxu1 %v1922_v52  ;;  %1159 = vmatprep.subr.bf16.mxu0 %v1923_v53  ;;  %v2016_v52 = vld [vmem:[%s2179_s15 + $0x3a8] ss:$16 sps:$4 sm:$0xff]   ;;  %v2021_v53 = vld [vmem:[%s2179_s15 + $0x18c] ss:$16 sps:$4 sm:$0xff]  }
  0x55   : > { %1202 = vmatprep.subr.bf16.mxu1 %v1925_v55  ;;  %v2019_v55 = vld [vmem:[%s2179_s15 + $0x188] ss:$16 sps:$4 sm:$0xff]  }
  0x57   : > { %1160 = vmatpush2.bf16.msra.mxu0 %v1927_v57  ;;  %v2027_v57 = vld [vmem:[%s2179_s15 + $0x16c] ss:$16 sps:$4 sm:$0xff]  }
  0x58   : > { %1203 = vmatpush2.bf16.msra.mxu1 %v1928_v58  ;;  %1161 = vmatprep.subr.bf16.mxu0 %v1929_v59  ;;  %v2030_v58 = vld [vmem:[%s2179_s15 + $0x36c] ss:$16 sps:$4 sm:$0xff]   ;;  %v2025_v59 = vld [vmem:[%s2179_s15 + $0x168] ss:$16 sps:$4 sm:$0xff]  }
  0x59   : > { %1204 = vmatprep.subr.bf16.mxu1 %v1931_v60  ;;  %v2028_v60 = vld [vmem:[%s2179_s15 + $0x368] ss:$16 sps:$4 sm:$0xff]  }
  0x5b   : > { %1162 = vmatpush2.bf16.msra.mxu0 %v1933_v61  ;;  %v2033_v61 = vld [vmem:[%s2179_s15 + $0x14c] ss:$16 sps:$4 sm:$0xff]  }
  0x5c   : > { %1205 = vmatpush2.bf16.msra.mxu1 %v1934_v62  ;;  %1163 = vmatprep.subr.bf16.mxu0 %v1935_v63  ;;  %v2036_v62 = vld [vmem:[%s2179_s15 + $0x34c] ss:$16 sps:$4 sm:$0xff]   ;;  %v2031_v63 = vld [vmem:[%s2179_s15 + $0x148] ss:$16 sps:$4 sm:$0xff]  }
  0x5d   : > { %1206 = vmatprep.subr.bf16.mxu1 %v1937_v0  ;;  %v2034_v0 = vld [vmem:[%s2179_s15 + $0x348] ss:$16 sps:$4 sm:$0xff]  }
  0x5f   : > { %1164 = vmatpush2.bf16.msra.mxu0 %v1939_v1  ;;  %v2039_v1 = vld [vmem:[%s2179_s15 + $0x12c] ss:$16 sps:$4 sm:$0xff]  }
  0x60   : > { %1207 = vmatpush2.bf16.msra.mxu1 %v1940_v2  ;;  %1165 = vmatprep.subr.bf16.mxu0 %v1941_v3  ;;  %v2042_v2 = vld [vmem:[%s2179_s15 + $0x32c] ss:$16 sps:$4 sm:$0xff]   ;;  %v2037_v3 = vld [vmem:[%s2179_s15 + $0x128] ss:$16 sps:$4 sm:$0xff]  }
  0x61   : > { %1208 = vmatprep.subr.bf16.mxu1 %v1943_v4  ;;  %v2040_v4 = vld [vmem:[%s2179_s15 + $0x328] ss:$16 sps:$4 sm:$0xff]  }
  0x63   : > { %1166 = vmatpush2.bf16.msra.mxu0 %v1945_v5  ;;  %v2045_v5 = vld [vmem:[%s2179_s15 + $0x10c] ss:$16 sps:$4 sm:$0xff]  }
  0x64   : > { %1209 = vmatpush2.bf16.msra.mxu1 %v1946_v6  ;;  %1221 = vmatprep.subr.bf16.mxu0 %v1955_v7  ;;  %v2048_v6 = vld [vmem:[%s2179_s15 + $0x30c] ss:$16 sps:$4 sm:$0xff]   ;;  %v2043_v7 = vld [vmem:[%s2179_s15 + $0x108] ss:$16 sps:$4 sm:$0xff]  }
  0x65   : > { %1264 = vmatprep.subr.bf16.mxu1 %v1958_v8  ;;  %v2046_v8 = vld [vmem:[%s2179_s15 + $0x308] ss:$16 sps:$4 sm:$0xff]  }
  0x66   : > { %1168 = vmatmul.mubr.bf16.vlgmr.msra.gmra.mxu0 %v2277_v9 }
  0x67   : > { %1211 = vmatmul.mubr.bf16.vlgmr.msra.gmra.mxu1 %v2280_v10  ;;  %1222 = vmatpush1.bf16.msra.mxu0 %v1953_v11 }
  0x68   : > { %1265 = vmatpush1.bf16.msra.mxu1 %v1956_v12  ;;  %1223 = vmatprep.subr.bf16.mxu0 %v1961_v13  ;;  %v335_v12 = vld [vmem:[%s2534_s5] sm:$0xff] }
  0x69   : > { %1266 = vmatprep.subr.bf16.mxu1 %v1964_v14  ;;  %1253 = vmatprep.mubr.bf16.mxu0 %v1949_v54  ;;  %v2024_v54 = vld [vmem:[%s2179_s15 + $0x38c] ss:$16 sps:$4 sm:$0xff]  }
  0x6a   : > { %1296 = vmatprep.mubr.bf16.mxu1 %v1952_v56  ;;  %v2022_v56 = vld [vmem:[%s2179_s15 + $0x388] ss:$16 sps:$4 sm:$0xff]  }
  0x6b   : > { %1224 = vmatpush1.bf16.msra.mxu0 %v1959_v15 }
  0x6c   : > { %1267 = vmatpush1.bf16.msra.mxu1 %v1962_v16  ;;  %1225 = vmatprep.subr.bf16.mxu0 %v1967_v17  ;;  %v336_v16 = vld [vmem:[%s2534_s5 + $0x8] sm:$0xff] }
  0x6d   : > { %1268 = vmatprep.subr.bf16.mxu1 %v1970_v18 }
  0x6f   : > { %1226 = vmatpush1.bf16.msra.mxu0 %v1965_v19 }
  0x70   : > { %1269 = vmatpush1.bf16.msra.mxu1 %v1968_v20  ;;  %1227 = vmatprep.subr.bf16.mxu0 %v1973_v21 }
  0x71   : > { %1270 = vmatprep.subr.bf16.mxu1 %v1976_v22 }
  0x73   : > { %1228 = vmatpush1.bf16.msra.mxu0 %v1971_v23 }
  0x74   : > { %1271 = vmatpush1.bf16.msra.mxu1 %v1974_v24  ;;  %1229 = vmatprep.subr.bf16.mxu0 %v1979_v25  ;;  %v340_v24 = vld [vmem:[%s2534_s5 + $0x28] sm:$0xff] }
  0x75   : > { %1272 = vmatprep.subr.bf16.mxu1 %v1982_v26 }
  0x77   : > { %1230 = vmatpush1.bf16.msra.mxu0 %v1977_v27 }
  0x78   : > { %1273 = vmatpush1.bf16.msra.mxu1 %v1980_v28  ;;  %1231 = vmatprep.subr.bf16.mxu0 %v1985_v29 }
  0x79   : > { %1274 = vmatprep.subr.bf16.mxu1 %v1988_v30  ;;  %v337_v30 = vld [vmem:[%s2534_s5 + $0x10] sm:$0xff] }
  0x7b   : > { %1232 = vmatpush1.bf16.msra.mxu0 %v1983_v31 }
  0x7c   : > { %1275 = vmatpush1.bf16.msra.mxu1 %v1986_v32  ;;  %1233 = vmatprep.subr.bf16.mxu0 %v1991_v33 }
  0x7d   : > { %1276 = vmatprep.subr.bf16.mxu1 %v1994_v34  ;;  %v338_v34 = vld [vmem:[%s2534_s5 + $0x18] sm:$0xff] }
  0x7f   : > { %1234 = vmatpush1.bf16.msra.mxu0 %v1989_v35 }
  0x80   : > { %1277 = vmatpush1.bf16.msra.mxu1 %v1992_v36  ;;  %1235 = vmatprep.subr.bf16.mxu0 %v1997_v37 }
  0x81   : > { %1278 = vmatprep.subr.bf16.mxu1 %v2000_v38 }
  0x83   : > { %1236 = vmatpush1.bf16.msra.mxu0 %v1995_v39  ;;  %v341_v39 = vld [vmem:[%s2534_s5 + $0x30] sm:$0xff] }
  0x84   : > { %1279 = vmatpush1.bf16.msra.mxu1 %v1998_v40  ;;  %1237 = vmatprep.subr.bf16.mxu0 %v2003_v41 }
  0x85   : > { %1280 = vmatprep.subr.bf16.mxu1 %v2006_v42 }
  0x87   : > { %1238 = vmatpush2.bf16.msra.mxu0 %v2001_v43 }
  0x88   : > { %1281 = vmatpush2.bf16.msra.mxu1 %v2004_v44  ;;  %1239 = vmatprep.subr.bf16.mxu0 %v2009_v45  ;;  %v342_v44 = vld [vmem:[%s2534_s5 + $0x38] sm:$0xff] }
  0x89   : > { %1282 = vmatprep.subr.bf16.mxu1 %v2012_v46 }
  0x8b   : > { %1240 = vmatpush2.bf16.msra.mxu0 %v2007_v47 }
  0x8c   : > { %1283 = vmatpush2.bf16.msra.mxu1 %v2010_v48  ;;  %1241 = vmatprep.subr.bf16.mxu0 %v2015_v49 }
  0x8d   : > { %1284 = vmatprep.subr.bf16.mxu1 %v2018_v50 }
  0x8f   : > { %1242 = vmatpush2.bf16.msra.mxu0 %v2013_v51 }
  0x90   : > { %1285 = vmatpush2.bf16.msra.mxu1 %v2016_v52  ;;  %1243 = vmatprep.subr.bf16.mxu0 %v2021_v53 }
  0x91   : > { %1286 = vmatprep.subr.bf16.mxu1 %v2024_v54 }
  0x93   : > { %1244 = vmatpush2.bf16.msra.mxu0 %v2019_v55 }
  0x94   : > { %1287 = vmatpush2.bf16.msra.mxu1 %v2022_v56  ;;  %1245 = vmatprep.subr.bf16.mxu0 %v2027_v57 }
  0x95   : > { %1288 = vmatprep.subr.bf16.mxu1 %v2030_v58 }
  0x97   : > { %1246 = vmatpush2.bf16.msra.mxu0 %v2025_v59 }
  0x98   : > { %1289 = vmatpush2.bf16.msra.mxu1 %v2028_v60  ;;  %1247 = vmatprep.subr.bf16.mxu0 %v2033_v61 }
  0x99   : > { %1290 = vmatprep.subr.bf16.mxu1 %v2036_v62 }
  0x9b   : > { %1248 = vmatpush2.bf16.msra.mxu0 %v2031_v63 }
  0x9c   : > { %1291 = vmatpush2.bf16.msra.mxu1 %v2034_v0  ;;  %1249 = vmatprep.subr.bf16.mxu0 %v2039_v1 }
  0x9d   : > { %1292 = vmatprep.subr.bf16.mxu1 %v2042_v2 }
  0x9f   : > { %1250 = vmatpush2.bf16.msra.mxu0 %v2037_v3 }
  0xa0   : > { %1293 = vmatpush2.bf16.msra.mxu1 %v2040_v4  ;;  %1251 = vmatprep.subr.bf16.mxu0 %v2045_v5 }
  0xa1   : > { %1294 = vmatprep.subr.bf16.mxu1 %v2048_v6 }
  0xa3   : > { %1252 = vmatpush2.bf16.msra.mxu0 %v2043_v7 }
  0xa4   : > { %1295 = vmatpush2.bf16.msra.mxu1 %v2046_v8 }
  0xa6   : > { %1254 = vmatmul.mubr.bf16.vlgmr.msra.gmra.mxu0 %v2277_v9  ;;  %v339_v9 = vld [vmem:[%s2534_s5 + $0x20] sm:$0xff] }
  0xa7   : > { %1297 = vmatmul.mubr.bf16.vlgmr.msra.gmra.mxu1 %v2280_v10 }
 0x126   : > { %v1169_v11 = vpop.f32.mrf.mxu0 }
 0x127   : > { %v1212_v13 = vpop.f32.mrf.mxu1 }
 0x128   : > { %v1213_v14 = vadd.f32 %v1212_v13, %v1169_v11  ;;  %v1171_v15 = vpop.f32.mrf.mxu0 }
 0x129   : > { %v1214_v17 = vpop.f32.mrf.mxu1 }
 0x12a   : > { %v1307_v18 = vadd.f32 %v1213_v14, %v335_v12  ;;  %v1215_v19 = vadd.f32 %v1214_v17, %v1171_v15  ;;  %v1173_v20 = vpop.f32.mrf.mxu0 }
 0x12b   : > { %v1216_v10 = vpop.f32.mrf.mxu1 }
 0x12c   : > { %1315 = vst [vmem:[%s2534_s5] sm:$0xff] %v1307_v18  ;;  %v1308_v21 = vadd.f32 %v1215_v19, %v336_v16  ;;  %v1217_v22 = vadd.f32 %v1216_v10, %v1173_v20  ;;  %v1175_v23 = vpop.f32.mrf.mxu0 }
 0x12d   : > { %v1218_v25 = vpop.f32.mrf.mxu1 }
 0x12e   : > { %1316 = vst [vmem:[%s2534_s5 + $0x8] sm:$0xff] %v1308_v21  ;;  %v1311_v26 = vadd.f32 %v1217_v22, %v339_v9  ;;  %v1219_v27 = vadd.f32 %v1218_v25, %v1175_v23 }
 0x130   : > { %1319 = vst [vmem:[%s2534_s5 + $0x20] sm:$0xff] %v1311_v26  ;;  %v1312_v28 = vadd.f32 %v1219_v27, %v340_v24 }
 0x132   : > { %1320 = vst [vmem:[%s2534_s5 + $0x28] sm:$0xff] %v1312_v28 }
 0x166   : > { %v1255_v29 = vpop.f32.mrf.mxu0 }
 0x167   : > { %v1298_v31 = vpop.f32.mrf.mxu1 }
 0x168   : > { %v1299_v32 = vadd.f32 %v1298_v31, %v1255_v29  ;;  %v1257_v33 = vpop.f32.mrf.mxu0 }
 0x169   : > { %v1300_v35 = vpop.f32.mrf.mxu1 }
 0x16a   : > { %v1309_v36 = vadd.f32 %v1299_v32, %v337_v30  ;;  %v1301_v37 = vadd.f32 %v1300_v35, %v1257_v33  ;;  %v1259_v38 = vpop.f32.mrf.mxu0 }
 0x16b   : > { %v1302_v40 = vpop.f32.mrf.mxu1 }
 0x16c   : > { %1317 = vst [vmem:[%s2534_s5 + $0x10] sm:$0xff] %v1309_v36  ;;  %v1310_v41 = vadd.f32 %v1301_v37, %v338_v34  ;;  %v1303_v42 = vadd.f32 %v1302_v40, %v1259_v38  ;;  %v1261_v43 = vpop.f32.mrf.mxu0 }
 0x16d   : > { %v1304_v45 = vpop.f32.mrf.mxu1 }
 0x16e   : > { %1318 = vst [vmem:[%s2534_s5 + $0x18] sm:$0xff] %v1310_v41  ;;  %v1313_v46 = vadd.f32 %v1303_v42, %v341_v39  ;;  %v1305_v47 = vadd.f32 %v1304_v45, %v1261_v43  ;;  %1326 = sbr.rel (%p1801_p11) target bundleno = 449 (0x1c1), region = 71 }
 0x170   : > { %1321 = vst [vmem:[%s2534_s5 + $0x30] sm:$0xff] %v1313_v46  ;;  %v1314_v48 = vadd.f32 %v1305_v47, %v342_v44 }
 0x172   : > { %1322 = vst [vmem:[%s2534_s5 + $0x38] sm:$0xff] %v1314_v48 }
 0x173   : > { %v1337_v49 = vlaneseq  ;;  %v1331_v50 = vld [vmem:[%s2534_s5 + $0x20] sm:$0xff]  ;;  %v1332_v52 = vld [vmem:[%s2534_s5 + $0x28] sm:$0xff]  ;;  %v1329_v58 = vld [vmem:[%s2534_s5 + $0x10] sm:$0xff]  ;;  %v2098_v60 = vmov 0.0  }
 0x174   : > { %v1327_v53 = vld [vmem:[%s2534_s5] sm:$0xff]  ;;  %v1328_v54 = vld [vmem:[%s2534_s5 + $0x8] sm:$0xff]  ;;  %v1350_v56 = vmul.f32 0.0, %v1331_v50  ;;  %v1351_v57 = vmul.f32 0.0, %v1332_v52 }
 0x175   : > { %v2400_v51 = vshrl.u32 %v1337_v49, 7  ;;  %v1330_v63 = vld [vmem:[%s2534_s5 + $0x18] sm:$0xff] }
 0x177   : > { %v1333_v55 = vld [vmem:[%s2534_s5 + $0x30] sm:$0xff]  ;;  %vm1340_vm0 = vcmp.lt.s32.totalorder %v2400_v51, 2 }
 0x178   : > { %v1802_v61 = vsel %vm1340_vm0, 1.0, %v2098_v60  ;;  %v1352_v62 = vmul.f32 0.0, %v1333_v55 }
 0x179   : > { %v1334_v59 = vld [vmem:[%s2534_s5 + $0x38] sm:$0xff]  ;;  %v1346_v0 = vmul.f32 %v1802_v61, %v1327_v53  ;;  %v1347_v1 = vmul.f32 %v1802_v61, %v1328_v54  ;;  %v1348_v3 = vmul.f32 %v1802_v61, %v1329_v58  ;;  %v1349_v6 = vmul.f32 %v1802_v61, %v1330_v63 }
 0x17a   : > { %v1353_v2 = vmul.f32 0.0, %v1334_v59 }
 0x17b   : > { %v1354_v4 = vadd.f32 %v1350_v56, %v1346_v0  ;;  %v1361_v5 = vadd.f32 %v1351_v57, %v1347_v1  ;;  %v1368_v7 = vadd.f32 %v1352_v62, %v1348_v3 }
 0x17c   : > { %v1375_v12 = vadd.f32 %v1353_v2, %v1349_v6 }
 0x17d   : > { %v1355_v8 = vrot.slane %v1354_v4, 4  ;;  %v1362_v11 = vrot.slane %v1361_v5, 4  ;;  %v1369_v13 = vrot.slane %v1368_v7, 4 }
 0x17e   : > { %v1376_v16 = vrot.slane %v1375_v12, 4 }
 0x17f   : > { %v1356_v14 = vadd.f32 %v1355_v8, %v1354_v4  ;;  %v1363_v15 = vadd.f32 %v1362_v11, %v1361_v5  ;;  %v1370_v17 = vadd.f32 %v1369_v13, %v1368_v7 }
 0x180   : > { %v1377_v20 = vadd.f32 %v1376_v16, %v1375_v12 }
 0x181   : > { %v1357_v18 = vrot.slane %v1356_v14, 2  ;;  %v1364_v19 = vrot.slane %v1363_v15, 2  ;;  %v1371_v9 = vrot.slane %v1370_v17, 2 }
 0x182   : > { %v1378_v22 = vrot.slane %v1377_v20, 2 }
 0x183   : > { %v1358_v10 = vadd.f32 %v1357_v18, %v1356_v14  ;;  %v1365_v21 = vadd.f32 %v1364_v19, %v1363_v15  ;;  %v1372_v23 = vadd.f32 %v1371_v9, %v1370_v17 }
 0x184   : > { %v1379_v26 = vadd.f32 %v1378_v22, %v1377_v20 }
 0x185   : > { %v1359_v24 = vrot.slane %v1358_v10, 1  ;;  %v1366_v25 = vrot.slane %v1365_v21, 1  ;;  %v1373_v27 = vrot.slane %v1372_v23, 1 }
 0x186   : > { %v1380_v30 = vrot.slane %v1379_v26, 1 }
 0x187   : > { %v1360_v28 = vadd.f32 %v1359_v24, %v1358_v10  ;;  %v1367_v29 = vadd.f32 %v1366_v25, %v1365_v21  ;;  %v1374_v31 = vadd.f32 %v1373_v27, %v1372_v23 }
 0x188   : > { %v1381_v34 = vadd.f32 %v1380_v30, %v1379_v26 }
 0x189   : > { %v1382_v32 = vmul.f32 0.5, %v1360_v28  ;;  %v1383_v33 = vmul.f32 0.5, %v1367_v29  ;;  %v1384_v35 = vmul.f32 0.5, %v1374_v31 }
 0x18a   : > { %v1385_v42 = vmul.f32 0.5, %v1381_v34  ;;  %v1461_v34 = vsub.s32 0, %v2400_v51 }
 0x18b   : > { %v2424_v36 = vsub.f32 %v1327_v53, %v1382_v32  ;;  %v2426_v37 = vsub.f32 %v1331_v50, %v1382_v32  ;;  %v2428_v38 = vsub.f32 %v1328_v54, %v1383_v33  ;;  %v2430_v39 = vsub.f32 %v1332_v52, %v1383_v33 }
 0x18c   : > { %v2432_v40 = vsub.f32 %v1329_v58, %v1384_v35  ;;  %v2434_v41 = vsub.f32 %v1333_v55, %v1384_v35  ;;  %v2442_v49 = vsub.f32 %v1330_v63, %v1385_v42  ;;  %v2444_v50 = vsub.f32 %v1334_v59, %v1385_v42  ;;  %v1335_v35 = vld [vmem:[%s2531_s2] sm:$0xf] }
 0x18d   : > { %v1394_v43 = vmul.f32 %v1802_v61, %v2424_v36  ;;  %v1398_v44 = vmul.f32 0.0, %v2426_v37  ;;  %v1395_v45 = vmul.f32 %v1802_v61, %v2428_v38  ;;  %v1399_v46 = vmul.f32 0.0, %v2430_v39 }
 0x18e   : > { %v1396_v47 = vmul.f32 %v1802_v61, %v2432_v40  ;;  %v1400_v48 = vmul.f32 0.0, %v2434_v41  ;;  %v1397_v58 = vmul.f32 %v1802_v61, %v2442_v49  ;;  %v1401_v60 = vmul.f32 0.0, %v2444_v50 }
 0x18f   : > { %v1402_v52 = vmul.f32 %v1394_v43, %v1394_v43  ;;  %v1406_v53 = vmul.f32 %v1398_v44, %v1398_v44  ;;  %v1403_v54 = vmul.f32 %v1395_v45, %v1395_v45  ;;  %v1407_v55 = vmul.f32 %v1399_v46, %v1399_v46  ;;  %v1336_v43 = vld [vmem:[%s2532_s3] sm:$0xf] }
 0x190   : > { %v1404_v56 = vmul.f32 %v1396_v47, %v1396_v47  ;;  %v1408_v57 = vmul.f32 %v1400_v48, %v1400_v48  ;;  %v1405_v2 = vmul.f32 %v1397_v58, %v1397_v58  ;;  %v1409_v3 = vmul.f32 %v1401_v60, %v1401_v60 }
 0x191   : > { %v1410_v62 = vadd.f32 %v1406_v53, %v1402_v52  ;;  %v1417_v0 = vadd.f32 %v1407_v55, %v1403_v54  ;;  %v1465_v42 = vsub.s32 1, %v2400_v51  ;;  %v1469_v44 = vsub.s32 2, %v2400_v51 }
 0x192   : > { %v1424_v1 = vadd.f32 %v1408_v57, %v1404_v56  ;;  %v1431_v59 = vadd.f32 %v1409_v3, %v1405_v2  ;;  %v1473_v45 = vsub.s32 3, %v2400_v51  ;;  %v1462_v46 = vrot.slane %v1335_v35, %v1461_v34 }
 0x193   : > { %v1411_v4 = vrot.slane %v1410_v62, 4  ;;  %v1418_v63 = vrot.slane %v1417_v0, 4  ;;  %v1491_v48 = vrot.slane %v1336_v43, %v1461_v34  ;;  %v1466_v52 = vrot.slane %v1335_v35, %v1465_v42 }
 0x194   : > { %v1425_v5 = vrot.slane %v1424_v1, 4  ;;  %v1432_v11 = vrot.slane %v1431_v59, 4  ;;  %v1495_v53 = vrot.slane %v1336_v43, %v1465_v42  ;;  %v1470_v56 = vrot.slane %v1335_v35, %v1469_v44 }
 0x195   : > { %v1412_v6 = vadd.f32 %v1411_v4, %v1410_v62  ;;  %v1419_v7 = vadd.f32 %v1418_v63, %v1417_v0  ;;  %v1499_v57 = vrot.slane %v1336_v43, %v1469_v44  ;;  %v1474_v0 = vrot.slane %v1335_v35, %v1473_v45 }
 0x196   : > { %v1426_v8 = vadd.f32 %v1425_v5, %v1424_v1  ;;  %v1433_v15 = vadd.f32 %v1432_v11, %v1431_v59  ;;  %v1503_v1 = vrot.slane %v1336_v43, %v1473_v45 }
 0x197   : > { %v1413_v12 = vrot.slane %v1412_v6, 2  ;;  %v1420_v13 = vrot.slane %v1419_v7, 2 }
 0x198   : > { %v1427_v14 = vrot.slane %v1426_v8, 2  ;;  %v1434_v18 = vrot.slane %v1433_v15, 2 }
 0x199   : > { %v1414_v61 = vadd.f32 %v1413_v12, %v1412_v6  ;;  %v1421_v16 = vadd.f32 %v1420_v13, %v1419_v7 }
 0x19a   : > { %v1428_v17 = vadd.f32 %v1427_v14, %v1426_v8  ;;  %v1435_v10 = vadd.f32 %v1434_v18, %v1433_v15 }
 0x19b   : > { %v1415_v19 = vrot.slane %v1414_v61, 1  ;;  %v1422_v20 = vrot.slane %v1421_v16, 1 }
 0x19c   : > { %v1429_v9 = vrot.slane %v1428_v17, 1  ;;  %v1436_v24 = vrot.slane %v1435_v10, 1 }
 0x19d   : > { %v1416_v21 = vadd.f32 %v1415_v19, %v1414_v61  ;;  %v1423_v22 = vadd.f32 %v1422_v20, %v1421_v16  ;;  %v1529_v16 = vld [vmem:[%s2533_s4 + $0x28] sm:$0xff]  ;;  %v1526_v19 = vld [vmem:[%s2533_s4 + $0x10] sm:$0xff] }
 0x19e   : > { %v1430_v23 = vadd.f32 %v1429_v9, %v1428_v17  ;;  %v1437_v28 = vadd.f32 %v1436_v24, %v1435_v10  ;;  %v1530_v10 = vld [vmem:[%s2533_s4 + $0x30] sm:$0xff]  ;;  %v1527_v24 = vld [vmem:[%s2533_s4 + $0x18] sm:$0xff] }
 0x19f   : > { %v1438_v25 = vmul.f32 0.5, %v1416_v21  ;;  %v1439_v26 = vmul.f32 0.5, %v1423_v22 }
 0x1a0   : > { %v1440_v27 = vmul.f32 0.5, %v1430_v23  ;;  %v1441_v32 = vmul.f32 0.5, %v1437_v28 }
 0x1a1   : > { %v1442_v29 = vadd.f32 1e-05, %v1438_v25  ;;  %v1443_v30 = vadd.f32 1e-05, %v1439_v26 }
 0x1a2   : > { %v1444_v31 = vadd.f32 1e-05, %v1440_v27  ;;  %v1445_v33 = vadd.f32 1e-05, %v1441_v32  ;;  %v1531_v27 = vld [vmem:[%s2533_s4 + $0x38] sm:$0xff] }
 0x1a3   : > { %2049 = vrsqrt.f32 %v1442_v29 }
 0x1a4   : > { %2051 = vrsqrt.f32 %v1443_v30 }
 0x1a5   : > { %2053 = vrsqrt.f32 %v1444_v31 }
 0x1a6   : > { %2055 = vrsqrt.f32 %v1445_v33 }
 0x1b0   : > { %v2050_v47 = vpop.eup %2049 }
 0x1b1   : > { %v2052_v54 = vpop.eup %2051  ;;  %v1450_v55 = vmul.f32 %v2050_v47, %v2424_v36  ;;  %v1454_v58 = vmul.f32 %v2050_v47, %v2426_v37 }
 0x1b2   : > { %v2054_v60 = vpop.eup %2053  ;;  %v1451_v62 = vmul.f32 %v2052_v54, %v2428_v38  ;;  %v1455_v2 = vmul.f32 %v2052_v54, %v2430_v39  ;;  %v1524_v39 = vld [vmem:[%s2533_s4] sm:$0xff] }
 0x1b3   : > { %v2056_v51 = vpop.eup %2055  ;;  %v1479_v3 = vmul.f32 %v1462_v46, %v1450_v55  ;;  %v1452_v4 = vmul.f32 %v2054_v60, %v2432_v40  ;;  %v1483_v63 = vmul.f32 %v1462_v46, %v1454_v58  ;;  %v1456_v5 = vmul.f32 %v2054_v60, %v2434_v41  ;;  %v1528_v40 = vld [vmem:[%s2533_s4 + $0x20] sm:$0xff] }
 0x1b4   : > { %v1480_v59 = vmul.f32 %v1466_v52, %v1451_v62  ;;  %v1453_v36 = vmul.f32 %v2056_v51, %v2442_v49  ;;  %v1484_v6 = vmul.f32 %v1466_v52, %v1455_v2  ;;  %v1457_v37 = vmul.f32 %v2056_v51, %v2444_v50  ;;  %v1525_v50 = vld [vmem:[%s2533_s4 + $0x8] sm:$0xff] }
 0x1b5   : > { %v1508_v7 = vadd.f32 %v1491_v48, %v1479_v3  ;;  %v1481_v8 = vmul.f32 %v1470_v56, %v1452_v4  ;;  %v1512_v38 = vadd.f32 %v1491_v48, %v1483_v63  ;;  %v1485_v11 = vmul.f32 %v1470_v56, %v1456_v5 }
 0x1b6   : > { %v1509_v12 = vadd.f32 %v1495_v53, %v1480_v59  ;;  %v1482_v13 = vmul.f32 %v1474_v0, %v1453_v36  ;;  %v1513_v41 = vadd.f32 %v1495_v53, %v1484_v6  ;;  %v1486_v14 = vmul.f32 %v1474_v0, %v1457_v37 }
 0x1b7   : > { %v1516_v49 = vmax.f32 %v1508_v7, 0.0  ;;  %v1510_v15 = vadd.f32 %v1499_v57, %v1481_v8  ;;  %v1520_v61 = vmax.f32 %v1512_v38, 0.0  ;;  %v1514_v17 = vadd.f32 %v1499_v57, %v1485_v11 }
 0x1b8   : > { %v1517_v18 = vmax.f32 %v1509_v12, 0.0  ;;  %v1511_v20 = vadd.f32 %v1503_v1, %v1482_v13  ;;  %v1521_v9 = vmax.f32 %v1513_v41, 0.0  ;;  %v1515_v21 = vadd.f32 %v1503_v1, %v1486_v14 }
 0x1b9   : > { %v1532_v22 = vadd.f32 %v1524_v39, %v1516_v49  ;;  %v1518_v23 = vmax.f32 %v1510_v15, 0.0  ;;  %v1536_v25 = vadd.f32 %v1528_v40, %v1520_v61  ;;  %v1522_v26 = vmax.f32 %v1514_v17, 0.0 }
 0x1ba   : > { %v1533_v28 = vadd.f32 %v1525_v50, %v1517_v18  ;;  %v1519_v29 = vmax.f32 %v1511_v20, 0.0  ;;  %v1537_v30 = vadd.f32 %v1529_v16, %v1521_v9  ;;  %v1523_v31 = vmax.f32 %v1515_v21, 0.0 }
 0x1bb   : > { %v1540_v32 = vmax.f32 %v1532_v22, 0.0  ;;  %v1534_v33 = vadd.f32 %v1526_v19, %v1518_v23  ;;  %v1544_v34 = vmax.f32 %v1536_v25, 0.0  ;;  %v1538_v35 = vadd.f32 %v1530_v10, %v1522_v26 }
 0x1bc   : > { %v1541_v42 = vmax.f32 %v1533_v28, 0.0  ;;  %v1535_v43 = vadd.f32 %v1527_v24, %v1519_v29  ;;  %v1545_v44 = vmax.f32 %v1537_v30, 0.0  ;;  %v1539_v45 = vadd.f32 %v1531_v27, %v1523_v31 }
 0x1bd   : > { %1548 = vst [vmem:[%s2534_s5] sm:$0xff] %v1540_v32  ;;  %v1542_v46 = vmax.f32 %v1534_v33, 0.0  ;;  %1552 = vst [vmem:[%s2534_s5 + $0x20] sm:$0xff] %v1544_v34  ;;  %v1546_v47 = vmax.f32 %v1538_v35, 0.0 }
 0x1be   : > { %1549 = vst [vmem:[%s2534_s5 + $0x8] sm:$0xff] %v1541_v42  ;;  %v1543_v48 = vmax.f32 %v1535_v43, 0.0  ;;  %1553 = vst [vmem:[%s2534_s5 + $0x28] sm:$0xff] %v1545_v44  ;;  %v1547_v52 = vmax.f32 %v1539_v45, 0.0 }
 0x1bf   : > { %1550 = vst [vmem:[%s2534_s5 + $0x10] sm:$0xff] %v1542_v46  ;;  %1554 = vst [vmem:[%s2534_s5 + $0x30] sm:$0xff] %v1546_v47 }
 0x1c0   : > { %1551 = vst [vmem:[%s2534_s5 + $0x18] sm:$0xff] %v1543_v48  ;;  %1555 = vst [vmem:[%s2534_s5 + $0x38] sm:$0xff] %v1547_v52 }
 0x1c1 PF: > { %s15_s22 = sadd.s32 1, %s2095_s22   ;;  %s2535_s18 = smov %s2083_s19 }
 0x1c2   : > { %p12_p12 = scmp.ge.s32.totalorder %s15_s22, 11   ;;  %s2536_s19 = smov %s2164_s26 }
 0x1c3   : > { %s2537_s20 = smov %s2091_s21  ;;  %s2538_s21 = smov %s2540_s23 }
 0x1c4   :  { %14 = sbr.rel (!%p12_p12) target bundleno = 3 (0x3), region = 112 }

// kernel: resnet_forward.40
= control target key start
LH: loop header
LB: loop body
LE: loop exit
PB: predicated region body
PF: predicated region fallthrough
CT: control target
= control target key end

     0   :  { %s2032_s15 = smov 0   ;;  %s2034_s16 = smov 0   ;;  %s2408_s0 = inlined_call_operand.vmem [shape: bf16[16,4608], index: 0, kind: input, shape index: {}]   ;;  %s2409_s1 = inlined_call_operand.vmem [shape: bf16[4608,512], index: 1, kind: input, shape index: {}]   ;;  %s2410_s2 = inlined_call_operand.vmem [shape: f32[1,512], index: 2, kind: input, shape index: {}]   ;;  %s2411_s3 = inlined_call_operand.vmem [shape: f32[1,512], index: 3, kind: input, shape index: {}]   ;;  %s2412_s4 = inlined_call_operand.vmem [shape: f32[16,512], index: 4, kind: output, shape index: {}]  }
   0x1   :  { %s2036_s17 = smov 0   ;;  %s2038_s18 = smov 0  }
   0x2   :  { %s2040_s19 = smov 0  }
   0x3 LB: > { %s23_s20 = sadd.s32 1, %s1999_s18  ;;  %p42_p1 = scmp.ne.s32.totalorder %s1991_s16, %s1987_s15  ;;  %s2003_s19 = sphi %s2040_s19, %s14_s19   ;;  %s1999_s18 = sphi %s2038_s18, %s2416_s18   ;;  %s1995_s17 = sphi %s2036_s17, %s2415_s17   ;;  %s1991_s16 = sphi %s2034_s16, %s2414_s16   ;;  %s1987_s15 = sphi %s2032_s15, %s2413_s15  }
   0x4   : > { %p24_p0 = scmp.ge.s32.totalorder %s23_s20, 9  ;;  %p43_p2 = scmp.eq.s32.totalorder %s2003_s19, 0 }
   0x5   : > { %s35_s22 = sadd.s32 1, %s1991_s16  ;;  %p1567_p5 = scmp.ge.s32.totalorder %s2003_s19, 9 }
   0x6   : > { %s2418_s20 = smov (%p24_p0, %s23_s20), 0  ;;  %p44_p3 = por %p43_p2, %p42_p1 }
   0x7   : > { %s31_s21 = ssub.s32 %s1999_s18, %s2418_s20  ;;  %168 = sbr.rel (%p1567_p5) target bundleno = 18 (0x12), region = 24 }
   0x8   : > { %p33_p4 = scmp.eq.s32.totalorder %s31_s21, 0 }
   0xa   : > { %s2067_s23 = scalar_select %p33_p4, %s1991_s16, %s35_s22  }
   0xc   : > { %171 = sbr.rel (!%p44_p3) target bundleno = 18 (0x12), region = 28  ;;  %s173_s24 = sand.u32 (%p44_p3), 1, %s1991_s16  }
   0xd   : > { %s1715_s25 = sshll.u32 (%p44_p3), %s1999_s18, 4  ;;  %s1568_s26 = sshll.u32 (%p44_p3), %s173_s24, 5 }
   0xe   : > { %s181_s29 = scalar_lea.vmem (%p44_p3), %s2408_s0, %s1715_s25  ;;  %s175_s30 = scalar_lea.vmem (%p44_p3), [#allocation2], %s1568_s26 }
   0xf   : > { %v194_v0 = vld [vmem:[%s181_s29] sm:$0xff] (%p44_p3)  ;;  %v196_v1 = vld [vmem:[%s181_s29 + $0x8] sm:$0xff] (%p44_p3)  ;;  %v198_v2 = vld [vmem:[%s181_s29 + $0x90] sm:$0xff] (%p44_p3) }
  0x10   : > { %195 = vst [vmem:[%s175_s30] sm:$0xff] (%p44_p3), %v194_v0  ;;  %197 = vst [vmem:[%s175_s30 + $0x8] sm:$0xff] (%p44_p3), %v196_v1  ;;  %v200_v3 = vld [vmem:[%s181_s29 + $0x98] sm:$0xff] (%p44_p3) }
  0x11   : > { %199 = vst [vmem:[%s175_s30 + $0x10] sm:$0xff] %v198_v2  ;;  %201 = vst [vmem:[%s175_s30 + $0x18] sm:$0xff] %v200_v3 }
  0x12 PF: > { %p1571_p6 = scmp.ge.s32.totalorder %s2003_s19, 1  ;;  %p216_p7 = scmp.lt.s32.totalorder %s2003_s19, 10 }
  0x14   : > { %p217_p8 = pnand %p1571_p6, %p216_p7 }
  0x15   : > { %s223_s5 = sand.u32 (!%p217_p8), 1, %s1987_s15   ;;  %s1573_s6 = sshll.u32 (!%p217_p8), %s1995_s17, 6 }
  0x16   : > { %220 = sbr.rel (%p217_p8) target bundleno = 445 (0x1bd), region = 55  ;;  %s1572_s7 = sshll.u32 (!%p217_p8), %s223_s5, 5 }
  0x17   : > { %p258_p9 = scmp.lt.s32.totalorder (!%p217_p8), %s1573_s6, 575  ;;  %s2084_s12 = scalar_lea.vmem (!%p217_p8), [#allocation2], %s1572_s7 }
  0x18   : > { %p1576_p10 = scmp.ne.s32.totalorder (!%p217_p8), %s1995_s17, 0 }
  0x1b   : > { %s2420_s6 = smov (!%p258_p9, %s1573_s6), 575  ;;  %274 = sbr.rel (%p1576_p10) target bundleno = 37 (0x25), region = 63 }
  0x1c   : > { %s1716_s8 = sshll.u32 %s2420_s6, 4 }
  0x1d   : > { %s2082_s11 = scalar_lea.vmem %s2409_s1, %s1716_s8 }
  0x20   : > { %v2005_v4 = vmov 0.0  }
  0x21   : > { %275 = vst [vmem:[%s2412_s4] sm:$0xff] %v2005_v4  ;;  %276 = vst [vmem:[%s2412_s4 + $0x8] sm:$0xff] %v2005_v4 }
  0x22   : > { %277 = vst [vmem:[%s2412_s4 + $0x10] sm:$0xff] %v2005_v4  ;;  %278 = vst [vmem:[%s2412_s4 + $0x18] sm:$0xff] %v2005_v4 }
  0x23   : > { %279 = vst [vmem:[%s2412_s4 + $0x20] sm:$0xff] %v2005_v4  ;;  %280 = vst [vmem:[%s2412_s4 + $0x28] sm:$0xff] %v2005_v4 }
  0x24   : > { %281 = vst [vmem:[%s2412_s4 + $0x30] sm:$0xff] %v2005_v4  ;;  %282 = vst [vmem:[%s2412_s4 + $0x38] sm:$0xff] %v2005_v4 }
  0x25 PF: > { %v1759_v5 = vld [vmem:[%s2082_s11 + $0xe4] ss:$16 sps:$4 sm:$0xff]   ;;  %v1763_v7 = vld [vmem:[%s2082_s11 + $0xe0] ss:$16 sps:$4 sm:$0xff]   ;;  %v1860_v56 = vld [vmem:[%s2084_s12 + $0xc] ss:$16 sps:$4 sm:$0xff]  }
  0x26   : > { %v1761_v6 = vld [vmem:[%s2082_s11 + $0x2e4] ss:$16 sps:$4 sm:$0xff]   ;;  %1083 = vmatprep.subr.bf16.mxu0 %v1759_v5  ;;  %v1764_v8 = vld [vmem:[%s2082_s11 + $0x2e0] ss:$16 sps:$4 sm:$0xff]   ;;  %1158 = vmatprep.mubr.bf16.mxu1 %v1860_v56  ;;  %p1709_p11 = scmp.ne.s32.totalorder %s1995_s17, 8 }
  0x27   : > { %1126 = vmatprep.subr.bf16.mxu1 %v1761_v6  ;;  %v1765_v9 = vld [vmem:[%s2082_s11 + $0xc4] ss:$16 sps:$4 sm:$0xff]   ;;  %1084 = vmatpush1.bf16.msra.mxu0 %v1763_v7  ;;  %v1769_v11 = vld [vmem:[%s2082_s11 + $0xc0] ss:$16 sps:$4 sm:$0xff]   ;;  %v1863_v7 = vld [vmem:[%s2082_s11 + $0xec] ss:$16 sps:$4 sm:$0xff]  }
  0x28   : > { %1127 = vmatpush1.bf16.msra.mxu1 %v1764_v8  ;;  %v1767_v10 = vld [vmem:[%s2082_s11 + $0x2c4] ss:$16 sps:$4 sm:$0xff]   ;;  %1085 = vmatprep.subr.bf16.mxu0 %v1765_v9  ;;  %v1770_v12 = vld [vmem:[%s2082_s11 + $0x2c0] ss:$16 sps:$4 sm:$0xff]   ;;  %v1866_v8 = vld [vmem:[%s2082_s11 + $0x2ec] ss:$16 sps:$4 sm:$0xff]  }
  0x29   : > { %1128 = vmatprep.subr.bf16.mxu1 %v1767_v10  ;;  %v1771_v13 = vld [vmem:[%s2082_s11 + $0xa4] ss:$16 sps:$4 sm:$0xff]   ;;  %v1775_v15 = vld [vmem:[%s2082_s11 + $0xa0] ss:$16 sps:$4 sm:$0xff]   ;;  %v2183_v10 = vld [vmem:[%s2084_s12 + $0x8] ss:$16 sps:$4 sm:$0xff]  }
  0x2a   : > { %v1773_v14 = vld [vmem:[%s2082_s11 + $0x2a4] ss:$16 sps:$4 sm:$0xff]   ;;  %v1776_v16 = vld [vmem:[%s2082_s11 + $0x2a0] ss:$16 sps:$4 sm:$0xff]  }
  0x2b   : > { %1086 = vmatpush1.bf16.msra.mxu0 %v1769_v11  ;;  %v1777_v17 = vld [vmem:[%s2082_s11 + $0x84] ss:$16 sps:$4 sm:$0xff]   ;;  %v1781_v19 = vld [vmem:[%s2082_s11 + $0x80] ss:$16 sps:$4 sm:$0xff]   ;;  %v1861_v11 = vld [vmem:[%s2082_s11 + $0xe8] ss:$16 sps:$4 sm:$0xff]  }
  0x2c   : > { %1129 = vmatpush1.bf16.msra.mxu1 %v1770_v12  ;;  %1087 = vmatprep.subr.bf16.mxu0 %v1771_v13  ;;  %v1779_v18 = vld [vmem:[%s2082_s11 + $0x284] ss:$16 sps:$4 sm:$0xff]   ;;  %v1782_v20 = vld [vmem:[%s2082_s11 + $0x280] ss:$16 sps:$4 sm:$0xff]   ;;  %v1864_v12 = vld [vmem:[%s2082_s11 + $0x2e8] ss:$16 sps:$4 sm:$0xff]  }
  0x2d   : > { %1130 = vmatprep.subr.bf16.mxu1 %v1773_v14  ;;  %v1783_v21 = vld [vmem:[%s2082_s11 + $0x64] ss:$16 sps:$4 sm:$0xff]   ;;  %v1787_v23 = vld [vmem:[%s2082_s11 + $0x60] ss:$16 sps:$4 sm:$0xff]   ;;  %v1869_v13 = vld [vmem:[%s2082_s11 + $0xcc] ss:$16 sps:$4 sm:$0xff]  }
  0x2e   : > { %v1785_v22 = vld [vmem:[%s2082_s11 + $0x264] ss:$16 sps:$4 sm:$0xff]   ;;  %v1788_v24 = vld [vmem:[%s2082_s11 + $0x260] ss:$16 sps:$4 sm:$0xff]   ;;  %v1872_v14 = vld [vmem:[%s2082_s11 + $0x2cc] ss:$16 sps:$4 sm:$0xff]  }
  0x2f   : > { %1088 = vmatpush1.bf16.msra.mxu0 %v1775_v15  ;;  %v1789_v25 = vld [vmem:[%s2082_s11 + $0x44] ss:$16 sps:$4 sm:$0xff]   ;;  %v1793_v27 = vld [vmem:[%s2082_s11 + $0x40] ss:$16 sps:$4 sm:$0xff]   ;;  %v1867_v15 = vld [vmem:[%s2082_s11 + $0xc8] ss:$16 sps:$4 sm:$0xff]  }
  0x30   : > { %1131 = vmatpush1.bf16.msra.mxu1 %v1776_v16  ;;  %1089 = vmatprep.subr.bf16.mxu0 %v1777_v17  ;;  %v1791_v26 = vld [vmem:[%s2082_s11 + $0x244] ss:$16 sps:$4 sm:$0xff]   ;;  %v1794_v28 = vld [vmem:[%s2082_s11 + $0x240] ss:$16 sps:$4 sm:$0xff]   ;;  %v1870_v16 = vld [vmem:[%s2082_s11 + $0x2c8] ss:$16 sps:$4 sm:$0xff]  }
  0x31   : > { %1132 = vmatprep.subr.bf16.mxu1 %v1779_v18  ;;  %v1795_v29 = vld [vmem:[%s2082_s11 + $0x24] ss:$16 sps:$4 sm:$0xff]   ;;  %v1799_v31 = vld [vmem:[%s2082_s11 + $0x20] ss:$16 sps:$4 sm:$0xff]   ;;  %v1875_v17 = vld [vmem:[%s2082_s11 + $0xac] ss:$16 sps:$4 sm:$0xff]  }
  0x32   : > { %v1797_v30 = vld [vmem:[%s2082_s11 + $0x224] ss:$16 sps:$4 sm:$0xff]   ;;  %v1800_v32 = vld [vmem:[%s2082_s11 + $0x220] ss:$16 sps:$4 sm:$0xff]   ;;  %v1878_v18 = vld [vmem:[%s2082_s11 + $0x2ac] ss:$16 sps:$4 sm:$0xff]  }
  0x33   : > { %1090 = vmatpush1.bf16.msra.mxu0 %v1781_v19  ;;  %v1801_v33 = vld [vmem:[%s2082_s11 + $0x4] ss:$16 sps:$4 sm:$0xff]   ;;  %v1805_v35 = vld [vmem:[%s2082_s11] ss:$16 sps:$4 sm:$0xff]   ;;  %v1873_v19 = vld [vmem:[%s2082_s11 + $0xa8] ss:$16 sps:$4 sm:$0xff]  }
  0x34   : > { %1133 = vmatpush1.bf16.msra.mxu1 %v1782_v20  ;;  %1091 = vmatprep.subr.bf16.mxu0 %v1783_v21  ;;  %v1803_v34 = vld [vmem:[%s2082_s11 + $0x204] ss:$16 sps:$4 sm:$0xff]   ;;  %v1806_v36 = vld [vmem:[%s2082_s11 + $0x200] ss:$16 sps:$4 sm:$0xff]   ;;  %v1876_v20 = vld [vmem:[%s2082_s11 + $0x2a8] ss:$16 sps:$4 sm:$0xff]  }
  0x35   : > { %1134 = vmatprep.subr.bf16.mxu1 %v1785_v22  ;;  %v1807_v37 = vld [vmem:[%s2082_s11 + $0x1e4] ss:$16 sps:$4 sm:$0xff]   ;;  %v1811_v39 = vld [vmem:[%s2082_s11 + $0x1e0] ss:$16 sps:$4 sm:$0xff]   ;;  %v1881_v21 = vld [vmem:[%s2082_s11 + $0x8c] ss:$16 sps:$4 sm:$0xff]  }
  0x36   : > { %v1809_v38 = vld [vmem:[%s2082_s11 + $0x3e4] ss:$16 sps:$4 sm:$0xff]   ;;  %v1812_v40 = vld [vmem:[%s2082_s11 + $0x3e0] ss:$16 sps:$4 sm:$0xff]   ;;  %v1884_v22 = vld [vmem:[%s2082_s11 + $0x28c] ss:$16 sps:$4 sm:$0xff]  }
  0x37   : > { %1092 = vmatpush1.bf16.msra.mxu0 %v1787_v23  ;;  %v1813_v41 = vld [vmem:[%s2082_s11 + $0x1c4] ss:$16 sps:$4 sm:$0xff]   ;;  %v1817_v43 = vld [vmem:[%s2082_s11 + $0x1c0] ss:$16 sps:$4 sm:$0xff]   ;;  %v1879_v23 = vld [vmem:[%s2082_s11 + $0x88] ss:$16 sps:$4 sm:$0xff]  }
  0x38   : > { %1135 = vmatpush1.bf16.msra.mxu1 %v1788_v24  ;;  %1093 = vmatprep.subr.bf16.mxu0 %v1789_v25  ;;  %v1815_v42 = vld [vmem:[%s2082_s11 + $0x3c4] ss:$16 sps:$4 sm:$0xff]   ;;  %v1818_v44 = vld [vmem:[%s2082_s11 + $0x3c0] ss:$16 sps:$4 sm:$0xff]   ;;  %v1882_v24 = vld [vmem:[%s2082_s11 + $0x288] ss:$16 sps:$4 sm:$0xff]  }
  0x39   : > { %1136 = vmatprep.subr.bf16.mxu1 %v1791_v26  ;;  %v1819_v45 = vld [vmem:[%s2082_s11 + $0x1a4] ss:$16 sps:$4 sm:$0xff]   ;;  %v1823_v47 = vld [vmem:[%s2082_s11 + $0x1a0] ss:$16 sps:$4 sm:$0xff]   ;;  %v1887_v25 = vld [vmem:[%s2082_s11 + $0x6c] ss:$16 sps:$4 sm:$0xff]  }
  0x3a   : > { %v1821_v46 = vld [vmem:[%s2082_s11 + $0x3a4] ss:$16 sps:$4 sm:$0xff]   ;;  %v1824_v48 = vld [vmem:[%s2082_s11 + $0x3a0] ss:$16 sps:$4 sm:$0xff]   ;;  %v1890_v26 = vld [vmem:[%s2082_s11 + $0x26c] ss:$16 sps:$4 sm:$0xff]  }
  0x3b   : > { %1094 = vmatpush1.bf16.msra.mxu0 %v1793_v27  ;;  %v1825_v49 = vld [vmem:[%s2082_s11 + $0x184] ss:$16 sps:$4 sm:$0xff]   ;;  %v1829_v51 = vld [vmem:[%s2082_s11 + $0x180] ss:$16 sps:$4 sm:$0xff]   ;;  %v1885_v27 = vld [vmem:[%s2082_s11 + $0x68] ss:$16 sps:$4 sm:$0xff]  }
  0x3c   : > { %1137 = vmatpush1.bf16.msra.mxu1 %v1794_v28  ;;  %1095 = vmatprep.subr.bf16.mxu0 %v1795_v29  ;;  %v1827_v50 = vld [vmem:[%s2082_s11 + $0x384] ss:$16 sps:$4 sm:$0xff]   ;;  %v1830_v52 = vld [vmem:[%s2082_s11 + $0x380] ss:$16 sps:$4 sm:$0xff]   ;;  %v1888_v28 = vld [vmem:[%s2082_s11 + $0x268] ss:$16 sps:$4 sm:$0xff]  }
  0x3d   : > { %1138 = vmatprep.subr.bf16.mxu1 %v1797_v30  ;;  %v1831_v53 = vld [vmem:[%s2082_s11 + $0x164] ss:$16 sps:$4 sm:$0xff]   ;;  %v1835_v57 = vld [vmem:[%s2082_s11 + $0x160] ss:$16 sps:$4 sm:$0xff]   ;;  %v1893_v29 = vld [vmem:[%s2082_s11 + $0x4c] ss:$16 sps:$4 sm:$0xff]  }
  0x3e   : > { %v1857_v54 = vld [vmem:[%s2084_s12 + $0x4] ss:$16 sps:$4 sm:$0xff]   ;;  %v1836_v58 = vld [vmem:[%s2082_s11 + $0x360] ss:$16 sps:$4 sm:$0xff]   ;;  %v1896_v30 = vld [vmem:[%s2082_s11 + $0x24c] ss:$16 sps:$4 sm:$0xff]  }
  0x3f   : > { %1096 = vmatpush1.bf16.msra.mxu0 %v1799_v31  ;;  %v1833_v55 = vld [vmem:[%s2082_s11 + $0x364] ss:$16 sps:$4 sm:$0xff]   ;;  %1115 = vmatprep.mubr.bf16.mxu0 %v1857_v54  ;;  %v1841_v61 = vld [vmem:[%s2082_s11 + $0x140] ss:$16 sps:$4 sm:$0xff]   ;;  %v1891_v31 = vld [vmem:[%s2082_s11 + $0x48] ss:$16 sps:$4 sm:$0xff]  }
  0x40   : > { %1139 = vmatpush1.bf16.msra.mxu1 %v1800_v32  ;;  %1097 = vmatprep.subr.bf16.mxu0 %v1801_v33  ;;  %v1837_v59 = vld [vmem:[%s2082_s11 + $0x144] ss:$16 sps:$4 sm:$0xff]   ;;  %v1842_v62 = vld [vmem:[%s2082_s11 + $0x340] ss:$16 sps:$4 sm:$0xff]   ;;  %v1894_v32 = vld [vmem:[%s2082_s11 + $0x248] ss:$16 sps:$4 sm:$0xff]  }
  0x41   : > { %1140 = vmatprep.subr.bf16.mxu1 %v1803_v34  ;;  %v1839_v60 = vld [vmem:[%s2082_s11 + $0x344] ss:$16 sps:$4 sm:$0xff]   ;;  %v1847_v1 = vld [vmem:[%s2082_s11 + $0x120] ss:$16 sps:$4 sm:$0xff]   ;;  %v1899_v33 = vld [vmem:[%s2082_s11 + $0x2c] ss:$16 sps:$4 sm:$0xff]  }
  0x42   : > { %v1843_v63 = vld [vmem:[%s2082_s11 + $0x124] ss:$16 sps:$4 sm:$0xff]   ;;  %v1848_v2 = vld [vmem:[%s2082_s11 + $0x320] ss:$16 sps:$4 sm:$0xff]   ;;  %v1902_v34 = vld [vmem:[%s2082_s11 + $0x22c] ss:$16 sps:$4 sm:$0xff]  }
  0x43   : > { %1098 = vmatpush1.bf16.msra.mxu0 %v1805_v35  ;;  %v1845_v0 = vld [vmem:[%s2082_s11 + $0x324] ss:$16 sps:$4 sm:$0xff]   ;;  %v1853_v5 = vld [vmem:[%s2082_s11 + $0x100] ss:$16 sps:$4 sm:$0xff]   ;;  %v1897_v35 = vld [vmem:[%s2082_s11 + $0x28] ss:$16 sps:$4 sm:$0xff]  }
  0x44   : > { %1141 = vmatpush1.bf16.msra.mxu1 %v1806_v36  ;;  %1099 = vmatprep.subr.bf16.mxu0 %v1807_v37  ;;  %v1849_v3 = vld [vmem:[%s2082_s11 + $0x104] ss:$16 sps:$4 sm:$0xff]   ;;  %v1854_v6 = vld [vmem:[%s2082_s11 + $0x300] ss:$16 sps:$4 sm:$0xff]   ;;  %v1900_v36 = vld [vmem:[%s2082_s11 + $0x228] ss:$16 sps:$4 sm:$0xff]  }
  0x45   : > { %1142 = vmatprep.subr.bf16.mxu1 %v1809_v38  ;;  %v1851_v4 = vld [vmem:[%s2082_s11 + $0x304] ss:$16 sps:$4 sm:$0xff]   ;;  %v2180_v9 = vld [vmem:[%s2084_s12] ss:$16 sps:$4 sm:$0xff]   ;;  %v1905_v37 = vld [vmem:[%s2082_s11 + $0xc] ss:$16 sps:$4 sm:$0xff]  }
  0x46   : > { %v1908_v38 = vld [vmem:[%s2082_s11 + $0x20c] ss:$16 sps:$4 sm:$0xff]  }
  0x47   : > { %1100 = vmatpush2.bf16.msra.mxu0 %v1811_v39  ;;  %v1903_v39 = vld [vmem:[%s2082_s11 + $0x8] ss:$16 sps:$4 sm:$0xff]  }
  0x48   : > { %1143 = vmatpush2.bf16.msra.mxu1 %v1812_v40  ;;  %1101 = vmatprep.subr.bf16.mxu0 %v1813_v41  ;;  %v1906_v40 = vld [vmem:[%s2082_s11 + $0x208] ss:$16 sps:$4 sm:$0xff]   ;;  %v1911_v41 = vld [vmem:[%s2082_s11 + $0x1ec] ss:$16 sps:$4 sm:$0xff]  }
  0x49   : > { %1144 = vmatprep.subr.bf16.mxu1 %v1815_v42  ;;  %v1914_v42 = vld [vmem:[%s2082_s11 + $0x3ec] ss:$16 sps:$4 sm:$0xff]  }
  0x4b   : > { %1102 = vmatpush2.bf16.msra.mxu0 %v1817_v43  ;;  %v1909_v43 = vld [vmem:[%s2082_s11 + $0x1e8] ss:$16 sps:$4 sm:$0xff]  }
  0x4c   : > { %1145 = vmatpush2.bf16.msra.mxu1 %v1818_v44  ;;  %1103 = vmatprep.subr.bf16.mxu0 %v1819_v45  ;;  %v1912_v44 = vld [vmem:[%s2082_s11 + $0x3e8] ss:$16 sps:$4 sm:$0xff]   ;;  %v1917_v45 = vld [vmem:[%s2082_s11 + $0x1cc] ss:$16 sps:$4 sm:$0xff]  }
  0x4d   : > { %1146 = vmatprep.subr.bf16.mxu1 %v1821_v46  ;;  %v1920_v46 = vld [vmem:[%s2082_s11 + $0x3cc] ss:$16 sps:$4 sm:$0xff]  }
  0x4f   : > { %1104 = vmatpush2.bf16.msra.mxu0 %v1823_v47  ;;  %v1915_v47 = vld [vmem:[%s2082_s11 + $0x1c8] ss:$16 sps:$4 sm:$0xff]  }
  0x50   : > { %1147 = vmatpush2.bf16.msra.mxu1 %v1824_v48  ;;  %1105 = vmatprep.subr.bf16.mxu0 %v1825_v49  ;;  %v1918_v48 = vld [vmem:[%s2082_s11 + $0x3c8] ss:$16 sps:$4 sm:$0xff]   ;;  %v1923_v49 = vld [vmem:[%s2082_s11 + $0x1ac] ss:$16 sps:$4 sm:$0xff]  }
  0x51   : > { %1148 = vmatprep.subr.bf16.mxu1 %v1827_v50  ;;  %v1926_v50 = vld [vmem:[%s2082_s11 + $0x3ac] ss:$16 sps:$4 sm:$0xff]  }
  0x53   : > { %1106 = vmatpush2.bf16.msra.mxu0 %v1829_v51  ;;  %v1921_v51 = vld [vmem:[%s2082_s11 + $0x1a8] ss:$16 sps:$4 sm:$0xff]  }
  0x54   : > { %1149 = vmatpush2.bf16.msra.mxu1 %v1830_v52  ;;  %1107 = vmatprep.subr.bf16.mxu0 %v1831_v53  ;;  %v1924_v52 = vld [vmem:[%s2082_s11 + $0x3a8] ss:$16 sps:$4 sm:$0xff]   ;;  %v1929_v53 = vld [vmem:[%s2082_s11 + $0x18c] ss:$16 sps:$4 sm:$0xff]  }
  0x55   : > { %1150 = vmatprep.subr.bf16.mxu1 %v1833_v55  ;;  %v1927_v55 = vld [vmem:[%s2082_s11 + $0x188] ss:$16 sps:$4 sm:$0xff]  }
  0x57   : > { %1108 = vmatpush2.bf16.msra.mxu0 %v1835_v57  ;;  %v1935_v57 = vld [vmem:[%s2082_s11 + $0x16c] ss:$16 sps:$4 sm:$0xff]  }
  0x58   : > { %1151 = vmatpush2.bf16.msra.mxu1 %v1836_v58  ;;  %1109 = vmatprep.subr.bf16.mxu0 %v1837_v59  ;;  %v1938_v58 = vld [vmem:[%s2082_s11 + $0x36c] ss:$16 sps:$4 sm:$0xff]   ;;  %v1933_v59 = vld [vmem:[%s2082_s11 + $0x168] ss:$16 sps:$4 sm:$0xff]  }
  0x59   : > { %1152 = vmatprep.subr.bf16.mxu1 %v1839_v60  ;;  %v1936_v60 = vld [vmem:[%s2082_s11 + $0x368] ss:$16 sps:$4 sm:$0xff]  }
  0x5b   : > { %1110 = vmatpush2.bf16.msra.mxu0 %v1841_v61  ;;  %v1941_v61 = vld [vmem:[%s2082_s11 + $0x14c] ss:$16 sps:$4 sm:$0xff]  }
  0x5c   : > { %1153 = vmatpush2.bf16.msra.mxu1 %v1842_v62  ;;  %1111 = vmatprep.subr.bf16.mxu0 %v1843_v63  ;;  %v1944_v62 = vld [vmem:[%s2082_s11 + $0x34c] ss:$16 sps:$4 sm:$0xff]   ;;  %v1939_v63 = vld [vmem:[%s2082_s11 + $0x148] ss:$16 sps:$4 sm:$0xff]  }
  0x5d   : > { %1154 = vmatprep.subr.bf16.mxu1 %v1845_v0  ;;  %v1942_v0 = vld [vmem:[%s2082_s11 + $0x348] ss:$16 sps:$4 sm:$0xff]  }
  0x5f   : > { %1112 = vmatpush2.bf16.msra.mxu0 %v1847_v1  ;;  %v1947_v1 = vld [vmem:[%s2082_s11 + $0x12c] ss:$16 sps:$4 sm:$0xff]  }
  0x60   : > { %1155 = vmatpush2.bf16.msra.mxu1 %v1848_v2  ;;  %1113 = vmatprep.subr.bf16.mxu0 %v1849_v3  ;;  %v1950_v2 = vld [vmem:[%s2082_s11 + $0x32c] ss:$16 sps:$4 sm:$0xff]   ;;  %v1945_v3 = vld [vmem:[%s2082_s11 + $0x128] ss:$16 sps:$4 sm:$0xff]  }
  0x61   : > { %1156 = vmatprep.subr.bf16.mxu1 %v1851_v4  ;;  %v1948_v4 = vld [vmem:[%s2082_s11 + $0x328] ss:$16 sps:$4 sm:$0xff]  }
  0x63   : > { %1114 = vmatpush2.bf16.msra.mxu0 %v1853_v5  ;;  %v1953_v5 = vld [vmem:[%s2082_s11 + $0x10c] ss:$16 sps:$4 sm:$0xff]  }
  0x64   : > { %1157 = vmatpush2.bf16.msra.mxu1 %v1854_v6  ;;  %1169 = vmatprep.subr.bf16.mxu0 %v1863_v7  ;;  %v1956_v6 = vld [vmem:[%s2082_s11 + $0x30c] ss:$16 sps:$4 sm:$0xff]   ;;  %v1951_v7 = vld [vmem:[%s2082_s11 + $0x108] ss:$16 sps:$4 sm:$0xff]  }
  0x65   : > { %1212 = vmatprep.subr.bf16.mxu1 %v1866_v8  ;;  %v1954_v8 = vld [vmem:[%s2082_s11 + $0x308] ss:$16 sps:$4 sm:$0xff]  }
  0x66   : > { %1116 = vmatmul.mubr.bf16.vlgmr.msra.gmra.mxu0 %v2180_v9 }
  0x67   : > { %1159 = vmatmul.mubr.bf16.vlgmr.msra.gmra.mxu1 %v2183_v10  ;;  %1170 = vmatpush1.bf16.msra.mxu0 %v1861_v11 }
  0x68   : > { %1213 = vmatpush1.bf16.msra.mxu1 %v1864_v12  ;;  %1171 = vmatprep.subr.bf16.mxu0 %v1869_v13  ;;  %v283_v12 = vld [vmem:[%s2412_s4] sm:$0xff] }
  0x69   : > { %1214 = vmatprep.subr.bf16.mxu1 %v1872_v14  ;;  %1201 = vmatprep.mubr.bf16.mxu0 %v1857_v54  ;;  %v1932_v54 = vld [vmem:[%s2082_s11 + $0x38c] ss:$16 sps:$4 sm:$0xff]  }
  0x6a   : > { %1244 = vmatprep.mubr.bf16.mxu1 %v1860_v56  ;;  %v1930_v56 = vld [vmem:[%s2082_s11 + $0x388] ss:$16 sps:$4 sm:$0xff]  }
  0x6b   : > { %1172 = vmatpush1.bf16.msra.mxu0 %v1867_v15 }
  0x6c   : > { %1215 = vmatpush1.bf16.msra.mxu1 %v1870_v16  ;;  %1173 = vmatprep.subr.bf16.mxu0 %v1875_v17  ;;  %v284_v16 = vld [vmem:[%s2412_s4 + $0x8] sm:$0xff] }
  0x6d   : > { %1216 = vmatprep.subr.bf16.mxu1 %v1878_v18 }
  0x6f   : > { %1174 = vmatpush1.bf16.msra.mxu0 %v1873_v19 }
  0x70   : > { %1217 = vmatpush1.bf16.msra.mxu1 %v1876_v20  ;;  %1175 = vmatprep.subr.bf16.mxu0 %v1881_v21 }
  0x71   : > { %1218 = vmatprep.subr.bf16.mxu1 %v1884_v22 }
  0x73   : > { %1176 = vmatpush1.bf16.msra.mxu0 %v1879_v23 }
  0x74   : > { %1219 = vmatpush1.bf16.msra.mxu1 %v1882_v24  ;;  %1177 = vmatprep.subr.bf16.mxu0 %v1887_v25  ;;  %v288_v24 = vld [vmem:[%s2412_s4 + $0x28] sm:$0xff] }
  0x75   : > { %1220 = vmatprep.subr.bf16.mxu1 %v1890_v26 }
  0x77   : > { %1178 = vmatpush1.bf16.msra.mxu0 %v1885_v27 }
  0x78   : > { %1221 = vmatpush1.bf16.msra.mxu1 %v1888_v28  ;;  %1179 = vmatprep.subr.bf16.mxu0 %v1893_v29 }
  0x79   : > { %1222 = vmatprep.subr.bf16.mxu1 %v1896_v30  ;;  %v285_v30 = vld [vmem:[%s2412_s4 + $0x10] sm:$0xff] }
  0x7b   : > { %1180 = vmatpush1.bf16.msra.mxu0 %v1891_v31 }
  0x7c   : > { %1223 = vmatpush1.bf16.msra.mxu1 %v1894_v32  ;;  %1181 = vmatprep.subr.bf16.mxu0 %v1899_v33 }
  0x7d   : > { %1224 = vmatprep.subr.bf16.mxu1 %v1902_v34  ;;  %v286_v34 = vld [vmem:[%s2412_s4 + $0x18] sm:$0xff] }
  0x7f   : > { %1182 = vmatpush1.bf16.msra.mxu0 %v1897_v35 }
  0x80   : > { %1225 = vmatpush1.bf16.msra.mxu1 %v1900_v36  ;;  %1183 = vmatprep.subr.bf16.mxu0 %v1905_v37 }
  0x81   : > { %1226 = vmatprep.subr.bf16.mxu1 %v1908_v38 }
  0x83   : > { %1184 = vmatpush1.bf16.msra.mxu0 %v1903_v39  ;;  %v289_v39 = vld [vmem:[%s2412_s4 + $0x30] sm:$0xff] }
  0x84   : > { %1227 = vmatpush1.bf16.msra.mxu1 %v1906_v40  ;;  %1185 = vmatprep.subr.bf16.mxu0 %v1911_v41 }
  0x85   : > { %1228 = vmatprep.subr.bf16.mxu1 %v1914_v42 }
  0x87   : > { %1186 = vmatpush2.bf16.msra.mxu0 %v1909_v43 }
  0x88   : > { %1229 = vmatpush2.bf16.msra.mxu1 %v1912_v44  ;;  %1187 = vmatprep.subr.bf16.mxu0 %v1917_v45  ;;  %v290_v44 = vld [vmem:[%s2412_s4 + $0x38] sm:$0xff] }
  0x89   : > { %1230 = vmatprep.subr.bf16.mxu1 %v1920_v46 }
  0x8b   : > { %1188 = vmatpush2.bf16.msra.mxu0 %v1915_v47 }
  0x8c   : > { %1231 = vmatpush2.bf16.msra.mxu1 %v1918_v48  ;;  %1189 = vmatprep.subr.bf16.mxu0 %v1923_v49 }
  0x8d   : > { %1232 = vmatprep.subr.bf16.mxu1 %v1926_v50 }
  0x8f   : > { %1190 = vmatpush2.bf16.msra.mxu0 %v1921_v51 }
  0x90   : > { %1233 = vmatpush2.bf16.msra.mxu1 %v1924_v52  ;;  %1191 = vmatprep.subr.bf16.mxu0 %v1929_v53 }
  0x91   : > { %1234 = vmatprep.subr.bf16.mxu1 %v1932_v54 }
  0x93   : > { %1192 = vmatpush2.bf16.msra.mxu0 %v1927_v55 }
  0x94   : > { %1235 = vmatpush2.bf16.msra.mxu1 %v1930_v56  ;;  %1193 = vmatprep.subr.bf16.mxu0 %v1935_v57 }
  0x95   : > { %1236 = vmatprep.subr.bf16.mxu1 %v1938_v58 }
  0x97   : > { %1194 = vmatpush2.bf16.msra.mxu0 %v1933_v59 }
  0x98   : > { %1237 = vmatpush2.bf16.msra.mxu1 %v1936_v60  ;;  %1195 = vmatprep.subr.bf16.mxu0 %v1941_v61 }
  0x99   : > { %1238 = vmatprep.subr.bf16.mxu1 %v1944_v62 }
  0x9b   : > { %1196 = vmatpush2.bf16.msra.mxu0 %v1939_v63 }
  0x9c   : > { %1239 = vmatpush2.bf16.msra.mxu1 %v1942_v0  ;;  %1197 = vmatprep.subr.bf16.mxu0 %v1947_v1 }
  0x9d   : > { %1240 = vmatprep.subr.bf16.mxu1 %v1950_v2 }
  0x9f   : > { %1198 = vmatpush2.bf16.msra.mxu0 %v1945_v3 }
  0xa0   : > { %1241 = vmatpush2.bf16.msra.mxu1 %v1948_v4  ;;  %1199 = vmatprep.subr.bf16.mxu0 %v1953_v5 }
  0xa1   : > { %1242 = vmatprep.subr.bf16.mxu1 %v1956_v6 }
  0xa3   : > { %1200 = vmatpush2.bf16.msra.mxu0 %v1951_v7 }
  0xa4   : > { %1243 = vmatpush2.bf16.msra.mxu1 %v1954_v8 }
  0xa6   : > { %1202 = vmatmul.mubr.bf16.vlgmr.msra.gmra.mxu0 %v2180_v9  ;;  %v287_v9 = vld [vmem:[%s2412_s4 + $0x20] sm:$0xff] }
  0xa7   : > { %1245 = vmatmul.mubr.bf16.vlgmr.msra.gmra.mxu1 %v2183_v10 }
 0x126   : > { %v1117_v11 = vpop.f32.mrf.mxu0 }
 0x127   : > { %v1160_v13 = vpop.f32.mrf.mxu1 }
 0x128   : > { %v1161_v14 = vadd.f32 %v1160_v13, %v1117_v11  ;;  %v1119_v15 = vpop.f32.mrf.mxu0 }
 0x129   : > { %v1162_v17 = vpop.f32.mrf.mxu1 }
 0x12a   : > { %v1255_v18 = vadd.f32 %v1161_v14, %v283_v12  ;;  %v1163_v19 = vadd.f32 %v1162_v17, %v1119_v15  ;;  %v1121_v20 = vpop.f32.mrf.mxu0 }
 0x12b   : > { %v1164_v10 = vpop.f32.mrf.mxu1 }
 0x12c   : > { %1263 = vst [vmem:[%s2412_s4] sm:$0xff] %v1255_v18  ;;  %v1256_v21 = vadd.f32 %v1163_v19, %v284_v16  ;;  %v1165_v22 = vadd.f32 %v1164_v10, %v1121_v20  ;;  %v1123_v23 = vpop.f32.mrf.mxu0 }
 0x12d   : > { %v1166_v25 = vpop.f32.mrf.mxu1 }
 0x12e   : > { %1264 = vst [vmem:[%s2412_s4 + $0x8] sm:$0xff] %v1256_v21  ;;  %v1259_v26 = vadd.f32 %v1165_v22, %v287_v9  ;;  %v1167_v27 = vadd.f32 %v1166_v25, %v1123_v23 }
 0x130   : > { %1267 = vst [vmem:[%s2412_s4 + $0x20] sm:$0xff] %v1259_v26  ;;  %v1260_v28 = vadd.f32 %v1167_v27, %v288_v24 }
 0x132   : > { %1268 = vst [vmem:[%s2412_s4 + $0x28] sm:$0xff] %v1260_v28 }
 0x166   : > { %v1203_v29 = vpop.f32.mrf.mxu0 }
 0x167   : > { %v1246_v31 = vpop.f32.mrf.mxu1 }
 0x168   : > { %v1247_v32 = vadd.f32 %v1246_v31, %v1203_v29  ;;  %v1205_v33 = vpop.f32.mrf.mxu0 }
 0x169   : > { %v1248_v35 = vpop.f32.mrf.mxu1 }
 0x16a   : > { %v1257_v36 = vadd.f32 %v1247_v32, %v285_v30  ;;  %v1249_v37 = vadd.f32 %v1248_v35, %v1205_v33  ;;  %v1207_v38 = vpop.f32.mrf.mxu0 }
 0x16b   : > { %v1250_v40 = vpop.f32.mrf.mxu1 }
 0x16c   : > { %1265 = vst [vmem:[%s2412_s4 + $0x10] sm:$0xff] %v1257_v36  ;;  %v1258_v41 = vadd.f32 %v1249_v37, %v286_v34  ;;  %v1251_v42 = vadd.f32 %v1250_v40, %v1207_v38  ;;  %v1209_v43 = vpop.f32.mrf.mxu0 }
 0x16d   : > { %v1252_v45 = vpop.f32.mrf.mxu1 }
 0x16e   : > { %1266 = vst [vmem:[%s2412_s4 + $0x18] sm:$0xff] %v1258_v41  ;;  %v1261_v46 = vadd.f32 %v1251_v42, %v289_v39  ;;  %v1253_v47 = vadd.f32 %v1252_v45, %v1209_v43  ;;  %1274 = sbr.rel (%p1709_p11) target bundleno = 445 (0x1bd), region = 67 }
 0x170   : > { %1269 = vst [vmem:[%s2412_s4 + $0x30] sm:$0xff] %v1261_v46  ;;  %v1262_v48 = vadd.f32 %v1253_v47, %v290_v44 }
 0x172   : > { %1270 = vst [vmem:[%s2412_s4 + $0x38] sm:$0xff] %v1262_v48 }
 0x173   : > { %v1285_v49 = vlaneseq  ;;  %v1279_v50 = vld [vmem:[%s2412_s4 + $0x20] sm:$0xff]  ;;  %v1280_v51 = vld [vmem:[%s2412_s4 + $0x28] sm:$0xff]  ;;  %v1277_v59 = vld [vmem:[%s2412_s4 + $0x10] sm:$0xff]  ;;  %v2006_v60 = vmov 0.0  }
 0x174   : > { %v1275_v54 = vld [vmem:[%s2412_s4] sm:$0xff]  ;;  %v1276_v55 = vld [vmem:[%s2412_s4 + $0x8] sm:$0xff]  ;;  %v1298_v57 = vmul.f32 0.0, %v1279_v50  ;;  %v1299_v58 = vmul.f32 0.0, %v1280_v51 }
 0x175   : > { %v2306_v52 = vshrl.u32 %v1285_v49, 7  ;;  %v1278_v63 = vld [vmem:[%s2412_s4 + $0x18] sm:$0xff] }
 0x177   : > { %v1281_v53 = vld [vmem:[%s2412_s4 + $0x30] sm:$0xff]  ;;  %vm1288_vm0 = vcmp.lt.s32.totalorder %v2306_v52, 2 }
 0x178   : > { %v1710_v61 = vsel %vm1288_vm0, 1.0, %v2006_v60  ;;  %v1300_v62 = vmul.f32 0.0, %v1281_v53 }
 0x179   : > { %v1282_v56 = vld [vmem:[%s2412_s4 + $0x38] sm:$0xff]  ;;  %v1294_v0 = vmul.f32 %v1710_v61, %v1275_v54  ;;  %v1295_v1 = vmul.f32 %v1710_v61, %v1276_v55  ;;  %v1296_v3 = vmul.f32 %v1710_v61, %v1277_v59  ;;  %v1297_v6 = vmul.f32 %v1710_v61, %v1278_v63 }
 0x17a   : > { %v1301_v2 = vmul.f32 0.0, %v1282_v56 }
 0x17b   : > { %v1302_v4 = vadd.f32 %v1298_v57, %v1294_v0  ;;  %v1309_v5 = vadd.f32 %v1299_v58, %v1295_v1  ;;  %v1316_v7 = vadd.f32 %v1300_v62, %v1296_v3 }
 0x17c   : > { %v1323_v12 = vadd.f32 %v1301_v2, %v1297_v6 }
 0x17d   : > { %v1303_v8 = vrot.slane %v1302_v4, 4  ;;  %v1310_v11 = vrot.slane %v1309_v5, 4  ;;  %v1317_v13 = vrot.slane %v1316_v7, 4 }
 0x17e   : > { %v1324_v16 = vrot.slane %v1323_v12, 4 }
 0x17f   : > { %v1304_v14 = vadd.f32 %v1303_v8, %v1302_v4  ;;  %v1311_v15 = vadd.f32 %v1310_v11, %v1309_v5  ;;  %v1318_v17 = vadd.f32 %v1317_v13, %v1316_v7 }
 0x180   : > { %v1325_v20 = vadd.f32 %v1324_v16, %v1323_v12 }
 0x181   : > { %v1305_v18 = vrot.slane %v1304_v14, 2  ;;  %v1312_v19 = vrot.slane %v1311_v15, 2  ;;  %v1319_v9 = vrot.slane %v1318_v17, 2 }
 0x182   : > { %v1326_v22 = vrot.slane %v1325_v20, 2 }
 0x183   : > { %v1306_v10 = vadd.f32 %v1305_v18, %v1304_v14  ;;  %v1313_v21 = vadd.f32 %v1312_v19, %v1311_v15  ;;  %v1320_v23 = vadd.f32 %v1319_v9, %v1318_v17 }
 0x184   : > { %v1327_v26 = vadd.f32 %v1326_v22, %v1325_v20 }
 0x185   : > { %v1307_v24 = vrot.slane %v1306_v10, 1  ;;  %v1314_v25 = vrot.slane %v1313_v21, 1  ;;  %v1321_v27 = vrot.slane %v1320_v23, 1 }
 0x186   : > { %v1328_v30 = vrot.slane %v1327_v26, 1 }
 0x187   : > { %v1308_v28 = vadd.f32 %v1307_v24, %v1306_v10  ;;  %v1315_v29 = vadd.f32 %v1314_v25, %v1313_v21  ;;  %v1322_v31 = vadd.f32 %v1321_v27, %v1320_v23 }
 0x188   : > { %v1329_v34 = vadd.f32 %v1328_v30, %v1327_v26 }
 0x189   : > { %v1330_v32 = vmul.f32 0.5, %v1308_v28  ;;  %v1331_v33 = vmul.f32 0.5, %v1315_v29  ;;  %v1332_v35 = vmul.f32 0.5, %v1322_v31 }
 0x18a   : > { %v1333_v42 = vmul.f32 0.5, %v1329_v34  ;;  %v1409_v34 = vsub.s32 0, %v2306_v52 }
 0x18b   : > { %v2327_v36 = vsub.f32 %v1275_v54, %v1330_v32  ;;  %v2329_v37 = vsub.f32 %v1279_v50, %v1330_v32  ;;  %v2331_v38 = vsub.f32 %v1276_v55, %v1331_v33  ;;  %v2333_v39 = vsub.f32 %v1280_v51, %v1331_v33 }
 0x18c   : > { %v2335_v40 = vsub.f32 %v1277_v59, %v1332_v35  ;;  %v2337_v41 = vsub.f32 %v1281_v53, %v1332_v35  ;;  %v2345_v49 = vsub.f32 %v1278_v63, %v1333_v42  ;;  %v2347_v50 = vsub.f32 %v1282_v56, %v1333_v42  ;;  %v1283_v35 = vld [vmem:[%s2410_s2] sm:$0xf] }
 0x18d   : > { %v1342_v43 = vmul.f32 %v1710_v61, %v2327_v36  ;;  %v1346_v44 = vmul.f32 0.0, %v2329_v37  ;;  %v1343_v45 = vmul.f32 %v1710_v61, %v2331_v38  ;;  %v1347_v46 = vmul.f32 0.0, %v2333_v39 }
 0x18e   : > { %v1344_v47 = vmul.f32 %v1710_v61, %v2335_v40  ;;  %v1348_v48 = vmul.f32 0.0, %v2337_v41  ;;  %v1345_v59 = vmul.f32 %v1710_v61, %v2345_v49  ;;  %v1349_v60 = vmul.f32 0.0, %v2347_v50 }
 0x18f   : > { %v1350_v51 = vmul.f32 %v1342_v43, %v1342_v43  ;;  %v1354_v53 = vmul.f32 %v1346_v44, %v1346_v44  ;;  %v1351_v54 = vmul.f32 %v1343_v45, %v1343_v45  ;;  %v1355_v55 = vmul.f32 %v1347_v46, %v1347_v46  ;;  %v1284_v43 = vld [vmem:[%s2411_s3] sm:$0xf] }
 0x190   : > { %v1352_v57 = vmul.f32 %v1344_v47, %v1344_v47  ;;  %v1356_v58 = vmul.f32 %v1348_v48, %v1348_v48  ;;  %v1353_v2 = vmul.f32 %v1345_v59, %v1345_v59  ;;  %v1357_v3 = vmul.f32 %v1349_v60, %v1349_v60 }
 0x191   : > { %v1358_v62 = vadd.f32 %v1354_v53, %v1350_v51  ;;  %v1365_v0 = vadd.f32 %v1355_v55, %v1351_v54  ;;  %v1413_v42 = vsub.s32 1, %v2306_v52  ;;  %v1417_v44 = vsub.s32 2, %v2306_v52 }
 0x192   : > { %v1372_v1 = vadd.f32 %v1356_v58, %v1352_v57  ;;  %v1379_v56 = vadd.f32 %v1357_v3, %v1353_v2  ;;  %v1421_v45 = vsub.s32 3, %v2306_v52  ;;  %v1410_v46 = vrot.slane %v1283_v35, %v1409_v34 }
 0x193   : > { %v1359_v4 = vrot.slane %v1358_v62, 4  ;;  %v1366_v63 = vrot.slane %v1365_v0, 4  ;;  %v1439_v48 = vrot.slane %v1284_v43, %v1409_v34  ;;  %v1414_v51 = vrot.slane %v1283_v35, %v1413_v42 }
 0x194   : > { %v1373_v5 = vrot.slane %v1372_v1, 4  ;;  %v1380_v11 = vrot.slane %v1379_v56, 4  ;;  %v1443_v53 = vrot.slane %v1284_v43, %v1413_v42  ;;  %v1418_v57 = vrot.slane %v1283_v35, %v1417_v44 }
 0x195   : > { %v1360_v6 = vadd.f32 %v1359_v4, %v1358_v62  ;;  %v1367_v7 = vadd.f32 %v1366_v63, %v1365_v0  ;;  %v1447_v58 = vrot.slane %v1284_v43, %v1417_v44  ;;  %v1422_v0 = vrot.slane %v1283_v35, %v1421_v45 }
 0x196   : > { %v1374_v8 = vadd.f32 %v1373_v5, %v1372_v1  ;;  %v1381_v15 = vadd.f32 %v1380_v11, %v1379_v56  ;;  %v1451_v1 = vrot.slane %v1284_v43, %v1421_v45 }
 0x197   : > { %v1361_v12 = vrot.slane %v1360_v6, 2  ;;  %v1368_v13 = vrot.slane %v1367_v7, 2 }
 0x198   : > { %v1375_v14 = vrot.slane %v1374_v8, 2  ;;  %v1382_v18 = vrot.slane %v1381_v15, 2 }
 0x199   : > { %v1362_v61 = vadd.f32 %v1361_v12, %v1360_v6  ;;  %v1369_v16 = vadd.f32 %v1368_v13, %v1367_v7 }
 0x19a   : > { %v1376_v17 = vadd.f32 %v1375_v14, %v1374_v8  ;;  %v1383_v10 = vadd.f32 %v1382_v18, %v1381_v15 }
 0x19b   : > { %v1363_v19 = vrot.slane %v1362_v61, 1  ;;  %v1370_v20 = vrot.slane %v1369_v16, 1 }
 0x19c   : > { %v1377_v9 = vrot.slane %v1376_v17, 1  ;;  %v1384_v24 = vrot.slane %v1383_v10, 1 }
 0x19d   : > { %v1364_v21 = vadd.f32 %v1363_v19, %v1362_v61  ;;  %v1371_v22 = vadd.f32 %v1370_v20, %v1369_v16 }
 0x19e   : > { %v1378_v23 = vadd.f32 %v1377_v9, %v1376_v17  ;;  %v1385_v28 = vadd.f32 %v1384_v24, %v1383_v10 }
 0x19f   : > { %v1386_v25 = vmul.f32 0.5, %v1364_v21  ;;  %v1387_v26 = vmul.f32 0.5, %v1371_v22 }
 0x1a0   : > { %v1388_v27 = vmul.f32 0.5, %v1378_v23  ;;  %v1389_v32 = vmul.f32 0.5, %v1385_v28 }
 0x1a1   : > { %v1390_v29 = vadd.f32 1e-05, %v1386_v25  ;;  %v1391_v30 = vadd.f32 1e-05, %v1387_v26 }
 0x1a2   : > { %v1392_v31 = vadd.f32 1e-05, %v1388_v27  ;;  %v1393_v33 = vadd.f32 1e-05, %v1389_v32 }
 0x1a3   : > { %1957 = vrsqrt.f32 %v1390_v29 }
 0x1a4   : > { %1959 = vrsqrt.f32 %v1391_v30 }
 0x1a5   : > { %1961 = vrsqrt.f32 %v1392_v31 }
 0x1a6   : > { %1963 = vrsqrt.f32 %v1393_v33 }
 0x1b0   : > { %v1958_v47 = vpop.eup %1957 }
 0x1b1   : > { %v1960_v54 = vpop.eup %1959  ;;  %v1398_v55 = vmul.f32 %v1958_v47, %v2327_v36  ;;  %v1402_v59 = vmul.f32 %v1958_v47, %v2329_v37 }
 0x1b2   : > { %v1962_v60 = vpop.eup %1961  ;;  %v1399_v62 = vmul.f32 %v1960_v54, %v2331_v38  ;;  %v1403_v2 = vmul.f32 %v1960_v54, %v2333_v39 }
 0x1b3   : > { %v1964_v52 = vpop.eup %1963  ;;  %v1427_v3 = vmul.f32 %v1410_v46, %v1398_v55  ;;  %v1400_v4 = vmul.f32 %v1962_v60, %v2335_v40  ;;  %v1431_v63 = vmul.f32 %v1410_v46, %v1402_v59  ;;  %v1404_v5 = vmul.f32 %v1962_v60, %v2337_v41 }
 0x1b4   : > { %v1428_v56 = vmul.f32 %v1414_v51, %v1399_v62  ;;  %v1401_v36 = vmul.f32 %v1964_v52, %v2345_v49  ;;  %v1432_v6 = vmul.f32 %v1414_v51, %v1403_v2  ;;  %v1405_v37 = vmul.f32 %v1964_v52, %v2347_v50 }
 0x1b5   : > { %v1456_v7 = vadd.f32 %v1439_v48, %v1427_v3  ;;  %v1429_v8 = vmul.f32 %v1418_v57, %v1400_v4  ;;  %v1460_v38 = vadd.f32 %v1439_v48, %v1431_v63  ;;  %v1433_v11 = vmul.f32 %v1418_v57, %v1404_v5 }
 0x1b6   : > { %v1457_v12 = vadd.f32 %v1443_v53, %v1428_v56  ;;  %v1430_v13 = vmul.f32 %v1422_v0, %v1401_v36  ;;  %v1461_v39 = vadd.f32 %v1443_v53, %v1432_v6  ;;  %v1434_v14 = vmul.f32 %v1422_v0, %v1405_v37 }
 0x1b7   : > { %v1464_v15 = vmax.f32 %v1456_v7, 0.0  ;;  %v1458_v61 = vadd.f32 %v1447_v58, %v1429_v8  ;;  %v1468_v40 = vmax.f32 %v1460_v38, 0.0  ;;  %v1462_v16 = vadd.f32 %v1447_v58, %v1433_v11 }
 0x1b8   : > { %v1465_v17 = vmax.f32 %v1457_v12, 0.0  ;;  %v1459_v41 = vadd.f32 %v1451_v1, %v1430_v13  ;;  %v1469_v18 = vmax.f32 %v1461_v39, 0.0  ;;  %v1463_v19 = vadd.f32 %v1451_v1, %v1434_v14 }
 0x1b9   : > { %1472 = vst [vmem:[%s2412_s4] sm:$0xff] %v1464_v15  ;;  %v1466_v49 = vmax.f32 %v1458_v61, 0.0  ;;  %1476 = vst [vmem:[%s2412_s4 + $0x20] sm:$0xff] %v1468_v40  ;;  %v1470_v50 = vmax.f32 %v1462_v16, 0.0 }
 0x1ba   : > { %1473 = vst [vmem:[%s2412_s4 + $0x8] sm:$0xff] %v1465_v17  ;;  %v1467_v20 = vmax.f32 %v1459_v41, 0.0  ;;  %1477 = vst [vmem:[%s2412_s4 + $0x28] sm:$0xff] %v1469_v18  ;;  %v1471_v9 = vmax.f32 %v1463_v19, 0.0 }
 0x1bb   : > { %1474 = vst [vmem:[%s2412_s4 + $0x10] sm:$0xff] %v1466_v49  ;;  %1478 = vst [vmem:[%s2412_s4 + $0x30] sm:$0xff] %v1470_v50 }
 0x1bc   : > { %1475 = vst [vmem:[%s2412_s4 + $0x18] sm:$0xff] %v1467_v20  ;;  %1479 = vst [vmem:[%s2412_s4 + $0x38] sm:$0xff] %v1471_v9 }
 0x1bd PF: > { %s14_s19 = sadd.s32 1, %s2003_s19   ;;  %s2413_s15 = smov %s1991_s16 }
 0x1be   : > { %p11_p12 = scmp.ge.s32.totalorder %s14_s19, 11   ;;  %s2414_s16 = smov %s2067_s23 }
 0x1bf   : > { %s2415_s17 = smov %s1999_s18  ;;  %s2416_s18 = smov %s2418_s20 }
 0x1c0   :  { %13 = sbr.rel (!%p11_p12) target bundleno = 3 (0x3), region = 105 }

</bundles_post_ra>
